<compile_context>
chip_gen: v7x
topology: tpu7x:2x2x1
jax: 0.10.0
libtpu: 0.0.40
codegen_flags: <defaults>
</compile_context>

<pallas_src>
import jax
import jax.numpy as jnp
from jax.experimental import pallas as pl
from jax.experimental.pallas import tpu as pltpu

LANE = 128


def _round_up(x, m):
    return (x + m - 1) // m * m


# ---------------------------------------------------------------------------
# Fused Pallas kernel: conv1+BN1+ReLU -> conv2+BN2 -> +residual -> ReLU
# ---------------------------------------------------------------------------
def _basic_block_kernel(xp_ref, w1_ref, b1_ref, w2_ref, b2_ref, o_ref,
                        h1_ref, acc_ref):
    """One grid step = one sample.

    xp_ref : (1, D+2, H+2, W+2, Cp) f32  halo+channel padded input (also residual)
    w1_ref : (27, Cp, Cp) bf16           conv1 weights, BN1 scale folded
    b1_ref : (1, Cp)      f32            BN1 folded bias
    w2_ref : (27, Cp, Cp) bf16           conv2 weights, BN2 scale folded
    b2_ref : (1, Cp)      f32            BN2 folded bias
    o_ref  : (1, D, H, W, Cp)            output block
    h1_ref : (D+2, H+2, W+2, Cp) f32     VMEM scratch: padded conv1 output
    acc_ref: (D*H*W, Cp)      f32        VMEM matmul accumulator
    """
    _, dp2, hp2, wp2, ci = xp_ref.shape
    d, h, w = dp2 - 2, hp2 - 2, wp2 - 2
    co = o_ref.shape[-1]
    m = d * h * w

    def accumulate(get_slab, w_ref):
        # acc = sum over 27 taps of slab_t @ w_t  (bf16 operands, f32 accum).
        t = 0
        for kd in range(3):
            for kh in range(3):
                for kw in range(3):
                    slab = get_slab(kd, kh, kw)
                    contrib = jnp.dot(slab, w_ref[t],
                                      preferred_element_type=jnp.float32)
                    if t == 0:
                        acc_ref[...] = contrib
                    else:
                        acc_ref[...] += contrib
                    t += 1

    def slab_from_input(kd, kh, kw):
        s = xp_ref[:, kd:kd + d, kh:kh + h, kw:kw + w, :]
        return s.reshape(m, ci).astype(jnp.bfloat16)

    def slab_from_h1(kd, kh, kw):
        s = h1_ref[kd:kd + d, kh:kh + h, kw:kw + w, :]
        return s.reshape(m, co).astype(jnp.bfloat16)

    # ---- conv1 + BN1 + ReLU -> padded h1, kept entirely in VMEM ------------
    accumulate(slab_from_input, w1_ref)
    h1 = jnp.maximum(acc_ref[...] + b1_ref[...], 0.0)
    h1_ref[...] = jnp.zeros(h1_ref.shape, h1_ref.dtype)        # zero conv halo
    h1_ref[1:1 + d, 1:1 + h, 1:1 + w, :] = h1.reshape(d, h, w, co)

    # ---- conv2 + BN2 + residual + ReLU --------------------------------------
    accumulate(slab_from_h1, w2_ref)
    residual = xp_ref[:, 1:1 + d, 1:1 + h, 1:1 + w, :].reshape(m, ci)   # f32
    out = jnp.maximum(acc_ref[...] + b2_ref[...] + residual, 0.0)
    o_ref[...] = out.reshape(1, d, h, w, co).astype(o_ref.dtype)


def _basic_block_pallas(xp, w1, b1, w2, b2):
    n, dp2, hp2, wp2, cp = xp.shape
    d, h, w = dp2 - 2, hp2 - 2, wp2 - 2
    return pl.pallas_call(
        _basic_block_kernel,
        out_shape=jax.ShapeDtypeStruct((n, d, h, w, cp), xp.dtype),
        grid=(n,),
        in_specs=[
            pl.BlockSpec((1, dp2, hp2, wp2, cp), lambda i: (i, 0, 0, 0, 0)),
            pl.BlockSpec((27, cp, cp), lambda i: (0, 0, 0)),
            pl.BlockSpec((1, cp), lambda i: (0, 0)),
            pl.BlockSpec((27, cp, cp), lambda i: (0, 0, 0)),
            pl.BlockSpec((1, cp), lambda i: (0, 0)),
        ],
        out_specs=pl.BlockSpec((1, d, h, w, cp), lambda i: (i, 0, 0, 0, 0)),
        scratch_shapes=[
            pltpu.VMEM((dp2, hp2, wp2, cp), jnp.float32),   # padded conv1 output
            pltpu.VMEM((d * h * w, cp), jnp.float32),       # f32 accumulator
        ],
        compiler_params=pltpu.CompilerParams(
            dimension_semantics=("parallel",),
            vmem_limit_bytes=32 * 1024 * 1024,
        ),
    )(xp, w1, b1, w2, b2)


# ---------------------------------------------------------------------------
# Glue: BN folding, weight repacking, channel/halo padding
# ---------------------------------------------------------------------------
def _fold_bn(gamma, beta, mean, var, eps=1e-5):
    scale = gamma / jnp.sqrt(var + eps)
    bias = beta - mean * scale
    return scale, bias


def _prep_weight(w_oidhw, scale, cin_p, cout_p):
    """PyTorch (Cout, Cin, 3, 3, 3) -> (27, Cin_p, Cout_p) bf16, BN scale folded."""
    cout, cin = w_oidhw.shape[0], w_oidhw.shape[1]
    wt = jnp.transpose(w_oidhw, (2, 3, 4, 1, 0)).reshape(27, cin, cout)
    wt = wt * scale.reshape(1, 1, cout)                       # fold BN scale
    wt = jnp.pad(wt, ((0, 0), (0, cin_p - cin), (0, cout_p - cout)))
    return wt.astype(jnp.bfloat16)


def basic_block_forward(x_ncdhw, params):
    """Full BasicBlock forward (stride=1, downsample=None)."""
    n, c, d, h, w = x_ncdhw.shape
    planes, inplanes = params["w1"].shape[0], params["w1"].shape[1]
    assert c == inplanes and inplanes == planes, (
        "stride=1 / downsample=None BasicBlock requires inplanes == planes")
    cp = _round_up(planes, LANE)

    # NCDHW -> NDHWC.  TODO(synk): in a full ResNet stack keep activations
    # NDHWC end-to-end and hoist these transposes to network entry/exit.
    x = jnp.transpose(x_ncdhw, (0, 2, 3, 4, 1))
    # Single pad pass: zero halo for the 'same' 3x3x3 conv + channel pad to a
    # lane multiple (lane-dense loads/stores, full MXU N dimension).
    xp = jnp.pad(x, ((0, 0), (1, 1), (1, 1), (1, 1), (0, cp - c)))

    s1, b1 = _fold_bn(params["bn1_g"], params["bn1_b"],
                      params["bn1_m"], params["bn1_v"])
    s2, b2 = _fold_bn(params["bn2_g"], params["bn2_b"],
                      params["bn2_m"], params["bn2_v"])
    w1 = _prep_weight(params["w1"], s1, cp, cp)
    w2 = _prep_weight(params["w2"], s2, cp, cp)
    b1p = jnp.pad(b1, (0, cp - planes)).reshape(1, cp).astype(jnp.float32)
    b2p = jnp.pad(b2, (0, cp - planes)).reshape(1, cp).astype(jnp.float32)

    out = _basic_block_pallas(xp, w1, b1p, w2, b2p)          # (N, D, H, W, Cp)
    out = out[..., :planes]
    return jnp.transpose(out, (0, 4, 1, 2, 3))               # back to NCDHW


# ---------------------------------------------------------------------------
# Pure-JAX reference (same bf16 matmul operands / f32 accumulation points)
# ---------------------------------------------------------------------------
def _conv3d_bf16_ref(x_ndhwc, w_dhwio):
    return jax.lax.conv_general_dilated(
        x_ndhwc.astype(jnp.bfloat16), w_dhwio.astype(jnp.bfloat16),
        window_strides=(1, 1, 1), padding=((1, 1), (1, 1), (1, 1)),
        dimension_numbers=("NDHWC", "DHWIO", "NDHWC"),
        preferred_element_type=jnp.float32)


def basic_block_ref(x_ncdhw, params):
    x = jnp.transpose(x_ncdhw, (0, 2, 3, 4, 1)).astype(jnp.float32)
    s1, b1 = _fold_bn(params["bn1_g"], params["bn1_b"],
                      params["bn1_m"], params["bn1_v"])
    s2, b2 = _fold_bn(params["bn2_g"], params["bn2_b"],
                      params["bn2_m"], params["bn2_v"])
    w1 = jnp.transpose(params["w1"], (2, 3, 4, 1, 0)) * s1
    w2 = jnp.transpose(params["w2"], (2, 3, 4, 1, 0)) * s2
    hid = jnp.maximum(_conv3d_bf16_ref(x, w1) + b1, 0.0)
    out = jnp.maximum(_conv3d_bf16_ref(hid, w2) + b2 + x, 0.0)
    return jnp.transpose(out, (0, 4, 1, 2, 3))


# ---------------------------------------------------------------------------
if __name__ == "__main__":
    # Small shapes consistent with the module: inplanes = planes = 8, stride = 1.
    N, C, D, H, W = 2, 8, 4, 8, 8
    inplanes = planes = C
    # midplanes is computed by BasicBlock but unused by the Conv3DSimple builder.
    midplanes = inplanes * planes * 3 * 3 * 3 // (inplanes * 3 * 3 + 3 * planes)

    key = jax.random.PRNGKey(0)
    (kx, k1, k2, kg1, kb1, km1, kv1, kg2, kb2, km2, kv2) = jax.random.split(key, 11)

    x = jax.random.normal(kx, (N, C, D, H, W), dtype=jnp.float32)
    params = {
        # conv weights in PyTorch layout (Cout, Cin, kd, kh, kw), no bias
        "w1": jax.random.normal(k1, (planes, inplanes, 3, 3, 3), jnp.float32) * 0.1,
        "w2": jax.random.normal(k2, (planes, planes, 3, 3, 3), jnp.float32) * 0.1,
        # BatchNorm3d parameters (inference-mode running stats)
        "bn1_g": 1.0 + 0.1 * jax.random.normal(kg1, (planes,), jnp.float32),
        "bn1_b": 0.1 * jax.random.normal(kb1, (planes,), jnp.float32),
        "bn1_m": 0.1 * jax.random.normal(km1, (planes,), jnp.float32),
        "bn1_v": 1.0 + 0.2 * jax.random.uniform(kv1, (planes,), jnp.float32),
        "bn2_g": 1.0 + 0.1 * jax.random.normal(kg2, (planes,), jnp.float32),
        "bn2_b": 0.1 * jax.random.normal(kb2, (planes,), jnp.float32),
        "bn2_m": 0.1 * jax.random.normal(km2, (planes,), jnp.float32),
        "bn2_v": 1.0 + 0.2 * jax.random.uniform(kv2, (planes,), jnp.float32),
    }

    out = jax.block_until_ready(jax.jit(basic_block_forward)(x, params))
    ref = jax.block_until_ready(jax.jit(basic_block_ref)(x, params))

    assert out.shape == (N, planes, D, H, W), out.shape
    max_err = float(jnp.max(jnp.abs(out - ref)))
    assert jnp.allclose(out, ref, atol=2e-3, rtol=2e-3), max_err
    print("KERNEL_OK")
</pallas_src>

<mosaic_0001>
module attributes {stable_mosaic.version = 11 : i64} {
  func.func @_basic_block_kernel(%arg0: i32, %arg1: memref<1x6x10x10x128xf32, #tpu.memory_space<vmem>>, %arg2: memref<27x128x128xbf16, #tpu.memory_space<vmem>>, %arg3: memref<1x128xf32, #tpu.memory_space<vmem>>, %arg4: memref<27x128x128xbf16, #tpu.memory_space<vmem>>, %arg5: memref<1x128xf32, #tpu.memory_space<vmem>>, %arg6: memref<1x4x8x8x128xf32, #tpu.memory_space<vmem>>, %arg7: memref<6x10x10x128xf32, #tpu.memory_space<vmem>>, %arg8: memref<256x128xf32, #tpu.memory_space<vmem>>) attributes {dimension_semantics = [#tpu.dimension_semantics<parallel>], iteration_bounds = array<i64: 2>, scalar_prefetch = 0 : i64, scratch_operands = 2 : i64, tpu.core_type = #tpu.core_type<tc>, window_params = [{transform_indices = @transform_0, window_bounds = array<i64: 1, 6, 10, 10, 128>}, {pipeline_mode = #tpu.pipeline_mode<synchronous>, transform_indices = @transform_1, window_bounds = array<i64: 27, 128, 128>}, {pipeline_mode = #tpu.pipeline_mode<synchronous>, transform_indices = @transform_2, window_bounds = array<i64: 1, 128>}, {pipeline_mode = #tpu.pipeline_mode<synchronous>, transform_indices = @transform_3, window_bounds = array<i64: 27, 128, 128>}, {pipeline_mode = #tpu.pipeline_mode<synchronous>, transform_indices = @transform_4, window_bounds = array<i64: 1, 128>}, {transform_indices = @transform_5, window_bounds = array<i64: 1, 4, 8, 8, 128>}]} {
    %c0 = arith.constant 0 : index
    %c0_0 = arith.constant 0 : index
    %c0_1 = arith.constant 0 : index
    %c0_2 = arith.constant 0 : index
    %c0_3 = arith.constant 0 : index
    %0 = vector.load %arg1[%c0, %c0_0, %c0_1, %c0_2, %c0_3] : memref<1x6x10x10x128xf32, #tpu.memory_space<vmem>>, vector<1x4x8x8x128xf32>
    %1 = vector.shape_cast %0 : vector<1x4x8x8x128xf32> to vector<256x128xf32>
    %2 = arith.truncf %1 : vector<256x128xf32> to vector<256x128xbf16>
    %c0_4 = arith.constant 0 : index
    %c0_5 = arith.constant 0 : index
    %c0_6 = arith.constant 0 : index
    %3 = vector.load %arg2[%c0_4, %c0_5, %c0_6] : memref<27x128x128xbf16, #tpu.memory_space<vmem>>, vector<1x128x128xbf16>
    %4 = vector.shape_cast %3 : vector<1x128x128xbf16> to vector<128x128xbf16>
    %cst = arith.constant dense<0.000000e+00> : vector<256x128xf32>
    %5 = tpu.matmul %2, %4, %cst {dimension_numbers = #tpu.dot_dimension_numbers<[1], [0], [0], [1], [0, 0, 1, 1], [], []>} : vector<256x128xbf16>, vector<128x128xbf16>, vector<256x128xf32> -> vector<256x128xf32>
    %c0_7 = arith.constant 0 : index
    %c0_8 = arith.constant 0 : index
    %6 = vector.load %arg8[%c0_7, %c0_8] : memref<256x128xf32, #tpu.memory_space<vmem>>, vector<256x128xf32>
    tpu.vector_store %arg8[%c0_7, %c0_8], %5 {strides = array<i32>} : memref<256x128xf32, #tpu.memory_space<vmem>>, vector<256x128xf32>,
    %c0_9 = arith.constant 0 : index
    %c0_10 = arith.constant 0 : index
    %c0_11 = arith.constant 0 : index
    %c1 = arith.constant 1 : index
    %c0_12 = arith.constant 0 : index
    %7 = vector.load %arg1[%c0_9, %c0_10, %c0_11, %c1, %c0_12] : memref<1x6x10x10x128xf32, #tpu.memory_space<vmem>>, vector<1x4x8x8x128xf32>
    %8 = vector.shape_cast %7 : vector<1x4x8x8x128xf32> to vector<256x128xf32>
    %9 = arith.truncf %8 : vector<256x128xf32> to vector<256x128xbf16>
    %c1_13 = arith.constant 1 : index
    %c0_14 = arith.constant 0 : index
    %c0_15 = arith.constant 0 : index
    %10 = vector.load %arg2[%c1_13, %c0_14, %c0_15] : memref<27x128x128xbf16, #tpu.memory_space<vmem>>, vector<1x128x128xbf16>
    %11 = vector.shape_cast %10 : vector<1x128x128xbf16> to vector<128x128xbf16>
    %cst_16 = arith.constant dense<0.000000e+00> : vector<256x128xf32>
    %12 = tpu.matmul %9, %11, %cst_16 {dimension_numbers = #tpu.dot_dimension_numbers<[1], [0], [0], [1], [0, 0, 1, 1], [], []>} : vector<256x128xbf16>, vector<128x128xbf16>, vector<256x128xf32> -> vector<256x128xf32>
    %c0_17 = arith.constant 0 : index
    %c0_18 = arith.constant 0 : index
    %13 = vector.load %arg8[%c0_17, %c0_18] : memref<256x128xf32, #tpu.memory_space<vmem>>, vector<256x128xf32>
    %14 = arith.addf %13, %12 : vector<256x128xf32>
    %c0_19 = arith.constant 0 : index
    %c0_20 = arith.constant 0 : index
    %15 = vector.load %arg8[%c0_19, %c0_20] : memref<256x128xf32, #tpu.memory_space<vmem>>, vector<256x128xf32>
    tpu.vector_store %arg8[%c0_19, %c0_20], %14 {strides = array<i32>} : memref<256x128xf32, #tpu.memory_space<vmem>>, vector<256x128xf32>,
    %c0_21 = arith.constant 0 : index
    %c0_22 = arith.constant 0 : index
    %c0_23 = arith.constant 0 : index
    %c2 = arith.constant 2 : index
    %c0_24 = arith.constant 0 : index
    %16 = vector.load %arg1[%c0_21, %c0_22, %c0_23, %c2, %c0_24] : memref<1x6x10x10x128xf32, #tpu.memory_space<vmem>>, vector<1x4x8x8x128xf32>
    %17 = vector.shape_cast %16 : vector<1x4x8x8x128xf32> to vector<256x128xf32>
    %18 = arith.truncf %17 : vector<256x128xf32> to vector<256x128xbf16>
    %c2_25 = arith.constant 2 : index
    %c0_26 = arith.constant 0 : index
    %c0_27 = arith.constant 0 : index
    %19 = vector.load %arg2[%c2_25, %c0_26, %c0_27] : memref<27x128x128xbf16, #tpu.memory_space<vmem>>, vector<1x128x128xbf16>
    %20 = vector.shape_cast %19 : vector<1x128x128xbf16> to vector<128x128xbf16>
    %cst_28 = arith.constant dense<0.000000e+00> : vector<256x128xf32>
    %21 = tpu.matmul %18, %20, %cst_28 {dimension_numbers = #tpu.dot_dimension_numbers<[1], [0], [0], [1], [0, 0, 1, 1], [], []>} : vector<256x128xbf16>, vector<128x128xbf16>, vector<256x128xf32> -> vector<256x128xf32>
    %c0_29 = arith.constant 0 : index
    %c0_30 = arith.constant 0 : index
    %22 = vector.load %arg8[%c0_29, %c0_30] : memref<256x128xf32, #tpu.memory_space<vmem>>, vector<256x128xf32>
    %23 = arith.addf %22, %21 : vector<256x128xf32>
    %c0_31 = arith.constant 0 : index
    %c0_32 = arith.constant 0 : index
    %24 = vector.load %arg8[%c0_31, %c0_32] : memref<256x128xf32, #tpu.memory_space<vmem>>, vector<256x128xf32>
    tpu.vector_store %arg8[%c0_31, %c0_32], %23 {strides = array<i32>} : memref<256x128xf32, #tpu.memory_space<vmem>>, vector<256x128xf32>,
    %c0_33 = arith.constant 0 : index
    %c0_34 = arith.constant 0 : index
    %c1_35 = arith.constant 1 : index
    %c0_36 = arith.constant 0 : index
    %c0_37 = arith.constant 0 : index
    %25 = vector.load %arg1[%c0_33, %c0_34, %c1_35, %c0_36, %c0_37] : memref<1x6x10x10x128xf32, #tpu.memory_space<vmem>>, vector<1x4x8x8x128xf32>
    %26 = vector.shape_cast %25 : vector<1x4x8x8x128xf32> to vector<256x128xf32>
    %27 = arith.truncf %26 : vector<256x128xf32> to vector<256x128xbf16>
    %c3 = arith.constant 3 : index
    %c0_38 = arith.constant 0 : index
    %c0_39 = arith.constant 0 : index
    %28 = vector.load %arg2[%c3, %c0_38, %c0_39] : memref<27x128x128xbf16, #tpu.memory_space<vmem>>, vector<1x128x128xbf16>
    %29 = vector.shape_cast %28 : vector<1x128x128xbf16> to vector<128x128xbf16>
    %cst_40 = arith.constant dense<0.000000e+00> : vector<256x128xf32>
    %30 = tpu.matmul %27, %29, %cst_40 {dimension_numbers = #tpu.dot_dimension_numbers<[1], [0], [0], [1], [0, 0, 1, 1], [], []>} : vector<256x128xbf16>, vector<128x128xbf16>, vector<256x128xf32> -> vector<256x128xf32>
    %c0_41 = arith.constant 0 : index
    %c0_42 = arith.constant 0 : index
    %31 = vector.load %arg8[%c0_41, %c0_42] : memref<256x128xf32, #tpu.memory_space<vmem>>, vector<256x128xf32>
    %32 = arith.addf %31, %30 : vector<256x128xf32>
    %c0_43 = arith.constant 0 : index
    %c0_44 = arith.constant 0 : index
    %33 = vector.load %arg8[%c0_43, %c0_44] : memref<256x128xf32, #tpu.memory_space<vmem>>, vector<256x128xf32>
    tpu.vector_store %arg8[%c0_43, %c0_44], %32 {strides = array<i32>} : memref<256x128xf32, #tpu.memory_space<vmem>>, vector<256x128xf32>,
    %c0_45 = arith.constant 0 : index
    %c0_46 = arith.constant 0 : index
    %c1_47 = arith.constant 1 : index
    %c1_48 = arith.constant 1 : index
    %c0_49 = arith.constant 0 : index
    %34 = vector.load %arg1[%c0_45, %c0_46, %c1_47, %c1_48, %c0_49] : memref<1x6x10x10x128xf32, #tpu.memory_space<vmem>>, vector<1x4x8x8x128xf32>
    %35 = vector.shape_cast %34 : vector<1x4x8x8x128xf32> to vector<256x128xf32>
    %36 = arith.truncf %35 : vector<256x128xf32> to vector<256x128xbf16>
    %c4 = arith.constant 4 : index
    %c0_50 = arith.constant 0 : index
    %c0_51 = arith.constant 0 : index
    %37 = vector.load %arg2[%c4, %c0_50, %c0_51] : memref<27x128x128xbf16, #tpu.memory_space<vmem>>, vector<1x128x128xbf16>
    %38 = vector.shape_cast %37 : vector<1x128x128xbf16> to vector<128x128xbf16>
    %cst_52 = arith.constant dense<0.000000e+00> : vector<256x128xf32>
    %39 = tpu.matmul %36, %38, %cst_52 {dimension_numbers = #tpu.dot_dimension_numbers<[1], [0], [0], [1], [0, 0, 1, 1], [], []>} : vector<256x128xbf16>, vector<128x128xbf16>, vector<256x128xf32> -> vector<256x128xf32>
    %c0_53 = arith.constant 0 : index
    %c0_54 = arith.constant 0 : index
    %40 = vector.load %arg8[%c0_53, %c0_54] : memref<256x128xf32, #tpu.memory_space<vmem>>, vector<256x128xf32>
    %41 = arith.addf %40, %39 : vector<256x128xf32>
    %c0_55 = arith.constant 0 : index
    %c0_56 = arith.constant 0 : index
    %42 = vector.load %arg8[%c0_55, %c0_56] : memref<256x128xf32, #tpu.memory_space<vmem>>, vector<256x128xf32>
    tpu.vector_store %arg8[%c0_55, %c0_56], %41 {strides = array<i32>} : memref<256x128xf32, #tpu.memory_space<vmem>>, vector<256x128xf32>,
    %c0_57 = arith.constant 0 : index
    %c0_58 = arith.constant 0 : index
    %c1_59 = arith.constant 1 : index
    %c2_60 = arith.constant 2 : index
    %c0_61 = arith.constant 0 : index
    %43 = vector.load %arg1[%c0_57, %c0_58, %c1_59, %c2_60, %c0_61] : memref<1x6x10x10x128xf32, #tpu.memory_space<vmem>>, vector<1x4x8x8x128xf32>
    %44 = vector.shape_cast %43 : vector<1x4x8x8x128xf32> to vector<256x128xf32>
    %45 = arith.truncf %44 : vector<256x128xf32> to vector<256x128xbf16>
    %c5 = arith.constant 5 : index
    %c0_62 = arith.constant 0 : index
    %c0_63 = arith.constant 0 : index
    %46 = vector.load %arg2[%c5, %c0_62, %c0_63] : memref<27x128x128xbf16, #tpu.memory_space<vmem>>, vector<1x128x128xbf16>
    %47 = vector.shape_cast %46 : vector<1x128x128xbf16> to vector<128x128xbf16>
    %cst_64 = arith.constant dense<0.000000e+00> : vector<256x128xf32>
    %48 = tpu.matmul %45, %47, %cst_64 {dimension_numbers = #tpu.dot_dimension_numbers<[1], [0], [0], [1], [0, 0, 1, 1], [], []>} : vector<256x128xbf16>, vector<128x128xbf16>, vector<256x128xf32> -> vector<256x128xf32>
    %c0_65 = arith.constant 0 : index
    %c0_66 = arith.constant 0 : index
    %49 = vector.load %arg8[%c0_65, %c0_66] : memref<256x128xf32, #tpu.memory_space<vmem>>, vector<256x128xf32>
    %50 = arith.addf %49, %48 : vector<256x128xf32>
    %c0_67 = arith.constant 0 : index
    %c0_68 = arith.constant 0 : index
    %51 = vector.load %arg8[%c0_67, %c0_68] : memref<256x128xf32, #tpu.memory_space<vmem>>, vector<256x128xf32>
    tpu.vector_store %arg8[%c0_67, %c0_68], %50 {strides = array<i32>} : memref<256x128xf32, #tpu.memory_space<vmem>>, vector<256x128xf32>,
    %c0_69 = arith.constant 0 : index
    %c0_70 = arith.constant 0 : index
    %c2_71 = arith.constant 2 : index
    %c0_72 = arith.constant 0 : index
    %c0_73 = arith.constant 0 : index
    %52 = vector.load %arg1[%c0_69, %c0_70, %c2_71, %c0_72, %c0_73] : memref<1x6x10x10x128xf32, #tpu.memory_space<vmem>>, vector<1x4x8x8x128xf32>
    %53 = vector.shape_cast %52 : vector<1x4x8x8x128xf32> to vector<256x128xf32>
    %54 = arith.truncf %53 : vector<256x128xf32> to vector<256x128xbf16>
    %c6 = arith.constant 6 : index
    %c0_74 = arith.constant 0 : index
    %c0_75 = arith.constant 0 : index
    %55 = vector.load %arg2[%c6, %c0_74, %c0_75] : memref<27x128x128xbf16, #tpu.memory_space<vmem>>, vector<1x128x128xbf16>
    %56 = vector.shape_cast %55 : vector<1x128x128xbf16> to vector<128x128xbf16>
    %cst_76 = arith.constant dense<0.000000e+00> : vector<256x128xf32>
    %57 = tpu.matmul %54, %56, %cst_76 {dimension_numbers = #tpu.dot_dimension_numbers<[1], [0], [0], [1], [0, 0, 1, 1], [], []>} : vector<256x128xbf16>, vector<128x128xbf16>, vector<256x128xf32> -> vector<256x128xf32>
    %c0_77 = arith.constant 0 : index
    %c0_78 = arith.constant 0 : index
    %58 = vector.load %arg8[%c0_77, %c0_78] : memref<256x128xf32, #tpu.memory_space<vmem>>, vector<256x128xf32>
    %59 = arith.addf %58, %57 : vector<256x128xf32>
    %c0_79 = arith.constant 0 : index
    %c0_80 = arith.constant 0 : index
    %60 = vector.load %arg8[%c0_79, %c0_80] : memref<256x128xf32, #tpu.memory_space<vmem>>, vector<256x128xf32>
    tpu.vector_store %arg8[%c0_79, %c0_80], %59 {strides = array<i32>} : memref<256x128xf32, #tpu.memory_space<vmem>>, vector<256x128xf32>,
    %c0_81 = arith.constant 0 : index
    %c0_82 = arith.constant 0 : index
    %c2_83 = arith.constant 2 : index
    %c1_84 = arith.constant 1 : index
    %c0_85 = arith.constant 0 : index
    %61 = vector.load %arg1[%c0_81, %c0_82, %c2_83, %c1_84, %c0_85] : memref<1x6x10x10x128xf32, #tpu.memory_space<vmem>>, vector<1x4x8x8x128xf32>
    %62 = vector.shape_cast %61 : vector<1x4x8x8x128xf32> to vector<256x128xf32>
    %63 = arith.truncf %62 : vector<256x128xf32> to vector<256x128xbf16>
    %c7 = arith.constant 7 : index
    %c0_86 = arith.constant 0 : index
    %c0_87 = arith.constant 0 : index
    %64 = vector.load %arg2[%c7, %c0_86, %c0_87] : memref<27x128x128xbf16, #tpu.memory_space<vmem>>, vector<1x128x128xbf16>
    %65 = vector.shape_cast %64 : vector<1x128x128xbf16> to vector<128x128xbf16>
    %cst_88 = arith.constant dense<0.000000e+00> : vector<256x128xf32>
    %66 = tpu.matmul %63, %65, %cst_88 {dimension_numbers = #tpu.dot_dimension_numbers<[1], [0], [0], [1], [0, 0, 1, 1], [], []>} : vector<256x128xbf16>, vector<128x128xbf16>, vector<256x128xf32> -> vector<256x128xf32>
    %c0_89 = arith.constant 0 : index
    %c0_90 = arith.constant 0 : index
    %67 = vector.load %arg8[%c0_89, %c0_90] : memref<256x128xf32, #tpu.memory_space<vmem>>, vector<256x128xf32>
    %68 = arith.addf %67, %66 : vector<256x128xf32>
    %c0_91 = arith.constant 0 : index
    %c0_92 = arith.constant 0 : index
    %69 = vector.load %arg8[%c0_91, %c0_92] : memref<256x128xf32, #tpu.memory_space<vmem>>, vector<256x128xf32>
    tpu.vector_store %arg8[%c0_91, %c0_92], %68 {strides = array<i32>} : memref<256x128xf32, #tpu.memory_space<vmem>>, vector<256x128xf32>,
    %c0_93 = arith.constant 0 : index
    %c0_94 = arith.constant 0 : index
    %c2_95 = arith.constant 2 : index
    %c2_96 = arith.constant 2 : index
    %c0_97 = arith.constant 0 : index
    %70 = vector.load %arg1[%c0_93, %c0_94, %c2_95, %c2_96, %c0_97] : memref<1x6x10x10x128xf32, #tpu.memory_space<vmem>>, vector<1x4x8x8x128xf32>
    %71 = vector.shape_cast %70 : vector<1x4x8x8x128xf32> to vector<256x128xf32>
    %72 = arith.truncf %71 : vector<256x128xf32> to vector<256x128xbf16>
    %c8 = arith.constant 8 : index
    %c0_98 = arith.constant 0 : index
    %c0_99 = arith.constant 0 : index
    %73 = vector.load %arg2[%c8, %c0_98, %c0_99] : memref<27x128x128xbf16, #tpu.memory_space<vmem>>, vector<1x128x128xbf16>
    %74 = vector.shape_cast %73 : vector<1x128x128xbf16> to vector<128x128xbf16>
    %cst_100 = arith.constant dense<0.000000e+00> : vector<256x128xf32>
    %75 = tpu.matmul %72, %74, %cst_100 {dimension_numbers = #tpu.dot_dimension_numbers<[1], [0], [0], [1], [0, 0, 1, 1], [], []>} : vector<256x128xbf16>, vector<128x128xbf16>, vector<256x128xf32> -> vector<256x128xf32>
    %c0_101 = arith.constant 0 : index
    %c0_102 = arith.constant 0 : index
    %76 = vector.load %arg8[%c0_101, %c0_102] : memref<256x128xf32, #tpu.memory_space<vmem>>, vector<256x128xf32>
    %77 = arith.addf %76, %75 : vector<256x128xf32>
    %c0_103 = arith.constant 0 : index
    %c0_104 = arith.constant 0 : index
    %78 = vector.load %arg8[%c0_103, %c0_104] : memref<256x128xf32, #tpu.memory_space<vmem>>, vector<256x128xf32>
    tpu.vector_store %arg8[%c0_103, %c0_104], %77 {strides = array<i32>} : memref<256x128xf32, #tpu.memory_space<vmem>>, vector<256x128xf32>,
    %c0_105 = arith.constant 0 : index
    %c1_106 = arith.constant 1 : index
    %c0_107 = arith.constant 0 : index
    %c0_108 = arith.constant 0 : index
    %c0_109 = arith.constant 0 : index
    %79 = vector.load %arg1[%c0_105, %c1_106, %c0_107, %c0_108, %c0_109] : memref<1x6x10x10x128xf32, #tpu.memory_space<vmem>>, vector<1x4x8x8x128xf32>
    %80 = vector.shape_cast %79 : vector<1x4x8x8x128xf32> to vector<256x128xf32>
    %81 = arith.truncf %80 : vector<256x128xf32> to vector<256x128xbf16>
    %c9 = arith.constant 9 : index
    %c0_110 = arith.constant 0 : index
    %c0_111 = arith.constant 0 : index
    %82 = vector.load %arg2[%c9, %c0_110, %c0_111] : memref<27x128x128xbf16, #tpu.memory_space<vmem>>, vector<1x128x128xbf16>
    %83 = vector.shape_cast %82 : vector<1x128x128xbf16> to vector<128x128xbf16>
    %cst_112 = arith.constant dense<0.000000e+00> : vector<256x128xf32>
    %84 = tpu.matmul %81, %83, %cst_112 {dimension_numbers = #tpu.dot_dimension_numbers<[1], [0], [0], [1], [0, 0, 1, 1], [], []>} : vector<256x128xbf16>, vector<128x128xbf16>, vector<256x128xf32> -> vector<256x128xf32>
    %c0_113 = arith.constant 0 : index
    %c0_114 = arith.constant 0 : index
    %85 = vector.load %arg8[%c0_113, %c0_114] : memref<256x128xf32, #tpu.memory_space<vmem>>, vector<256x128xf32>
    %86 = arith.addf %85, %84 : vector<256x128xf32>
    %c0_115 = arith.constant 0 : index
    %c0_116 = arith.constant 0 : index
    %87 = vector.load %arg8[%c0_115, %c0_116] : memref<256x128xf32, #tpu.memory_space<vmem>>, vector<256x128xf32>
    tpu.vector_store %arg8[%c0_115, %c0_116], %86 {strides = array<i32>} : memref<256x128xf32, #tpu.memory_space<vmem>>, vector<256x128xf32>,
    %c0_117 = arith.constant 0 : index
    %c1_118 = arith.constant 1 : index
    %c0_119 = arith.constant 0 : index
    %c1_120 = arith.constant 1 : index
    %c0_121 = arith.constant 0 : index
    %88 = vector.load %arg1[%c0_117, %c1_118, %c0_119, %c1_120, %c0_121] : memref<1x6x10x10x128xf32, #tpu.memory_space<vmem>>, vector<1x4x8x8x128xf32>
    %89 = vector.shape_cast %88 : vector<1x4x8x8x128xf32> to vector<256x128xf32>
    %90 = arith.truncf %89 : vector<256x128xf32> to vector<256x128xbf16>
    %c10 = arith.constant 10 : index
    %c0_122 = arith.constant 0 : index
    %c0_123 = arith.constant 0 : index
    %91 = vector.load %arg2[%c10, %c0_122, %c0_123] : memref<27x128x128xbf16, #tpu.memory_space<vmem>>, vector<1x128x128xbf16>
    %92 = vector.shape_cast %91 : vector<1x128x128xbf16> to vector<128x128xbf16>
    %cst_124 = arith.constant dense<0.000000e+00> : vector<256x128xf32>
    %93 = tpu.matmul %90, %92, %cst_124 {dimension_numbers = #tpu.dot_dimension_numbers<[1], [0], [0], [1], [0, 0, 1, 1], [], []>} : vector<256x128xbf16>, vector<128x128xbf16>, vector<256x128xf32> -> vector<256x128xf32>
    %c0_125 = arith.constant 0 : index
    %c0_126 = arith.constant 0 : index
    %94 = vector.load %arg8[%c0_125, %c0_126] : memref<256x128xf32, #tpu.memory_space<vmem>>, vector<256x128xf32>
    %95 = arith.addf %94, %93 : vector<256x128xf32>
    %c0_127 = arith.constant 0 : index
    %c0_128 = arith.constant 0 : index
    %96 = vector.load %arg8[%c0_127, %c0_128] : memref<256x128xf32, #tpu.memory_space<vmem>>, vector<256x128xf32>
    tpu.vector_store %arg8[%c0_127, %c0_128], %95 {strides = array<i32>} : memref<256x128xf32, #tpu.memory_space<vmem>>, vector<256x128xf32>,
    %c0_129 = arith.constant 0 : index
    %c1_130 = arith.constant 1 : index
    %c0_131 = arith.constant 0 : index
    %c2_132 = arith.constant 2 : index
    %c0_133 = arith.constant 0 : index
    %97 = vector.load %arg1[%c0_129, %c1_130, %c0_131, %c2_132, %c0_133] : memref<1x6x10x10x128xf32, #tpu.memory_space<vmem>>, vector<1x4x8x8x128xf32>
    %98 = vector.shape_cast %97 : vector<1x4x8x8x128xf32> to vector<256x128xf32>
    %99 = arith.truncf %98 : vector<256x128xf32> to vector<256x128xbf16>
    %c11 = arith.constant 11 : index
    %c0_134 = arith.constant 0 : index
    %c0_135 = arith.constant 0 : index
    %100 = vector.load %arg2[%c11, %c0_134, %c0_135] : memref<27x128x128xbf16, #tpu.memory_space<vmem>>, vector<1x128x128xbf16>
    %101 = vector.shape_cast %100 : vector<1x128x128xbf16> to vector<128x128xbf16>
    %cst_136 = arith.constant dense<0.000000e+00> : vector<256x128xf32>
    %102 = tpu.matmul %99, %101, %cst_136 {dimension_numbers = #tpu.dot_dimension_numbers<[1], [0], [0], [1], [0, 0, 1, 1], [], []>} : vector<256x128xbf16>, vector<128x128xbf16>, vector<256x128xf32> -> vector<256x128xf32>
    %c0_137 = arith.constant 0 : index
    %c0_138 = arith.constant 0 : index
    %103 = vector.load %arg8[%c0_137, %c0_138] : memref<256x128xf32, #tpu.memory_space<vmem>>, vector<256x128xf32>
    %104 = arith.addf %103, %102 : vector<256x128xf32>
    %c0_139 = arith.constant 0 : index
    %c0_140 = arith.constant 0 : index
    %105 = vector.load %arg8[%c0_139, %c0_140] : memref<256x128xf32, #tpu.memory_space<vmem>>, vector<256x128xf32>
    tpu.vector_store %arg8[%c0_139, %c0_140], %104 {strides = array<i32>} : memref<256x128xf32, #tpu.memory_space<vmem>>, vector<256x128xf32>,
    %c0_141 = arith.constant 0 : index
    %c1_142 = arith.constant 1 : index
    %c1_143 = arith.constant 1 : index
    %c0_144 = arith.constant 0 : index
    %c0_145 = arith.constant 0 : index
    %106 = vector.load %arg1[%c0_141, %c1_142, %c1_143, %c0_144, %c0_145] : memref<1x6x10x10x128xf32, #tpu.memory_space<vmem>>, vector<1x4x8x8x128xf32>
    %107 = vector.shape_cast %106 : vector<1x4x8x8x128xf32> to vector<256x128xf32>
    %108 = arith.truncf %107 : vector<256x128xf32> to vector<256x128xbf16>
    %c12 = arith.constant 12 : index
    %c0_146 = arith.constant 0 : index
    %c0_147 = arith.constant 0 : index
    %109 = vector.load %arg2[%c12, %c0_146, %c0_147] : memref<27x128x128xbf16, #tpu.memory_space<vmem>>, vector<1x128x128xbf16>
    %110 = vector.shape_cast %109 : vector<1x128x128xbf16> to vector<128x128xbf16>
    %cst_148 = arith.constant dense<0.000000e+00> : vector<256x128xf32>
    %111 = tpu.matmul %108, %110, %cst_148 {dimension_numbers = #tpu.dot_dimension_numbers<[1], [0], [0], [1], [0, 0, 1, 1], [], []>} : vector<256x128xbf16>, vector<128x128xbf16>, vector<256x128xf32> -> vector<256x128xf32>
    %c0_149 = arith.constant 0 : index
    %c0_150 = arith.constant 0 : index
    %112 = vector.load %arg8[%c0_149, %c0_150] : memref<256x128xf32, #tpu.memory_space<vmem>>, vector<256x128xf32>
    %113 = arith.addf %112, %111 : vector<256x128xf32>
    %c0_151 = arith.constant 0 : index
    %c0_152 = arith.constant 0 : index
    %114 = vector.load %arg8[%c0_151, %c0_152] : memref<256x128xf32, #tpu.memory_space<vmem>>, vector<256x128xf32>
    tpu.vector_store %arg8[%c0_151, %c0_152], %113 {strides = array<i32>} : memref<256x128xf32, #tpu.memory_space<vmem>>, vector<256x128xf32>,
    %c0_153 = arith.constant 0 : index
    %c1_154 = arith.constant 1 : index
    %c1_155 = arith.constant 1 : index
    %c1_156 = arith.constant 1 : index
    %c0_157 = arith.constant 0 : index
    %115 = vector.load %arg1[%c0_153, %c1_154, %c1_155, %c1_156, %c0_157] : memref<1x6x10x10x128xf32, #tpu.memory_space<vmem>>, vector<1x4x8x8x128xf32>
    %116 = vector.shape_cast %115 : vector<1x4x8x8x128xf32> to vector<256x128xf32>
    %117 = arith.truncf %116 : vector<256x128xf32> to vector<256x128xbf16>
    %c13 = arith.constant 13 : index
    %c0_158 = arith.constant 0 : index
    %c0_159 = arith.constant 0 : index
    %118 = vector.load %arg2[%c13, %c0_158, %c0_159] : memref<27x128x128xbf16, #tpu.memory_space<vmem>>, vector<1x128x128xbf16>
    %119 = vector.shape_cast %118 : vector<1x128x128xbf16> to vector<128x128xbf16>
    %cst_160 = arith.constant dense<0.000000e+00> : vector<256x128xf32>
    %120 = tpu.matmul %117, %119, %cst_160 {dimension_numbers = #tpu.dot_dimension_numbers<[1], [0], [0], [1], [0, 0, 1, 1], [], []>} : vector<256x128xbf16>, vector<128x128xbf16>, vector<256x128xf32> -> vector<256x128xf32>
    %c0_161 = arith.constant 0 : index
    %c0_162 = arith.constant 0 : index
    %121 = vector.load %arg8[%c0_161, %c0_162] : memref<256x128xf32, #tpu.memory_space<vmem>>, vector<256x128xf32>
    %122 = arith.addf %121, %120 : vector<256x128xf32>
    %c0_163 = arith.constant 0 : index
    %c0_164 = arith.constant 0 : index
    %123 = vector.load %arg8[%c0_163, %c0_164] : memref<256x128xf32, #tpu.memory_space<vmem>>, vector<256x128xf32>
    tpu.vector_store %arg8[%c0_163, %c0_164], %122 {strides = array<i32>} : memref<256x128xf32, #tpu.memory_space<vmem>>, vector<256x128xf32>,
    %c0_165 = arith.constant 0 : index
    %c1_166 = arith.constant 1 : index
    %c1_167 = arith.constant 1 : index
    %c2_168 = arith.constant 2 : index
    %c0_169 = arith.constant 0 : index
    %124 = vector.load %arg1[%c0_165, %c1_166, %c1_167, %c2_168, %c0_169] : memref<1x6x10x10x128xf32, #tpu.memory_space<vmem>>, vector<1x4x8x8x128xf32>
    %125 = vector.shape_cast %124 : vector<1x4x8x8x128xf32> to vector<256x128xf32>
    %126 = arith.truncf %125 : vector<256x128xf32> to vector<256x128xbf16>
    %c14 = arith.constant 14 : index
    %c0_170 = arith.constant 0 : index
    %c0_171 = arith.constant 0 : index
    %127 = vector.load %arg2[%c14, %c0_170, %c0_171] : memref<27x128x128xbf16, #tpu.memory_space<vmem>>, vector<1x128x128xbf16>
    %128 = vector.shape_cast %127 : vector<1x128x128xbf16> to vector<128x128xbf16>
    %cst_172 = arith.constant dense<0.000000e+00> : vector<256x128xf32>
    %129 = tpu.matmul %126, %128, %cst_172 {dimension_numbers = #tpu.dot_dimension_numbers<[1], [0], [0], [1], [0, 0, 1, 1], [], []>} : vector<256x128xbf16>, vector<128x128xbf16>, vector<256x128xf32> -> vector<256x128xf32>
    %c0_173 = arith.constant 0 : index
    %c0_174 = arith.constant 0 : index
    %130 = vector.load %arg8[%c0_173, %c0_174] : memref<256x128xf32, #tpu.memory_space<vmem>>, vector<256x128xf32>
    %131 = arith.addf %130, %129 : vector<256x128xf32>
    %c0_175 = arith.constant 0 : index
    %c0_176 = arith.constant 0 : index
    %132 = vector.load %arg8[%c0_175, %c0_176] : memref<256x128xf32, #tpu.memory_space<vmem>>, vector<256x128xf32>
    tpu.vector_store %arg8[%c0_175, %c0_176], %131 {strides = array<i32>} : memref<256x128xf32, #tpu.memory_space<vmem>>, vector<256x128xf32>,
    %c0_177 = arith.constant 0 : index
    %c1_178 = arith.constant 1 : index
    %c2_179 = arith.constant 2 : index
    %c0_180 = arith.constant 0 : index
    %c0_181 = arith.constant 0 : index
    %133 = vector.load %arg1[%c0_177, %c1_178, %c2_179, %c0_180, %c0_181] : memref<1x6x10x10x128xf32, #tpu.memory_space<vmem>>, vector<1x4x8x8x128xf32>
    %134 = vector.shape_cast %133 : vector<1x4x8x8x128xf32> to vector<256x128xf32>
    %135 = arith.truncf %134 : vector<256x128xf32> to vector<256x128xbf16>
    %c15 = arith.constant 15 : index
    %c0_182 = arith.constant 0 : index
    %c0_183 = arith.constant 0 : index
    %136 = vector.load %arg2[%c15, %c0_182, %c0_183] : memref<27x128x128xbf16, #tpu.memory_space<vmem>>, vector<1x128x128xbf16>
    %137 = vector.shape_cast %136 : vector<1x128x128xbf16> to vector<128x128xbf16>
    %cst_184 = arith.constant dense<0.000000e+00> : vector<256x128xf32>
    %138 = tpu.matmul %135, %137, %cst_184 {dimension_numbers = #tpu.dot_dimension_numbers<[1], [0], [0], [1], [0, 0, 1, 1], [], []>} : vector<256x128xbf16>, vector<128x128xbf16>, vector<256x128xf32> -> vector<256x128xf32>
    %c0_185 = arith.constant 0 : index
    %c0_186 = arith.constant 0 : index
    %139 = vector.load %arg8[%c0_185, %c0_186] : memref<256x128xf32, #tpu.memory_space<vmem>>, vector<256x128xf32>
    %140 = arith.addf %139, %138 : vector<256x128xf32>
    %c0_187 = arith.constant 0 : index
    %c0_188 = arith.constant 0 : index
    %141 = vector.load %arg8[%c0_187, %c0_188] : memref<256x128xf32, #tpu.memory_space<vmem>>, vector<256x128xf32>
    tpu.vector_store %arg8[%c0_187, %c0_188], %140 {strides = array<i32>} : memref<256x128xf32, #tpu.memory_space<vmem>>, vector<256x128xf32>,
    %c0_189 = arith.constant 0 : index
    %c1_190 = arith.constant 1 : index
    %c2_191 = arith.constant 2 : index
    %c1_192 = arith.constant 1 : index
    %c0_193 = arith.constant 0 : index
    %142 = vector.load %arg1[%c0_189, %c1_190, %c2_191, %c1_192, %c0_193] : memref<1x6x10x10x128xf32, #tpu.memory_space<vmem>>, vector<1x4x8x8x128xf32>
    %143 = vector.shape_cast %142 : vector<1x4x8x8x128xf32> to vector<256x128xf32>
    %144 = arith.truncf %143 : vector<256x128xf32> to vector<256x128xbf16>
    %c16 = arith.constant 16 : index
    %c0_194 = arith.constant 0 : index
    %c0_195 = arith.constant 0 : index
    %145 = vector.load %arg2[%c16, %c0_194, %c0_195] : memref<27x128x128xbf16, #tpu.memory_space<vmem>>, vector<1x128x128xbf16>
    %146 = vector.shape_cast %145 : vector<1x128x128xbf16> to vector<128x128xbf16>
    %cst_196 = arith.constant dense<0.000000e+00> : vector<256x128xf32>
    %147 = tpu.matmul %144, %146, %cst_196 {dimension_numbers = #tpu.dot_dimension_numbers<[1], [0], [0], [1], [0, 0, 1, 1], [], []>} : vector<256x128xbf16>, vector<128x128xbf16>, vector<256x128xf32> -> vector<256x128xf32>
    %c0_197 = arith.constant 0 : index
    %c0_198 = arith.constant 0 : index
    %148 = vector.load %arg8[%c0_197, %c0_198] : memref<256x128xf32, #tpu.memory_space<vmem>>, vector<256x128xf32>
    %149 = arith.addf %148, %147 : vector<256x128xf32>
    %c0_199 = arith.constant 0 : index
    %c0_200 = arith.constant 0 : index
    %150 = vector.load %arg8[%c0_199, %c0_200] : memref<256x128xf32, #tpu.memory_space<vmem>>, vector<256x128xf32>
    tpu.vector_store %arg8[%c0_199, %c0_200], %149 {strides = array<i32>} : memref<256x128xf32, #tpu.memory_space<vmem>>, vector<256x128xf32>,
    %c0_201 = arith.constant 0 : index
    %c1_202 = arith.constant 1 : index
    %c2_203 = arith.constant 2 : index
    %c2_204 = arith.constant 2 : index
    %c0_205 = arith.constant 0 : index
    %151 = vector.load %arg1[%c0_201, %c1_202, %c2_203, %c2_204, %c0_205] : memref<1x6x10x10x128xf32, #tpu.memory_space<vmem>>, vector<1x4x8x8x128xf32>
    %152 = vector.shape_cast %151 : vector<1x4x8x8x128xf32> to vector<256x128xf32>
    %153 = arith.truncf %152 : vector<256x128xf32> to vector<256x128xbf16>
    %c17 = arith.constant 17 : index
    %c0_206 = arith.constant 0 : index
    %c0_207 = arith.constant 0 : index
    %154 = vector.load %arg2[%c17, %c0_206, %c0_207] : memref<27x128x128xbf16, #tpu.memory_space<vmem>>, vector<1x128x128xbf16>
    %155 = vector.shape_cast %154 : vector<1x128x128xbf16> to vector<128x128xbf16>
    %cst_208 = arith.constant dense<0.000000e+00> : vector<256x128xf32>
    %156 = tpu.matmul %153, %155, %cst_208 {dimension_numbers = #tpu.dot_dimension_numbers<[1], [0], [0], [1], [0, 0, 1, 1], [], []>} : vector<256x128xbf16>, vector<128x128xbf16>, vector<256x128xf32> -> vector<256x128xf32>
    %c0_209 = arith.constant 0 : index
    %c0_210 = arith.constant 0 : index
    %157 = vector.load %arg8[%c0_209, %c0_210] : memref<256x128xf32, #tpu.memory_space<vmem>>, vector<256x128xf32>
    %158 = arith.addf %157, %156 : vector<256x128xf32>
    %c0_211 = arith.constant 0 : index
    %c0_212 = arith.constant 0 : index
    %159 = vector.load %arg8[%c0_211, %c0_212] : memref<256x128xf32, #tpu.memory_space<vmem>>, vector<256x128xf32>
    tpu.vector_store %arg8[%c0_211, %c0_212], %158 {strides = array<i32>} : memref<256x128xf32, #tpu.memory_space<vmem>>, vector<256x128xf32>,
    %c0_213 = arith.constant 0 : index
    %c2_214 = arith.constant 2 : index
    %c0_215 = arith.constant 0 : index
    %c0_216 = arith.constant 0 : index
    %c0_217 = arith.constant 0 : index
    %160 = vector.load %arg1[%c0_213, %c2_214, %c0_215, %c0_216, %c0_217] : memref<1x6x10x10x128xf32, #tpu.memory_space<vmem>>, vector<1x4x8x8x128xf32>
    %161 = vector.shape_cast %160 : vector<1x4x8x8x128xf32> to vector<256x128xf32>
    %162 = arith.truncf %161 : vector<256x128xf32> to vector<256x128xbf16>
    %c18 = arith.constant 18 : index
    %c0_218 = arith.constant 0 : index
    %c0_219 = arith.constant 0 : index
    %163 = vector.load %arg2[%c18, %c0_218, %c0_219] : memref<27x128x128xbf16, #tpu.memory_space<vmem>>, vector<1x128x128xbf16>
    %164 = vector.shape_cast %163 : vector<1x128x128xbf16> to vector<128x128xbf16>
    %cst_220 = arith.constant dense<0.000000e+00> : vector<256x128xf32>
    %165 = tpu.matmul %162, %164, %cst_220 {dimension_numbers = #tpu.dot_dimension_numbers<[1], [0], [0], [1], [0, 0, 1, 1], [], []>} : vector<256x128xbf16>, vector<128x128xbf16>, vector<256x128xf32> -> vector<256x128xf32>
    %c0_221 = arith.constant 0 : index
    %c0_222 = arith.constant 0 : index
    %166 = vector.load %arg8[%c0_221, %c0_222] : memref<256x128xf32, #tpu.memory_space<vmem>>, vector<256x128xf32>
    %167 = arith.addf %166, %165 : vector<256x128xf32>
    %c0_223 = arith.constant 0 : index
    %c0_224 = arith.constant 0 : index
    %168 = vector.load %arg8[%c0_223, %c0_224] : memref<256x128xf32, #tpu.memory_space<vmem>>, vector<256x128xf32>
    tpu.vector_store %arg8[%c0_223, %c0_224], %167 {strides = array<i32>} : memref<256x128xf32, #tpu.memory_space<vmem>>, vector<256x128xf32>,
    %c0_225 = arith.constant 0 : index
    %c2_226 = arith.constant 2 : index
    %c0_227 = arith.constant 0 : index
    %c1_228 = arith.constant 1 : index
    %c0_229 = arith.constant 0 : index
    %169 = vector.load %arg1[%c0_225, %c2_226, %c0_227, %c1_228, %c0_229] : memref<1x6x10x10x128xf32, #tpu.memory_space<vmem>>, vector<1x4x8x8x128xf32>
    %170 = vector.shape_cast %169 : vector<1x4x8x8x128xf32> to vector<256x128xf32>
    %171 = arith.truncf %170 : vector<256x128xf32> to vector<256x128xbf16>
    %c19 = arith.constant 19 : index
    %c0_230 = arith.constant 0 : index
    %c0_231 = arith.constant 0 : index
    %172 = vector.load %arg2[%c19, %c0_230, %c0_231] : memref<27x128x128xbf16, #tpu.memory_space<vmem>>, vector<1x128x128xbf16>
    %173 = vector.shape_cast %172 : vector<1x128x128xbf16> to vector<128x128xbf16>
    %cst_232 = arith.constant dense<0.000000e+00> : vector<256x128xf32>
    %174 = tpu.matmul %171, %173, %cst_232 {dimension_numbers = #tpu.dot_dimension_numbers<[1], [0], [0], [1], [0, 0, 1, 1], [], []>} : vector<256x128xbf16>, vector<128x128xbf16>, vector<256x128xf32> -> vector<256x128xf32>
    %c0_233 = arith.constant 0 : index
    %c0_234 = arith.constant 0 : index
    %175 = vector.load %arg8[%c0_233, %c0_234] : memref<256x128xf32, #tpu.memory_space<vmem>>, vector<256x128xf32>
    %176 = arith.addf %175, %174 : vector<256x128xf32>
    %c0_235 = arith.constant 0 : index
    %c0_236 = arith.constant 0 : index
    %177 = vector.load %arg8[%c0_235, %c0_236] : memref<256x128xf32, #tpu.memory_space<vmem>>, vector<256x128xf32>
    tpu.vector_store %arg8[%c0_235, %c0_236], %176 {strides = array<i32>} : memref<256x128xf32, #tpu.memory_space<vmem>>, vector<256x128xf32>,
    %c0_237 = arith.constant 0 : index
    %c2_238 = arith.constant 2 : index
    %c0_239 = arith.constant 0 : index
    %c2_240 = arith.constant 2 : index
    %c0_241 = arith.constant 0 : index
    %178 = vector.load %arg1[%c0_237, %c2_238, %c0_239, %c2_240, %c0_241] : memref<1x6x10x10x128xf32, #tpu.memory_space<vmem>>, vector<1x4x8x8x128xf32>
    %179 = vector.shape_cast %178 : vector<1x4x8x8x128xf32> to vector<256x128xf32>
    %180 = arith.truncf %179 : vector<256x128xf32> to vector<256x128xbf16>
    %c20 = arith.constant 20 : index
    %c0_242 = arith.constant 0 : index
    %c0_243 = arith.constant 0 : index
    %181 = vector.load %arg2[%c20, %c0_242, %c0_243] : memref<27x128x128xbf16, #tpu.memory_space<vmem>>, vector<1x128x128xbf16>
    %182 = vector.shape_cast %181 : vector<1x128x128xbf16> to vector<128x128xbf16>
    %cst_244 = arith.constant dense<0.000000e+00> : vector<256x128xf32>
    %183 = tpu.matmul %180, %182, %cst_244 {dimension_numbers = #tpu.dot_dimension_numbers<[1], [0], [0], [1], [0, 0, 1, 1], [], []>} : vector<256x128xbf16>, vector<128x128xbf16>, vector<256x128xf32> -> vector<256x128xf32>
    %c0_245 = arith.constant 0 : index
    %c0_246 = arith.constant 0 : index
    %184 = vector.load %arg8[%c0_245, %c0_246] : memref<256x128xf32, #tpu.memory_space<vmem>>, vector<256x128xf32>
    %185 = arith.addf %184, %183 : vector<256x128xf32>
    %c0_247 = arith.constant 0 : index
    %c0_248 = arith.constant 0 : index
    %186 = vector.load %arg8[%c0_247, %c0_248] : memref<256x128xf32, #tpu.memory_space<vmem>>, vector<256x128xf32>
    tpu.vector_store %arg8[%c0_247, %c0_248], %185 {strides = array<i32>} : memref<256x128xf32, #tpu.memory_space<vmem>>, vector<256x128xf32>,
    %c0_249 = arith.constant 0 : index
    %c2_250 = arith.constant 2 : index
    %c1_251 = arith.constant 1 : index
    %c0_252 = arith.constant 0 : index
    %c0_253 = arith.constant 0 : index
    %187 = vector.load %arg1[%c0_249, %c2_250, %c1_251, %c0_252, %c0_253] : memref<1x6x10x10x128xf32, #tpu.memory_space<vmem>>, vector<1x4x8x8x128xf32>
    %188 = vector.shape_cast %187 : vector<1x4x8x8x128xf32> to vector<256x128xf32>
    %189 = arith.truncf %188 : vector<256x128xf32> to vector<256x128xbf16>
    %c21 = arith.constant 21 : index
    %c0_254 = arith.constant 0 : index
    %c0_255 = arith.constant 0 : index
    %190 = vector.load %arg2[%c21, %c0_254, %c0_255] : memref<27x128x128xbf16, #tpu.memory_space<vmem>>, vector<1x128x128xbf16>
    %191 = vector.shape_cast %190 : vector<1x128x128xbf16> to vector<128x128xbf16>
    %cst_256 = arith.constant dense<0.000000e+00> : vector<256x128xf32>
    %192 = tpu.matmul %189, %191, %cst_256 {dimension_numbers = #tpu.dot_dimension_numbers<[1], [0], [0], [1], [0, 0, 1, 1], [], []>} : vector<256x128xbf16>, vector<128x128xbf16>, vector<256x128xf32> -> vector<256x128xf32>
    %c0_257 = arith.constant 0 : index
    %c0_258 = arith.constant 0 : index
    %193 = vector.load %arg8[%c0_257, %c0_258] : memref<256x128xf32, #tpu.memory_space<vmem>>, vector<256x128xf32>
    %194 = arith.addf %193, %192 : vector<256x128xf32>
    %c0_259 = arith.constant 0 : index
    %c0_260 = arith.constant 0 : index
    %195 = vector.load %arg8[%c0_259, %c0_260] : memref<256x128xf32, #tpu.memory_space<vmem>>, vector<256x128xf32>
    tpu.vector_store %arg8[%c0_259, %c0_260], %194 {strides = array<i32>} : memref<256x128xf32, #tpu.memory_space<vmem>>, vector<256x128xf32>,
    %c0_261 = arith.constant 0 : index
    %c2_262 = arith.constant 2 : index
    %c1_263 = arith.constant 1 : index
    %c1_264 = arith.constant 1 : index
    %c0_265 = arith.constant 0 : index
    %196 = vector.load %arg1[%c0_261, %c2_262, %c1_263, %c1_264, %c0_265] : memref<1x6x10x10x128xf32, #tpu.memory_space<vmem>>, vector<1x4x8x8x128xf32>
    %197 = vector.shape_cast %196 : vector<1x4x8x8x128xf32> to vector<256x128xf32>
    %198 = arith.truncf %197 : vector<256x128xf32> to vector<256x128xbf16>
    %c22 = arith.constant 22 : index
    %c0_266 = arith.constant 0 : index
    %c0_267 = arith.constant 0 : index
    %199 = vector.load %arg2[%c22, %c0_266, %c0_267] : memref<27x128x128xbf16, #tpu.memory_space<vmem>>, vector<1x128x128xbf16>
    %200 = vector.shape_cast %199 : vector<1x128x128xbf16> to vector<128x128xbf16>
    %cst_268 = arith.constant dense<0.000000e+00> : vector<256x128xf32>
    %201 = tpu.matmul %198, %200, %cst_268 {dimension_numbers = #tpu.dot_dimension_numbers<[1], [0], [0], [1], [0, 0, 1, 1], [], []>} : vector<256x128xbf16>, vector<128x128xbf16>, vector<256x128xf32> -> vector<256x128xf32>
    %c0_269 = arith.constant 0 : index
    %c0_270 = arith.constant 0 : index
    %202 = vector.load %arg8[%c0_269, %c0_270] : memref<256x128xf32, #tpu.memory_space<vmem>>, vector<256x128xf32>
    %203 = arith.addf %202, %201 : vector<256x128xf32>
    %c0_271 = arith.constant 0 : index
    %c0_272 = arith.constant 0 : index
    %204 = vector.load %arg8[%c0_271, %c0_272] : memref<256x128xf32, #tpu.memory_space<vmem>>, vector<256x128xf32>
    tpu.vector_store %arg8[%c0_271, %c0_272], %203 {strides = array<i32>} : memref<256x128xf32, #tpu.memory_space<vmem>>, vector<256x128xf32>,
    %c0_273 = arith.constant 0 : index
    %c2_274 = arith.constant 2 : index
    %c1_275 = arith.constant 1 : index
    %c2_276 = arith.constant 2 : index
    %c0_277 = arith.constant 0 : index
    %205 = vector.load %arg1[%c0_273, %c2_274, %c1_275, %c2_276, %c0_277] : memref<1x6x10x10x128xf32, #tpu.memory_space<vmem>>, vector<1x4x8x8x128xf32>
    %206 = vector.shape_cast %205 : vector<1x4x8x8x128xf32> to vector<256x128xf32>
    %207 = arith.truncf %206 : vector<256x128xf32> to vector<256x128xbf16>
    %c23 = arith.constant 23 : index
    %c0_278 = arith.constant 0 : index
    %c0_279 = arith.constant 0 : index
    %208 = vector.load %arg2[%c23, %c0_278, %c0_279] : memref<27x128x128xbf16, #tpu.memory_space<vmem>>, vector<1x128x128xbf16>
    %209 = vector.shape_cast %208 : vector<1x128x128xbf16> to vector<128x128xbf16>
    %cst_280 = arith.constant dense<0.000000e+00> : vector<256x128xf32>
    %210 = tpu.matmul %207, %209, %cst_280 {dimension_numbers = #tpu.dot_dimension_numbers<[1], [0], [0], [1], [0, 0, 1, 1], [], []>} : vector<256x128xbf16>, vector<128x128xbf16>, vector<256x128xf32> -> vector<256x128xf32>
    %c0_281 = arith.constant 0 : index
    %c0_282 = arith.constant 0 : index
    %211 = vector.load %arg8[%c0_281, %c0_282] : memref<256x128xf32, #tpu.memory_space<vmem>>, vector<256x128xf32>
    %212 = arith.addf %211, %210 : vector<256x128xf32>
    %c0_283 = arith.constant 0 : index
    %c0_284 = arith.constant 0 : index
    %213 = vector.load %arg8[%c0_283, %c0_284] : memref<256x128xf32, #tpu.memory_space<vmem>>, vector<256x128xf32>
    tpu.vector_store %arg8[%c0_283, %c0_284], %212 {strides = array<i32>} : memref<256x128xf32, #tpu.memory_space<vmem>>, vector<256x128xf32>,
    %c0_285 = arith.constant 0 : index
    %c2_286 = arith.constant 2 : index
    %c2_287 = arith.constant 2 : index
    %c0_288 = arith.constant 0 : index
    %c0_289 = arith.constant 0 : index
    %214 = vector.load %arg1[%c0_285, %c2_286, %c2_287, %c0_288, %c0_289] : memref<1x6x10x10x128xf32, #tpu.memory_space<vmem>>, vector<1x4x8x8x128xf32>
    %215 = vector.shape_cast %214 : vector<1x4x8x8x128xf32> to vector<256x128xf32>
    %216 = arith.truncf %215 : vector<256x128xf32> to vector<256x128xbf16>
    %c24 = arith.constant 24 : index
    %c0_290 = arith.constant 0 : index
    %c0_291 = arith.constant 0 : index
    %217 = vector.load %arg2[%c24, %c0_290, %c0_291] : memref<27x128x128xbf16, #tpu.memory_space<vmem>>, vector<1x128x128xbf16>
    %218 = vector.shape_cast %217 : vector<1x128x128xbf16> to vector<128x128xbf16>
    %cst_292 = arith.constant dense<0.000000e+00> : vector<256x128xf32>
    %219 = tpu.matmul %216, %218, %cst_292 {dimension_numbers = #tpu.dot_dimension_numbers<[1], [0], [0], [1], [0, 0, 1, 1], [], []>} : vector<256x128xbf16>, vector<128x128xbf16>, vector<256x128xf32> -> vector<256x128xf32>
    %c0_293 = arith.constant 0 : index
    %c0_294 = arith.constant 0 : index
    %220 = vector.load %arg8[%c0_293, %c0_294] : memref<256x128xf32, #tpu.memory_space<vmem>>, vector<256x128xf32>
    %221 = arith.addf %220, %219 : vector<256x128xf32>
    %c0_295 = arith.constant 0 : index
    %c0_296 = arith.constant 0 : index
    %222 = vector.load %arg8[%c0_295, %c0_296] : memref<256x128xf32, #tpu.memory_space<vmem>>, vector<256x128xf32>
    tpu.vector_store %arg8[%c0_295, %c0_296], %221 {strides = array<i32>} : memref<256x128xf32, #tpu.memory_space<vmem>>, vector<256x128xf32>,
    %c0_297 = arith.constant 0 : index
    %c2_298 = arith.constant 2 : index
    %c2_299 = arith.constant 2 : index
    %c1_300 = arith.constant 1 : index
    %c0_301 = arith.constant 0 : index
    %223 = vector.load %arg1[%c0_297, %c2_298, %c2_299, %c1_300, %c0_301] : memref<1x6x10x10x128xf32, #tpu.memory_space<vmem>>, vector<1x4x8x8x128xf32>
    %224 = vector.shape_cast %223 : vector<1x4x8x8x128xf32> to vector<256x128xf32>
    %225 = arith.truncf %224 : vector<256x128xf32> to vector<256x128xbf16>
    %c25 = arith.constant 25 : index
    %c0_302 = arith.constant 0 : index
    %c0_303 = arith.constant 0 : index
    %226 = vector.load %arg2[%c25, %c0_302, %c0_303] : memref<27x128x128xbf16, #tpu.memory_space<vmem>>, vector<1x128x128xbf16>
    %227 = vector.shape_cast %226 : vector<1x128x128xbf16> to vector<128x128xbf16>
    %cst_304 = arith.constant dense<0.000000e+00> : vector<256x128xf32>
    %228 = tpu.matmul %225, %227, %cst_304 {dimension_numbers = #tpu.dot_dimension_numbers<[1], [0], [0], [1], [0, 0, 1, 1], [], []>} : vector<256x128xbf16>, vector<128x128xbf16>, vector<256x128xf32> -> vector<256x128xf32>
    %c0_305 = arith.constant 0 : index
    %c0_306 = arith.constant 0 : index
    %229 = vector.load %arg8[%c0_305, %c0_306] : memref<256x128xf32, #tpu.memory_space<vmem>>, vector<256x128xf32>
    %230 = arith.addf %229, %228 : vector<256x128xf32>
    %c0_307 = arith.constant 0 : index
    %c0_308 = arith.constant 0 : index
    %231 = vector.load %arg8[%c0_307, %c0_308] : memref<256x128xf32, #tpu.memory_space<vmem>>, vector<256x128xf32>
    tpu.vector_store %arg8[%c0_307, %c0_308], %230 {strides = array<i32>} : memref<256x128xf32, #tpu.memory_space<vmem>>, vector<256x128xf32>,
    %c0_309 = arith.constant 0 : index
    %c2_310 = arith.constant 2 : index
    %c2_311 = arith.constant 2 : index
    %c2_312 = arith.constant 2 : index
    %c0_313 = arith.constant 0 : index
    %232 = vector.load %arg1[%c0_309, %c2_310, %c2_311, %c2_312, %c0_313] : memref<1x6x10x10x128xf32, #tpu.memory_space<vmem>>, vector<1x4x8x8x128xf32>
    %233 = vector.shape_cast %232 : vector<1x4x8x8x128xf32> to vector<256x128xf32>
    %234 = arith.truncf %233 : vector<256x128xf32> to vector<256x128xbf16>
    %c26 = arith.constant 26 : index
    %c0_314 = arith.constant 0 : index
    %c0_315 = arith.constant 0 : index
    %235 = vector.load %arg2[%c26, %c0_314, %c0_315] : memref<27x128x128xbf16, #tpu.memory_space<vmem>>, vector<1x128x128xbf16>
    %236 = vector.shape_cast %235 : vector<1x128x128xbf16> to vector<128x128xbf16>
    %cst_316 = arith.constant dense<0.000000e+00> : vector<256x128xf32>
    %237 = tpu.matmul %234, %236, %cst_316 {dimension_numbers = #tpu.dot_dimension_numbers<[1], [0], [0], [1], [0, 0, 1, 1], [], []>} : vector<256x128xbf16>, vector<128x128xbf16>, vector<256x128xf32> -> vector<256x128xf32>
    %c0_317 = arith.constant 0 : index
    %c0_318 = arith.constant 0 : index
    %238 = vector.load %arg8[%c0_317, %c0_318] : memref<256x128xf32, #tpu.memory_space<vmem>>, vector<256x128xf32>
    %239 = arith.addf %238, %237 : vector<256x128xf32>
    %c0_319 = arith.constant 0 : index
    %c0_320 = arith.constant 0 : index
    %240 = vector.load %arg8[%c0_319, %c0_320] : memref<256x128xf32, #tpu.memory_space<vmem>>, vector<256x128xf32>
    tpu.vector_store %arg8[%c0_319, %c0_320], %239 {strides = array<i32>} : memref<256x128xf32, #tpu.memory_space<vmem>>, vector<256x128xf32>,
    %c0_321 = arith.constant 0 : index
    %c0_322 = arith.constant 0 : index
    %241 = vector.load %arg8[%c0_321, %c0_322] : memref<256x128xf32, #tpu.memory_space<vmem>>, vector<256x128xf32>
    %c0_323 = arith.constant 0 : index
    %c0_324 = arith.constant 0 : index
    %242 = vector.load %arg3[%c0_323, %c0_324] : memref<1x128xf32, #tpu.memory_space<vmem>>, vector<1x128xf32>
    %243 = vector.broadcast %242 : vector<1x128xf32> to vector<256x128xf32>
    %244 = arith.addf %241, %243 : vector<256x128xf32>
    %cst_325 = arith.constant 0.000000e+00 : f32
    %245 = vector.broadcast %cst_325 : f32 to vector<256x128xf32>
    %246 = arith.maximumf %244, %245 : vector<256x128xf32>
    %cst_326 = arith.constant 0.000000e+00 : f32
    %247 = vector.broadcast %cst_326 : f32 to vector<6x10x10x128xf32>
    %c0_327 = arith.constant 0 : index
    %c0_328 = arith.constant 0 : index
    %c0_329 = arith.constant 0 : index
    %c0_330 = arith.constant 0 : index
    %248 = vector.load %arg7[%c0_327, %c0_328, %c0_329, %c0_330] : memref<6x10x10x128xf32, #tpu.memory_space<vmem>>, vector<6x10x10x128xf32>
    tpu.vector_store %arg7[%c0_327, %c0_328, %c0_329, %c0_330], %247 {strides = array<i32>} : memref<6x10x10x128xf32, #tpu.memory_space<vmem>>, vector<6x10x10x128xf32>,
    %249 = vector.shape_cast %246 : vector<256x128xf32> to vector<4x8x8x128xf32>
    %c1_331 = arith.constant 1 : index
    %c1_332 = arith.constant 1 : index
    %c1_333 = arith.constant 1 : index
    %c0_334 = arith.constant 0 : index
    %250 = vector.load %arg7[%c1_331, %c1_332, %c1_333, %c0_334] : memref<6x10x10x128xf32, #tpu.memory_space<vmem>>, vector<4x8x8x128xf32>
    tpu.vector_store %arg7[%c1_331, %c1_332, %c1_333, %c0_334], %249 {strides = array<i32>} : memref<6x10x10x128xf32, #tpu.memory_space<vmem>>, vector<4x8x8x128xf32>,
    %c0_335 = arith.constant 0 : index
    %c0_336 = arith.constant 0 : index
    %c0_337 = arith.constant 0 : index
    %c0_338 = arith.constant 0 : index
    %251 = vector.load %arg7[%c0_335, %c0_336, %c0_337, %c0_338] : memref<6x10x10x128xf32, #tpu.memory_space<vmem>>, vector<4x8x8x128xf32>
    %252 = vector.shape_cast %251 : vector<4x8x8x128xf32> to vector<256x128xf32>
    %253 = arith.truncf %252 : vector<256x128xf32> to vector<256x128xbf16>
    %c0_339 = arith.constant 0 : index
    %c0_340 = arith.constant 0 : index
    %c0_341 = arith.constant 0 : index
    %254 = vector.load %arg4[%c0_339, %c0_340, %c0_341] : memref<27x128x128xbf16, #tpu.memory_space<vmem>>, vector<1x128x128xbf16>
    %255 = vector.shape_cast %254 : vector<1x128x128xbf16> to vector<128x128xbf16>
    %cst_342 = arith.constant dense<0.000000e+00> : vector<256x128xf32>
    %256 = tpu.matmul %253, %255, %cst_342 {dimension_numbers = #tpu.dot_dimension_numbers<[1], [0], [0], [1], [0, 0, 1, 1], [], []>} : vector<256x128xbf16>, vector<128x128xbf16>, vector<256x128xf32> -> vector<256x128xf32>
    %c0_343 = arith.constant 0 : index
    %c0_344 = arith.constant 0 : index
    %257 = vector.load %arg8[%c0_343, %c0_344] : memref<256x128xf32, #tpu.memory_space<vmem>>, vector<256x128xf32>
    tpu.vector_store %arg8[%c0_343, %c0_344], %256 {strides = array<i32>} : memref<256x128xf32, #tpu.memory_space<vmem>>, vector<256x128xf32>,
    %c0_345 = arith.constant 0 : index
    %c0_346 = arith.constant 0 : index
    %c1_347 = arith.constant 1 : index
    %c0_348 = arith.constant 0 : index
    %258 = vector.load %arg7[%c0_345, %c0_346, %c1_347, %c0_348] : memref<6x10x10x128xf32, #tpu.memory_space<vmem>>, vector<4x8x8x128xf32>
    %259 = vector.shape_cast %258 : vector<4x8x8x128xf32> to vector<256x128xf32>
    %260 = arith.truncf %259 : vector<256x128xf32> to vector<256x128xbf16>
    %c1_349 = arith.constant 1 : index
    %c0_350 = arith.constant 0 : index
    %c0_351 = arith.constant 0 : index
    %261 = vector.load %arg4[%c1_349, %c0_350, %c0_351] : memref<27x128x128xbf16, #tpu.memory_space<vmem>>, vector<1x128x128xbf16>
    %262 = vector.shape_cast %261 : vector<1x128x128xbf16> to vector<128x128xbf16>
    %cst_352 = arith.constant dense<0.000000e+00> : vector<256x128xf32>
    %263 = tpu.matmul %260, %262, %cst_352 {dimension_numbers = #tpu.dot_dimension_numbers<[1], [0], [0], [1], [0, 0, 1, 1], [], []>} : vector<256x128xbf16>, vector<128x128xbf16>, vector<256x128xf32> -> vector<256x128xf32>
    %c0_353 = arith.constant 0 : index
    %c0_354 = arith.constant 0 : index
    %264 = vector.load %arg8[%c0_353, %c0_354] : memref<256x128xf32, #tpu.memory_space<vmem>>, vector<256x128xf32>
    %265 = arith.addf %264, %263 : vector<256x128xf32>
    %c0_355 = arith.constant 0 : index
    %c0_356 = arith.constant 0 : index
    %266 = vector.load %arg8[%c0_355, %c0_356] : memref<256x128xf32, #tpu.memory_space<vmem>>, vector<256x128xf32>
    tpu.vector_store %arg8[%c0_355, %c0_356], %265 {strides = array<i32>} : memref<256x128xf32, #tpu.memory_space<vmem>>, vector<256x128xf32>,
    %c0_357 = arith.constant 0 : index
    %c0_358 = arith.constant 0 : index
    %c2_359 = arith.constant 2 : index
    %c0_360 = arith.constant 0 : index
    %267 = vector.load %arg7[%c0_357, %c0_358, %c2_359, %c0_360] : memref<6x10x10x128xf32, #tpu.memory_space<vmem>>, vector<4x8x8x128xf32>
    %268 = vector.shape_cast %267 : vector<4x8x8x128xf32> to vector<256x128xf32>
    %269 = arith.truncf %268 : vector<256x128xf32> to vector<256x128xbf16>
    %c2_361 = arith.constant 2 : index
    %c0_362 = arith.constant 0 : index
    %c0_363 = arith.constant 0 : index
    %270 = vector.load %arg4[%c2_361, %c0_362, %c0_363] : memref<27x128x128xbf16, #tpu.memory_space<vmem>>, vector<1x128x128xbf16>
    %271 = vector.shape_cast %270 : vector<1x128x128xbf16> to vector<128x128xbf16>
    %cst_364 = arith.constant dense<0.000000e+00> : vector<256x128xf32>
    %272 = tpu.matmul %269, %271, %cst_364 {dimension_numbers = #tpu.dot_dimension_numbers<[1], [0], [0], [1], [0, 0, 1, 1], [], []>} : vector<256x128xbf16>, vector<128x128xbf16>, vector<256x128xf32> -> vector<256x128xf32>
    %c0_365 = arith.constant 0 : index
    %c0_366 = arith.constant 0 : index
    %273 = vector.load %arg8[%c0_365, %c0_366] : memref<256x128xf32, #tpu.memory_space<vmem>>, vector<256x128xf32>
    %274 = arith.addf %273, %272 : vector<256x128xf32>
    %c0_367 = arith.constant 0 : index
    %c0_368 = arith.constant 0 : index
    %275 = vector.load %arg8[%c0_367, %c0_368] : memref<256x128xf32, #tpu.memory_space<vmem>>, vector<256x128xf32>
    tpu.vector_store %arg8[%c0_367, %c0_368], %274 {strides = array<i32>} : memref<256x128xf32, #tpu.memory_space<vmem>>, vector<256x128xf32>,
    %c0_369 = arith.constant 0 : index
    %c1_370 = arith.constant 1 : index
    %c0_371 = arith.constant 0 : index
    %c0_372 = arith.constant 0 : index
    %276 = vector.load %arg7[%c0_369, %c1_370, %c0_371, %c0_372] : memref<6x10x10x128xf32, #tpu.memory_space<vmem>>, vector<4x8x8x128xf32>
    %277 = vector.shape_cast %276 : vector<4x8x8x128xf32> to vector<256x128xf32>
    %278 = arith.truncf %277 : vector<256x128xf32> to vector<256x128xbf16>
    %c3_373 = arith.constant 3 : index
    %c0_374 = arith.constant 0 : index
    %c0_375 = arith.constant 0 : index
    %279 = vector.load %arg4[%c3_373, %c0_374, %c0_375] : memref<27x128x128xbf16, #tpu.memory_space<vmem>>, vector<1x128x128xbf16>
    %280 = vector.shape_cast %279 : vector<1x128x128xbf16> to vector<128x128xbf16>
    %cst_376 = arith.constant dense<0.000000e+00> : vector<256x128xf32>
    %281 = tpu.matmul %278, %280, %cst_376 {dimension_numbers = #tpu.dot_dimension_numbers<[1], [0], [0], [1], [0, 0, 1, 1], [], []>} : vector<256x128xbf16>, vector<128x128xbf16>, vector<256x128xf32> -> vector<256x128xf32>
    %c0_377 = arith.constant 0 : index
    %c0_378 = arith.constant 0 : index
    %282 = vector.load %arg8[%c0_377, %c0_378] : memref<256x128xf32, #tpu.memory_space<vmem>>, vector<256x128xf32>
    %283 = arith.addf %282, %281 : vector<256x128xf32>
    %c0_379 = arith.constant 0 : index
    %c0_380 = arith.constant 0 : index
    %284 = vector.load %arg8[%c0_379, %c0_380] : memref<256x128xf32, #tpu.memory_space<vmem>>, vector<256x128xf32>
    tpu.vector_store %arg8[%c0_379, %c0_380], %283 {strides = array<i32>} : memref<256x128xf32, #tpu.memory_space<vmem>>, vector<256x128xf32>,
    %c0_381 = arith.constant 0 : index
    %c1_382 = arith.constant 1 : index
    %c1_383 = arith.constant 1 : index
    %c0_384 = arith.constant 0 : index
    %285 = vector.load %arg7[%c0_381, %c1_382, %c1_383, %c0_384] : memref<6x10x10x128xf32, #tpu.memory_space<vmem>>, vector<4x8x8x128xf32>
    %286 = vector.shape_cast %285 : vector<4x8x8x128xf32> to vector<256x128xf32>
    %287 = arith.truncf %286 : vector<256x128xf32> to vector<256x128xbf16>
    %c4_385 = arith.constant 4 : index
    %c0_386 = arith.constant 0 : index
    %c0_387 = arith.constant 0 : index
    %288 = vector.load %arg4[%c4_385, %c0_386, %c0_387] : memref<27x128x128xbf16, #tpu.memory_space<vmem>>, vector<1x128x128xbf16>
    %289 = vector.shape_cast %288 : vector<1x128x128xbf16> to vector<128x128xbf16>
    %cst_388 = arith.constant dense<0.000000e+00> : vector<256x128xf32>
    %290 = tpu.matmul %287, %289, %cst_388 {dimension_numbers = #tpu.dot_dimension_numbers<[1], [0], [0], [1], [0, 0, 1, 1], [], []>} : vector<256x128xbf16>, vector<128x128xbf16>, vector<256x128xf32> -> vector<256x128xf32>
    %c0_389 = arith.constant 0 : index
    %c0_390 = arith.constant 0 : index
    %291 = vector.load %arg8[%c0_389, %c0_390] : memref<256x128xf32, #tpu.memory_space<vmem>>, vector<256x128xf32>
    %292 = arith.addf %291, %290 : vector<256x128xf32>
    %c0_391 = arith.constant 0 : index
    %c0_392 = arith.constant 0 : index
    %293 = vector.load %arg8[%c0_391, %c0_392] : memref<256x128xf32, #tpu.memory_space<vmem>>, vector<256x128xf32>
    tpu.vector_store %arg8[%c0_391, %c0_392], %292 {strides = array<i32>} : memref<256x128xf32, #tpu.memory_space<vmem>>, vector<256x128xf32>,
    %c0_393 = arith.constant 0 : index
    %c1_394 = arith.constant 1 : index
    %c2_395 = arith.constant 2 : index
    %c0_396 = arith.constant 0 : index
    %294 = vector.load %arg7[%c0_393, %c1_394, %c2_395, %c0_396] : memref<6x10x10x128xf32, #tpu.memory_space<vmem>>, vector<4x8x8x128xf32>
    %295 = vector.shape_cast %294 : vector<4x8x8x128xf32> to vector<256x128xf32>
    %296 = arith.truncf %295 : vector<256x128xf32> to vector<256x128xbf16>
    %c5_397 = arith.constant 5 : index
    %c0_398 = arith.constant 0 : index
    %c0_399 = arith.constant 0 : index
    %297 = vector.load %arg4[%c5_397, %c0_398, %c0_399] : memref<27x128x128xbf16, #tpu.memory_space<vmem>>, vector<1x128x128xbf16>
    %298 = vector.shape_cast %297 : vector<1x128x128xbf16> to vector<128x128xbf16>
    %cst_400 = arith.constant dense<0.000000e+00> : vector<256x128xf32>
    %299 = tpu.matmul %296, %298, %cst_400 {dimension_numbers = #tpu.dot_dimension_numbers<[1], [0], [0], [1], [0, 0, 1, 1], [], []>} : vector<256x128xbf16>, vector<128x128xbf16>, vector<256x128xf32> -> vector<256x128xf32>
    %c0_401 = arith.constant 0 : index
    %c0_402 = arith.constant 0 : index
    %300 = vector.load %arg8[%c0_401, %c0_402] : memref<256x128xf32, #tpu.memory_space<vmem>>, vector<256x128xf32>
    %301 = arith.addf %300, %299 : vector<256x128xf32>
    %c0_403 = arith.constant 0 : index
    %c0_404 = arith.constant 0 : index
    %302 = vector.load %arg8[%c0_403, %c0_404] : memref<256x128xf32, #tpu.memory_space<vmem>>, vector<256x128xf32>
    tpu.vector_store %arg8[%c0_403, %c0_404], %301 {strides = array<i32>} : memref<256x128xf32, #tpu.memory_space<vmem>>, vector<256x128xf32>,
    %c0_405 = arith.constant 0 : index
    %c2_406 = arith.constant 2 : index
    %c0_407 = arith.constant 0 : index
    %c0_408 = arith.constant 0 : index
    %303 = vector.load %arg7[%c0_405, %c2_406, %c0_407, %c0_408] : memref<6x10x10x128xf32, #tpu.memory_space<vmem>>, vector<4x8x8x128xf32>
    %304 = vector.shape_cast %303 : vector<4x8x8x128xf32> to vector<256x128xf32>
    %305 = arith.truncf %304 : vector<256x128xf32> to vector<256x128xbf16>
    %c6_409 = arith.constant 6 : index
    %c0_410 = arith.constant 0 : index
    %c0_411 = arith.constant 0 : index
    %306 = vector.load %arg4[%c6_409, %c0_410, %c0_411] : memref<27x128x128xbf16, #tpu.memory_space<vmem>>, vector<1x128x128xbf16>
    %307 = vector.shape_cast %306 : vector<1x128x128xbf16> to vector<128x128xbf16>
    %cst_412 = arith.constant dense<0.000000e+00> : vector<256x128xf32>
    %308 = tpu.matmul %305, %307, %cst_412 {dimension_numbers = #tpu.dot_dimension_numbers<[1], [0], [0], [1], [0, 0, 1, 1], [], []>} : vector<256x128xbf16>, vector<128x128xbf16>, vector<256x128xf32> -> vector<256x128xf32>
    %c0_413 = arith.constant 0 : index
    %c0_414 = arith.constant 0 : index
    %309 = vector.load %arg8[%c0_413, %c0_414] : memref<256x128xf32, #tpu.memory_space<vmem>>, vector<256x128xf32>
    %310 = arith.addf %309, %308 : vector<256x128xf32>
    %c0_415 = arith.constant 0 : index
    %c0_416 = arith.constant 0 : index
    %311 = vector.load %arg8[%c0_415, %c0_416] : memref<256x128xf32, #tpu.memory_space<vmem>>, vector<256x128xf32>
    tpu.vector_store %arg8[%c0_415, %c0_416], %310 {strides = array<i32>} : memref<256x128xf32, #tpu.memory_space<vmem>>, vector<256x128xf32>,
    %c0_417 = arith.constant 0 : index
    %c2_418 = arith.constant 2 : index
    %c1_419 = arith.constant 1 : index
    %c0_420 = arith.constant 0 : index
    %312 = vector.load %arg7[%c0_417, %c2_418, %c1_419, %c0_420] : memref<6x10x10x128xf32, #tpu.memory_space<vmem>>, vector<4x8x8x128xf32>
    %313 = vector.shape_cast %312 : vector<4x8x8x128xf32> to vector<256x128xf32>
    %314 = arith.truncf %313 : vector<256x128xf32> to vector<256x128xbf16>
    %c7_421 = arith.constant 7 : index
    %c0_422 = arith.constant 0 : index
    %c0_423 = arith.constant 0 : index
    %315 = vector.load %arg4[%c7_421, %c0_422, %c0_423] : memref<27x128x128xbf16, #tpu.memory_space<vmem>>, vector<1x128x128xbf16>
    %316 = vector.shape_cast %315 : vector<1x128x128xbf16> to vector<128x128xbf16>
    %cst_424 = arith.constant dense<0.000000e+00> : vector<256x128xf32>
    %317 = tpu.matmul %314, %316, %cst_424 {dimension_numbers = #tpu.dot_dimension_numbers<[1], [0], [0], [1], [0, 0, 1, 1], [], []>} : vector<256x128xbf16>, vector<128x128xbf16>, vector<256x128xf32> -> vector<256x128xf32>
    %c0_425 = arith.constant 0 : index
    %c0_426 = arith.constant 0 : index
    %318 = vector.load %arg8[%c0_425, %c0_426] : memref<256x128xf32, #tpu.memory_space<vmem>>, vector<256x128xf32>
    %319 = arith.addf %318, %317 : vector<256x128xf32>
    %c0_427 = arith.constant 0 : index
    %c0_428 = arith.constant 0 : index
    %320 = vector.load %arg8[%c0_427, %c0_428] : memref<256x128xf32, #tpu.memory_space<vmem>>, vector<256x128xf32>
    tpu.vector_store %arg8[%c0_427, %c0_428], %319 {strides = array<i32>} : memref<256x128xf32, #tpu.memory_space<vmem>>, vector<256x128xf32>,
    %c0_429 = arith.constant 0 : index
    %c2_430 = arith.constant 2 : index
    %c2_431 = arith.constant 2 : index
    %c0_432 = arith.constant 0 : index
    %321 = vector.load %arg7[%c0_429, %c2_430, %c2_431, %c0_432] : memref<6x10x10x128xf32, #tpu.memory_space<vmem>>, vector<4x8x8x128xf32>
    %322 = vector.shape_cast %321 : vector<4x8x8x128xf32> to vector<256x128xf32>
    %323 = arith.truncf %322 : vector<256x128xf32> to vector<256x128xbf16>
    %c8_433 = arith.constant 8 : index
    %c0_434 = arith.constant 0 : index
    %c0_435 = arith.constant 0 : index
    %324 = vector.load %arg4[%c8_433, %c0_434, %c0_435] : memref<27x128x128xbf16, #tpu.memory_space<vmem>>, vector<1x128x128xbf16>
    %325 = vector.shape_cast %324 : vector<1x128x128xbf16> to vector<128x128xbf16>
    %cst_436 = arith.constant dense<0.000000e+00> : vector<256x128xf32>
    %326 = tpu.matmul %323, %325, %cst_436 {dimension_numbers = #tpu.dot_dimension_numbers<[1], [0], [0], [1], [0, 0, 1, 1], [], []>} : vector<256x128xbf16>, vector<128x128xbf16>, vector<256x128xf32> -> vector<256x128xf32>
    %c0_437 = arith.constant 0 : index
    %c0_438 = arith.constant 0 : index
    %327 = vector.load %arg8[%c0_437, %c0_438] : memref<256x128xf32, #tpu.memory_space<vmem>>, vector<256x128xf32>
    %328 = arith.addf %327, %326 : vector<256x128xf32>
    %c0_439 = arith.constant 0 : index
    %c0_440 = arith.constant 0 : index
    %329 = vector.load %arg8[%c0_439, %c0_440] : memref<256x128xf32, #tpu.memory_space<vmem>>, vector<256x128xf32>
    tpu.vector_store %arg8[%c0_439, %c0_440], %328 {strides = array<i32>} : memref<256x128xf32, #tpu.memory_space<vmem>>, vector<256x128xf32>,
    %c1_441 = arith.constant 1 : index
    %c0_442 = arith.constant 0 : index
    %c0_443 = arith.constant 0 : index
    %c0_444 = arith.constant 0 : index
    %330 = vector.load %arg7[%c1_441, %c0_442, %c0_443, %c0_444] : memref<6x10x10x128xf32, #tpu.memory_space<vmem>>, vector<4x8x8x128xf32>
    %331 = vector.shape_cast %330 : vector<4x8x8x128xf32> to vector<256x128xf32>
    %332 = arith.truncf %331 : vector<256x128xf32> to vector<256x128xbf16>
    %c9_445 = arith.constant 9 : index
    %c0_446 = arith.constant 0 : index
    %c0_447 = arith.constant 0 : index
    %333 = vector.load %arg4[%c9_445, %c0_446, %c0_447] : memref<27x128x128xbf16, #tpu.memory_space<vmem>>, vector<1x128x128xbf16>
    %334 = vector.shape_cast %333 : vector<1x128x128xbf16> to vector<128x128xbf16>
    %cst_448 = arith.constant dense<0.000000e+00> : vector<256x128xf32>
    %335 = tpu.matmul %332, %334, %cst_448 {dimension_numbers = #tpu.dot_dimension_numbers<[1], [0], [0], [1], [0, 0, 1, 1], [], []>} : vector<256x128xbf16>, vector<128x128xbf16>, vector<256x128xf32> -> vector<256x128xf32>
    %c0_449 = arith.constant 0 : index
    %c0_450 = arith.constant 0 : index
    %336 = vector.load %arg8[%c0_449, %c0_450] : memref<256x128xf32, #tpu.memory_space<vmem>>, vector<256x128xf32>
    %337 = arith.addf %336, %335 : vector<256x128xf32>
    %c0_451 = arith.constant 0 : index
    %c0_452 = arith.constant 0 : index
    %338 = vector.load %arg8[%c0_451, %c0_452] : memref<256x128xf32, #tpu.memory_space<vmem>>, vector<256x128xf32>
    tpu.vector_store %arg8[%c0_451, %c0_452], %337 {strides = array<i32>} : memref<256x128xf32, #tpu.memory_space<vmem>>, vector<256x128xf32>,
    %c1_453 = arith.constant 1 : index
    %c0_454 = arith.constant 0 : index
    %c1_455 = arith.constant 1 : index
    %c0_456 = arith.constant 0 : index
    %339 = vector.load %arg7[%c1_453, %c0_454, %c1_455, %c0_456] : memref<6x10x10x128xf32, #tpu.memory_space<vmem>>, vector<4x8x8x128xf32>
    %340 = vector.shape_cast %339 : vector<4x8x8x128xf32> to vector<256x128xf32>
    %341 = arith.truncf %340 : vector<256x128xf32> to vector<256x128xbf16>
    %c10_457 = arith.constant 10 : index
    %c0_458 = arith.constant 0 : index
    %c0_459 = arith.constant 0 : index
    %342 = vector.load %arg4[%c10_457, %c0_458, %c0_459] : memref<27x128x128xbf16, #tpu.memory_space<vmem>>, vector<1x128x128xbf16>
    %343 = vector.shape_cast %342 : vector<1x128x128xbf16> to vector<128x128xbf16>
    %cst_460 = arith.constant dense<0.000000e+00> : vector<256x128xf32>
    %344 = tpu.matmul %341, %343, %cst_460 {dimension_numbers = #tpu.dot_dimension_numbers<[1], [0], [0], [1], [0, 0, 1, 1], [], []>} : vector<256x128xbf16>, vector<128x128xbf16>, vector<256x128xf32> -> vector<256x128xf32>
    %c0_461 = arith.constant 0 : index
    %c0_462 = arith.constant 0 : index
    %345 = vector.load %arg8[%c0_461, %c0_462] : memref<256x128xf32, #tpu.memory_space<vmem>>, vector<256x128xf32>
    %346 = arith.addf %345, %344 : vector<256x128xf32>
    %c0_463 = arith.constant 0 : index
    %c0_464 = arith.constant 0 : index
    %347 = vector.load %arg8[%c0_463, %c0_464] : memref<256x128xf32, #tpu.memory_space<vmem>>, vector<256x128xf32>
    tpu.vector_store %arg8[%c0_463, %c0_464], %346 {strides = array<i32>} : memref<256x128xf32, #tpu.memory_space<vmem>>, vector<256x128xf32>,
    %c1_465 = arith.constant 1 : index
    %c0_466 = arith.constant 0 : index
    %c2_467 = arith.constant 2 : index
    %c0_468 = arith.constant 0 : index
    %348 = vector.load %arg7[%c1_465, %c0_466, %c2_467, %c0_468] : memref<6x10x10x128xf32, #tpu.memory_space<vmem>>, vector<4x8x8x128xf32>
    %349 = vector.shape_cast %348 : vector<4x8x8x128xf32> to vector<256x128xf32>
    %350 = arith.truncf %349 : vector<256x128xf32> to vector<256x128xbf16>
    %c11_469 = arith.constant 11 : index
    %c0_470 = arith.constant 0 : index
    %c0_471 = arith.constant 0 : index
    %351 = vector.load %arg4[%c11_469, %c0_470, %c0_471] : memref<27x128x128xbf16, #tpu.memory_space<vmem>>, vector<1x128x128xbf16>
    %352 = vector.shape_cast %351 : vector<1x128x128xbf16> to vector<128x128xbf16>
    %cst_472 = arith.constant dense<0.000000e+00> : vector<256x128xf32>
    %353 = tpu.matmul %350, %352, %cst_472 {dimension_numbers = #tpu.dot_dimension_numbers<[1], [0], [0], [1], [0, 0, 1, 1], [], []>} : vector<256x128xbf16>, vector<128x128xbf16>, vector<256x128xf32> -> vector<256x128xf32>
    %c0_473 = arith.constant 0 : index
    %c0_474 = arith.constant 0 : index
    %354 = vector.load %arg8[%c0_473, %c0_474] : memref<256x128xf32, #tpu.memory_space<vmem>>, vector<256x128xf32>
    %355 = arith.addf %354, %353 : vector<256x128xf32>
    %c0_475 = arith.constant 0 : index
    %c0_476 = arith.constant 0 : index
    %356 = vector.load %arg8[%c0_475, %c0_476] : memref<256x128xf32, #tpu.memory_space<vmem>>, vector<256x128xf32>
    tpu.vector_store %arg8[%c0_475, %c0_476], %355 {strides = array<i32>} : memref<256x128xf32, #tpu.memory_space<vmem>>, vector<256x128xf32>,
    %c1_477 = arith.constant 1 : index
    %c1_478 = arith.constant 1 : index
    %c0_479 = arith.constant 0 : index
    %c0_480 = arith.constant 0 : index
    %357 = vector.load %arg7[%c1_477, %c1_478, %c0_479, %c0_480] : memref<6x10x10x128xf32, #tpu.memory_space<vmem>>, vector<4x8x8x128xf32>
    %358 = vector.shape_cast %357 : vector<4x8x8x128xf32> to vector<256x128xf32>
    %359 = arith.truncf %358 : vector<256x128xf32> to vector<256x128xbf16>
    %c12_481 = arith.constant 12 : index
    %c0_482 = arith.constant 0 : index
    %c0_483 = arith.constant 0 : index
    %360 = vector.load %arg4[%c12_481, %c0_482, %c0_483] : memref<27x128x128xbf16, #tpu.memory_space<vmem>>, vector<1x128x128xbf16>
    %361 = vector.shape_cast %360 : vector<1x128x128xbf16> to vector<128x128xbf16>
    %cst_484 = arith.constant dense<0.000000e+00> : vector<256x128xf32>
    %362 = tpu.matmul %359, %361, %cst_484 {dimension_numbers = #tpu.dot_dimension_numbers<[1], [0], [0], [1], [0, 0, 1, 1], [], []>} : vector<256x128xbf16>, vector<128x128xbf16>, vector<256x128xf32> -> vector<256x128xf32>
    %c0_485 = arith.constant 0 : index
    %c0_486 = arith.constant 0 : index
    %363 = vector.load %arg8[%c0_485, %c0_486] : memref<256x128xf32, #tpu.memory_space<vmem>>, vector<256x128xf32>
    %364 = arith.addf %363, %362 : vector<256x128xf32>
    %c0_487 = arith.constant 0 : index
    %c0_488 = arith.constant 0 : index
    %365 = vector.load %arg8[%c0_487, %c0_488] : memref<256x128xf32, #tpu.memory_space<vmem>>, vector<256x128xf32>
    tpu.vector_store %arg8[%c0_487, %c0_488], %364 {strides = array<i32>} : memref<256x128xf32, #tpu.memory_space<vmem>>, vector<256x128xf32>,
    %c1_489 = arith.constant 1 : index
    %c1_490 = arith.constant 1 : index
    %c1_491 = arith.constant 1 : index
    %c0_492 = arith.constant 0 : index
    %366 = vector.load %arg7[%c1_489, %c1_490, %c1_491, %c0_492] : memref<6x10x10x128xf32, #tpu.memory_space<vmem>>, vector<4x8x8x128xf32>
    %367 = vector.shape_cast %366 : vector<4x8x8x128xf32> to vector<256x128xf32>
    %368 = arith.truncf %367 : vector<256x128xf32> to vector<256x128xbf16>
    %c13_493 = arith.constant 13 : index
    %c0_494 = arith.constant 0 : index
    %c0_495 = arith.constant 0 : index
    %369 = vector.load %arg4[%c13_493, %c0_494, %c0_495] : memref<27x128x128xbf16, #tpu.memory_space<vmem>>, vector<1x128x128xbf16>
    %370 = vector.shape_cast %369 : vector<1x128x128xbf16> to vector<128x128xbf16>
    %cst_496 = arith.constant dense<0.000000e+00> : vector<256x128xf32>
    %371 = tpu.matmul %368, %370, %cst_496 {dimension_numbers = #tpu.dot_dimension_numbers<[1], [0], [0], [1], [0, 0, 1, 1], [], []>} : vector<256x128xbf16>, vector<128x128xbf16>, vector<256x128xf32> -> vector<256x128xf32>
    %c0_497 = arith.constant 0 : index
    %c0_498 = arith.constant 0 : index
    %372 = vector.load %arg8[%c0_497, %c0_498] : memref<256x128xf32, #tpu.memory_space<vmem>>, vector<256x128xf32>
    %373 = arith.addf %372, %371 : vector<256x128xf32>
    %c0_499 = arith.constant 0 : index
    %c0_500 = arith.constant 0 : index
    %374 = vector.load %arg8[%c0_499, %c0_500] : memref<256x128xf32, #tpu.memory_space<vmem>>, vector<256x128xf32>
    tpu.vector_store %arg8[%c0_499, %c0_500], %373 {strides = array<i32>} : memref<256x128xf32, #tpu.memory_space<vmem>>, vector<256x128xf32>,
    %c1_501 = arith.constant 1 : index
    %c1_502 = arith.constant 1 : index
    %c2_503 = arith.constant 2 : index
    %c0_504 = arith.constant 0 : index
    %375 = vector.load %arg7[%c1_501, %c1_502, %c2_503, %c0_504] : memref<6x10x10x128xf32, #tpu.memory_space<vmem>>, vector<4x8x8x128xf32>
    %376 = vector.shape_cast %375 : vector<4x8x8x128xf32> to vector<256x128xf32>
    %377 = arith.truncf %376 : vector<256x128xf32> to vector<256x128xbf16>
    %c14_505 = arith.constant 14 : index
    %c0_506 = arith.constant 0 : index
    %c0_507 = arith.constant 0 : index
    %378 = vector.load %arg4[%c14_505, %c0_506, %c0_507] : memref<27x128x128xbf16, #tpu.memory_space<vmem>>, vector<1x128x128xbf16>
    %379 = vector.shape_cast %378 : vector<1x128x128xbf16> to vector<128x128xbf16>
    %cst_508 = arith.constant dense<0.000000e+00> : vector<256x128xf32>
    %380 = tpu.matmul %377, %379, %cst_508 {dimension_numbers = #tpu.dot_dimension_numbers<[1], [0], [0], [1], [0, 0, 1, 1], [], []>} : vector<256x128xbf16>, vector<128x128xbf16>, vector<256x128xf32> -> vector<256x128xf32>
    %c0_509 = arith.constant 0 : index
    %c0_510 = arith.constant 0 : index
    %381 = vector.load %arg8[%c0_509, %c0_510] : memref<256x128xf32, #tpu.memory_space<vmem>>, vector<256x128xf32>
    %382 = arith.addf %381, %380 : vector<256x128xf32>
    %c0_511 = arith.constant 0 : index
    %c0_512 = arith.constant 0 : index
    %383 = vector.load %arg8[%c0_511, %c0_512] : memref<256x128xf32, #tpu.memory_space<vmem>>, vector<256x128xf32>
    tpu.vector_store %arg8[%c0_511, %c0_512], %382 {strides = array<i32>} : memref<256x128xf32, #tpu.memory_space<vmem>>, vector<256x128xf32>,
    %c1_513 = arith.constant 1 : index
    %c2_514 = arith.constant 2 : index
    %c0_515 = arith.constant 0 : index
    %c0_516 = arith.constant 0 : index
    %384 = vector.load %arg7[%c1_513, %c2_514, %c0_515, %c0_516] : memref<6x10x10x128xf32, #tpu.memory_space<vmem>>, vector<4x8x8x128xf32>
    %385 = vector.shape_cast %384 : vector<4x8x8x128xf32> to vector<256x128xf32>
    %386 = arith.truncf %385 : vector<256x128xf32> to vector<256x128xbf16>
    %c15_517 = arith.constant 15 : index
    %c0_518 = arith.constant 0 : index
    %c0_519 = arith.constant 0 : index
    %387 = vector.load %arg4[%c15_517, %c0_518, %c0_519] : memref<27x128x128xbf16, #tpu.memory_space<vmem>>, vector<1x128x128xbf16>
    %388 = vector.shape_cast %387 : vector<1x128x128xbf16> to vector<128x128xbf16>
    %cst_520 = arith.constant dense<0.000000e+00> : vector<256x128xf32>
    %389 = tpu.matmul %386, %388, %cst_520 {dimension_numbers = #tpu.dot_dimension_numbers<[1], [0], [0], [1], [0, 0, 1, 1], [], []>} : vector<256x128xbf16>, vector<128x128xbf16>, vector<256x128xf32> -> vector<256x128xf32>
    %c0_521 = arith.constant 0 : index
    %c0_522 = arith.constant 0 : index
    %390 = vector.load %arg8[%c0_521, %c0_522] : memref<256x128xf32, #tpu.memory_space<vmem>>, vector<256x128xf32>
    %391 = arith.addf %390, %389 : vector<256x128xf32>
    %c0_523 = arith.constant 0 : index
    %c0_524 = arith.constant 0 : index
    %392 = vector.load %arg8[%c0_523, %c0_524] : memref<256x128xf32, #tpu.memory_space<vmem>>, vector<256x128xf32>
    tpu.vector_store %arg8[%c0_523, %c0_524], %391 {strides = array<i32>} : memref<256x128xf32, #tpu.memory_space<vmem>>, vector<256x128xf32>,
    %c1_525 = arith.constant 1 : index
    %c2_526 = arith.constant 2 : index
    %c1_527 = arith.constant 1 : index
    %c0_528 = arith.constant 0 : index
    %393 = vector.load %arg7[%c1_525, %c2_526, %c1_527, %c0_528] : memref<6x10x10x128xf32, #tpu.memory_space<vmem>>, vector<4x8x8x128xf32>
    %394 = vector.shape_cast %393 : vector<4x8x8x128xf32> to vector<256x128xf32>
    %395 = arith.truncf %394 : vector<256x128xf32> to vector<256x128xbf16>
    %c16_529 = arith.constant 16 : index
    %c0_530 = arith.constant 0 : index
    %c0_531 = arith.constant 0 : index
    %396 = vector.load %arg4[%c16_529, %c0_530, %c0_531] : memref<27x128x128xbf16, #tpu.memory_space<vmem>>, vector<1x128x128xbf16>
    %397 = vector.shape_cast %396 : vector<1x128x128xbf16> to vector<128x128xbf16>
    %cst_532 = arith.constant dense<0.000000e+00> : vector<256x128xf32>
    %398 = tpu.matmul %395, %397, %cst_532 {dimension_numbers = #tpu.dot_dimension_numbers<[1], [0], [0], [1], [0, 0, 1, 1], [], []>} : vector<256x128xbf16>, vector<128x128xbf16>, vector<256x128xf32> -> vector<256x128xf32>
    %c0_533 = arith.constant 0 : index
    %c0_534 = arith.constant 0 : index
    %399 = vector.load %arg8[%c0_533, %c0_534] : memref<256x128xf32, #tpu.memory_space<vmem>>, vector<256x128xf32>
    %400 = arith.addf %399, %398 : vector<256x128xf32>
    %c0_535 = arith.constant 0 : index
    %c0_536 = arith.constant 0 : index
    %401 = vector.load %arg8[%c0_535, %c0_536] : memref<256x128xf32, #tpu.memory_space<vmem>>, vector<256x128xf32>
    tpu.vector_store %arg8[%c0_535, %c0_536], %400 {strides = array<i32>} : memref<256x128xf32, #tpu.memory_space<vmem>>, vector<256x128xf32>,
    %c1_537 = arith.constant 1 : index
    %c2_538 = arith.constant 2 : index
    %c2_539 = arith.constant 2 : index
    %c0_540 = arith.constant 0 : index
    %402 = vector.load %arg7[%c1_537, %c2_538, %c2_539, %c0_540] : memref<6x10x10x128xf32, #tpu.memory_space<vmem>>, vector<4x8x8x128xf32>
    %403 = vector.shape_cast %402 : vector<4x8x8x128xf32> to vector<256x128xf32>
    %404 = arith.truncf %403 : vector<256x128xf32> to vector<256x128xbf16>
    %c17_541 = arith.constant 17 : index
    %c0_542 = arith.constant 0 : index
    %c0_543 = arith.constant 0 : index
    %405 = vector.load %arg4[%c17_541, %c0_542, %c0_543] : memref<27x128x128xbf16, #tpu.memory_space<vmem>>, vector<1x128x128xbf16>
    %406 = vector.shape_cast %405 : vector<1x128x128xbf16> to vector<128x128xbf16>
    %cst_544 = arith.constant dense<0.000000e+00> : vector<256x128xf32>
    %407 = tpu.matmul %404, %406, %cst_544 {dimension_numbers = #tpu.dot_dimension_numbers<[1], [0], [0], [1], [0, 0, 1, 1], [], []>} : vector<256x128xbf16>, vector<128x128xbf16>, vector<256x128xf32> -> vector<256x128xf32>
    %c0_545 = arith.constant 0 : index
    %c0_546 = arith.constant 0 : index
    %408 = vector.load %arg8[%c0_545, %c0_546] : memref<256x128xf32, #tpu.memory_space<vmem>>, vector<256x128xf32>
    %409 = arith.addf %408, %407 : vector<256x128xf32>
    %c0_547 = arith.constant 0 : index
    %c0_548 = arith.constant 0 : index
    %410 = vector.load %arg8[%c0_547, %c0_548] : memref<256x128xf32, #tpu.memory_space<vmem>>, vector<256x128xf32>
    tpu.vector_store %arg8[%c0_547, %c0_548], %409 {strides = array<i32>} : memref<256x128xf32, #tpu.memory_space<vmem>>, vector<256x128xf32>,
    %c2_549 = arith.constant 2 : index
    %c0_550 = arith.constant 0 : index
    %c0_551 = arith.constant 0 : index
    %c0_552 = arith.constant 0 : index
    %411 = vector.load %arg7[%c2_549, %c0_550, %c0_551, %c0_552] : memref<6x10x10x128xf32, #tpu.memory_space<vmem>>, vector<4x8x8x128xf32>
    %412 = vector.shape_cast %411 : vector<4x8x8x128xf32> to vector<256x128xf32>
    %413 = arith.truncf %412 : vector<256x128xf32> to vector<256x128xbf16>
    %c18_553 = arith.constant 18 : index
    %c0_554 = arith.constant 0 : index
    %c0_555 = arith.constant 0 : index
    %414 = vector.load %arg4[%c18_553, %c0_554, %c0_555] : memref<27x128x128xbf16, #tpu.memory_space<vmem>>, vector<1x128x128xbf16>
    %415 = vector.shape_cast %414 : vector<1x128x128xbf16> to vector<128x128xbf16>
    %cst_556 = arith.constant dense<0.000000e+00> : vector<256x128xf32>
    %416 = tpu.matmul %413, %415, %cst_556 {dimension_numbers = #tpu.dot_dimension_numbers<[1], [0], [0], [1], [0, 0, 1, 1], [], []>} : vector<256x128xbf16>, vector<128x128xbf16>, vector<256x128xf32> -> vector<256x128xf32>
    %c0_557 = arith.constant 0 : index
    %c0_558 = arith.constant 0 : index
    %417 = vector.load %arg8[%c0_557, %c0_558] : memref<256x128xf32, #tpu.memory_space<vmem>>, vector<256x128xf32>
    %418 = arith.addf %417, %416 : vector<256x128xf32>
    %c0_559 = arith.constant 0 : index
    %c0_560 = arith.constant 0 : index
    %419 = vector.load %arg8[%c0_559, %c0_560] : memref<256x128xf32, #tpu.memory_space<vmem>>, vector<256x128xf32>
    tpu.vector_store %arg8[%c0_559, %c0_560], %418 {strides = array<i32>} : memref<256x128xf32, #tpu.memory_space<vmem>>, vector<256x128xf32>,
    %c2_561 = arith.constant 2 : index
    %c0_562 = arith.constant 0 : index
    %c1_563 = arith.constant 1 : index
    %c0_564 = arith.constant 0 : index
    %420 = vector.load %arg7[%c2_561, %c0_562, %c1_563, %c0_564] : memref<6x10x10x128xf32, #tpu.memory_space<vmem>>, vector<4x8x8x128xf32>
    %421 = vector.shape_cast %420 : vector<4x8x8x128xf32> to vector<256x128xf32>
    %422 = arith.truncf %421 : vector<256x128xf32> to vector<256x128xbf16>
    %c19_565 = arith.constant 19 : index
    %c0_566 = arith.constant 0 : index
    %c0_567 = arith.constant 0 : index
    %423 = vector.load %arg4[%c19_565, %c0_566, %c0_567] : memref<27x128x128xbf16, #tpu.memory_space<vmem>>, vector<1x128x128xbf16>
    %424 = vector.shape_cast %423 : vector<1x128x128xbf16> to vector<128x128xbf16>
    %cst_568 = arith.constant dense<0.000000e+00> : vector<256x128xf32>
    %425 = tpu.matmul %422, %424, %cst_568 {dimension_numbers = #tpu.dot_dimension_numbers<[1], [0], [0], [1], [0, 0, 1, 1], [], []>} : vector<256x128xbf16>, vector<128x128xbf16>, vector<256x128xf32> -> vector<256x128xf32>
    %c0_569 = arith.constant 0 : index
    %c0_570 = arith.constant 0 : index
    %426 = vector.load %arg8[%c0_569, %c0_570] : memref<256x128xf32, #tpu.memory_space<vmem>>, vector<256x128xf32>
    %427 = arith.addf %426, %425 : vector<256x128xf32>
    %c0_571 = arith.constant 0 : index
    %c0_572 = arith.constant 0 : index
    %428 = vector.load %arg8[%c0_571, %c0_572] : memref<256x128xf32, #tpu.memory_space<vmem>>, vector<256x128xf32>
    tpu.vector_store %arg8[%c0_571, %c0_572], %427 {strides = array<i32>} : memref<256x128xf32, #tpu.memory_space<vmem>>, vector<256x128xf32>,
    %c2_573 = arith.constant 2 : index
    %c0_574 = arith.constant 0 : index
    %c2_575 = arith.constant 2 : index
    %c0_576 = arith.constant 0 : index
    %429 = vector.load %arg7[%c2_573, %c0_574, %c2_575, %c0_576] : memref<6x10x10x128xf32, #tpu.memory_space<vmem>>, vector<4x8x8x128xf32>
    %430 = vector.shape_cast %429 : vector<4x8x8x128xf32> to vector<256x128xf32>
    %431 = arith.truncf %430 : vector<256x128xf32> to vector<256x128xbf16>
    %c20_577 = arith.constant 20 : index
    %c0_578 = arith.constant 0 : index
    %c0_579 = arith.constant 0 : index
    %432 = vector.load %arg4[%c20_577, %c0_578, %c0_579] : memref<27x128x128xbf16, #tpu.memory_space<vmem>>, vector<1x128x128xbf16>
    %433 = vector.shape_cast %432 : vector<1x128x128xbf16> to vector<128x128xbf16>
    %cst_580 = arith.constant dense<0.000000e+00> : vector<256x128xf32>
    %434 = tpu.matmul %431, %433, %cst_580 {dimension_numbers = #tpu.dot_dimension_numbers<[1], [0], [0], [1], [0, 0, 1, 1], [], []>} : vector<256x128xbf16>, vector<128x128xbf16>, vector<256x128xf32> -> vector<256x128xf32>
    %c0_581 = arith.constant 0 : index
    %c0_582 = arith.constant 0 : index
    %435 = vector.load %arg8[%c0_581, %c0_582] : memref<256x128xf32, #tpu.memory_space<vmem>>, vector<256x128xf32>
    %436 = arith.addf %435, %434 : vector<256x128xf32>
    %c0_583 = arith.constant 0 : index
    %c0_584 = arith.constant 0 : index
    %437 = vector.load %arg8[%c0_583, %c0_584] : memref<256x128xf32, #tpu.memory_space<vmem>>, vector<256x128xf32>
    tpu.vector_store %arg8[%c0_583, %c0_584], %436 {strides = array<i32>} : memref<256x128xf32, #tpu.memory_space<vmem>>, vector<256x128xf32>,
    %c2_585 = arith.constant 2 : index
    %c1_586 = arith.constant 1 : index
    %c0_587 = arith.constant 0 : index
    %c0_588 = arith.constant 0 : index
    %438 = vector.load %arg7[%c2_585, %c1_586, %c0_587, %c0_588] : memref<6x10x10x128xf32, #tpu.memory_space<vmem>>, vector<4x8x8x128xf32>
    %439 = vector.shape_cast %438 : vector<4x8x8x128xf32> to vector<256x128xf32>
    %440 = arith.truncf %439 : vector<256x128xf32> to vector<256x128xbf16>
    %c21_589 = arith.constant 21 : index
    %c0_590 = arith.constant 0 : index
    %c0_591 = arith.constant 0 : index
    %441 = vector.load %arg4[%c21_589, %c0_590, %c0_591] : memref<27x128x128xbf16, #tpu.memory_space<vmem>>, vector<1x128x128xbf16>
    %442 = vector.shape_cast %441 : vector<1x128x128xbf16> to vector<128x128xbf16>
    %cst_592 = arith.constant dense<0.000000e+00> : vector<256x128xf32>
    %443 = tpu.matmul %440, %442, %cst_592 {dimension_numbers = #tpu.dot_dimension_numbers<[1], [0], [0], [1], [0, 0, 1, 1], [], []>} : vector<256x128xbf16>, vector<128x128xbf16>, vector<256x128xf32> -> vector<256x128xf32>
    %c0_593 = arith.constant 0 : index
    %c0_594 = arith.constant 0 : index
    %444 = vector.load %arg8[%c0_593, %c0_594] : memref<256x128xf32, #tpu.memory_space<vmem>>, vector<256x128xf32>
    %445 = arith.addf %444, %443 : vector<256x128xf32>
    %c0_595 = arith.constant 0 : index
    %c0_596 = arith.constant 0 : index
    %446 = vector.load %arg8[%c0_595, %c0_596] : memref<256x128xf32, #tpu.memory_space<vmem>>, vector<256x128xf32>
    tpu.vector_store %arg8[%c0_595, %c0_596], %445 {strides = array<i32>} : memref<256x128xf32, #tpu.memory_space<vmem>>, vector<256x128xf32>,
    %c2_597 = arith.constant 2 : index
    %c1_598 = arith.constant 1 : index
    %c1_599 = arith.constant 1 : index
    %c0_600 = arith.constant 0 : index
    %447 = vector.load %arg7[%c2_597, %c1_598, %c1_599, %c0_600] : memref<6x10x10x128xf32, #tpu.memory_space<vmem>>, vector<4x8x8x128xf32>
    %448 = vector.shape_cast %447 : vector<4x8x8x128xf32> to vector<256x128xf32>
    %449 = arith.truncf %448 : vector<256x128xf32> to vector<256x128xbf16>
    %c22_601 = arith.constant 22 : index
    %c0_602 = arith.constant 0 : index
    %c0_603 = arith.constant 0 : index
    %450 = vector.load %arg4[%c22_601, %c0_602, %c0_603] : memref<27x128x128xbf16, #tpu.memory_space<vmem>>, vector<1x128x128xbf16>
    %451 = vector.shape_cast %450 : vector<1x128x128xbf16> to vector<128x128xbf16>
    %cst_604 = arith.constant dense<0.000000e+00> : vector<256x128xf32>
    %452 = tpu.matmul %449, %451, %cst_604 {dimension_numbers = #tpu.dot_dimension_numbers<[1], [0], [0], [1], [0, 0, 1, 1], [], []>} : vector<256x128xbf16>, vector<128x128xbf16>, vector<256x128xf32> -> vector<256x128xf32>
    %c0_605 = arith.constant 0 : index
    %c0_606 = arith.constant 0 : index
    %453 = vector.load %arg8[%c0_605, %c0_606] : memref<256x128xf32, #tpu.memory_space<vmem>>, vector<256x128xf32>
    %454 = arith.addf %453, %452 : vector<256x128xf32>
    %c0_607 = arith.constant 0 : index
    %c0_608 = arith.constant 0 : index
    %455 = vector.load %arg8[%c0_607, %c0_608] : memref<256x128xf32, #tpu.memory_space<vmem>>, vector<256x128xf32>
    tpu.vector_store %arg8[%c0_607, %c0_608], %454 {strides = array<i32>} : memref<256x128xf32, #tpu.memory_space<vmem>>, vector<256x128xf32>,
    %c2_609 = arith.constant 2 : index
    %c1_610 = arith.constant 1 : index
    %c2_611 = arith.constant 2 : index
    %c0_612 = arith.constant 0 : index
    %456 = vector.load %arg7[%c2_609, %c1_610, %c2_611, %c0_612] : memref<6x10x10x128xf32, #tpu.memory_space<vmem>>, vector<4x8x8x128xf32>
    %457 = vector.shape_cast %456 : vector<4x8x8x128xf32> to vector<256x128xf32>
    %458 = arith.truncf %457 : vector<256x128xf32> to vector<256x128xbf16>
    %c23_613 = arith.constant 23 : index
    %c0_614 = arith.constant 0 : index
    %c0_615 = arith.constant 0 : index
    %459 = vector.load %arg4[%c23_613, %c0_614, %c0_615] : memref<27x128x128xbf16, #tpu.memory_space<vmem>>, vector<1x128x128xbf16>
    %460 = vector.shape_cast %459 : vector<1x128x128xbf16> to vector<128x128xbf16>
    %cst_616 = arith.constant dense<0.000000e+00> : vector<256x128xf32>
    %461 = tpu.matmul %458, %460, %cst_616 {dimension_numbers = #tpu.dot_dimension_numbers<[1], [0], [0], [1], [0, 0, 1, 1], [], []>} : vector<256x128xbf16>, vector<128x128xbf16>, vector<256x128xf32> -> vector<256x128xf32>
    %c0_617 = arith.constant 0 : index
    %c0_618 = arith.constant 0 : index
    %462 = vector.load %arg8[%c0_617, %c0_618] : memref<256x128xf32, #tpu.memory_space<vmem>>, vector<256x128xf32>
    %463 = arith.addf %462, %461 : vector<256x128xf32>
    %c0_619 = arith.constant 0 : index
    %c0_620 = arith.constant 0 : index
    %464 = vector.load %arg8[%c0_619, %c0_620] : memref<256x128xf32, #tpu.memory_space<vmem>>, vector<256x128xf32>
    tpu.vector_store %arg8[%c0_619, %c0_620], %463 {strides = array<i32>} : memref<256x128xf32, #tpu.memory_space<vmem>>, vector<256x128xf32>,
    %c2_621 = arith.constant 2 : index
    %c2_622 = arith.constant 2 : index
    %c0_623 = arith.constant 0 : index
    %c0_624 = arith.constant 0 : index
    %465 = vector.load %arg7[%c2_621, %c2_622, %c0_623, %c0_624] : memref<6x10x10x128xf32, #tpu.memory_space<vmem>>, vector<4x8x8x128xf32>
    %466 = vector.shape_cast %465 : vector<4x8x8x128xf32> to vector<256x128xf32>
    %467 = arith.truncf %466 : vector<256x128xf32> to vector<256x128xbf16>
    %c24_625 = arith.constant 24 : index
    %c0_626 = arith.constant 0 : index
    %c0_627 = arith.constant 0 : index
    %468 = vector.load %arg4[%c24_625, %c0_626, %c0_627] : memref<27x128x128xbf16, #tpu.memory_space<vmem>>, vector<1x128x128xbf16>
    %469 = vector.shape_cast %468 : vector<1x128x128xbf16> to vector<128x128xbf16>
    %cst_628 = arith.constant dense<0.000000e+00> : vector<256x128xf32>
    %470 = tpu.matmul %467, %469, %cst_628 {dimension_numbers = #tpu.dot_dimension_numbers<[1], [0], [0], [1], [0, 0, 1, 1], [], []>} : vector<256x128xbf16>, vector<128x128xbf16>, vector<256x128xf32> -> vector<256x128xf32>
    %c0_629 = arith.constant 0 : index
    %c0_630 = arith.constant 0 : index
    %471 = vector.load %arg8[%c0_629, %c0_630] : memref<256x128xf32, #tpu.memory_space<vmem>>, vector<256x128xf32>
    %472 = arith.addf %471, %470 : vector<256x128xf32>
    %c0_631 = arith.constant 0 : index
    %c0_632 = arith.constant 0 : index
    %473 = vector.load %arg8[%c0_631, %c0_632] : memref<256x128xf32, #tpu.memory_space<vmem>>, vector<256x128xf32>
    tpu.vector_store %arg8[%c0_631, %c0_632], %472 {strides = array<i32>} : memref<256x128xf32, #tpu.memory_space<vmem>>, vector<256x128xf32>,
    %c2_633 = arith.constant 2 : index
    %c2_634 = arith.constant 2 : index
    %c1_635 = arith.constant 1 : index
    %c0_636 = arith.constant 0 : index
    %474 = vector.load %arg7[%c2_633, %c2_634, %c1_635, %c0_636] : memref<6x10x10x128xf32, #tpu.memory_space<vmem>>, vector<4x8x8x128xf32>
    %475 = vector.shape_cast %474 : vector<4x8x8x128xf32> to vector<256x128xf32>
    %476 = arith.truncf %475 : vector<256x128xf32> to vector<256x128xbf16>
    %c25_637 = arith.constant 25 : index
    %c0_638 = arith.constant 0 : index
    %c0_639 = arith.constant 0 : index
    %477 = vector.load %arg4[%c25_637, %c0_638, %c0_639] : memref<27x128x128xbf16, #tpu.memory_space<vmem>>, vector<1x128x128xbf16>
    %478 = vector.shape_cast %477 : vector<1x128x128xbf16> to vector<128x128xbf16>
    %cst_640 = arith.constant dense<0.000000e+00> : vector<256x128xf32>
    %479 = tpu.matmul %476, %478, %cst_640 {dimension_numbers = #tpu.dot_dimension_numbers<[1], [0], [0], [1], [0, 0, 1, 1], [], []>} : vector<256x128xbf16>, vector<128x128xbf16>, vector<256x128xf32> -> vector<256x128xf32>
    %c0_641 = arith.constant 0 : index
    %c0_642 = arith.constant 0 : index
    %480 = vector.load %arg8[%c0_641, %c0_642] : memref<256x128xf32, #tpu.memory_space<vmem>>, vector<256x128xf32>
    %481 = arith.addf %480, %479 : vector<256x128xf32>
    %c0_643 = arith.constant 0 : index
    %c0_644 = arith.constant 0 : index
    %482 = vector.load %arg8[%c0_643, %c0_644] : memref<256x128xf32, #tpu.memory_space<vmem>>, vector<256x128xf32>
    tpu.vector_store %arg8[%c0_643, %c0_644], %481 {strides = array<i32>} : memref<256x128xf32, #tpu.memory_space<vmem>>, vector<256x128xf32>,
    %c2_645 = arith.constant 2 : index
    %c2_646 = arith.constant 2 : index
    %c2_647 = arith.constant 2 : index
    %c0_648 = arith.constant 0 : index
    %483 = vector.load %arg7[%c2_645, %c2_646, %c2_647, %c0_648] : memref<6x10x10x128xf32, #tpu.memory_space<vmem>>, vector<4x8x8x128xf32>
    %484 = vector.shape_cast %483 : vector<4x8x8x128xf32> to vector<256x128xf32>
    %485 = arith.truncf %484 : vector<256x128xf32> to vector<256x128xbf16>
    %c26_649 = arith.constant 26 : index
    %c0_650 = arith.constant 0 : index
    %c0_651 = arith.constant 0 : index
    %486 = vector.load %arg4[%c26_649, %c0_650, %c0_651] : memref<27x128x128xbf16, #tpu.memory_space<vmem>>, vector<1x128x128xbf16>
    %487 = vector.shape_cast %486 : vector<1x128x128xbf16> to vector<128x128xbf16>
    %cst_652 = arith.constant dense<0.000000e+00> : vector<256x128xf32>
    %488 = tpu.matmul %485, %487, %cst_652 {dimension_numbers = #tpu.dot_dimension_numbers<[1], [0], [0], [1], [0, 0, 1, 1], [], []>} : vector<256x128xbf16>, vector<128x128xbf16>, vector<256x128xf32> -> vector<256x128xf32>
    %c0_653 = arith.constant 0 : index
    %c0_654 = arith.constant 0 : index
    %489 = vector.load %arg8[%c0_653, %c0_654] : memref<256x128xf32, #tpu.memory_space<vmem>>, vector<256x128xf32>
    %490 = arith.addf %489, %488 : vector<256x128xf32>
    %c0_655 = arith.constant 0 : index
    %c0_656 = arith.constant 0 : index
    %491 = vector.load %arg8[%c0_655, %c0_656] : memref<256x128xf32, #tpu.memory_space<vmem>>, vector<256x128xf32>
    tpu.vector_store %arg8[%c0_655, %c0_656], %490 {strides = array<i32>} : memref<256x128xf32, #tpu.memory_space<vmem>>, vector<256x128xf32>,
    %c0_657 = arith.constant 0 : index
    %c1_658 = arith.constant 1 : index
    %c1_659 = arith.constant 1 : index
    %c1_660 = arith.constant 1 : index
    %c0_661 = arith.constant 0 : index
    %492 = vector.load %arg1[%c0_657, %c1_658, %c1_659, %c1_660, %c0_661] : memref<1x6x10x10x128xf32, #tpu.memory_space<vmem>>, vector<1x4x8x8x128xf32>
    %493 = vector.shape_cast %492 : vector<1x4x8x8x128xf32> to vector<256x128xf32>
    %c0_662 = arith.constant 0 : index
    %c0_663 = arith.constant 0 : index
    %494 = vector.load %arg8[%c0_662, %c0_663] : memref<256x128xf32, #tpu.memory_space<vmem>>, vector<256x128xf32>
    %c0_664 = arith.constant 0 : index
    %c0_665 = arith.constant 0 : index
    %495 = vector.load %arg5[%c0_664, %c0_665] : memref<1x128xf32, #tpu.memory_space<vmem>>, vector<1x128xf32>
    %496 = vector.broadcast %495 : vector<1x128xf32> to vector<256x128xf32>
    %497 = arith.addf %494, %496 : vector<256x128xf32>
    %498 = arith.addf %497, %493 : vector<256x128xf32>
    %cst_666 = arith.constant 0.000000e+00 : f32
    %499 = vector.broadcast %cst_666 : f32 to vector<256x128xf32>
    %500 = arith.maximumf %498, %499 : vector<256x128xf32>
    %501 = vector.shape_cast %500 : vector<256x128xf32> to vector<1x4x8x8x128xf32>
    %c0_667 = arith.constant 0 : index
    %c0_668 = arith.constant 0 : index
    %c0_669 = arith.constant 0 : index
    %c0_670 = arith.constant 0 : index
    %c0_671 = arith.constant 0 : index
    %502 = vector.load %arg6[%c0_667, %c0_668, %c0_669, %c0_670, %c0_671] : memref<1x4x8x8x128xf32, #tpu.memory_space<vmem>>, vector<1x4x8x8x128xf32>
    tpu.vector_store %arg6[%c0_667, %c0_668, %c0_669, %c0_670, %c0_671], %501 {strides = array<i32>} : memref<1x4x8x8x128xf32, #tpu.memory_space<vmem>>, vector<1x4x8x8x128xf32>,
    return
  }
  func.func @transform_0(%arg0: i32) -> (i32, i32, i32, i32, i32) {
    %c0_i32 = arith.constant 0 : i32
    %c0_i32_0 = arith.constant 0 : i32
    %c0_i32_1 = arith.constant 0 : i32
    %c0_i32_2 = arith.constant 0 : i32
    %c0_i32_3 = arith.constant 0 : i32
    return %arg0, %c0_i32, %c0_i32_0, %c0_i32_1, %c0_i32_2 : i32, i32, i32, i32, i32
  }
  func.func @transform_1(%arg0: i32) -> (i32, i32, i32) {
    %c0_i32 = arith.constant 0 : i32
    %c0_i32_0 = arith.constant 0 : i32
    %c0_i32_1 = arith.constant 0 : i32
    %c0_i32_2 = arith.constant 0 : i32
    return %c0_i32, %c0_i32_0, %c0_i32_1 : i32, i32, i32
  }
  func.func @transform_2(%arg0: i32) -> (i32, i32) {
    %c0_i32 = arith.constant 0 : i32
    %c0_i32_0 = arith.constant 0 : i32
    %c0_i32_1 = arith.constant 0 : i32
    return %c0_i32, %c0_i32_0 : i32, i32
  }
  func.func @transform_3(%arg0: i32) -> (i32, i32, i32) {
    %c0_i32 = arith.constant 0 : i32
    %c0_i32_0 = arith.constant 0 : i32
    %c0_i32_1 = arith.constant 0 : i32
    %c0_i32_2 = arith.constant 0 : i32
    return %c0_i32, %c0_i32_0, %c0_i32_1 : i32, i32, i32
  }
  func.func @transform_4(%arg0: i32) -> (i32, i32) {
    %c0_i32 = arith.constant 0 : i32
    %c0_i32_0 = arith.constant 0 : i32
    %c0_i32_1 = arith.constant 0 : i32
    return %c0_i32, %c0_i32_0 : i32, i32
  }
  func.func @transform_5(%arg0: i32) -> (i32, i32, i32, i32, i32) {
    %c0_i32 = arith.constant 0 : i32
    %c0_i32_0 = arith.constant 0 : i32
    %c0_i32_1 = arith.constant 0 : i32
    %c0_i32_2 = arith.constant 0 : i32
    %c0_i32_3 = arith.constant 0 : i32
    return %arg0, %c0_i32, %c0_i32_0, %c0_i32_1, %c0_i32_2 : i32, i32, i32, i32, i32
  }
}

</mosaic_0001>

<bundles_post_ra>
// kernel: basic_block_forward.1
= control target key start
LH: loop header
LB: loop body
LE: loop exit
PB: predicated region body
PF: predicated region fallthrough
CT: control target
= control target key end

     0   :  { %s28928_s18 = smov 0   ;;  %s33497_s0 = inlined_call_operand.vmem [shape: f32[2,6,10,10,128], index: 0, kind: input, shape index: {}]   ;;  %s33498_s1 = inlined_call_operand.vmem [shape: bf16[27,128,128], index: 1, kind: input, shape index: {}]   ;;  %s33499_s2 = inlined_call_operand.vmem [shape: f32[1,128], index: 2, kind: input, shape index: {}]   ;;  %s33500_s3 = inlined_call_operand.vmem [shape: bf16[27,128,128], index: 3, kind: input, shape index: {}]   ;;  %s33501_s4 = inlined_call_operand.vmem [shape: f32[1,128], index: 4, kind: input, shape index: {}]   ;;  %s33502_s5 = inlined_call_operand.vmem [shape: f32[2,4,8,8,128], index: 5, kind: output, shape index: {}]  }
   0x1 LB: > { %s20601_s19 = sadd.s32 4294967295, %s28894_s18   ;;  %p20605_p0 = scmp.ge.s32.totalorder %s28894_s18, 1  ;;  %s28894_s18 = sphi %s28928_s18, %s15_s18  }
   0x2   : > { %p187_p1 = scmp.lt.s32.totalorder %s28894_s18, 3 }
   0x4   : > { %p188_p2 = pnand %p20605_p0, %p187_p1 }
   0x6   : > { %191 = sbr.rel (%p188_p2) target bundleno = 3866 (0xf1a), region = 40 }
   0xd   : > { %v28240_v0 = vld [vmem:[%s33498_s1] sm:$0xff]   ;;  %p215_p3 = scmp.lt.s32.totalorder %s20601_s19, 1  ;;  %v28241_v1 = vld [vmem:[%s33498_s1 + $0x8] sm:$0xff]   ;;  %v28242_v2 = vld [vmem:[%s33498_s1 + $0x10] sm:$0xff]  }
   0xe   : > { %23974 = vmatprep.subr.bf16.mxu0 %v28240_v0  ;;  %v28243_v3 = vld [vmem:[%s33498_s1 + $0x18] sm:$0xff]   ;;  %v28244_v7 = vld [vmem:[%s33498_s1 + $0x20] sm:$0xff]   ;;  %v28245_v8 = vld [vmem:[%s33498_s1 + $0x28] sm:$0xff]  }
   0xf   : > { %s34092_s19 = smov (!%p215_p3, %s20601_s19), 1  ;;  %23975 = vmatpush3.bf16.msra.mxu0 %v28240_v0  ;;  %v28246_v9 = vld [vmem:[%s33498_s1 + $0x30] sm:$0xff]   ;;  %v28247_v10 = vld [vmem:[%s33498_s1 + $0x38] sm:$0xff]   ;;  %v28248_v13 = vld [vmem:[%s33498_s1 + $0x40] sm:$0xff]  }
  0x10   : > { %23976 = vmatprep.subr.bf16.mxu0 %v28241_v1  ;;  %s28230_s26 = smul.u32 960, %s34092_s19  ;;  %v28249_v18 = vld [vmem:[%s33498_s1 + $0x48] sm:$0xff]   ;;  %v28250_v23 = vld [vmem:[%s33498_s1 + $0x50] sm:$0xff]   ;;  %v28251_v26 = vld [vmem:[%s33498_s1 + $0x58] sm:$0xff]   ;;  %s22677_s9 = sshll.u32 %s34092_s19, 8 }
  0x11   : > { %v28252_v31 = vld [vmem:[%s33498_s1 + $0x60] sm:$0xff]   ;;  %v28253_v34 = vld [vmem:[%s33498_s1 + $0x68] sm:$0xff]   ;;  %v28254_v39 = vld [vmem:[%s33498_s1 + $0x70] sm:$0xff]   ;;  %s33403_s12 = scalar_lea.vmem %s33502_s5, %s22677_s9 }
  0x12   : > { %s28951_s29 = scalar_lea.vmem %s33497_s0, %s28230_s26  ;;  %v28255_v41 = vld [vmem:[%s33498_s1 + $0x78] sm:$0xff]   ;;  %v28256_v47 = vld [vmem:[%s33498_s1 + $0x80] sm:$0xff]  }
  0x13   : > { %23977 = vmatpush3.bf16.msra.mxu0 %v28241_v1  ;;  %v226_v4 = vld [vmem:[%s28951_s29] sm:$0xff]  ;;  %v227_v5 = vld [vmem:[%s28951_s29 + $0x10] sm:$0xff] }
  0x14   : > { %23978 = vmatprep.subr.bf16.mxu0 %v28242_v2  ;;  %v258_v6 = vpack.c.bf16 %v227_v5, %v226_v4  ;;  %v228_v11 = vld [vmem:[%s28951_s29 + $0x20] sm:$0xff]  ;;  %v229_v12 = vld [vmem:[%s28951_s29 + $0x30] sm:$0xff] }
  0x15   : > { %v230_v14 = vld [vmem:[%s28951_s29 + $0x40] sm:$0xff]  ;;  %v231_v15 = vld [vmem:[%s28951_s29 + $0x50] sm:$0xff]  ;;  %v259_v16 = vpack.c.bf16 %v229_v12, %v228_v11 }
  0x16   : > { %23990 = vmatprep.mubr.bf16.mxu0 %v258_v6  ;;  %v260_v17 = vpack.c.bf16 %v231_v15, %v230_v14  ;;  %v232_v19 = vld [vmem:[%s28951_s29 + $0x60] sm:$0xff]  ;;  %v233_v20 = vld [vmem:[%s28951_s29 + $0x70] sm:$0xff] }
  0x17   : > { %23979 = vmatpush3.bf16.msra.mxu0 %v28242_v2  ;;  %v234_v21 = vld [vmem:[%s28951_s29 + $0xa0] sm:$0xff]  ;;  %v235_v22 = vld [vmem:[%s28951_s29 + $0xb0] sm:$0xff]  ;;  %v261_v24 = vpack.c.bf16 %v233_v20, %v232_v19 }
  0x18   : > { %23980 = vmatprep.subr.bf16.mxu0 %v28243_v3  ;;  %v262_v25 = vpack.c.bf16 %v235_v22, %v234_v21  ;;  %v236_v27 = vld [vmem:[%s28951_s29 + $0xc0] sm:$0xff]  ;;  %v237_v28 = vld [vmem:[%s28951_s29 + $0xd0] sm:$0xff] }
  0x19   : > { %v238_v29 = vld [vmem:[%s28951_s29 + $0xe0] sm:$0xff]  ;;  %v239_v30 = vld [vmem:[%s28951_s29 + $0xf0] sm:$0xff]  ;;  %v263_v32 = vpack.c.bf16 %v237_v28, %v236_v27 }
  0x1a   : > { %v264_v33 = vpack.c.bf16 %v239_v30, %v238_v29  ;;  %v240_v35 = vld [vmem:[%s28951_s29 + $0x100] sm:$0xff]  ;;  %v241_v36 = vld [vmem:[%s28951_s29 + $0x110] sm:$0xff] }
  0x1b   : > { %23981 = vmatpush3.bf16.msra.mxu0 %v28243_v3  ;;  %v242_v37 = vld [vmem:[%s28951_s29 + $0x140] sm:$0xff]  ;;  %v243_v38 = vld [vmem:[%s28951_s29 + $0x150] sm:$0xff]  ;;  %v265_v40 = vpack.c.bf16 %v241_v36, %v240_v35 }
  0x1c   : > { %23982 = vmatprep.subr.bf16.mxu0 %v28244_v7  ;;  %v266_v42 = vpack.c.bf16 %v243_v38, %v242_v37  ;;  %v244_v43 = vld [vmem:[%s28951_s29 + $0x160] sm:$0xff]  ;;  %v245_v44 = vld [vmem:[%s28951_s29 + $0x170] sm:$0xff] }
  0x1d   : > { %v246_v45 = vld [vmem:[%s28951_s29 + $0x180] sm:$0xff]  ;;  %v247_v46 = vld [vmem:[%s28951_s29 + $0x190] sm:$0xff]  ;;  %v267_v48 = vpack.c.bf16 %v245_v44, %v244_v43 }
  0x1e   : > { %v268_v49 = vpack.c.bf16 %v247_v46, %v246_v45  ;;  %v248_v50 = vld [vmem:[%s28951_s29 + $0x1a0] sm:$0xff]  ;;  %v249_v51 = vld [vmem:[%s28951_s29 + $0x1b0] sm:$0xff] }
  0x1f   : > { %23983 = vmatpush3.bf16.msra.mxu0 %v28244_v7  ;;  %v250_v52 = vld [vmem:[%s28951_s29 + $0x1e0] sm:$0xff]  ;;  %v251_v53 = vld [vmem:[%s28951_s29 + $0x1f0] sm:$0xff]  ;;  %v269_v54 = vpack.c.bf16 %v249_v51, %v248_v50 }
  0x20   : > { %23984 = vmatprep.subr.bf16.mxu0 %v28245_v8  ;;  %v270_v55 = vpack.c.bf16 %v251_v53, %v250_v52  ;;  %v252_v56 = vld [vmem:[%s28951_s29 + $0x200] sm:$0xff]  ;;  %v253_v57 = vld [vmem:[%s28951_s29 + $0x210] sm:$0xff] }
  0x21   : > { %v254_v58 = vld [vmem:[%s28951_s29 + $0x220] sm:$0xff]  ;;  %v255_v59 = vld [vmem:[%s28951_s29 + $0x230] sm:$0xff]  ;;  %v271_v60 = vpack.c.bf16 %v253_v57, %v252_v56 }
  0x22   : > { %v272_v61 = vpack.c.bf16 %v255_v59, %v254_v58  ;;  %v256_v62 = vld [vmem:[%s28951_s29 + $0x240] sm:$0xff]  ;;  %v257_v63 = vld [vmem:[%s28951_s29 + $0x250] sm:$0xff] }
  0x23   : > { %23985 = vmatpush3.bf16.msra.mxu0 %v28245_v8  ;;  %v531_v0 = vld [vmem:[%s28951_s29 + $0x1] sm:$0xff]  ;;  %v532_v1 = vld [vmem:[%s28951_s29 + $0x11] sm:$0xff]  ;;  %v273_v2 = vpack.c.bf16 %v257_v63, %v256_v62 }
  0x24   : > { %23986 = vmatprep.subr.bf16.mxu0 %v28246_v9  ;;  %v563_v3 = vpack.c.bf16 %v532_v1, %v531_v0  ;;  %v533_v4 = vld [vmem:[%s28951_s29 + $0x21] sm:$0xff]  ;;  %v534_v5 = vld [vmem:[%s28951_s29 + $0x31] sm:$0xff] }
  0x25   : > { %v535_v6 = vld [vmem:[%s28951_s29 + $0x41] sm:$0xff]  ;;  %v536_v7 = vld [vmem:[%s28951_s29 + $0x51] sm:$0xff]  ;;  %v564_v8 = vpack.c.bf16 %v534_v5, %v533_v4 }
  0x26   : > { %v537_v11 = vld [vmem:[%s28951_s29 + $0x61] sm:$0xff]  ;;  %v538_v12 = vld [vmem:[%s28951_s29 + $0x71] sm:$0xff] }
  0x27   : > { %23987 = vmatpush3.bf16.msra.mxu0 %v28246_v9  ;;  %v28257_v9 = vld [vmem:[%s33498_s1 + $0x88] sm:$0xff]   ;;  %v540_v14 = vld [vmem:[%s28951_s29 + $0xb1] sm:$0xff] }
  0x28   : > { %23988 = vmatprep.subr.bf16.mxu0 %v28247_v10  ;;  %v28258_v15 = vld [vmem:[%s33498_s1 + $0x90] sm:$0xff]   ;;  %v541_v19 = vld [vmem:[%s28951_s29 + $0xc1] sm:$0xff] }
  0x29   : > { %v542_v20 = vld [vmem:[%s28951_s29 + $0xd1] sm:$0xff]  ;;  %v543_v21 = vld [vmem:[%s28951_s29 + $0xe1] sm:$0xff] }
  0x2a   : > { %v544_v22 = vld [vmem:[%s28951_s29 + $0xf1] sm:$0xff]  ;;  %v545_v27 = vld [vmem:[%s28951_s29 + $0x101] sm:$0xff] }
  0x2b   : > { %23989 = vmatpush3.bf16.msra.mxu0 %v28247_v10  ;;  %v565_v10 = vpack.c.bf16 %v536_v7, %v535_v6  ;;  %v546_v28 = vld [vmem:[%s28951_s29 + $0x111] sm:$0xff]  ;;  %v547_v29 = vld [vmem:[%s28951_s29 + $0x141] sm:$0xff] }
  0x2c   : > { %24022 = vmatprep.subr.bf16.mxu0 %v28248_v13  ;;  %v548_v30 = vld [vmem:[%s28951_s29 + $0x151] sm:$0xff]  ;;  %v549_v35 = vld [vmem:[%s28951_s29 + $0x161] sm:$0xff] }
  0x2d   : > { %v550_v36 = vld [vmem:[%s28951_s29 + $0x171] sm:$0xff]  ;;  %v551_v37 = vld [vmem:[%s28951_s29 + $0x181] sm:$0xff] }
  0x2e   : > { %23991 = vmatmul.mubr.bf16.vlgmr.msra.gmra.mrb[0].mxu0 %v259_v16  ;;  %v566_v16 = vpack.c.bf16 %v538_v12, %v537_v11  ;;  %v552_v38 = vld [vmem:[%s28951_s29 + $0x191] sm:$0xff]  ;;  %v555_v44 = vld [vmem:[%s28951_s29 + $0x1e1] sm:$0xff] }
  0x2f   : > { %24023 = vmatpush3.bf16.msra.mxu0 %v28248_v13  ;;  %23994 = vmatprep.mubr.bf16.mxu0 %v260_v17  ;;  %v539_v13 = vld [vmem:[%s28951_s29 + $0xa1] sm:$0xff]  ;;  %v28259_v17 = vld [vmem:[%s33498_s1 + $0x98] sm:$0xff]   ;;  %v28266_v7 = vld [vmem:[%s33498_s1 + $0xd0] sm:$0xff]  }
  0x30   : > { %24024 = vmatprep.subr.bf16.mxu0 %v28249_v18  ;;  %v554_v43 = vld [vmem:[%s28951_s29 + $0x1b1] sm:$0xff]  ;;  %v559_v50 = vld [vmem:[%s28951_s29 + $0x221] sm:$0xff] }
  0x31   : > { %v556_v45 = vld [vmem:[%s28951_s29 + $0x1f1] sm:$0xff]  ;;  %v901_v56 = vld [vmem:[%s28951_s29 + $0x2] sm:$0xff] }
  0x32   : > { %v560_v51 = vld [vmem:[%s28951_s29 + $0x231] sm:$0xff]  ;;  %v905_v62 = vld [vmem:[%s28951_s29 + $0x42] sm:$0xff] }
  0x33   : > { %24025 = vmatpush3.bf16.msra.mxu0 %v28249_v18  ;;  %v567_v18 = vpack.c.bf16 %v540_v14, %v539_v13  ;;  %v577_v53 = vpack.c.bf16 %v560_v51, %v559_v50  ;;  %v902_v57 = vld [vmem:[%s28951_s29 + $0x12] sm:$0xff]  ;;  %v28265_v1 = vld [vmem:[%s33498_s1 + $0xc8] sm:$0xff]   ;;  %v28673_v50 = vld [vmem:[%s28951_s29 + $0x20] sm:$0xff] }
  0x34   : > { %24026 = vmatprep.subr.bf16.mxu0 %v28250_v23  ;;  %v933_v59 = vpack.c.bf16 %v902_v57, %v901_v56  ;;  %v906_v63 = vld [vmem:[%s28951_s29 + $0x52] sm:$0xff]  ;;  %v909_v5 = vld [vmem:[%s28951_s29 + $0xa2] sm:$0xff] }
  0x35   : > { %v908_v4 = vld [vmem:[%s28951_s29 + $0x72] sm:$0xff]  ;;  %v911_v11 = vld [vmem:[%s28951_s29 + $0xc2] sm:$0xff] }
  0x36   : > { %23995 = vmatmul.mubr.bf16.gmra.mrb[4].mxu0 %v261_v24  ;;  %v568_v24 = vpack.c.bf16 %v542_v20, %v541_v19  ;;  %v910_v6 = vld [vmem:[%s28951_s29 + $0xb2] sm:$0xff]  ;;  %v913_v13 = vld [vmem:[%s28951_s29 + $0xe2] sm:$0xff] }
  0x37   : > { %23998 = vmatprep.mubr.bf16.mxu0 %v262_v25  ;;  %24027 = vmatpush3.bf16.msra.mxu0 %v28250_v23  ;;  %v28260_v23 = vld [vmem:[%s33498_s1 + $0xa0] sm:$0xff]   ;;  %v28261_v25 = vld [vmem:[%s33498_s1 + $0xa8] sm:$0xff]   ;;  %v912_v12 = vld [vmem:[%s28951_s29 + $0xd2] sm:$0xff] }
  0x38   : > { %24028 = vmatprep.subr.bf16.mxu0 %v28251_v26  ;;  %v914_v14 = vld [vmem:[%s28951_s29 + $0xf2] sm:$0xff]  ;;  %v915_v19 = vld [vmem:[%s28951_s29 + $0x102] sm:$0xff] }
  0x39   : > { %v916_v20 = vld [vmem:[%s28951_s29 + $0x112] sm:$0xff]  ;;  %v28677_v57 = vld [vmem:[%s28951_s29 + $0x60] sm:$0xff] }
  0x3a   : > { %v28676_v56 = vld [vmem:[%s28951_s29 + $0x50] sm:$0xff] }
  0x3b   : > { %24029 = vmatpush3.bf16.msra.mxu0 %v28251_v26  ;;  %v569_v26 = vpack.c.bf16 %v544_v22, %v543_v21  ;;  %v917_v21 = vld [vmem:[%s28951_s29 + $0x142] sm:$0xff]  ;;  %v918_v22 = vld [vmem:[%s28951_s29 + $0x152] sm:$0xff] }
  0x3c   : > { %24030 = vmatprep.subr.bf16.mxu0 %v28252_v31 }
  0x3e   : > { %23999 = vmatmul.mubr.bf16.gmra.mrb[8].mxu0 %v263_v32  ;;  %v570_v32 = vpack.c.bf16 %v546_v28, %v545_v27  ;;  %v919_v27 = vld [vmem:[%s28951_s29 + $0x162] sm:$0xff]  ;;  %v920_v28 = vld [vmem:[%s28951_s29 + $0x172] sm:$0xff] }
  0x3f   : > { %24002 = vmatprep.mubr.bf16.mxu0 %v264_v33  ;;  %24031 = vmatpush3.bf16.msra.mxu0 %v28252_v31  ;;  %v28262_v31 = vld [vmem:[%s33498_s1 + $0xb0] sm:$0xff]   ;;  %v28263_v33 = vld [vmem:[%s33498_s1 + $0xb8] sm:$0xff]  }
  0x40   : > { %24032 = vmatprep.subr.bf16.mxu0 %v28253_v34 }
  0x43   : > { %24033 = vmatpush3.bf16.msra.mxu0 %v28253_v34  ;;  %v571_v34 = vpack.c.bf16 %v548_v30, %v547_v29  ;;  %v921_v29 = vld [vmem:[%s28951_s29 + $0x182] sm:$0xff]  ;;  %v922_v30 = vld [vmem:[%s28951_s29 + $0x192] sm:$0xff] }
  0x44   : > { %24034 = vmatprep.subr.bf16.mxu0 %v28254_v39 }
  0x46   : > { %24003 = vmatmul.mubr.bf16.gmra.mrb[12].mxu0 %v265_v40  ;;  %v572_v40 = vpack.c.bf16 %v550_v36, %v549_v35  ;;  %v924_v35 = vld [vmem:[%s28951_s29 + $0x1b2] sm:$0xff]  ;;  %v925_v36 = vld [vmem:[%s28951_s29 + $0x1e2] sm:$0xff] }
  0x47   : > { %24006 = vmatprep.mubr.bf16.mxu0 %v266_v42  ;;  %24035 = vmatpush3.bf16.msra.mxu0 %v28254_v39  ;;  %v28264_v39 = vld [vmem:[%s33498_s1 + $0xc0] sm:$0xff]  }
  0x48   : > { %24036 = vmatprep.subr.bf16.mxu0 %v28255_v41  ;;  %v553_v42 = vld [vmem:[%s28951_s29 + $0x1a1] sm:$0xff] }
  0x49   : > { %v574_v46 = vpack.c.bf16 %v554_v43, %v553_v42  ;;  %v929_v42 = vld [vmem:[%s28951_s29 + $0x222] sm:$0xff]  ;;  %v930_v43 = vld [vmem:[%s28951_s29 + $0x232] sm:$0xff] }
  0x4b   : > { %24037 = vmatpush3.bf16.msra.mxu0 %v28255_v41  ;;  %v573_v41 = vpack.c.bf16 %v552_v38, %v551_v37  ;;  %v926_v37 = vld [vmem:[%s28951_s29 + $0x1f2] sm:$0xff] }
  0x4c   : > { %24070 = vmatprep.subr.bf16.mxu0 %v28256_v47 }
  0x4e   : > { %24007 = vmatmul.mubr.bf16.gmra.mrb[16].mxu0 %v267_v48  ;;  %v557_v48 = vld [vmem:[%s28951_s29 + $0x201] sm:$0xff] }
  0x4f   : > { %24010 = vmatprep.mubr.bf16.mxu0 %v268_v49  ;;  %v558_v49 = vld [vmem:[%s28951_s29 + $0x211] sm:$0xff] }
  0x50   : > { %v576_v52 = vpack.c.bf16 %v558_v49, %v557_v48  ;;  %v28672_v49 = vld [vmem:[%s28951_s29 + $0x10] sm:$0xff] }
  0x51   : > { %v1304_v51 = vpack.c.bf16 %v28673_v50, %v28672_v49  ;;  %v28705_v49 = vld [vmem:[%s28951_s29 + $0x61] sm:$0xff] }
  0x56   : > { %24011 = vmatmul.mubr.bf16.gmra.mrb[20].mxu0 %v269_v54  ;;  %v561_v54 = vld [vmem:[%s28951_s29 + $0x241] sm:$0xff] }
  0x57   : > { %24014 = vmatprep.mubr.bf16.mxu0 %v270_v55  ;;  %v562_v55 = vld [vmem:[%s28951_s29 + $0x251] sm:$0xff] }
  0x58   : > { %v578_v58 = vpack.c.bf16 %v562_v55, %v561_v54  ;;  %v28273_v55 = vld [vmem:[%s33498_s1 + $0x108] sm:$0xff]  }
  0x5e   : > { %24015 = vmatmul.mubr.bf16.gmra.mrb[24].mxu0 %v271_v60  ;;  %v903_v60 = vld [vmem:[%s28951_s29 + $0x22] sm:$0xff] }
  0x5f   : > { %24018 = vmatprep.mubr.bf16.mxu0 %v272_v61  ;;  %v904_v61 = vld [vmem:[%s28951_s29 + $0x32] sm:$0xff] }
  0x60   : > { %v934_v0 = vpack.c.bf16 %v904_v61, %v903_v60  ;;  %v28274_v60 = vld [vmem:[%s33498_s1 + $0x110] sm:$0xff]  }
  0x61   : > { %v28678_v61 = vld [vmem:[%s28951_s29 + $0x70] sm:$0xff] }
  0x66   : > { %24019 = vmatmul.mubr.bf16.gmra.mrb[28].mxu0 %v273_v2  ;;  %v935_v2 = vpack.c.bf16 %v906_v63, %v905_v62  ;;  %v28275_v63 = vld [vmem:[%s33498_s1 + $0x118] sm:$0xff]  }
  0x67   : > { %24038 = vmatprep.mubr.bf16.mxu0 %v563_v3  ;;  %v907_v3 = vld [vmem:[%s28951_s29 + $0x62] sm:$0xff] }
  0x6e   : > { %24039 = vmatmul.mubr.bf16.vlgmr.msra.gmra.mrb[0].mxu0 %v564_v8  ;;  %v936_v8 = vpack.c.bf16 %v908_v4, %v907_v3  ;;  %v28276_v3 = vld [vmem:[%s33498_s1 + $0x120] sm:$0xff]   ;;  %v28681_v4 = vld [vmem:[%s28951_s29 + $0xd0] sm:$0xff] }
  0x6f   : > { %24071 = vmatpush3.bf16.msra.mxu0 %v28256_v47  ;;  %24042 = vmatprep.mubr.bf16.mxu0 %v565_v10  ;;  %v575_v47 = vpack.c.bf16 %v556_v45, %v555_v44  ;;  %v937_v10 = vpack.c.bf16 %v910_v6, %v909_v5  ;;  %v947_v45 = vpack.c.bf16 %v930_v43, %v929_v42  ;;  %v28682_v5 = vld [vmem:[%s28951_s29 + $0xe0] sm:$0xff] }
  0x70   : > { %24072 = vmatprep.subr.bf16.mxu0 %v28257_v9  ;;  %v1309_v6 = vpack.c.bf16 %v28682_v5, %v28681_v4  ;;  %v28701_v42 = vld [vmem:[%s28951_s29 + $0x21] sm:$0xff]  ;;  %v28286_v4 = vld [vmem:[%s33498_s1 + $0x170] sm:$0xff]  }
  0x71   : > { %v28713_v5 = vld [vmem:[%s28951_s29 + $0x111] sm:$0xff] }
  0x73   : > { %24073 = vmatpush3.bf16.msra.mxu0 %v28257_v9  ;;  %v28267_v9 = vld [vmem:[%s33498_s1 + $0xd8] sm:$0xff]  }
  0x74   : > { %24074 = vmatprep.subr.bf16.mxu0 %v28258_v15 }
  0x76   : > { %24043 = vmatmul.mubr.bf16.gmra.mrb[4].mxu0 %v566_v16  ;;  %v938_v16 = vpack.c.bf16 %v912_v12, %v911_v11  ;;  %v29169_v11 = vld [vmem:[%s28951_s29 + $0x120] sm:$0xff]  ;;  %v28278_v12 = vld [vmem:[%s33498_s1 + $0x130] sm:$0xff]  }
  0x77   : > { %24046 = vmatprep.mubr.bf16.mxu0 %v567_v18  ;;  %24075 = vmatpush3.bf16.msra.mxu0 %v28258_v15  ;;  %v28268_v15 = vld [vmem:[%s33498_s1 + $0xe0] sm:$0xff]   ;;  %v939_v18 = vpack.c.bf16 %v914_v14, %v913_v13  ;;  %v28685_v13 = vld [vmem:[%s28951_s29 + $0x110] sm:$0xff] }
  0x78   : > { %24076 = vmatprep.subr.bf16.mxu0 %v28259_v17  ;;  %v1311_v14 = vpack.c.bf16 %v29169_v11, %v28685_v13  ;;  %v28716_v13 = vld [vmem:[%s28951_s29 + $0x171] sm:$0xff] }
  0x7b   : > { %24077 = vmatpush3.bf16.msra.mxu0 %v28259_v17  ;;  %v28269_v17 = vld [vmem:[%s33498_s1 + $0xe8] sm:$0xff]  }
  0x7c   : > { %24078 = vmatprep.subr.bf16.mxu0 %v28260_v23 }
  0x7e   : > { %24047 = vmatmul.mubr.bf16.gmra.mrb[8].mxu0 %v568_v24  ;;  %v940_v24 = vpack.c.bf16 %v916_v20, %v915_v19  ;;  %v28280_v19 = vld [vmem:[%s33498_s1 + $0x140] sm:$0xff]   ;;  %v28688_v20 = vld [vmem:[%s28951_s29 + $0x170] sm:$0xff] }
  0x7f   : > { %24050 = vmatprep.mubr.bf16.mxu0 %v569_v26  ;;  %24079 = vmatpush3.bf16.msra.mxu0 %v28260_v23  ;;  %v28270_v23 = vld [vmem:[%s33498_s1 + $0xf0] sm:$0xff]   ;;  %v941_v26 = vpack.c.bf16 %v918_v22, %v917_v21  ;;  %v28689_v21 = vld [vmem:[%s28951_s29 + $0x180] sm:$0xff] }
  0x80   : > { %24080 = vmatprep.subr.bf16.mxu0 %v28261_v25  ;;  %v1313_v22 = vpack.c.bf16 %v28689_v21, %v28688_v20  ;;  %v28720_v20 = vld [vmem:[%s28951_s29 + $0x1b1] sm:$0xff] }
  0x83   : > { %24081 = vmatpush3.bf16.msra.mxu0 %v28261_v25  ;;  %v28271_v25 = vld [vmem:[%s33498_s1 + $0xf8] sm:$0xff]  }
  0x84   : > { %24082 = vmatprep.subr.bf16.mxu0 %v28262_v31 }
  0x86   : > { %24051 = vmatmul.mubr.bf16.gmra.mrb[12].mxu0 %v570_v32  ;;  %v942_v32 = vpack.c.bf16 %v920_v28, %v919_v27  ;;  %v28692_v27 = vld [vmem:[%s28951_s29 + $0x1b0] sm:$0xff] }
  0x87   : > { %24054 = vmatprep.mubr.bf16.mxu0 %v571_v34  ;;  %24083 = vmatpush3.bf16.msra.mxu0 %v28262_v31  ;;  %v28272_v31 = vld [vmem:[%s33498_s1 + $0x100] sm:$0xff]  }
  0x88   : > { %24084 = vmatprep.subr.bf16.mxu0 %v28263_v33  ;;  %v923_v34 = vld [vmem:[%s28951_s29 + $0x1a2] sm:$0xff] }
  0x89   : > { %v944_v38 = vpack.c.bf16 %v924_v35, %v923_v34  ;;  %v28697_v35 = vld [vmem:[%s28951_s29 + $0x230] sm:$0xff] }
  0x8b   : > { %24085 = vmatpush3.bf16.msra.mxu0 %v28263_v33  ;;  %v943_v33 = vpack.c.bf16 %v922_v30, %v921_v29  ;;  %v28693_v29 = vld [vmem:[%s28951_s29 + $0x1f0] sm:$0xff]  ;;  %v28694_v30 = vld [vmem:[%s28951_s29 + $0x200] sm:$0xff] }
  0x8c   : > { %24118 = vmatprep.subr.bf16.mxu0 %v28264_v39 }
  0x8e   : > { %24055 = vmatmul.mubr.bf16.gmra.mrb[16].mxu0 %v572_v40  ;;  %v927_v40 = vld [vmem:[%s28951_s29 + $0x202] sm:$0xff] }
  0x8f   : > { %24058 = vmatprep.mubr.bf16.mxu0 %v573_v41  ;;  %v928_v41 = vld [vmem:[%s28951_s29 + $0x212] sm:$0xff] }
  0x90   : > { %v946_v44 = vpack.c.bf16 %v928_v41, %v927_v40  ;;  %v28700_v41 = vld [vmem:[%s28951_s29 + $0x11] sm:$0xff] }
  0x91   : > { %v1674_v43 = vpack.c.bf16 %v28701_v42, %v28700_v41  ;;  %v28289_v42 = vld [vmem:[%s33498_s1 + $0x188] sm:$0xff]  }
  0x96   : > { %24059 = vmatmul.mubr.bf16.gmra.mrb[20].mxu0 %v574_v46  ;;  %v931_v46 = vld [vmem:[%s28951_s29 + $0x242] sm:$0xff] }
  0x97   : > { %24062 = vmatprep.mubr.bf16.mxu0 %v575_v47  ;;  %v932_v47 = vld [vmem:[%s28951_s29 + $0x252] sm:$0xff] }
  0x98   : > { %v948_v48 = vpack.c.bf16 %v932_v47, %v931_v46  ;;  %v28281_v47 = vld [vmem:[%s33498_s1 + $0x148] sm:$0xff]  }
  0x9e   : > { %24063 = vmatmul.mubr.bf16.gmra.mrb[24].mxu0 %v576_v52  ;;  %v28674_v52 = vld [vmem:[%s28951_s29 + $0x30] sm:$0xff] }
  0x9f   : > { %24066 = vmatprep.mubr.bf16.mxu0 %v577_v53  ;;  %v28675_v53 = vld [vmem:[%s28951_s29 + $0x40] sm:$0xff] }
  0xa0   : > { %v1305_v54 = vpack.c.bf16 %v28675_v53, %v28674_v52  ;;  %v28282_v52 = vld [vmem:[%s33498_s1 + $0x150] sm:$0xff]  }
  0xa1   : > { %v28706_v53 = vld [vmem:[%s28951_s29 + $0x71] sm:$0xff] }
  0xa6   : > { %24067 = vmatmul.mubr.bf16.gmra.mrb[28].mxu0 %v578_v58  ;;  %v1306_v58 = vpack.c.bf16 %v28677_v57, %v28676_v56  ;;  %v28707_v56 = vld [vmem:[%s28951_s29 + $0xb1] sm:$0xff]  ;;  %v28708_v57 = vld [vmem:[%s28951_s29 + $0xc1] sm:$0xff] }
  0xa7   : > { %24086 = vmatprep.mubr.bf16.mxu0 %v933_v59  ;;  %v20672_v59 = vld [vmem:[%s28951_s29 + $0x80] sm:$0xff] }
  0xa8   : > { %v1307_v62 = vpack.c.bf16 %v20672_v59, %v28678_v61  ;;  %v28284_v59 = vld [vmem:[%s33498_s1 + $0x160] sm:$0xff]  }
  0xa9   : > { %v28710_v61 = vld [vmem:[%s28951_s29 + $0xe1] sm:$0xff] }
  0xae   : > { %24087 = vmatmul.mubr.bf16.vlgmr.msra.gmra.mrb[0].mxu0 %v934_v0  ;;  %v28679_v0 = vld [vmem:[%s28951_s29 + $0xb0] sm:$0xff] }
  0xaf   : > { %24119 = vmatpush3.bf16.msra.mxu0 %v28264_v39  ;;  %24090 = vmatprep.mubr.bf16.mxu0 %v935_v2  ;;  %v945_v39 = vpack.c.bf16 %v926_v37, %v925_v36  ;;  %v28698_v36 = vld [vmem:[%s28951_s29 + $0x240] sm:$0xff] }
  0xb0   : > { %24120 = vmatprep.subr.bf16.mxu0 %v28265_v1  ;;  %v1318_v37 = vpack.c.bf16 %v28698_v36, %v28697_v35  ;;  %v28728_v35 = vld [vmem:[%s28951_s29 + $0x12] sm:$0xff]  ;;  %v28729_v36 = vld [vmem:[%s28951_s29 + $0x22] sm:$0xff] }
  0xb3   : > { %24121 = vmatpush3.bf16.msra.mxu0 %v28265_v1  ;;  %v28680_v1 = vld [vmem:[%s28951_s29 + $0xc0] sm:$0xff] }
  0xb4   : > { %24122 = vmatprep.subr.bf16.mxu0 %v28266_v7  ;;  %v1308_v2 = vpack.c.bf16 %v28680_v1, %v28679_v0  ;;  %v28711_v0 = vld [vmem:[%s28951_s29 + $0xf1] sm:$0xff]  ;;  %v28712_v1 = vld [vmem:[%s28951_s29 + $0x101] sm:$0xff] }
  0xb6   : > { %24091 = vmatmul.mubr.bf16.gmra.mrb[4].mxu0 %v936_v8  ;;  %v28683_v8 = vld [vmem:[%s28951_s29 + $0xf0] sm:$0xff] }
  0xb7   : > { %24094 = vmatprep.mubr.bf16.mxu0 %v937_v10  ;;  %24123 = vmatpush3.bf16.msra.mxu0 %v28266_v7  ;;  %v28277_v7 = vld [vmem:[%s33498_s1 + $0x128] sm:$0xff]  }
  0xb8   : > { %24124 = vmatprep.subr.bf16.mxu0 %v28267_v9 }
  0xbb   : > { %24125 = vmatpush3.bf16.msra.mxu0 %v28267_v9  ;;  %v28684_v9 = vld [vmem:[%s28951_s29 + $0x100] sm:$0xff] }
  0xbc   : > { %24126 = vmatprep.subr.bf16.mxu0 %v28268_v15  ;;  %v1310_v10 = vpack.c.bf16 %v28684_v9, %v28683_v8  ;;  %v28714_v8 = vld [vmem:[%s28951_s29 + $0x151] sm:$0xff]  ;;  %v28715_v9 = vld [vmem:[%s28951_s29 + $0x161] sm:$0xff] }
  0xbe   : > { %24095 = vmatmul.mubr.bf16.gmra.mrb[8].mxu0 %v938_v16  ;;  %v28686_v16 = vld [vmem:[%s28951_s29 + $0x150] sm:$0xff] }
  0xbf   : > { %24098 = vmatprep.mubr.bf16.mxu0 %v939_v18  ;;  %24127 = vmatpush3.bf16.msra.mxu0 %v28268_v15  ;;  %v28279_v15 = vld [vmem:[%s33498_s1 + $0x138] sm:$0xff]  }
  0xc0   : > { %24128 = vmatprep.subr.bf16.mxu0 %v28269_v17 }
  0xc3   : > { %24129 = vmatpush3.bf16.msra.mxu0 %v28269_v17  ;;  %v28687_v17 = vld [vmem:[%s28951_s29 + $0x160] sm:$0xff] }
  0xc4   : > { %24130 = vmatprep.subr.bf16.mxu0 %v28270_v23  ;;  %v1312_v18 = vpack.c.bf16 %v28687_v17, %v28686_v16  ;;  %v28718_v16 = vld [vmem:[%s28951_s29 + $0x191] sm:$0xff]  ;;  %v28719_v17 = vld [vmem:[%s28951_s29 + $0x1a1] sm:$0xff] }
  0xc6   : > { %24099 = vmatmul.mubr.bf16.gmra.mrb[12].mxu0 %v940_v24  ;;  %v28691_v24 = vld [vmem:[%s28951_s29 + $0x1a0] sm:$0xff] }
  0xc7   : > { %24102 = vmatprep.mubr.bf16.mxu0 %v941_v26  ;;  %24131 = vmatpush3.bf16.msra.mxu0 %v28270_v23  ;;  %v28690_v23 = vld [vmem:[%s28951_s29 + $0x190] sm:$0xff]  ;;  %v29189_v26 = vld [vmem:[%s28951_s29 + $0x1c0] sm:$0xff] }
  0xc8   : > { %24132 = vmatprep.subr.bf16.mxu0 %v28271_v25  ;;  %v1315_v28 = vpack.c.bf16 %v29189_v26, %v28692_v27  ;;  %v28724_v27 = vld [vmem:[%s28951_s29 + $0x221] sm:$0xff] }
  0xcb   : > { %24133 = vmatpush3.bf16.msra.mxu0 %v28271_v25  ;;  %v1314_v25 = vpack.c.bf16 %v28691_v24, %v28690_v23  ;;  %v28722_v23 = vld [vmem:[%s28951_s29 + $0x201] sm:$0xff] }
  0xcc   : > { %24166 = vmatprep.subr.bf16.mxu0 %v28272_v31 }
  0xce   : > { %24103 = vmatmul.mubr.bf16.gmra.mrb[16].mxu0 %v942_v32  ;;  %v28695_v32 = vld [vmem:[%s28951_s29 + $0x210] sm:$0xff] }
  0xcf   : > { %24106 = vmatprep.mubr.bf16.mxu0 %v943_v33  ;;  %v28696_v33 = vld [vmem:[%s28951_s29 + $0x220] sm:$0xff] }
  0xd0   : > { %v1317_v34 = vpack.c.bf16 %v28696_v33, %v28695_v32  ;;  %v29268_v32 = vld [vmem:[%s28951_s29 + $0x261] sm:$0xff]  ;;  %v28727_v33 = vld [vmem:[%s28951_s29 + $0x251] sm:$0xff] }
  0xd6   : > { %24107 = vmatmul.mubr.bf16.gmra.mrb[20].mxu0 %v944_v38  ;;  %v29200_v38 = vld [vmem:[%s28951_s29 + $0x260] sm:$0xff] }
  0xd7   : > { %24110 = vmatprep.mubr.bf16.mxu0 %v945_v39  ;;  %v28699_v39 = vld [vmem:[%s28951_s29 + $0x250] sm:$0xff] }
  0xd8   : > { %v1319_v40 = vpack.c.bf16 %v29200_v38, %v28699_v39  ;;  %v28730_v39 = vld [vmem:[%s28951_s29 + $0x32] sm:$0xff] }
  0xde   : > { %24111 = vmatmul.mubr.bf16.gmra.mrb[24].mxu0 %v946_v44  ;;  %v28702_v44 = vld [vmem:[%s28951_s29 + $0x31] sm:$0xff] }
  0xdf   : > { %24114 = vmatprep.mubr.bf16.mxu0 %v947_v45  ;;  %v28703_v45 = vld [vmem:[%s28951_s29 + $0x41] sm:$0xff] }
  0xe0   : > { %v1675_v46 = vpack.c.bf16 %v28703_v45, %v28702_v44  ;;  %v28733_v44 = vld [vmem:[%s28951_s29 + $0x62] sm:$0xff] }
  0xe6   : > { %24115 = vmatmul.mubr.bf16.gmra.mrb[28].mxu0 %v948_v48  ;;  %v28704_v48 = vld [vmem:[%s28951_s29 + $0x51] sm:$0xff] }
  0xe7   : > { %24134 = vmatprep.mubr.bf16.mxu0 %v1304_v51  ;;  %v1676_v50 = vpack.c.bf16 %v28705_v49, %v28704_v48  ;;  %v29214_v51 = vld [vmem:[%s28951_s29 + $0x81] sm:$0xff]  ;;  %v28734_v48 = vld [vmem:[%s28951_s29 + $0x72] sm:$0xff] }
  0xee   : > { %24135 = vmatmul.mubr.bf16.vlgmr.msra.gmra.mrb[0].mxu0 %v1305_v54  ;;  %v1677_v54 = vpack.c.bf16 %v29214_v51, %v28706_v53 }
  0xef   : > { %24167 = vmatpush3.bf16.msra.mxu0 %v28272_v31  ;;  %24138 = vmatprep.mubr.bf16.mxu0 %v1306_v58  ;;  %v1316_v31 = vpack.c.bf16 %v28694_v30, %v28693_v29  ;;  %v1678_v58 = vpack.c.bf16 %v28708_v57, %v28707_v56  ;;  %v28725_v29 = vld [vmem:[%s28951_s29 + $0x231] sm:$0xff]  ;;  %v28726_v30 = vld [vmem:[%s28951_s29 + $0x241] sm:$0xff] }
  0xf0   : > { %24168 = vmatprep.subr.bf16.mxu0 %v28273_v55  ;;  %v28737_v56 = vld [vmem:[%s28951_s29 + $0xd2] sm:$0xff]  ;;  %v28738_v57 = vld [vmem:[%s28951_s29 + $0xe2] sm:$0xff] }
  0xf3   : > { %24169 = vmatpush3.bf16.msra.mxu0 %v28273_v55  ;;  %v28283_v55 = vld [vmem:[%s33498_s1 + $0x158] sm:$0xff]  }
  0xf4   : > { %24170 = vmatprep.subr.bf16.mxu0 %v28274_v60 }
  0xf6   : > { %24139 = vmatmul.mubr.bf16.gmra.mrb[4].mxu0 %v1307_v62 }
  0xf7   : > { %24142 = vmatprep.mubr.bf16.mxu0 %v1308_v2  ;;  %24171 = vmatpush3.bf16.msra.mxu0 %v28274_v60  ;;  %v28709_v60 = vld [vmem:[%s28951_s29 + $0xd1] sm:$0xff]  ;;  %v1680_v2 = vpack.c.bf16 %v28712_v1, %v28711_v0 }
  0xf8   : > { %24172 = vmatprep.subr.bf16.mxu0 %v28275_v63  ;;  %v1679_v62 = vpack.c.bf16 %v28710_v61, %v28709_v60  ;;  %v28740_v60 = vld [vmem:[%s28951_s29 + $0x102] sm:$0xff]  ;;  %v28294_v0 = vld [vmem:[%s33498_s1 + $0x1b0] sm:$0xff]  }
  0xf9   : > { %v28741_v1 = vld [vmem:[%s28951_s29 + $0x112] sm:$0xff] }
  0xfb   : > { %24173 = vmatpush3.bf16.msra.mxu0 %v28275_v63  ;;  %v28285_v63 = vld [vmem:[%s33498_s1 + $0x168] sm:$0xff]  }
  0xfc   : > { %24174 = vmatprep.subr.bf16.mxu0 %v28276_v3 }
  0xfe   : > { %24143 = vmatmul.mubr.bf16.gmra.mrb[8].mxu0 %v1309_v6 }
  0xff   : > { %24146 = vmatprep.mubr.bf16.mxu0 %v1310_v10  ;;  %24175 = vmatpush3.bf16.msra.mxu0 %v28276_v3  ;;  %v29237_v3 = vld [vmem:[%s28951_s29 + $0x121] sm:$0xff]  ;;  %v1682_v10 = vpack.c.bf16 %v28715_v9, %v28714_v8  ;;  %v28744_v9 = vld [vmem:[%s28951_s29 + $0x172] sm:$0xff] }
 0x100   : > { %24176 = vmatprep.subr.bf16.mxu0 %v28277_v7  ;;  %v1681_v6 = vpack.c.bf16 %v29237_v3, %v28713_v5  ;;  %v28743_v5 = vld [vmem:[%s28951_s29 + $0x162] sm:$0xff] }
 0x101   : > { %v28296_v8 = vld [vmem:[%s33498_s1 + $0x1c0] sm:$0xff]  }
 0x103   : > { %24177 = vmatpush3.bf16.msra.mxu0 %v28277_v7  ;;  %v28287_v7 = vld [vmem:[%s33498_s1 + $0x178] sm:$0xff]  }
 0x104   : > { %24178 = vmatprep.subr.bf16.mxu0 %v28278_v12 }
 0x106   : > { %24147 = vmatmul.mubr.bf16.gmra.mrb[12].mxu0 %v1311_v14  ;;  %v28717_v14 = vld [vmem:[%s28951_s29 + $0x181] sm:$0xff] }
 0x107   : > { %24150 = vmatprep.mubr.bf16.mxu0 %v1312_v18  ;;  %24179 = vmatpush3.bf16.msra.mxu0 %v28278_v12  ;;  %v28288_v12 = vld [vmem:[%s33498_s1 + $0x180] sm:$0xff]   ;;  %v1684_v18 = vpack.c.bf16 %v28719_v17, %v28718_v16  ;;  %v28748_v17 = vld [vmem:[%s28951_s29 + $0x1b2] sm:$0xff] }
 0x108   : > { %24180 = vmatprep.subr.bf16.mxu0 %v28279_v15  ;;  %v29325_v16 = vld [vmem:[%s28951_s29 + $0x1c2] sm:$0xff] }
 0x10b   : > { %24181 = vmatpush3.bf16.msra.mxu0 %v28279_v15  ;;  %v1683_v15 = vpack.c.bf16 %v28717_v14, %v28716_v13  ;;  %v28746_v13 = vld [vmem:[%s28951_s29 + $0x192] sm:$0xff]  ;;  %v28747_v14 = vld [vmem:[%s28951_s29 + $0x1a2] sm:$0xff] }
 0x10c   : > { %24214 = vmatprep.subr.bf16.mxu0 %v28280_v19 }
 0x10e   : > { %24151 = vmatmul.mubr.bf16.gmra.mrb[16].mxu0 %v1313_v22  ;;  %v28721_v22 = vld [vmem:[%s28951_s29 + $0x1f1] sm:$0xff] }
 0x10f   : > { %24154 = vmatprep.mubr.bf16.mxu0 %v1314_v25  ;;  %v1686_v24 = vpack.c.bf16 %v28722_v23, %v28721_v22  ;;  %v28723_v25 = vld [vmem:[%s28951_s29 + $0x211] sm:$0xff] }
 0x110   : > { %v28751_v23 = vld [vmem:[%s28951_s29 + $0x212] sm:$0xff] }
 0x116   : > { %24155 = vmatmul.mubr.bf16.gmra.mrb[20].mxu0 %v1315_v28  ;;  %v1687_v28 = vpack.c.bf16 %v28724_v27, %v28723_v25  ;;  %v28753_v27 = vld [vmem:[%s28951_s29 + $0x232] sm:$0xff] }
 0x117   : > { %24158 = vmatprep.mubr.bf16.mxu0 %v1316_v31  ;;  %v1688_v31 = vpack.c.bf16 %v28726_v30, %v28725_v29  ;;  %v29336_v30 = vld [vmem:[%s28951_s29 + $0x262] sm:$0xff] }
 0x11e   : > { %24159 = vmatmul.mubr.bf16.gmra.mrb[24].mxu0 %v1317_v34  ;;  %v1689_v34 = vpack.c.bf16 %v29268_v32, %v28727_v33  ;;  %v20834_v33 = vld [vmem:[%s28951_s29 + $0x30] sm:$0xff] }
 0x11f   : > { %24162 = vmatprep.mubr.bf16.mxu0 %v1318_v37  ;;  %v2044_v37 = vpack.c.bf16 %v28729_v36, %v28728_v35 }
 0x126   : > { %24163 = vmatmul.mubr.bf16.gmra.mrb[28].mxu0 %v1319_v40  ;;  %v28731_v40 = vld [vmem:[%s28951_s29 + $0x42] sm:$0xff] }
 0x127   : > { %24182 = vmatprep.mubr.bf16.mxu0 %v1674_v43  ;;  %v2045_v41 = vpack.c.bf16 %v28731_v40, %v28730_v39  ;;  %v28732_v43 = vld [vmem:[%s28951_s29 + $0x52] sm:$0xff]  ;;  %v20837_v40 = vld [vmem:[%s28951_s29 + $0x60] sm:$0xff] }
 0x128   : > { %v2046_v45 = vpack.c.bf16 %v28733_v44, %v28732_v43  ;;  %v20836_v39 = vld [vmem:[%s28951_s29 + $0x50] sm:$0xff]  ;;  %v28297_v44 = vld [vmem:[%s33498_s1 + $0x1c8] sm:$0xff]  }
 0x12e   : > { %24183 = vmatmul.mubr.bf16.vlgmr.msra.gmra.mrb[0].mxu0 %v1675_v46  ;;  %v29282_v46 = vld [vmem:[%s28951_s29 + $0x82] sm:$0xff] }
 0x12f   : > { %24215 = vmatpush3.bf16.msra.mxu0 %v28280_v19  ;;  %24186 = vmatprep.mubr.bf16.mxu0 %v1676_v50  ;;  %v29257_v19 = vld [vmem:[%s28951_s29 + $0x1c1] sm:$0xff]  ;;  %v2047_v49 = vpack.c.bf16 %v29282_v46, %v28734_v48  ;;  %v28735_v50 = vld [vmem:[%s28951_s29 + $0xb2] sm:$0xff] }
 0x130   : > { %24216 = vmatprep.subr.bf16.mxu0 %v28281_v47  ;;  %v1685_v21 = vpack.c.bf16 %v29257_v19, %v28720_v20  ;;  %v28749_v20 = vld [vmem:[%s28951_s29 + $0x1f2] sm:$0xff] }
 0x131   : > { %v20842_v48 = vld [vmem:[%s28951_s29 + $0xd0] sm:$0xff] }
 0x133   : > { %24217 = vmatpush3.bf16.msra.mxu0 %v28281_v47  ;;  %v28290_v47 = vld [vmem:[%s33498_s1 + $0x190] sm:$0xff]  }
 0x134   : > { %24218 = vmatprep.subr.bf16.mxu0 %v28282_v52 }
 0x136   : > { %24187 = vmatmul.mubr.bf16.gmra.mrb[4].mxu0 %v1677_v54  ;;  %v28291_v54 = vld [vmem:[%s33498_s1 + $0x198] sm:$0xff]  }
 0x137   : > { %24190 = vmatprep.mubr.bf16.mxu0 %v1678_v58  ;;  %24219 = vmatpush3.bf16.msra.mxu0 %v28282_v52  ;;  %v28736_v52 = vld [vmem:[%s28951_s29 + $0xc2] sm:$0xff]  ;;  %v2049_v58 = vpack.c.bf16 %v28738_v57, %v28737_v56  ;;  %v20844_v56 = vld [vmem:[%s28951_s29 + $0xf0] sm:$0xff] }
 0x138   : > { %24220 = vmatprep.subr.bf16.mxu0 %v28283_v55  ;;  %v2048_v53 = vpack.c.bf16 %v28736_v52, %v28735_v50  ;;  %v28756_v50 = vld [vmem:[%s28951_s29 + $0x80] sm:$0xff] }
 0x139   : > { %v20845_v57 = vld [vmem:[%s28951_s29 + $0x100] sm:$0xff] }
 0x13b   : > { %24221 = vmatpush3.bf16.msra.mxu0 %v28283_v55  ;;  %v28292_v55 = vld [vmem:[%s33498_s1 + $0x1a0] sm:$0xff]  }
 0x13c   : > { %24222 = vmatprep.subr.bf16.mxu0 %v28284_v59 }
 0x13e   : > { %24191 = vmatmul.mubr.bf16.gmra.mrb[8].mxu0 %v1679_v62  ;;  %v28293_v62 = vld [vmem:[%s33498_s1 + $0x1a8] sm:$0xff]  }
 0x13f   : > { %24194 = vmatprep.mubr.bf16.mxu0 %v1680_v2  ;;  %24223 = vmatpush3.bf16.msra.mxu0 %v28284_v59  ;;  %v28739_v59 = vld [vmem:[%s28951_s29 + $0xf2] sm:$0xff] }
 0x140   : > { %24224 = vmatprep.subr.bf16.mxu0 %v28285_v63  ;;  %v2050_v61 = vpack.c.bf16 %v28740_v60, %v28739_v59  ;;  %v28300_v59 = vld [vmem:[%s33498_s1 + $0x1e0] sm:$0xff]  }
 0x143   : > { %24225 = vmatpush3.bf16.msra.mxu0 %v28285_v63  ;;  %v29305_v63 = vld [vmem:[%s28951_s29 + $0x122] sm:$0xff] }
 0x144   : > { %24226 = vmatprep.subr.bf16.mxu0 %v28286_v4  ;;  %v2051_v2 = vpack.c.bf16 %v29305_v63, %v28741_v1  ;;  %v20849_v1 = vld [vmem:[%s28951_s29 + $0x160] sm:$0xff] }
 0x146   : > { %24195 = vmatmul.mubr.bf16.gmra.mrb[12].mxu0 %v1681_v6 }
 0x147   : > { %24198 = vmatprep.mubr.bf16.mxu0 %v1682_v10  ;;  %24227 = vmatpush3.bf16.msra.mxu0 %v28286_v4  ;;  %v28742_v4 = vld [vmem:[%s28951_s29 + $0x152] sm:$0xff]  ;;  %v28745_v10 = vld [vmem:[%s28951_s29 + $0x182] sm:$0xff] }
 0x148   : > { %24228 = vmatprep.subr.bf16.mxu0 %v28287_v7  ;;  %v2052_v6 = vpack.c.bf16 %v28743_v5, %v28742_v4  ;;  %v28302_v4 = vld [vmem:[%s33498_s1 + $0x1f0] sm:$0xff]  }
 0x14b   : > { %24229 = vmatpush3.bf16.msra.mxu0 %v28287_v7  ;;  %v28295_v7 = vld [vmem:[%s33498_s1 + $0x1b8] sm:$0xff]  }
 0x14c   : > { %24262 = vmatprep.subr.bf16.mxu0 %v28288_v12 }
 0x14e   : > { %24199 = vmatmul.mubr.bf16.gmra.mrb[16].mxu0 %v1683_v15  ;;  %v2054_v15 = vpack.c.bf16 %v28747_v14, %v28746_v13 }
 0x14f   : > { %24202 = vmatprep.mubr.bf16.mxu0 %v1684_v18  ;;  %v2055_v18 = vpack.c.bf16 %v29325_v16, %v28748_v17  ;;  %v20857_v17 = vld [vmem:[%s28951_s29 + $0x200] sm:$0xff] }
 0x156   : > { %24203 = vmatmul.mubr.bf16.gmra.mrb[20].mxu0 %v1685_v21  ;;  %v28750_v21 = vld [vmem:[%s28951_s29 + $0x202] sm:$0xff] }
 0x157   : > { %24206 = vmatprep.mubr.bf16.mxu0 %v1686_v24  ;;  %v2056_v22 = vpack.c.bf16 %v28750_v21, %v28749_v20  ;;  %v28752_v24 = vld [vmem:[%s28951_s29 + $0x222] sm:$0xff] }
 0x158   : > { %v2057_v25 = vpack.c.bf16 %v28752_v24, %v28751_v23  ;;  %v20860_v23 = vld [vmem:[%s28951_s29 + $0x230] sm:$0xff]  ;;  %v20861_v24 = vld [vmem:[%s28951_s29 + $0x240] sm:$0xff] }
 0x15e   : > { %24207 = vmatmul.mubr.bf16.gmra.mrb[24].mxu0 %v1687_v28  ;;  %v28754_v28 = vld [vmem:[%s28951_s29 + $0x242] sm:$0xff] }
 0x15f   : > { %24210 = vmatprep.mubr.bf16.mxu0 %v1688_v31  ;;  %v2058_v29 = vpack.c.bf16 %v28754_v28, %v28753_v27  ;;  %v20833_v31 = vld [vmem:[%s28951_s29 + $0x20] sm:$0xff] }
 0x160   : > { %v2415_v36 = vpack.c.bf16 %v20834_v33, %v20833_v31  ;;  %v20890_v31 = vld [vmem:[%s28951_s29 + $0x31] sm:$0xff] }
 0x166   : > { %24211 = vmatmul.mubr.bf16.gmra.mrb[28].mxu0 %v1689_v34  ;;  %v28755_v34 = vld [vmem:[%s28951_s29 + $0x252] sm:$0xff] }
 0x167   : > { %24230 = vmatprep.mubr.bf16.mxu0 %v2044_v37  ;;  %v2059_v35 = vpack.c.bf16 %v29336_v30, %v28755_v34  ;;  %v20835_v37 = vld [vmem:[%s28951_s29 + $0x40] sm:$0xff] }
 0x16e   : > { %24231 = vmatmul.mubr.bf16.vlgmr.msra.gmra.mrb[0].mxu0 %v2045_v41  ;;  %v20838_v41 = vld [vmem:[%s28951_s29 + $0x70] sm:$0xff] }
 0x16f   : > { %24263 = vmatpush3.bf16.msra.mxu0 %v28288_v12  ;;  %24234 = vmatprep.mubr.bf16.mxu0 %v2046_v45  ;;  %v2053_v12 = vpack.c.bf16 %v28745_v10, %v28744_v9  ;;  %v2417_v43 = vpack.c.bf16 %v20838_v41, %v20837_v40  ;;  %v20840_v45 = vld [vmem:[%s28951_s29 + $0x90] sm:$0xff]  ;;  %v20853_v10 = vld [vmem:[%s28951_s29 + $0x1a0] sm:$0xff] }
 0x170   : > { %24264 = vmatprep.subr.bf16.mxu0 %v28289_v42  ;;  %v2418_v52 = vpack.c.bf16 %v20840_v45, %v28756_v50  ;;  %v20852_v9 = vld [vmem:[%s28951_s29 + $0x190] sm:$0xff]  ;;  %v20899_v50 = vld [vmem:[%s28951_s29 + $0xe1] sm:$0xff] }
 0x171   : > { %v28306_v45 = vld [vmem:[%s33498_s1 + $0x210] sm:$0xff]  }
 0x173   : > { %24265 = vmatpush3.bf16.msra.mxu0 %v28289_v42  ;;  %v2416_v42 = vpack.c.bf16 %v20836_v39, %v20835_v37  ;;  %v20893_v37 = vld [vmem:[%s28951_s29 + $0x61] sm:$0xff]  ;;  %v20894_v39 = vld [vmem:[%s28951_s29 + $0x71] sm:$0xff] }
 0x174   : > { %24266 = vmatprep.subr.bf16.mxu0 %v28290_v47  ;;  %v2787_v41 = vpack.c.bf16 %v20894_v39, %v20893_v37  ;;  %v20947_v37 = vld [vmem:[%s28951_s29 + $0x42] sm:$0xff]  ;;  %v20948_v39 = vld [vmem:[%s28951_s29 + $0x52] sm:$0xff] }
 0x176   : > { %24235 = vmatmul.mubr.bf16.gmra.mrb[4].mxu0 %v2047_v49  ;;  %v28298_v49 = vld [vmem:[%s33498_s1 + $0x1d0] sm:$0xff]  }
 0x177   : > { %24238 = vmatprep.mubr.bf16.mxu0 %v2048_v53  ;;  %24267 = vmatpush3.bf16.msra.mxu0 %v28290_v47  ;;  %v20841_v47 = vld [vmem:[%s28951_s29 + $0xc0] sm:$0xff] }
 0x178   : > { %24268 = vmatprep.subr.bf16.mxu0 %v28291_v54  ;;  %v29356_v53 = vpack.c.bf16 %v20842_v48, %v20841_v47 }
 0x17b   : > { %24269 = vmatpush3.bf16.msra.mxu0 %v28291_v54  ;;  %v28299_v54 = vld [vmem:[%s33498_s1 + $0x1d8] sm:$0xff]  }
 0x17c   : > { %24270 = vmatprep.subr.bf16.mxu0 %v28292_v55 }
 0x17e   : > { %24239 = vmatmul.mubr.bf16.gmra.mrb[8].mxu0 %v2049_v58  ;;  %v20846_v58 = vld [vmem:[%s28951_s29 + $0x110] sm:$0xff] }
 0x17f   : > { %24242 = vmatprep.mubr.bf16.mxu0 %v2050_v61  ;;  %24271 = vmatpush3.bf16.msra.mxu0 %v28292_v55  ;;  %v20843_v55 = vld [vmem:[%s28951_s29 + $0xe0] sm:$0xff]  ;;  %v29371_v61 = vpack.c.bf16 %v20846_v58, %v20845_v57  ;;  %v28309_v58 = vld [vmem:[%s33498_s1 + $0x228] sm:$0xff]  }
 0x180   : > { %24272 = vmatprep.subr.bf16.mxu0 %v28293_v62  ;;  %v29369_v60 = vpack.c.bf16 %v20844_v56, %v20843_v55  ;;  %v20902_v55 = vld [vmem:[%s28951_s29 + $0x111] sm:$0xff] }
 0x183   : > { %24273 = vmatpush3.bf16.msra.mxu0 %v28293_v62  ;;  %v28301_v62 = vld [vmem:[%s33498_s1 + $0x1e8] sm:$0xff]  }
 0x184   : > { %24274 = vmatprep.subr.bf16.mxu0 %v28294_v0 }
 0x186   : > { %24243 = vmatmul.mubr.bf16.gmra.mrb[12].mxu0 %v2051_v2  ;;  %v20850_v2 = vld [vmem:[%s28951_s29 + $0x170] sm:$0xff] }
 0x187   : > { %24246 = vmatprep.mubr.bf16.mxu0 %v2052_v6  ;;  %24275 = vmatpush3.bf16.msra.mxu0 %v28294_v0  ;;  %v20848_v0 = vld [vmem:[%s28951_s29 + $0x130] sm:$0xff]  ;;  %v29385_v6 = vpack.c.bf16 %v20850_v2, %v20849_v1 }
 0x188   : > { %24276 = vmatprep.subr.bf16.mxu0 %v28295_v7  ;;  %v2422_v5 = vpack.c.bf16 %v20848_v0, %v29169_v11  ;;  %v28304_v11 = vld [vmem:[%s33498_s1 + $0x200] sm:$0xff]   ;;  %v20906_v0 = vld [vmem:[%s28951_s29 + $0x171] sm:$0xff] }
 0x189   : > { %v28310_v1 = vld [vmem:[%s33498_s1 + $0x230] sm:$0xff]  }
 0x18b   : > { %24277 = vmatpush3.bf16.msra.mxu0 %v28295_v7  ;;  %v28303_v7 = vld [vmem:[%s33498_s1 + $0x1f8] sm:$0xff]  }
 0x18c   : > { %24310 = vmatprep.subr.bf16.mxu0 %v28296_v8 }
 0x18e   : > { %24247 = vmatmul.mubr.bf16.gmra.mrb[16].mxu0 %v2053_v12  ;;  %v20854_v12 = vld [vmem:[%s28951_s29 + $0x1b0] sm:$0xff] }
 0x18f   : > { %24250 = vmatprep.mubr.bf16.mxu0 %v2054_v15  ;;  %v29400_v14 = vpack.c.bf16 %v20854_v12, %v20853_v10  ;;  %v20856_v15 = vld [vmem:[%s28951_s29 + $0x1d0] sm:$0xff] }
 0x190   : > { %v2426_v20 = vpack.c.bf16 %v20856_v15, %v29189_v26  ;;  %v20864_v26 = vld [vmem:[%s28951_s29 + $0x270] sm:$0xff] }
 0x191   : > { %v2430_v33 = vpack.c.bf16 %v20864_v26, %v29200_v38  ;;  %v20896_v38 = vld [vmem:[%s28951_s29 + $0x91] sm:$0xff] }
 0x192   : > { %v2788_v47 = vpack.c.bf16 %v20896_v38, %v29214_v51  ;;  %v28308_v51 = vld [vmem:[%s33498_s1 + $0x220] sm:$0xff]   ;;  %v20910_v10 = vld [vmem:[%s28951_s29 + $0x1b1] sm:$0xff] }
 0x193   : > { %v20912_v15 = vld [vmem:[%s28951_s29 + $0x1d1] sm:$0xff] }
 0x194   : > { %v20918_v26 = vld [vmem:[%s28951_s29 + $0x251] sm:$0xff] }
 0x196   : > { %24251 = vmatmul.mubr.bf16.gmra.mrb[20].mxu0 %v2055_v18  ;;  %v20858_v18 = vld [vmem:[%s28951_s29 + $0x210] sm:$0xff] }
 0x197   : > { %24254 = vmatprep.mubr.bf16.mxu0 %v2056_v22  ;;  %v29408_v21 = vpack.c.bf16 %v20858_v18, %v20857_v17  ;;  %v20859_v22 = vld [vmem:[%s28951_s29 + $0x220] sm:$0xff]  ;;  %v20914_v18 = vld [vmem:[%s28951_s29 + $0x211] sm:$0xff] }
 0x198   : > { %v29415_v27 = vpack.c.bf16 %v20860_v23, %v20859_v22  ;;  %v20913_v17 = vld [vmem:[%s28951_s29 + $0x201] sm:$0xff] }
 0x199   : > { %v29491_v22 = vpack.c.bf16 %v20914_v18, %v20913_v17  ;;  %v20915_v23 = vld [vmem:[%s28951_s29 + $0x221] sm:$0xff]  ;;  %v20966_v18 = vld [vmem:[%s28951_s29 + $0x1b2] sm:$0xff] }
 0x19a   : > { %v20965_v17 = vld [vmem:[%s28951_s29 + $0x1a2] sm:$0xff] }
 0x19e   : > { %24255 = vmatmul.mubr.bf16.gmra.mrb[24].mxu0 %v2057_v25  ;;  %v20862_v25 = vld [vmem:[%s28951_s29 + $0x250] sm:$0xff] }
 0x19f   : > { %24258 = vmatprep.mubr.bf16.mxu0 %v2058_v29  ;;  %v29417_v28 = vpack.c.bf16 %v20862_v25, %v20861_v24  ;;  %v20889_v29 = vld [vmem:[%s28951_s29 + $0x21] sm:$0xff]  ;;  %v20916_v24 = vld [vmem:[%s28951_s29 + $0x231] sm:$0xff] }
 0x1a0   : > { %v2785_v34 = vpack.c.bf16 %v20890_v31, %v20889_v29  ;;  %v20917_v25 = vld [vmem:[%s28951_s29 + $0x241] sm:$0xff]  ;;  %v29498_v29 = vpack.c.bf16 %v20916_v24, %v20915_v23  ;;  %v29566_v23 = vpack.c.bf16 %v20966_v18, %v20965_v17  ;;  %v20968_v24 = vld [vmem:[%s28951_s29 + $0x1d2] sm:$0xff] }
 0x1a1   : > { %v29500_v31 = vpack.c.bf16 %v20918_v26, %v20917_v25  ;;  %v20969_v25 = vld [vmem:[%s28951_s29 + $0x202] sm:$0xff]  ;;  %v20970_v26 = vld [vmem:[%s28951_s29 + $0x212] sm:$0xff] }
 0x1a2   : > { %v21065_v17 = vld [vmem:[%s28951_s29 + $0x141] sm:$0xff]  ;;  %v29678_v18 = vld [vmem:[%s28951_s29 + $0x151] sm:$0xff] }
 0x1a6   : > { %24259 = vmatmul.mubr.bf16.gmra.mrb[28].mxu0 %v2059_v35  ;;  %v20891_v35 = vld [vmem:[%s28951_s29 + $0x41] sm:$0xff] }
 0x1a7   : > { %24278 = vmatprep.mubr.bf16.mxu0 %v2415_v36  ;;  %v20892_v36 = vld [vmem:[%s28951_s29 + $0x51] sm:$0xff] }
 0x1a8   : > { %v2786_v40 = vpack.c.bf16 %v20892_v36, %v20891_v35 }
 0x1ae   : > { %24279 = vmatmul.mubr.bf16.vlgmr.msra.gmra.mrb[0].mxu0 %v2416_v42  ;;  %v28305_v42 = vld [vmem:[%s33498_s1 + $0x208] sm:$0xff]  }
 0x1af   : > { %24311 = vmatpush3.bf16.msra.mxu0 %v28296_v8  ;;  %24282 = vmatprep.mubr.bf16.mxu0 %v2417_v43  ;;  %v20851_v8 = vld [vmem:[%s28951_s29 + $0x180] sm:$0xff] }
 0x1b0   : > { %24312 = vmatprep.subr.bf16.mxu0 %v28297_v44  ;;  %v29398_v13 = vpack.c.bf16 %v20852_v9, %v20851_v8  ;;  %v20897_v43 = vld [vmem:[%s28951_s29 + $0xc1] sm:$0xff]  ;;  %v20908_v8 = vld [vmem:[%s28951_s29 + $0x191] sm:$0xff] }
 0x1b1   : > { %v20909_v9 = vld [vmem:[%s28951_s29 + $0x1a1] sm:$0xff] }
 0x1b3   : > { %24313 = vmatpush3.bf16.msra.mxu0 %v28297_v44  ;;  %v20898_v44 = vld [vmem:[%s28951_s29 + $0xd1] sm:$0xff] }
 0x1b4   : > { %24314 = vmatprep.subr.bf16.mxu0 %v28298_v49  ;;  %v29439_v48 = vpack.c.bf16 %v20898_v44, %v20897_v43  ;;  %v28313_v43 = vld [vmem:[%s33498_s1 + $0x248] sm:$0xff]  }
 0x1b5   : > { %v20953_v44 = vld [vmem:[%s28951_s29 + $0xc2] sm:$0xff] }
 0x1b6   : > { %24283 = vmatmul.mubr.bf16.gmra.mrb[4].mxu0 %v2418_v52  ;;  %v20900_v52 = vld [vmem:[%s28951_s29 + $0xf1] sm:$0xff] }
 0x1b7   : > { %24286 = vmatprep.mubr.bf16.mxu0 %v29356_v53  ;;  %24315 = vmatpush3.bf16.msra.mxu0 %v28298_v49  ;;  %v28307_v49 = vld [vmem:[%s33498_s1 + $0x218] sm:$0xff]   ;;  %v29452_v56 = vpack.c.bf16 %v20900_v52, %v20899_v50 }
 0x1b8   : > { %24316 = vmatprep.subr.bf16.mxu0 %v28299_v54  ;;  %v28315_v52 = vld [vmem:[%s33498_s1 + $0x258] sm:$0xff]  }
 0x1bb   : > { %24317 = vmatpush3.bf16.msra.mxu0 %v28299_v54  ;;  %v20901_v54 = vld [vmem:[%s28951_s29 + $0x101] sm:$0xff] }
 0x1bc   : > { %24318 = vmatprep.subr.bf16.mxu0 %v28300_v59  ;;  %v29454_v57 = vpack.c.bf16 %v20902_v55, %v20901_v54  ;;  %v20955_v54 = vld [vmem:[%s28951_s29 + $0xe2] sm:$0xff]  ;;  %v20956_v55 = vld [vmem:[%s28951_s29 + $0xf2] sm:$0xff] }
 0x1be   : > { %24287 = vmatmul.mubr.bf16.gmra.mrb[8].mxu0 %v29369_v60 }
 0x1bf   : > { %24290 = vmatprep.mubr.bf16.mxu0 %v29371_v61  ;;  %24319 = vmatpush3.bf16.msra.mxu0 %v28300_v59  ;;  %v20904_v59 = vld [vmem:[%s28951_s29 + $0x131] sm:$0xff] }
 0x1c0   : > { %24320 = vmatprep.subr.bf16.mxu0 %v28301_v62  ;;  %v2792_v2 = vpack.c.bf16 %v20904_v59, %v29237_v3  ;;  %v28312_v3 = vld [vmem:[%s33498_s1 + $0x240] sm:$0xff]   ;;  %v29535_v59 = vpack.c.bf16 %v20956_v55, %v20955_v54  ;;  %v28326_v54 = vld [vmem:[%s33498_s1 + $0x2b0] sm:$0xff]  }
 0x1c3   : > { %24321 = vmatpush3.bf16.msra.mxu0 %v28301_v62  ;;  %v20905_v62 = vld [vmem:[%s28951_s29 + $0x161] sm:$0xff] }
 0x1c4   : > { %24322 = vmatprep.subr.bf16.mxu0 %v28302_v4 }
 0x1c6   : > { %24291 = vmatmul.mubr.bf16.gmra.mrb[12].mxu0 %v2422_v5  ;;  %v28311_v5 = vld [vmem:[%s33498_s1 + $0x238] sm:$0xff]  }
 0x1c7   : > { %24294 = vmatprep.mubr.bf16.mxu0 %v29385_v6  ;;  %24323 = vmatpush3.bf16.msra.mxu0 %v28302_v4  ;;  %v29468_v4 = vpack.c.bf16 %v20906_v0, %v20905_v62  ;;  %v28317_v0 = vld [vmem:[%s33498_s1 + $0x268] sm:$0xff]  }
 0x1c8   : > { %24324 = vmatprep.subr.bf16.mxu0 %v28303_v7 }
 0x1cb   : > { %24325 = vmatpush3.bf16.msra.mxu0 %v28303_v7  ;;  %v20907_v7 = vld [vmem:[%s28951_s29 + $0x181] sm:$0xff] }
 0x1cc   : > { %24358 = vmatprep.subr.bf16.mxu0 %v28304_v11  ;;  %v29481_v12 = vpack.c.bf16 %v20908_v8, %v20907_v7  ;;  %v28318_v7 = vld [vmem:[%s33498_s1 + $0x270] sm:$0xff]  }
 0x1ce   : > { %24295 = vmatmul.mubr.bf16.gmra.mrb[16].mxu0 %v29398_v13 }
 0x1cf   : > { %24298 = vmatprep.mubr.bf16.mxu0 %v29400_v14 }
 0x1d6   : > { %24299 = vmatmul.mubr.bf16.gmra.mrb[20].mxu0 %v2426_v20  ;;  %v2796_v20 = vpack.c.bf16 %v20912_v15, %v29257_v19  ;;  %v20920_v19 = vld [vmem:[%s28951_s29 + $0x271] sm:$0xff] }
 0x1d7   : > { %24302 = vmatprep.mubr.bf16.mxu0 %v29408_v21  ;;  %v2800_v35 = vpack.c.bf16 %v20920_v19, %v29268_v32  ;;  %v20952_v32 = vld [vmem:[%s28951_s29 + $0x92] sm:$0xff]  ;;  %v3166_v19 = vpack.c.bf16 %v20968_v24, %v29325_v16  ;;  %v3900_v24 = vpack.c.bf16 %v29678_v18, %v21065_v17  ;;  %v29819_v17 = vld [vmem:[%s28951_s29 + $0xc0] sm:$0xff] }
 0x1d8   : > { %v20964_v15 = vld [vmem:[%s28951_s29 + $0x192] sm:$0xff] }
 0x1d9   : > { %v20976_v16 = vld [vmem:[%s28951_s29 + $0x272] sm:$0xff] }
 0x1de   : > { %24303 = vmatmul.mubr.bf16.gmra.mrb[24].mxu0 %v29415_v27 }
 0x1df   : > { %24306 = vmatprep.mubr.bf16.mxu0 %v29417_v28 }
 0x1e6   : > { %24307 = vmatmul.mubr.bf16.gmra.mrb[28].mxu0 %v2430_v33  ;;  %v20945_v33 = vld [vmem:[%s28951_s29 + $0x22] sm:$0xff] }
 0x1e7   : > { %24326 = vmatprep.mubr.bf16.mxu0 %v2785_v34  ;;  %v20946_v34 = vld [vmem:[%s28951_s29 + $0x32] sm:$0xff] }
 0x1e8   : > { %v3155_v36 = vpack.c.bf16 %v20946_v34, %v20945_v33  ;;  %v29574_v33 = vpack.c.bf16 %v20970_v26, %v20969_v25  ;;  %v20971_v34 = vld [vmem:[%s28951_s29 + $0x222] sm:$0xff] }
 0x1e9   : > { %v28333_v25 = vld [vmem:[%s33498_s1 + $0x2e8] sm:$0xff]  }
 0x1ea   : > { %v21073_v26 = vld [vmem:[%s28951_s29 + $0x1e1] sm:$0xff] }
 0x1ee   : > { %24327 = vmatmul.mubr.bf16.vlgmr.msra.gmra.mrb[0].mxu0 %v2786_v40  ;;  %v20949_v40 = vld [vmem:[%s28951_s29 + $0x62] sm:$0xff] }
 0x1ef   : > { %24359 = vmatpush3.bf16.msra.mxu0 %v28304_v11  ;;  %24330 = vmatprep.mubr.bf16.mxu0 %v2787_v41  ;;  %v29483_v11 = vpack.c.bf16 %v20910_v10, %v20909_v9  ;;  %v20950_v41 = vld [vmem:[%s28951_s29 + $0x72] sm:$0xff] }
 0x1f0   : > { %24360 = vmatprep.subr.bf16.mxu0 %v28305_v42  ;;  %v3157_v38 = vpack.c.bf16 %v20950_v41, %v20949_v40  ;;  %v28319_v10 = vld [vmem:[%s33498_s1 + $0x278] sm:$0xff]   ;;  %v21001_v41 = vld [vmem:[%s28951_s29 + $0xa0] sm:$0xff] }
 0x1f3   : > { %24361 = vmatpush3.bf16.msra.mxu0 %v28305_v42  ;;  %v3156_v42 = vpack.c.bf16 %v20948_v39, %v20947_v37  ;;  %v20974_v37 = vld [vmem:[%s28951_s29 + $0x252] sm:$0xff] }
 0x1f4   : > { %24362 = vmatprep.subr.bf16.mxu0 %v28306_v45 }
 0x1f6   : > { %24331 = vmatmul.mubr.bf16.gmra.mrb[4].mxu0 %v2788_v47  ;;  %v28314_v47 = vld [vmem:[%s33498_s1 + $0x250] sm:$0xff]  }
 0x1f7   : > { %24334 = vmatprep.mubr.bf16.mxu0 %v29439_v48  ;;  %24363 = vmatpush3.bf16.msra.mxu0 %v28306_v45  ;;  %v20954_v45 = vld [vmem:[%s28951_s29 + $0xd2] sm:$0xff] }
 0x1f8   : > { %24364 = vmatprep.subr.bf16.mxu0 %v28307_v49  ;;  %v29522_v50 = vpack.c.bf16 %v20954_v45, %v20953_v44  ;;  %v21009_v44 = vld [vmem:[%s28951_s29 + $0x140] sm:$0xff]  ;;  %v29601_v45 = vld [vmem:[%s28951_s29 + $0x150] sm:$0xff] }
 0x1fb   : > { %24365 = vmatpush3.bf16.msra.mxu0 %v28307_v49  ;;  %v3158_v49 = vpack.c.bf16 %v20952_v32, %v29282_v46  ;;  %v28316_v46 = vld [vmem:[%s33498_s1 + $0x260] sm:$0xff]   ;;  %v28321_v32 = vld [vmem:[%s33498_s1 + $0x288] sm:$0xff]  }
 0x1fc   : > { %24366 = vmatprep.subr.bf16.mxu0 %v28308_v51 }
 0x1fe   : > { %24335 = vmatmul.mubr.bf16.gmra.mrb[8].mxu0 %v29452_v56 }
 0x1ff   : > { %24338 = vmatprep.mubr.bf16.mxu0 %v29454_v57  ;;  %24367 = vmatpush3.bf16.msra.mxu0 %v28308_v51  ;;  %v20957_v51 = vld [vmem:[%s28951_s29 + $0x102] sm:$0xff] }
 0x200   : > { %24368 = vmatprep.subr.bf16.mxu0 %v28309_v58 }
 0x203   : > { %24369 = vmatpush3.bf16.msra.mxu0 %v28309_v58  ;;  %v20958_v58 = vld [vmem:[%s28951_s29 + $0x112] sm:$0xff] }
 0x204   : > { %24370 = vmatprep.subr.bf16.mxu0 %v28310_v1  ;;  %v29537_v62 = vpack.c.bf16 %v20958_v58, %v20957_v51  ;;  %v21025_v51 = vld [vmem:[%s28951_s29 + $0x280] sm:$0xff] }
 0x206   : > { %24339 = vmatmul.mubr.bf16.gmra.mrb[12].mxu0 %v2792_v2  ;;  %v20961_v2 = vld [vmem:[%s28951_s29 + $0x162] sm:$0xff] }
 0x207   : > { %24342 = vmatprep.mubr.bf16.mxu0 %v29468_v4  ;;  %24371 = vmatpush3.bf16.msra.mxu0 %v28310_v1  ;;  %v20960_v1 = vld [vmem:[%s28951_s29 + $0x132] sm:$0xff] }
 0x208   : > { %24372 = vmatprep.subr.bf16.mxu0 %v28311_v5  ;;  %v3162_v8 = vpack.c.bf16 %v20960_v1, %v29305_v63  ;;  %v28320_v63 = vld [vmem:[%s33498_s1 + $0x280] sm:$0xff]  }
 0x209   : > { %v29649_v1 = vld [vmem:[%s28951_s29 + $0x2c0] sm:$0xff] }
 0x20b   : > { %24373 = vmatpush3.bf16.msra.mxu0 %v28311_v5  ;;  %v20962_v5 = vld [vmem:[%s28951_s29 + $0x172] sm:$0xff] }
 0x20c   : > { %24406 = vmatprep.subr.bf16.mxu0 %v28312_v3  ;;  %v29551_v9 = vpack.c.bf16 %v20962_v5, %v20961_v2  ;;  %v29662_v5 = vld [vmem:[%s28951_s29 + $0x2f0] sm:$0xff] }
 0x20e   : > { %24343 = vmatmul.mubr.bf16.gmra.mrb[16].mxu0 %v29481_v12 }
 0x20f   : > { %24346 = vmatprep.mubr.bf16.mxu0 %v29483_v11 }
 0x216   : > { %24347 = vmatmul.mubr.bf16.gmra.mrb[20].mxu0 %v2796_v20 }
 0x217   : > { %24350 = vmatprep.mubr.bf16.mxu0 %v29491_v22 }
 0x21e   : > { %24351 = vmatmul.mubr.bf16.gmra.mrb[24].mxu0 %v29498_v29 }
 0x21f   : > { %24354 = vmatprep.mubr.bf16.mxu0 %v29500_v31 }
 0x226   : > { %24355 = vmatmul.mubr.bf16.gmra.mrb[28].mxu0 %v2800_v35  ;;  %v20972_v35 = vld [vmem:[%s28951_s29 + $0x232] sm:$0xff] }
 0x227   : > { %24374 = vmatprep.mubr.bf16.mxu0 %v3155_v36  ;;  %v20973_v36 = vld [vmem:[%s28951_s29 + $0x242] sm:$0xff]  ;;  %v29581_v39 = vpack.c.bf16 %v20972_v35, %v20971_v34 }
 0x228   : > { %v29583_v40 = vpack.c.bf16 %v20974_v37, %v20973_v36  ;;  %v21081_v35 = vld [vmem:[%s28951_s29 + $0x281] sm:$0xff] }
 0x229   : > { %v29720_v37 = vld [vmem:[%s28951_s29 + $0x2a1] sm:$0xff] }
 0x22e   : > { %24375 = vmatmul.mubr.bf16.vlgmr.msra.gmra.mrb[0].mxu0 %v3156_v42  ;;  %v29590_v42 = vld [vmem:[%s28951_s29 + $0xb0] sm:$0xff] }
 0x22f   : > { %24407 = vmatpush3.bf16.msra.mxu0 %v28312_v3  ;;  %24378 = vmatprep.mubr.bf16.mxu0 %v3157_v38  ;;  %v20963_v3 = vld [vmem:[%s28951_s29 + $0x182] sm:$0xff]  ;;  %v3170_v38 = vpack.c.bf16 %v20976_v16, %v29336_v30  ;;  %v28322_v30 = vld [vmem:[%s33498_s1 + $0x290] sm:$0xff]  }
 0x230   : > { %24408 = vmatprep.subr.bf16.mxu0 %v28313_v43  ;;  %v29564_v20 = vpack.c.bf16 %v20964_v15, %v20963_v3  ;;  %v28329_v15 = vld [vmem:[%s33498_s1 + $0x2c8] sm:$0xff]   ;;  %v29723_v16 = vld [vmem:[%s28951_s29 + $0x2b1] sm:$0xff] }
 0x233   : > { %24409 = vmatpush3.bf16.msra.mxu0 %v28313_v43  ;;  %v3526_v43 = vpack.c.bf16 %v29590_v42, %v21001_v41  ;;  %v29726_v41 = vld [vmem:[%s28951_s29 + $0x2c1] sm:$0xff] }
 0x234   : > { %24410 = vmatprep.subr.bf16.mxu0 %v28314_v47 }
 0x236   : > { %24379 = vmatmul.mubr.bf16.gmra.mrb[4].mxu0 %v3158_v49  ;;  %v28325_v49 = vld [vmem:[%s33498_s1 + $0x2a8] sm:$0xff]  }
 0x237   : > { %24382 = vmatprep.mubr.bf16.mxu0 %v29522_v50  ;;  %24411 = vmatpush3.bf16.msra.mxu0 %v28314_v47  ;;  %v3530_v47 = vpack.c.bf16 %v29601_v45, %v21009_v44  ;;  %v29743_v44 = vld [vmem:[%s28951_s29 + $0xb2] sm:$0xff] }
 0x238   : > { %24412 = vmatprep.subr.bf16.mxu0 %v28315_v52 }
 0x23b   : > { %24413 = vmatpush3.bf16.msra.mxu0 %v28315_v52  ;;  %v21017_v52 = vld [vmem:[%s28951_s29 + $0x1e0] sm:$0xff] }
 0x23c   : > { %24414 = vmatprep.subr.bf16.mxu0 %v28316_v46 }
 0x23e   : > { %24383 = vmatmul.mubr.bf16.gmra.mrb[8].mxu0 %v29535_v59 }
 0x23f   : > { %24386 = vmatprep.mubr.bf16.mxu0 %v29537_v62  ;;  %24415 = vmatpush3.bf16.msra.mxu0 %v28316_v46  ;;  %v29643_v46 = vld [vmem:[%s28951_s29 + $0x2a0] sm:$0xff] }
 0x240   : > { %24416 = vmatprep.subr.bf16.mxu0 %v28317_v0 }
 0x243   : > { %24417 = vmatpush3.bf16.msra.mxu0 %v28317_v0  ;;  %v29646_v0 = vld [vmem:[%s28951_s29 + $0x2b0] sm:$0xff] }
 0x244   : > { %24418 = vmatprep.subr.bf16.mxu0 %v28318_v7 }
 0x246   : > { %24387 = vmatmul.mubr.bf16.gmra.mrb[12].mxu0 %v3162_v8  ;;  %v29666_v8 = vld [vmem:[%s28951_s29 + $0xb1] sm:$0xff] }
 0x247   : > { %24390 = vmatprep.mubr.bf16.mxu0 %v29551_v9  ;;  %24419 = vmatpush3.bf16.msra.mxu0 %v28318_v7  ;;  %v21057_v7 = vld [vmem:[%s28951_s29 + $0xa1] sm:$0xff] }
 0x248   : > { %24420 = vmatprep.subr.bf16.mxu0 %v28319_v10  ;;  %v3896_v3 = vpack.c.bf16 %v29666_v8, %v21057_v7  ;;  %v29800_v7 = vld [vmem:[%s28951_s29 + $0x2b2] sm:$0xff] }
 0x24b   : > { %24421 = vmatpush3.bf16.msra.mxu0 %v28319_v10 }
 0x24c   : > { %24454 = vmatprep.subr.bf16.mxu0 %v28320_v63 }
 0x24e   : > { %24391 = vmatmul.mubr.bf16.gmra.mrb[16].mxu0 %v29564_v20 }
 0x24f   : > { %24394 = vmatprep.mubr.bf16.mxu0 %v29566_v23 }
 0x256   : > { %24395 = vmatmul.mubr.bf16.gmra.mrb[20].mxu0 %v3166_v19  ;;  %v28334_v19 = vld [vmem:[%s33498_s1 + $0x2f0] sm:$0xff]  }
 0x257   : > { %24398 = vmatprep.mubr.bf16.mxu0 %v29574_v33 }
 0x25e   : > { %24399 = vmatmul.mubr.bf16.gmra.mrb[24].mxu0 %v29581_v39 }
 0x25f   : > { %24402 = vmatprep.mubr.bf16.mxu0 %v29583_v40 }
 0x266   : > { %24403 = vmatmul.mubr.bf16.gmra.mrb[28].mxu0 %v3170_v38 }
 0x267   : > { %24422 = vmatprep.mubr.bf16.mxu0 %v3526_v43  ;;  %v29739_v43 = vld [vmem:[%s28951_s29 + $0x2f1] sm:$0xff] }
 0x26e   : > { %24423 = vmatmul.mubr.bf16.vlgmr.msra.gmra.mrb[0].mxu0 %v29356_v53  ;;  %v28323_v53 = vld [vmem:[%s33498_s1 + $0x298] sm:$0xff]  }
 0x26f   : > { %24455 = vmatpush3.bf16.msra.mxu0 %v28320_v63  ;;  %24426 = vmatprep.mubr.bf16.mxu0 %v29369_v60  ;;  %v28324_v60 = vld [vmem:[%s33498_s1 + $0x2a0] sm:$0xff]   ;;  %v28330_v63 = vld [vmem:[%s33498_s1 + $0x2d0] sm:$0xff]  }
 0x270   : > { %24456 = vmatprep.subr.bf16.mxu0 %v28321_v32 }
 0x273   : > { %24457 = vmatpush3.bf16.msra.mxu0 %v28321_v32  ;;  %v21113_v32 = vld [vmem:[%s28951_s29 + $0xa2] sm:$0xff] }
 0x274   : > { %24458 = vmatprep.subr.bf16.mxu0 %v28322_v30 }
 0x276   : > { %24427 = vmatmul.mubr.bf16.gmra.mrb[4].mxu0 %v29371_v61  ;;  %v29621_v61 = vld [vmem:[%s28951_s29 + $0x1f0] sm:$0xff] }
 0x277   : > { %24430 = vmatprep.mubr.bf16.mxu0 %v3530_v47  ;;  %24459 = vmatpush3.bf16.msra.mxu0 %v28322_v30  ;;  %v3534_v55 = vpack.c.bf16 %v29621_v61, %v21017_v52  ;;  %v4266_v47 = vpack.c.bf16 %v29743_v44, %v21113_v32  ;;  %v28338_v52 = vld [vmem:[%s33498_s1 + $0x310] sm:$0xff]   ;;  %v28347_v32 = vld [vmem:[%s33498_s1 + $0x358] sm:$0xff]  }
 0x278   : > { %24460 = vmatprep.subr.bf16.mxu0 %v28323_v53 }
 0x27b   : > { %24461 = vmatpush3.bf16.msra.mxu0 %v28323_v53  ;;  %v28337_v53 = vld [vmem:[%s33498_s1 + $0x308] sm:$0xff]  }
 0x27c   : > { %24462 = vmatprep.subr.bf16.mxu0 %v28324_v60 }
 0x27e   : > { %24431 = vmatmul.mubr.bf16.gmra.mrb[8].mxu0 %v29385_v6  ;;  %v28327_v6 = vld [vmem:[%s33498_s1 + $0x2b8] sm:$0xff]  }
 0x27f   : > { %24434 = vmatprep.mubr.bf16.mxu0 %v29398_v13  ;;  %24463 = vmatpush3.bf16.msra.mxu0 %v28324_v60  ;;  %v28328_v13 = vld [vmem:[%s33498_s1 + $0x2c0] sm:$0xff]  }
 0x280   : > { %24464 = vmatprep.subr.bf16.mxu0 %v28325_v49  ;;  %v21121_v60 = vld [vmem:[%s28951_s29 + $0x142] sm:$0xff] }
 0x283   : > { %24465 = vmatpush3.bf16.msra.mxu0 %v28325_v49  ;;  %v29755_v49 = vld [vmem:[%s28951_s29 + $0x152] sm:$0xff] }
 0x284   : > { %24466 = vmatprep.subr.bf16.mxu0 %v28326_v54 }
 0x286   : > { %24435 = vmatmul.mubr.bf16.gmra.mrb[12].mxu0 %v29400_v14  ;;  %v29638_v14 = vld [vmem:[%s28951_s29 + $0x290] sm:$0xff] }
 0x287   : > { %24438 = vmatprep.mubr.bf16.mxu0 %v3534_v55  ;;  %24467 = vmatpush3.bf16.msra.mxu0 %v28326_v54  ;;  %v3538_v58 = vpack.c.bf16 %v29638_v14, %v21025_v51  ;;  %v4270_v54 = vpack.c.bf16 %v29755_v49, %v21121_v60  ;;  %v28341_v55 = vld [vmem:[%s33498_s1 + $0x328] sm:$0xff]   ;;  %v29873_v60 = vld [vmem:[%s28951_s29 + $0x1a0] sm:$0xff] }
 0x288   : > { %24468 = vmatprep.subr.bf16.mxu0 %v28327_v6 }
 0x28b   : > { %24469 = vmatpush3.bf16.msra.mxu0 %v28327_v6  ;;  %v21129_v6 = vld [vmem:[%s28951_s29 + $0x1e2] sm:$0xff] }
 0x28c   : > { %24502 = vmatprep.subr.bf16.mxu0 %v28328_v13 }
 0x28e   : > { %24439 = vmatmul.mubr.bf16.gmra.mrb[16].mxu0 %v29408_v21  ;;  %v29652_v21 = vld [vmem:[%s28951_s29 + $0x2d0] sm:$0xff] }
 0x28f   : > { %24442 = vmatprep.mubr.bf16.mxu0 %v29415_v27  ;;  %v3539_v27 = vpack.c.bf16 %v29646_v0, %v29643_v46  ;;  %v3540_v2 = vpack.c.bf16 %v29652_v21, %v29649_v1 }
 0x296   : > { %24443 = vmatmul.mubr.bf16.gmra.mrb[20].mxu0 %v29417_v28  ;;  %v29659_v28 = vld [vmem:[%s28951_s29 + $0x2e0] sm:$0xff] }
 0x297   : > { %24446 = vmatprep.mubr.bf16.mxu0 %v3538_v58  ;;  %v3541_v10 = vpack.c.bf16 %v29662_v5, %v29659_v28  ;;  %v21137_v58 = vld [vmem:[%s28951_s29 + $0x282] sm:$0xff] }
 0x29e   : > { %24447 = vmatmul.mubr.bf16.gmra.mrb[24].mxu0 %v3539_v27 }
 0x29f   : > { %24450 = vmatprep.mubr.bf16.mxu0 %v3540_v2  ;;  %v29797_v2 = vld [vmem:[%s28951_s29 + $0x2a2] sm:$0xff] }
 0x2a6   : > { %24451 = vmatmul.mubr.bf16.gmra.mrb[28].mxu0 %v3541_v10  ;;  %v4279_v10 = vpack.c.bf16 %v29800_v7, %v29797_v2 }
 0x2a7   : > { %24470 = vmatprep.mubr.bf16.mxu0 %v3896_v3 }
 0x2ae   : > { %24471 = vmatmul.mubr.bf16.vlgmr.msra.gmra.mrb[0].mxu0 %v29439_v48  ;;  %v28331_v48 = vld [vmem:[%s33498_s1 + $0x2d8] sm:$0xff]  }
 0x2af   : > { %24503 = vmatpush3.bf16.msra.mxu0 %v28328_v13  ;;  %24474 = vmatprep.mubr.bf16.mxu0 %v29452_v56  ;;  %v28332_v56 = vld [vmem:[%s33498_s1 + $0x2e0] sm:$0xff]   ;;  %v28342_v13 = vld [vmem:[%s33498_s1 + $0x330] sm:$0xff]  }
 0x2b0   : > { %24504 = vmatprep.subr.bf16.mxu0 %v28329_v15 }
 0x2b3   : > { %24505 = vmatpush3.bf16.msra.mxu0 %v28329_v15  ;;  %v29816_v15 = vld [vmem:[%s28951_s29 + $0x2f2] sm:$0xff] }
 0x2b4   : > { %24506 = vmatprep.subr.bf16.mxu0 %v28330_v63 }
 0x2b6   : > { %24475 = vmatmul.mubr.bf16.gmra.mrb[4].mxu0 %v29454_v57  ;;  %v29698_v57 = vld [vmem:[%s28951_s29 + $0x1f1] sm:$0xff] }
 0x2b7   : > { %24478 = vmatprep.mubr.bf16.mxu0 %v3900_v24  ;;  %24507 = vmatpush3.bf16.msra.mxu0 %v28330_v63  ;;  %v3904_v34 = vpack.c.bf16 %v29698_v57, %v21073_v26  ;;  %v4637_v24 = vpack.c.bf16 %v29819_v17, %v29590_v42  ;;  %v29835_v26 = vld [vmem:[%s28951_s29 + $0x100] sm:$0xff]  ;;  %v28345_v42 = vld [vmem:[%s33498_s1 + $0x348] sm:$0xff]  }
 0x2b8   : > { %24508 = vmatprep.subr.bf16.mxu0 %v28331_v48 }
 0x2bb   : > { %24509 = vmatpush3.bf16.msra.mxu0 %v28331_v48  ;;  %v29826_v48 = vld [vmem:[%s28951_s29 + $0xd0] sm:$0xff] }
 0x2bc   : > { %24510 = vmatprep.subr.bf16.mxu0 %v28332_v56 }
 0x2be   : > { %24479 = vmatmul.mubr.bf16.gmra.mrb[8].mxu0 %v29468_v4  ;;  %v28335_v4 = vld [vmem:[%s33498_s1 + $0x2f8] sm:$0xff]  }
 0x2bf   : > { %24482 = vmatprep.mubr.bf16.mxu0 %v29481_v12  ;;  %24511 = vmatpush3.bf16.msra.mxu0 %v28332_v56  ;;  %v28336_v12 = vld [vmem:[%s33498_s1 + $0x300] sm:$0xff]  }
 0x2c0   : > { %24512 = vmatprep.subr.bf16.mxu0 %v28333_v25  ;;  %v29829_v56 = vld [vmem:[%s28951_s29 + $0xe0] sm:$0xff] }
 0x2c3   : > { %24513 = vmatpush3.bf16.msra.mxu0 %v28333_v25  ;;  %v29832_v25 = vld [vmem:[%s28951_s29 + $0xf0] sm:$0xff] }
 0x2c4   : > { %24514 = vmatprep.subr.bf16.mxu0 %v28334_v19 }
 0x2c6   : > { %24483 = vmatmul.mubr.bf16.gmra.mrb[12].mxu0 %v29483_v11  ;;  %v29715_v11 = vld [vmem:[%s28951_s29 + $0x291] sm:$0xff] }
 0x2c7   : > { %24486 = vmatprep.mubr.bf16.mxu0 %v3904_v34  ;;  %24515 = vmatpush3.bf16.msra.mxu0 %v28334_v19  ;;  %v3908_v36 = vpack.c.bf16 %v29715_v11, %v21081_v35  ;;  %v4638_v19 = vpack.c.bf16 %v29829_v56, %v29826_v48  ;;  %v4639_v34 = vpack.c.bf16 %v29835_v26, %v29832_v25  ;;  %v29851_v35 = vld [vmem:[%s28951_s29 + $0x160] sm:$0xff] }
 0x2c8   : > { %24516 = vmatprep.subr.bf16.mxu0 %v28335_v4 }
 0x2cb   : > { %24517 = vmatpush3.bf16.msra.mxu0 %v28335_v4  ;;  %v29845_v4 = vld [vmem:[%s28951_s29 + $0x110] sm:$0xff] }
 0x2cc   : > { %24550 = vmatprep.subr.bf16.mxu0 %v28336_v12 }
 0x2ce   : > { %24487 = vmatmul.mubr.bf16.gmra.mrb[16].mxu0 %v29491_v22  ;;  %v29729_v22 = vld [vmem:[%s28951_s29 + $0x2d1] sm:$0xff] }
 0x2cf   : > { %24490 = vmatprep.mubr.bf16.mxu0 %v29498_v29  ;;  %v3909_v29 = vpack.c.bf16 %v29723_v16, %v29720_v37  ;;  %v3910_v38 = vpack.c.bf16 %v29729_v22, %v29726_v41 }
 0x2d6   : > { %24491 = vmatmul.mubr.bf16.gmra.mrb[20].mxu0 %v29500_v31  ;;  %v29736_v31 = vld [vmem:[%s28951_s29 + $0x2e1] sm:$0xff] }
 0x2d7   : > { %24494 = vmatprep.mubr.bf16.mxu0 %v3908_v36  ;;  %v3911_v30 = vpack.c.bf16 %v29739_v43, %v29736_v31  ;;  %v28346_v36 = vld [vmem:[%s33498_s1 + $0x350] sm:$0xff]  }
 0x2de   : > { %24495 = vmatmul.mubr.bf16.gmra.mrb[24].mxu0 %v3909_v29 }
 0x2df   : > { %24498 = vmatprep.mubr.bf16.mxu0 %v3910_v38  ;;  %v4641_v38 = vpack.c.bf16 %v29851_v35, %v29601_v45  ;;  %v28348_v45 = vld [vmem:[%s33498_s1 + $0x360] sm:$0xff]  }
 0x2e6   : > { %24499 = vmatmul.mubr.bf16.gmra.mrb[28].mxu0 %v3911_v30  ;;  %v29864_v30 = vld [vmem:[%s28951_s29 + $0x170] sm:$0xff] }
 0x2e7   : > { %24518 = vmatprep.mubr.bf16.mxu0 %v4266_v47  ;;  %v29867_v47 = vld [vmem:[%s28951_s29 + $0x180] sm:$0xff] }
 0x2ee   : > { %24519 = vmatmul.mubr.bf16.vlgmr.msra.gmra.mrb[0].mxu0 %v29522_v50  ;;  %v28339_v50 = vld [vmem:[%s33498_s1 + $0x318] sm:$0xff]  }
 0x2ef   : > { %24551 = vmatpush3.bf16.msra.mxu0 %v28336_v12  ;;  %24522 = vmatprep.mubr.bf16.mxu0 %v29535_v59  ;;  %v28340_v59 = vld [vmem:[%s33498_s1 + $0x320] sm:$0xff]  }
 0x2f0   : > { %24552 = vmatprep.subr.bf16.mxu0 %v28337_v53  ;;  %v29848_v12 = vld [vmem:[%s28951_s29 + $0x120] sm:$0xff] }
 0x2f1   : > { %v4640_v29 = vpack.c.bf16 %v29848_v12, %v29845_v4 }
 0x2f3   : > { %24553 = vmatpush3.bf16.msra.mxu0 %v28337_v53  ;;  %v29870_v53 = vld [vmem:[%s28951_s29 + $0x190] sm:$0xff] }
 0x2f4   : > { %24554 = vmatprep.subr.bf16.mxu0 %v28338_v52 }
 0x2f6   : > { %24523 = vmatmul.mubr.bf16.gmra.mrb[4].mxu0 %v29537_v62  ;;  %v29775_v62 = vld [vmem:[%s28951_s29 + $0x1f2] sm:$0xff] }
 0x2f7   : > { %24526 = vmatprep.mubr.bf16.mxu0 %v4270_v54  ;;  %24555 = vmatpush3.bf16.msra.mxu0 %v28338_v52  ;;  %v4274_v51 = vpack.c.bf16 %v29775_v62, %v21129_v6  ;;  %v4642_v52 = vpack.c.bf16 %v29867_v47, %v29864_v30  ;;  %v4643_v54 = vpack.c.bf16 %v29873_v60, %v29870_v53  ;;  %v29892_v6 = vld [vmem:[%s28951_s29 + $0x200] sm:$0xff] }
 0x2f8   : > { %24556 = vmatprep.subr.bf16.mxu0 %v28339_v50 }
 0x2fb   : > { %24557 = vmatpush3.bf16.msra.mxu0 %v28339_v50  ;;  %v28349_v50 = vld [vmem:[%s33498_s1 + $0x368] sm:$0xff]  }
 0x2fc   : > { %24558 = vmatprep.subr.bf16.mxu0 %v28340_v59 }
 0x2fe   : > { %24527 = vmatmul.mubr.bf16.gmra.mrb[8].mxu0 %v29551_v9  ;;  %v28343_v9 = vld [vmem:[%s33498_s1 + $0x338] sm:$0xff]  }
 0x2ff   : > { %24530 = vmatprep.mubr.bf16.mxu0 %v29564_v20  ;;  %24559 = vmatpush3.bf16.msra.mxu0 %v28340_v59  ;;  %v28344_v20 = vld [vmem:[%s33498_s1 + $0x340] sm:$0xff]   ;;  %v29886_v59 = vld [vmem:[%s28951_s29 + $0x1b0] sm:$0xff] }
 0x300   : > { %24560 = vmatprep.subr.bf16.mxu0 %v28341_v55 }
 0x303   : > { %24561 = vmatpush3.bf16.msra.mxu0 %v28341_v55  ;;  %v29889_v55 = vld [vmem:[%s28951_s29 + $0x1c0] sm:$0xff] }
 0x304   : > { %24562 = vmatprep.subr.bf16.mxu0 %v28342_v13 }
 0x306   : > { %24531 = vmatmul.mubr.bf16.gmra.mrb[12].mxu0 %v29566_v23  ;;  %v29792_v23 = vld [vmem:[%s28951_s29 + $0x292] sm:$0xff] }
 0x307   : > { %24534 = vmatprep.mubr.bf16.mxu0 %v4274_v51  ;;  %24563 = vmatpush3.bf16.msra.mxu0 %v28342_v13  ;;  %v4278_v27 = vpack.c.bf16 %v29792_v23, %v21137_v58  ;;  %v28350_v13 = vld [vmem:[%s33498_s1 + $0x370] sm:$0xff]   ;;  %v4644_v51 = vpack.c.bf16 %v29889_v55, %v29886_v59 }
 0x308   : > { %24564 = vmatprep.subr.bf16.mxu0 %v28343_v9  ;;  %v29905_v58 = vld [vmem:[%s28951_s29 + $0x210] sm:$0xff] }
 0x30b   : > { %24565 = vmatpush3.bf16.msra.mxu0 %v28343_v9  ;;  %v4645_v9 = vpack.c.bf16 %v29892_v6, %v29621_v61  ;;  %v28352_v61 = vld [vmem:[%s33498_s1 + $0x380] sm:$0xff]  }
 0x30c   : > { %24598 = vmatprep.subr.bf16.mxu0 %v28344_v20 }
 0x30e   : > { %24535 = vmatmul.mubr.bf16.gmra.mrb[16].mxu0 %v29574_v33  ;;  %v29803_v33 = vld [vmem:[%s28951_s29 + $0x2c2] sm:$0xff] }
 0x30f   : > { %24538 = vmatprep.mubr.bf16.mxu0 %v29581_v39  ;;  %v29806_v39 = vld [vmem:[%s28951_s29 + $0x2d2] sm:$0xff] }
 0x310   : > { %v4280_v3 = vpack.c.bf16 %v29806_v39, %v29803_v33 }
 0x316   : > { %24539 = vmatmul.mubr.bf16.gmra.mrb[20].mxu0 %v29583_v40  ;;  %v29813_v40 = vld [vmem:[%s28951_s29 + $0x2e2] sm:$0xff] }
 0x317   : > { %24542 = vmatprep.mubr.bf16.mxu0 %v4278_v27  ;;  %v4281_v63 = vpack.c.bf16 %v29816_v15, %v29813_v40  ;;  %v29908_v27 = vld [vmem:[%s28951_s29 + $0x220] sm:$0xff] }
 0x31e   : > { %24543 = vmatmul.mubr.bf16.gmra.mrb[24].mxu0 %v4279_v10  ;;  %v29911_v10 = vld [vmem:[%s28951_s29 + $0x230] sm:$0xff] }
 0x31f   : > { %24546 = vmatprep.mubr.bf16.mxu0 %v4280_v3  ;;  %v29914_v3 = vld [vmem:[%s28951_s29 + $0x240] sm:$0xff] }
 0x326   : > { %24547 = vmatmul.mubr.bf16.gmra.mrb[28].mxu0 %v4281_v63  ;;  %v4646_v63 = vpack.c.bf16 %v29908_v27, %v29905_v58 }
 0x327   : > { %24566 = vmatprep.mubr.bf16.mxu0 %v4637_v24  ;;  %v4647_v24 = vpack.c.bf16 %v29914_v3, %v29911_v10 }
 0x32e   : > { %24567 = vmatmul.mubr.bf16.vlgmr.msra.gmra.mrb[0].mxu0 %v4638_v19  ;;  %v29924_v19 = vld [vmem:[%s28951_s29 + $0x250] sm:$0xff] }
 0x32f   : > { %24599 = vmatpush3.bf16.msra.mxu0 %v28344_v20  ;;  %24570 = vmatprep.mubr.bf16.mxu0 %v4639_v34  ;;  %v28351_v20 = vld [vmem:[%s33498_s1 + $0x378] sm:$0xff]   ;;  %v29927_v34 = vld [vmem:[%s28951_s29 + $0x260] sm:$0xff] }
 0x330   : > { %24600 = vmatprep.subr.bf16.mxu0 %v28345_v42 }
 0x333   : > { %24601 = vmatpush3.bf16.msra.mxu0 %v28345_v42  ;;  %v4648_v42 = vpack.c.bf16 %v29927_v34, %v29924_v19 }
 0x334   : > { %24602 = vmatprep.subr.bf16.mxu0 %v28346_v36 }
 0x336   : > { %24571 = vmatmul.mubr.bf16.gmra.mrb[4].mxu0 %v4640_v29  ;;  %v4650_v29 = vpack.c.bf16 %v29649_v1, %v29646_v0  ;;  %v29948_v0 = vld [vmem:[%s28951_s29 + $0xd1] sm:$0xff]  ;;  %v29951_v1 = vld [vmem:[%s28951_s29 + $0xe1] sm:$0xff] }
 0x337   : > { %24574 = vmatprep.mubr.bf16.mxu0 %v4641_v38  ;;  %24603 = vmatpush3.bf16.msra.mxu0 %v28346_v36  ;;  %v4649_v36 = vpack.c.bf16 %v29643_v46, %v29638_v14  ;;  %v4651_v38 = vpack.c.bf16 %v29659_v28, %v29652_v21  ;;  %v29954_v21 = vld [vmem:[%s28951_s29 + $0xf1] sm:$0xff]  ;;  %v29957_v28 = vld [vmem:[%s28951_s29 + $0x101] sm:$0xff] }
 0x338   : > { %24604 = vmatprep.subr.bf16.mxu0 %v28347_v32 }
 0x33b   : > { %24605 = vmatpush3.bf16.msra.mxu0 %v28347_v32  ;;  %v29938_v32 = vld [vmem:[%s28951_s29 + $0x300] sm:$0xff] }
 0x33c   : > { %24606 = vmatprep.subr.bf16.mxu0 %v28348_v45  ;;  %v4652_v14 = vpack.c.bf16 %v29938_v32, %v29662_v5  ;;  %v5009_v5 = vpack.c.bf16 %v29957_v28, %v29954_v21 }
 0x33e   : > { %24575 = vmatmul.mubr.bf16.gmra.mrb[8].mxu0 %v4642_v52  ;;  %v5008_v52 = vpack.c.bf16 %v29951_v1, %v29948_v0 }
 0x33f   : > { %24578 = vmatprep.mubr.bf16.mxu0 %v4643_v54  ;;  %24607 = vmatpush3.bf16.msra.mxu0 %v28348_v45  ;;  %v29941_v45 = vld [vmem:[%s28951_s29 + $0xc1] sm:$0xff]  ;;  %v29967_v54 = vld [vmem:[%s28951_s29 + $0x111] sm:$0xff] }
 0x340   : > { %24608 = vmatprep.subr.bf16.mxu0 %v28349_v50  ;;  %v5007_v46 = vpack.c.bf16 %v29941_v45, %v29666_v8  ;;  %v28353_v8 = vld [vmem:[%s33498_s1 + $0x388] sm:$0xff]  }
 0x343   : > { %24609 = vmatpush3.bf16.msra.mxu0 %v28349_v50  ;;  %v29970_v50 = vld [vmem:[%s28951_s29 + $0x121] sm:$0xff] }
 0x344   : > { %24610 = vmatprep.subr.bf16.mxu0 %v28350_v13 }
 0x346   : > { %24579 = vmatmul.mubr.bf16.gmra.mrb[12].mxu0 %v4644_v51  ;;  %v28354_v51 = vld [vmem:[%s33498_s1 + $0x390] sm:$0xff]  }
 0x347   : > { %24582 = vmatprep.mubr.bf16.mxu0 %v4645_v9  ;;  %24611 = vmatpush3.bf16.msra.mxu0 %v28350_v13  ;;  %v29973_v13 = vld [vmem:[%s28951_s29 + $0x161] sm:$0xff]  ;;  %v5010_v9 = vpack.c.bf16 %v29970_v50, %v29967_v54 }
 0x348   : > { %24612 = vmatprep.subr.bf16.mxu0 %v28351_v20 }
 0x34b   : > { %24613 = vmatpush3.bf16.msra.mxu0 %v28351_v20  ;;  %v5011_v20 = vpack.c.bf16 %v29973_v13, %v29678_v18  ;;  %v28356_v18 = vld [vmem:[%s33498_s1 + $0x3a0] sm:$0xff]  }
 0x34c   : > { %24646 = vmatprep.subr.bf16.mxu0 %v28352_v61 }
 0x34e   : > { %24583 = vmatmul.mubr.bf16.gmra.mrb[16].mxu0 %v4646_v63  ;;  %v29986_v63 = vld [vmem:[%s28951_s29 + $0x171] sm:$0xff] }
 0x34f   : > { %24586 = vmatprep.mubr.bf16.mxu0 %v4647_v24  ;;  %v29989_v24 = vld [vmem:[%s28951_s29 + $0x181] sm:$0xff] }
 0x356   : > { %24587 = vmatmul.mubr.bf16.gmra.mrb[20].mxu0 %v4648_v42  ;;  %v29992_v42 = vld [vmem:[%s28951_s29 + $0x191] sm:$0xff] }
 0x357   : > { %24590 = vmatprep.mubr.bf16.mxu0 %v4649_v36  ;;  %v29995_v36 = vld [vmem:[%s28951_s29 + $0x1a1] sm:$0xff] }
 0x35e   : > { %24591 = vmatmul.mubr.bf16.gmra.mrb[24].mxu0 %v4650_v29  ;;  %v5012_v29 = vpack.c.bf16 %v29989_v24, %v29986_v63 }
 0x35f   : > { %24594 = vmatprep.mubr.bf16.mxu0 %v4651_v38  ;;  %v5013_v38 = vpack.c.bf16 %v29995_v36, %v29992_v42 }
 0x366   : > { %24595 = vmatmul.mubr.bf16.gmra.mrb[28].mxu0 %v4652_v14  ;;  %v28357_v14 = vld [vmem:[%s33498_s1 + $0x3a8] sm:$0xff]  }
 0x367   : > { %24614 = vmatprep.mubr.bf16.mxu0 %v5007_v46  ;;  %v30008_v46 = vld [vmem:[%s28951_s29 + $0x1b1] sm:$0xff] }
 0x36e   : > { %24615 = vmatmul.mubr.bf16.vlgmr.msra.gmra.mrb[0].mxu0 %v5008_v52  ;;  %v30011_v52 = vld [vmem:[%s28951_s29 + $0x1c1] sm:$0xff] }
 0x36f   : > { %24647 = vmatpush3.bf16.msra.mxu0 %v28352_v61  ;;  %24618 = vmatprep.mubr.bf16.mxu0 %v5009_v5  ;;  %v28355_v61 = vld [vmem:[%s33498_s1 + $0x398] sm:$0xff]   ;;  %v30014_v5 = vld [vmem:[%s28951_s29 + $0x201] sm:$0xff] }
 0x370   : > { %24648 = vmatprep.subr.bf16.mxu0 %v28353_v8  ;;  %33671 = vst [vmem:[#allocation4_spill] sm:$0xff] %v30014_v5 }
 0x373   : > { %24649 = vmatpush3.bf16.msra.mxu0 %v28353_v8  ;;  %v28358_v8 = vld [vmem:[%s33498_s1 + $0x3b0] sm:$0xff]  }
 0x374   : > { %24650 = vmatprep.subr.bf16.mxu0 %v28354_v51 }
 0x376   : > { %24619 = vmatmul.mubr.bf16.gmra.mrb[4].mxu0 %v5010_v9  ;;  %v5015_v9 = vpack.c.bf16 %v30014_v5, %v29698_v57  ;;  %v28360_v57 = vld [vmem:[%s33498_s1 + $0x3c0] sm:$0xff]  }
 0x377   : > { %24622 = vmatprep.mubr.bf16.mxu0 %v5011_v20  ;;  %24651 = vmatpush3.bf16.msra.mxu0 %v28354_v51  ;;  %v5014_v51 = vpack.c.bf16 %v30011_v52, %v30008_v46  ;;  %v28359_v20 = vld [vmem:[%s33498_s1 + $0x3b8] sm:$0xff]  }
 0x378   : > { %24652 = vmatprep.subr.bf16.mxu0 %v28355_v61 }
 0x37b   : > { %24653 = vmatpush3.bf16.msra.mxu0 %v28355_v61  ;;  %v30027_v61 = vld [vmem:[%s28951_s29 + $0x211] sm:$0xff] }
 0x37c   : > { %24654 = vmatprep.subr.bf16.mxu0 %v28356_v18 }
 0x37e   : > { %24623 = vmatmul.mubr.bf16.gmra.mrb[8].mxu0 %v5012_v29  ;;  %v30033_v29 = vld [vmem:[%s28951_s29 + $0x231] sm:$0xff] }
 0x37f   : > { %24626 = vmatprep.mubr.bf16.mxu0 %v5013_v38  ;;  %24655 = vmatpush3.bf16.msra.mxu0 %v28356_v18  ;;  %v30030_v18 = vld [vmem:[%s28951_s29 + $0x221] sm:$0xff] }
 0x380   : > { %24656 = vmatprep.subr.bf16.mxu0 %v28357_v14  ;;  %33672 = vst [vmem:[#allocation5_spill] sm:$0xff] %v30030_v18  ;;  %v30036_v38 = vld [vmem:[%s28951_s29 + $0x241] sm:$0xff] }
 0x381   : > { %33673 = vst [vmem:[#allocation6_spill] sm:$0xff] %v30036_v38 }
 0x383   : > { %24657 = vmatpush3.bf16.msra.mxu0 %v28357_v14  ;;  %v5016_v14 = vpack.c.bf16 %v30030_v18, %v30027_v61  ;;  %v5019_v18 = vpack.c.bf16 %v29720_v37, %v29715_v11 }
 0x384   : > { %24658 = vmatprep.subr.bf16.mxu0 %v28358_v8 }
 0x386   : > { %24627 = vmatmul.mubr.bf16.gmra.mrb[12].mxu0 %v5014_v51  ;;  %v5017_v51 = vpack.c.bf16 %v30036_v38, %v30033_v29  ;;  %v30063_v38 = vld [vmem:[%s28951_s29 + $0xc2] sm:$0xff] }
 0x387   : > { %24630 = vmatprep.mubr.bf16.mxu0 %v5015_v9  ;;  %24659 = vmatpush3.bf16.msra.mxu0 %v28358_v8  ;;  %v30046_v8 = vld [vmem:[%s28951_s29 + $0x251] sm:$0xff]  ;;  %v30049_v9 = vld [vmem:[%s28951_s29 + $0x261] sm:$0xff]  ;;  %v5377_v37 = vpack.c.bf16 %v30063_v38, %v29743_v44 }
 0x388   : > { %24660 = vmatprep.subr.bf16.mxu0 %v28359_v20  ;;  %v5018_v5 = vpack.c.bf16 %v30049_v9, %v30046_v8  ;;  %v28361_v44 = vld [vmem:[%s33498_s1 + $0x3c8] sm:$0xff]  }
 0x38b   : > { %24661 = vmatpush3.bf16.msra.mxu0 %v28359_v20  ;;  %v5020_v20 = vpack.c.bf16 %v29726_v41, %v29723_v16  ;;  %v30070_v16 = vld [vmem:[%s28951_s29 + $0xd2] sm:$0xff]  ;;  %v30073_v41 = vld [vmem:[%s28951_s29 + $0xe2] sm:$0xff] }
 0x38c   : > { %24694 = vmatprep.subr.bf16.mxu0 %v28360_v57 }
 0x38e   : > { %24631 = vmatmul.mubr.bf16.gmra.mrb[16].mxu0 %v5016_v14  ;;  %v5021_v14 = vpack.c.bf16 %v29736_v31, %v29729_v22  ;;  %v30076_v22 = vld [vmem:[%s28951_s29 + $0xf2] sm:$0xff]  ;;  %v30079_v31 = vld [vmem:[%s28951_s29 + $0x102] sm:$0xff] }
 0x38f   : > { %24634 = vmatprep.mubr.bf16.mxu0 %v5017_v51  ;;  %v30060_v51 = vld [vmem:[%s28951_s29 + $0x301] sm:$0xff]  ;;  %33674 = vst [vmem:[#allocation7_spill] sm:$0xff] %v30079_v31 }
 0x390   : > { %v5022_v11 = vpack.c.bf16 %v30060_v51, %v29739_v43  ;;  %v5379_v43 = vpack.c.bf16 %v30079_v31, %v30076_v22  ;;  %v30111_v31 = vld [vmem:[%s28951_s29 + $0x182] sm:$0xff] }
 0x391   : > { %33679 = vst [vmem:[#allocation12_spill] sm:$0xff] %v30111_v31 }
 0x396   : > { %24635 = vmatmul.mubr.bf16.gmra.mrb[20].mxu0 %v5018_v5  ;;  %v5378_v5 = vpack.c.bf16 %v30073_v41, %v30070_v16 }
 0x397   : > { %24638 = vmatprep.mubr.bf16.mxu0 %v5019_v18  ;;  %v30089_v18 = vld [vmem:[%s28951_s29 + $0x112] sm:$0xff] }
 0x398   : > { %33675 = vst [vmem:[#allocation8_spill] sm:$0xff] %v30089_v18 }
 0x39e   : > { %24639 = vmatmul.mubr.bf16.gmra.mrb[24].mxu0 %v5020_v20  ;;  %v30092_v20 = vld [vmem:[%s28951_s29 + $0x122] sm:$0xff] }
 0x39f   : > { %24642 = vmatprep.mubr.bf16.mxu0 %v5021_v14  ;;  %33676 = vst [vmem:[#allocation9_spill] sm:$0xff] %v30092_v20  ;;  %v30095_v14 = vld [vmem:[%s28951_s29 + $0x162] sm:$0xff] }
 0x3a0   : > { %33677 = vst [vmem:[#allocation10_spill] sm:$0xff] %v30095_v14 }
 0x3a6   : > { %24643 = vmatmul.mubr.bf16.gmra.mrb[28].mxu0 %v5022_v11  ;;  %v28362_v11 = vld [vmem:[%s33498_s1 + $0x3d0] sm:$0xff]  }
 0x3a7   : > { %24662 = vmatprep.mubr.bf16.mxu0 %v5377_v37  ;;  %v5380_v37 = vpack.c.bf16 %v30092_v20, %v30089_v18  ;;  %v30114_v20 = vld [vmem:[%s28951_s29 + $0x192] sm:$0xff]  ;;  %v30133_v18 = vld [vmem:[%s28951_s29 + $0x1c2] sm:$0xff] }
 0x3a8   : > { %33680 = vst [vmem:[#allocation13_spill] sm:$0xff] %v30114_v20  ;;  %33683 = vst [vmem:[#allocation16_spill] sm:$0xff] %v30133_v18 }
 0x3ae   : > { %24663 = vmatmul.mubr.bf16.vlgmr.msra.gmra.mrb[0].mxu0 %v5378_v5  ;;  %v28363_v5 = vld [vmem:[%s33498_s1 + $0x3d8] sm:$0xff]  }
 0x3af   : > { %24695 = vmatpush3.bf16.msra.mxu0 %v28360_v57  ;;  %24666 = vmatprep.mubr.bf16.mxu0 %v5379_v43  ;;  %v5381_v57 = vpack.c.bf16 %v30095_v14, %v29755_v49  ;;  %v30108_v43 = vld [vmem:[%s28951_s29 + $0x172] sm:$0xff]  ;;  %v28364_v49 = vld [vmem:[%s33498_s1 + $0x3e0] sm:$0xff]  }
 0x3b0   : > { %24696 = vmatprep.subr.bf16.mxu0 %v28361_v44  ;;  %33678 = vst [vmem:[#allocation11_spill] sm:$0xff] %v30108_v43  ;;  %v30130_v14 = vld [vmem:[%s28951_s29 + $0x1b2] sm:$0xff] }
 0x3b1   : > { %33682 = vst [vmem:[#allocation15_spill] sm:$0xff] %v30130_v14 }
 0x3b3   : > { %24697 = vmatpush3.bf16.msra.mxu0 %v28361_v44  ;;  %v30117_v44 = vld [vmem:[%s28951_s29 + $0x1a2] sm:$0xff] }
 0x3b4   : > { %24698 = vmatprep.subr.bf16.mxu0 %v28362_v11  ;;  %33681 = vst [vmem:[#allocation14_spill] sm:$0xff] %v30117_v44 }
 0x3b6   : > { %24667 = vmatmul.mubr.bf16.gmra.mrb[4].mxu0 %v5380_v37  ;;  %v5382_v37 = vpack.c.bf16 %v30111_v31, %v30108_v43  ;;  %v30136_v31 = vld [vmem:[%s28951_s29 + $0x202] sm:$0xff]  ;;  %v30155_v43 = vld [vmem:[%s28951_s29 + $0x232] sm:$0xff] }
 0x3b7   : > { %24670 = vmatprep.mubr.bf16.mxu0 %v5381_v57  ;;  %24699 = vmatpush3.bf16.msra.mxu0 %v28362_v11  ;;  %v5383_v57 = vpack.c.bf16 %v30117_v44, %v30114_v20  ;;  %v28365_v11 = vld [vmem:[%s33498_s1 + $0x3e8] sm:$0xff]   ;;  %33684 = vst [vmem:[#allocation17_spill] sm:$0xff] %v30136_v31  ;;  %v5384_v44 = vpack.c.bf16 %v30133_v18, %v30130_v14 }
 0x3b8   : > { %24700 = vmatprep.subr.bf16.mxu0 %v28363_v5  ;;  %v30152_v20 = vld [vmem:[%s28951_s29 + $0x222] sm:$0xff]  ;;  %v5389_v14 = vpack.c.bf16 %v29797_v2, %v29792_v23  ;;  %v5749_v23 = vpack.c.bf16 %v29832_v25, %v29829_v56  ;;  %v5750_v2 = vpack.c.bf16 %v29845_v4, %v29835_v26  ;;  %v5753_v56 = vpack.c.bf16 %v29870_v53, %v29867_v47  ;;  %v21352_v4 = vld [vmem:[%s28951_s29 + $0x1d0] sm:$0xff]  ;;  %v28375_v47 = vld [vmem:[%s33498_s1 + $0x438] sm:$0xff]  }
 0x3b9   : > { %v30158_v18 = vld [vmem:[%s28951_s29 + $0x242] sm:$0xff]  ;;  %v5754_v25 = vpack.c.bf16 %v29886_v59, %v29873_v60  ;;  %v5757_v60 = vpack.c.bf16 %v29911_v10, %v29908_v27  ;;  %v5758_v59 = vpack.c.bf16 %v29924_v19, %v29914_v3  ;;  %v21364_v10 = vld [vmem:[%s28951_s29 + $0x2d0] sm:$0xff] }
 0x3ba   : > { %33685 = vst [vmem:[#allocation18_spill] sm:$0xff] %v30158_v18  ;;  %v28373_v26 = vld [vmem:[%s33498_s1 + $0x428] sm:$0xff]   ;;  %v28376_v53 = vld [vmem:[%s33498_s1 + $0x440] sm:$0xff]  }
 0x3bb   : > { %24701 = vmatpush3.bf16.msra.mxu0 %v28363_v5  ;;  %v28366_v5 = vld [vmem:[%s33498_s1 + $0x3f0] sm:$0xff]   ;;  %v21363_v27 = vld [vmem:[%s28951_s29 + $0x2c0] sm:$0xff] }
 0x3bc   : > { %24702 = vmatprep.subr.bf16.mxu0 %v28364_v49  ;;  %v30243_v3 = vpack.c.bf16 %v21364_v10, %v21363_v27  ;;  %v28387_v27 = vld [vmem:[%s33498_s1 + $0x498] sm:$0xff]   ;;  %v28388_v10 = vld [vmem:[%s33498_s1 + $0x4a0] sm:$0xff]  }
 0x3be   : > { %24671 = vmatmul.mubr.bf16.gmra.mrb[8].mxu0 %v5382_v37  ;;  %v5385_v37 = vpack.c.bf16 %v30136_v31, %v29775_v62  ;;  %v28368_v62 = vld [vmem:[%s33498_s1 + $0x400] sm:$0xff]  }
 0x3bf   : > { %24674 = vmatprep.mubr.bf16.mxu0 %v5383_v57  ;;  %24703 = vmatpush3.bf16.msra.mxu0 %v28364_v49  ;;  %v28367_v57 = vld [vmem:[%s33498_s1 + $0x3f8] sm:$0xff]  }
 0x3c0   : > { %24704 = vmatprep.subr.bf16.mxu0 %v28365_v11  ;;  %v30149_v49 = vld [vmem:[%s28951_s29 + $0x212] sm:$0xff] }
 0x3c3   : > { %24705 = vmatpush3.bf16.msra.mxu0 %v28365_v11  ;;  %v5386_v11 = vpack.c.bf16 %v30152_v20, %v30149_v49 }
 0x3c4   : > { %24706 = vmatprep.subr.bf16.mxu0 %v28366_v5 }
 0x3c6   : > { %24675 = vmatmul.mubr.bf16.gmra.mrb[12].mxu0 %v5384_v44  ;;  %v5387_v44 = vpack.c.bf16 %v30158_v18, %v30155_v43  ;;  %v5390_v18 = vpack.c.bf16 %v29803_v33, %v29800_v7  ;;  %v28369_v7 = vld [vmem:[%s33498_s1 + $0x408] sm:$0xff]   ;;  %v21344_v33 = vld [vmem:[%s28951_s29 + $0x130] sm:$0xff] }
 0x3c7   : > { %24678 = vmatprep.mubr.bf16.mxu0 %v5385_v37  ;;  %24707 = vmatpush3.bf16.msra.mxu0 %v28366_v5  ;;  %v30168_v5 = vld [vmem:[%s28951_s29 + $0x252] sm:$0xff]  ;;  %v30171_v37 = vld [vmem:[%s28951_s29 + $0x262] sm:$0xff] }
 0x3c8   : > { %24708 = vmatprep.subr.bf16.mxu0 %v28367_v57  ;;  %33686 = vst [vmem:[#allocation19_spill] sm:$0xff] %v30171_v37  ;;  %v5388_v31 = vpack.c.bf16 %v30171_v37, %v30168_v5  ;;  %v5748_v37 = vpack.c.bf16 %v29826_v48, %v29819_v17  ;;  %v28371_v17 = vld [vmem:[%s33498_s1 + $0x418] sm:$0xff]   ;;  %v28372_v48 = vld [vmem:[%s33498_s1 + $0x420] sm:$0xff]  }
 0x3cb   : > { %24709 = vmatpush3.bf16.msra.mxu0 %v28367_v57  ;;  %v5391_v57 = vpack.c.bf16 %v29813_v40, %v29806_v39  ;;  %v28370_v39 = vld [vmem:[%s33498_s1 + $0x410] sm:$0xff]   ;;  %v5751_v40 = vpack.c.bf16 %v21344_v33, %v29848_v12  ;;  %v33688_v33 = vld [vmem:[#allocation5_spill] sm:$0xff] }
 0x3cc   : > { %24742 = vmatprep.subr.bf16.mxu0 %v28368_v62  ;;  %v28374_v12 = vld [vmem:[%s33498_s1 + $0x430] sm:$0xff]  }
 0x3ce   : > { %24679 = vmatmul.mubr.bf16.gmra.mrb[16].mxu0 %v5386_v11  ;;  %v30182_v11 = vld [vmem:[%s28951_s29 + $0x302] sm:$0xff] }
 0x3cf   : > { %24682 = vmatprep.mubr.bf16.mxu0 %v5387_v44  ;;  %v5392_v44 = vpack.c.bf16 %v30182_v11, %v29816_v15  ;;  %v5752_v15 = vpack.c.bf16 %v29864_v30, %v29851_v35  ;;  %v5755_v35 = vpack.c.bf16 %v21352_v4, %v29889_v55  ;;  %v5756_v30 = vpack.c.bf16 %v29905_v58, %v29892_v6  ;;  %v21360_v55 = vld [vmem:[%s28951_s29 + $0x270] sm:$0xff]  ;;  %v21361_v6 = vld [vmem:[%s28951_s29 + $0x2a0] sm:$0xff] }
 0x3d0   : > { %v21362_v58 = vld [vmem:[%s28951_s29 + $0x2b0] sm:$0xff]  ;;  %v21421_v4 = vld [vmem:[%s28951_s29 + $0x2e1] sm:$0xff] }
 0x3d6   : > { %24683 = vmatmul.mubr.bf16.gmra.mrb[20].mxu0 %v5388_v31  ;;  %v5759_v31 = vpack.c.bf16 %v21360_v55, %v29927_v34 }
 0x3d7   : > { %24686 = vmatprep.mubr.bf16.mxu0 %v5389_v14  ;;  %v21365_v14 = vld [vmem:[%s28951_s29 + $0x2e0] sm:$0xff] }
 0x3de   : > { %24687 = vmatmul.mubr.bf16.gmra.mrb[24].mxu0 %v5390_v18  ;;  %v30236_v18 = vpack.c.bf16 %v21362_v58, %v21361_v6  ;;  %v28385_v6 = vld [vmem:[%s33498_s1 + $0x488] sm:$0xff]   ;;  %v21456_v58 = vld [vmem:[%s28951_s29 + $0x132] sm:$0xff] }
 0x3df   : > { %24690 = vmatprep.mubr.bf16.mxu0 %v5391_v57  ;;  %v6118_v57 = vpack.c.bf16 %v29948_v0, %v29941_v45  ;;  %v6122_v0 = vpack.c.bf16 %v29986_v63, %v29973_v13  ;;  %v21408_v13 = vld [vmem:[%s28951_s29 + $0x1d1] sm:$0xff] }
 0x3e0   : > { %v28382_v63 = vld [vmem:[%s33498_s1 + $0x470] sm:$0xff]  }
 0x3e6   : > { %24691 = vmatmul.mubr.bf16.gmra.mrb[28].mxu0 %v5392_v44  ;;  %v6119_v44 = vpack.c.bf16 %v29954_v21, %v29951_v1  ;;  %v28379_v1 = vld [vmem:[%s33498_s1 + $0x458] sm:$0xff]   ;;  %v28380_v21 = vld [vmem:[%s33498_s1 + $0x460] sm:$0xff]  }
 0x3e7   : > { %24710 = vmatprep.mubr.bf16.mxu0 %v5748_v37  ;;  %v21368_v37 = vld [vmem:[%s28951_s29 + $0x310] sm:$0xff] }
 0x3e8   : > { %v5763_v34 = vpack.c.bf16 %v21368_v37, %v29938_v32  ;;  %v28378_v32 = vld [vmem:[%s33498_s1 + $0x450] sm:$0xff]  }
 0x3ee   : > { %24711 = vmatmul.mubr.bf16.vlgmr.msra.gmra.mrb[0].mxu0 %v5749_v23  ;;  %v6120_v23 = vpack.c.bf16 %v29967_v54, %v29957_v28  ;;  %v6123_v28 = vpack.c.bf16 %v29992_v42, %v29989_v24  ;;  %v6124_v54 = vpack.c.bf16 %v30008_v46, %v29995_v36  ;;  %v6125_v24 = vpack.c.bf16 %v21408_v13, %v30011_v52  ;;  %v33687_v42 = vld [vmem:[#allocation4_spill] sm:$0xff]  ;;  %v28383_v46 = vld [vmem:[%s33498_s1 + $0x478] sm:$0xff]  }
 0x3ef   : > { %24743 = vmatpush3.bf16.msra.mxu0 %v28368_v62  ;;  %24714 = vmatprep.mubr.bf16.mxu0 %v5750_v2  ;;  %v21366_v62 = vld [vmem:[%s28951_s29 + $0x2f0] sm:$0xff]  ;;  %v28377_v2 = vld [vmem:[%s33498_s1 + $0x448] sm:$0xff]   ;;  %v6126_v36 = vpack.c.bf16 %v30027_v61, %v33687_v42  ;;  %v28384_v52 = vld [vmem:[%s33498_s1 + $0x480] sm:$0xff]   ;;  %v6127_v61 = vpack.c.bf16 %v30033_v29, %v33688_v33 }
 0x3f0   : > { %24744 = vmatprep.subr.bf16.mxu0 %v28369_v7  ;;  %v30245_v19 = vpack.c.bf16 %v21366_v62, %v21365_v14  ;;  %v21419_v29 = vld [vmem:[%s28951_s29 + $0x2c1] sm:$0xff]  ;;  %v21472_v13 = vld [vmem:[%s28951_s29 + $0x272] sm:$0xff] }
 0x3f1   : > { %v33695_v14 = vld [vmem:[#allocation12_spill] sm:$0xff]  ;;  %v33696_v62 = vld [vmem:[#allocation13_spill] sm:$0xff]  ;;  %v33702_v42 = vld [vmem:[#allocation19_spill] sm:$0xff] }
 0x3f2   : > { %v6493_v37 = vpack.c.bf16 %v33696_v62, %v33695_v14  ;;  %v30447_v14 = vld [vmem:[%s28951_s29 + $0x240] sm:$0xff]  ;;  %v30450_v62 = vld [vmem:[%s28951_s29 + $0x250] sm:$0xff] }
 0x3f3   : > { %24745 = vmatpush3.bf16.msra.mxu0 %v28369_v7  ;;  %v21400_v7 = vld [vmem:[%s28951_s29 + $0x131] sm:$0xff] }
 0x3f4   : > { %24746 = vmatprep.subr.bf16.mxu0 %v28370_v39  ;;  %v6121_v45 = vpack.c.bf16 %v21400_v7, %v29970_v50  ;;  %v28381_v50 = vld [vmem:[%s33498_s1 + $0x468] sm:$0xff]   ;;  %v28390_v7 = vld [vmem:[%s33498_s1 + $0x4b0] sm:$0xff]  }
 0x3f6   : > { %24715 = vmatmul.mubr.bf16.gmra.mrb[4].mxu0 %v5751_v40 }
 0x3f7   : > { %24718 = vmatprep.mubr.bf16.mxu0 %v5752_v15  ;;  %24747 = vmatpush3.bf16.msra.mxu0 %v28370_v39  ;;  %v33689_v39 = vld [vmem:[#allocation6_spill] sm:$0xff] }
 0x3f8   : > { %24748 = vmatprep.subr.bf16.mxu0 %v28371_v17  ;;  %v6128_v40 = vpack.c.bf16 %v30046_v8, %v33689_v39  ;;  %v21416_v15 = vld [vmem:[%s28951_s29 + $0x271] sm:$0xff] }
 0x3f9   : > { %v21480_v39 = vld [vmem:[%s28951_s29 + $0x312] sm:$0xff] }
 0x3fb   : > { %24749 = vmatpush3.bf16.msra.mxu0 %v28371_v17  ;;  %v21417_v17 = vld [vmem:[%s28951_s29 + $0x2a1] sm:$0xff] }
 0x3fc   : > { %24750 = vmatprep.subr.bf16.mxu0 %v28372_v48 }
 0x3fe   : > { %24719 = vmatmul.mubr.bf16.gmra.mrb[8].mxu0 %v5753_v56  ;;  %v6129_v56 = vpack.c.bf16 %v21416_v15, %v30049_v9  ;;  %v30382_v15 = vld [vmem:[%s28951_s29 + $0x150] sm:$0xff] }
 0x3ff   : > { %24722 = vmatprep.mubr.bf16.mxu0 %v5754_v25  ;;  %24751 = vmatpush3.bf16.msra.mxu0 %v28372_v48  ;;  %v21418_v48 = vld [vmem:[%s28951_s29 + $0x2b1] sm:$0xff] }
 0x400   : > { %24752 = vmatprep.subr.bf16.mxu0 %v28373_v26  ;;  %v30301_v25 = vpack.c.bf16 %v21418_v48, %v21417_v17  ;;  %v6503_v17 = vpack.c.bf16 %v21480_v39, %v30182_v11  ;;  %v28401_v39 = vld [vmem:[%s33498_s1 + $0x508] sm:$0xff]  }
 0x403   : > { %24753 = vmatpush3.bf16.msra.mxu0 %v28373_v26  ;;  %v21420_v26 = vld [vmem:[%s28951_s29 + $0x2d1] sm:$0xff] }
 0x404   : > { %24754 = vmatprep.subr.bf16.mxu0 %v28374_v12  ;;  %v30308_v8 = vpack.c.bf16 %v21420_v26, %v21419_v29  ;;  %v30390_v29 = vld [vmem:[%s28951_s29 + $0x170] sm:$0xff]  ;;  %v30393_v26 = vld [vmem:[%s28951_s29 + $0x180] sm:$0xff] }
 0x406   : > { %24723 = vmatmul.mubr.bf16.gmra.mrb[12].mxu0 %v5755_v35 }
 0x407   : > { %24726 = vmatprep.mubr.bf16.mxu0 %v5756_v30  ;;  %24755 = vmatpush3.bf16.msra.mxu0 %v28374_v12  ;;  %v21422_v12 = vld [vmem:[%s28951_s29 + $0x2f1] sm:$0xff] }
 0x408   : > { %24756 = vmatprep.subr.bf16.mxu0 %v28375_v47  ;;  %v30310_v35 = vpack.c.bf16 %v21422_v12, %v21421_v4  ;;  %v21424_v30 = vld [vmem:[%s28951_s29 + $0x311] sm:$0xff] }
 0x409   : > { %v6133_v9 = vpack.c.bf16 %v21424_v30, %v30060_v51  ;;  %v33692_v51 = vld [vmem:[#allocation9_spill] sm:$0xff]  ;;  %v30396_v4 = vld [vmem:[%s28951_s29 + $0x190] sm:$0xff] }
 0x40a   : > { %v6861_v11 = vpack.c.bf16 %v30396_v4, %v30393_v26  ;;  %v28393_v30 = vld [vmem:[%s33498_s1 + $0x4c8] sm:$0xff]  }
 0x40b   : > { %24757 = vmatpush3.bf16.msra.mxu0 %v28375_v47  ;;  %v6488_v47 = vpack.c.bf16 %v30070_v16, %v30063_v38  ;;  %v28386_v38 = vld [vmem:[%s33498_s1 + $0x490] sm:$0xff]   ;;  %v6491_v16 = vpack.c.bf16 %v21456_v58, %v33692_v51  ;;  %v28395_v58 = vld [vmem:[%s33498_s1 + $0x4d8] sm:$0xff]  }
 0x40c   : > { %24790 = vmatprep.subr.bf16.mxu0 %v28376_v53  ;;  %v30428_v51 = vld [vmem:[%s28951_s29 + $0x210] sm:$0xff] }
 0x40e   : > { %24727 = vmatmul.mubr.bf16.gmra.mrb[16].mxu0 %v5757_v60  ;;  %v33690_v60 = vld [vmem:[#allocation7_spill] sm:$0xff] }
 0x40f   : > { %24730 = vmatprep.mubr.bf16.mxu0 %v5758_v59  ;;  %v33691_v59 = vld [vmem:[#allocation8_spill] sm:$0xff] }
 0x410   : > { %v6490_v55 = vpack.c.bf16 %v33691_v59, %v33690_v60  ;;  %v30413_v60 = vld [vmem:[%s28951_s29 + $0x1f0] sm:$0xff] }
 0x411   : > { %v28394_v59 = vld [vmem:[%s33498_s1 + $0x4d0] sm:$0xff]  }
 0x416   : > { %24731 = vmatmul.mubr.bf16.gmra.mrb[20].mxu0 %v5759_v31 }
 0x417   : > { %24734 = vmatprep.mubr.bf16.mxu0 %v30236_v18 }
 0x41e   : > { %24735 = vmatmul.mubr.bf16.gmra.mrb[24].mxu0 %v30243_v3 }
 0x41f   : > { %24738 = vmatprep.mubr.bf16.mxu0 %v30245_v19 }
 0x426   : > { %24739 = vmatmul.mubr.bf16.gmra.mrb[28].mxu0 %v5763_v34  ;;  %v33697_v34 = vld [vmem:[#allocation14_spill] sm:$0xff] }
 0x427   : > { %24758 = vmatprep.mubr.bf16.mxu0 %v6118_v57  ;;  %v33698_v57 = vld [vmem:[#allocation15_spill] sm:$0xff] }
 0x42e   : > { %24759 = vmatmul.mubr.bf16.vlgmr.msra.gmra.mrb[0].mxu0 %v6119_v44  ;;  %v6494_v44 = vpack.c.bf16 %v33698_v57, %v33697_v34  ;;  %v30454_v34 = vld [vmem:[%s28951_s29 + $0x290] sm:$0xff] }
 0x42f   : > { %24791 = vmatpush3.bf16.msra.mxu0 %v28376_v53  ;;  %24762 = vmatprep.mubr.bf16.mxu0 %v6120_v23  ;;  %v6489_v53 = vpack.c.bf16 %v30076_v22, %v30073_v41  ;;  %v33693_v41 = vld [vmem:[#allocation10_spill] sm:$0xff]  ;;  %v33694_v22 = vld [vmem:[#allocation11_spill] sm:$0xff]  ;;  %v28389_v23 = vld [vmem:[%s33498_s1 + $0x4a8] sm:$0xff]  }
 0x430   : > { %24792 = vmatprep.subr.bf16.mxu0 %v28377_v2  ;;  %v6492_v31 = vpack.c.bf16 %v33694_v22, %v33693_v41  ;;  %v30434_v41 = vld [vmem:[%s28951_s29 + $0x230] sm:$0xff]  ;;  %v28396_v22 = vld [vmem:[%s33498_s1 + $0x4e0] sm:$0xff]  }
 0x431   : > { %v28398_v57 = vld [vmem:[%s33498_s1 + $0x4f0] sm:$0xff]  }
 0x433   : > { %24793 = vmatpush3.bf16.msra.mxu0 %v28377_v2  ;;  %v21464_v2 = vld [vmem:[%s28951_s29 + $0x1d2] sm:$0xff] }
 0x434   : > { %24794 = vmatprep.subr.bf16.mxu0 %v28378_v32 }
 0x436   : > { %24763 = vmatmul.mubr.bf16.gmra.mrb[4].mxu0 %v6121_v45 }
 0x437   : > { %24766 = vmatprep.mubr.bf16.mxu0 %v6122_v0  ;;  %24795 = vmatpush3.bf16.msra.mxu0 %v28378_v32  ;;  %v33699_v32 = vld [vmem:[#allocation16_spill] sm:$0xff]  ;;  %v33700_v0 = vld [vmem:[#allocation17_spill] sm:$0xff] }
 0x438   : > { %24796 = vmatprep.subr.bf16.mxu0 %v28379_v1  ;;  %v6495_v45 = vpack.c.bf16 %v21464_v2, %v33699_v32  ;;  %v28399_v2 = vld [vmem:[%s33498_s1 + $0x4f8] sm:$0xff]   ;;  %v21529_v32 = vld [vmem:[%s28951_s29 + $0x320] sm:$0xff] }
 0x43b   : > { %24797 = vmatpush3.bf16.msra.mxu0 %v28379_v1  ;;  %v6496_v1 = vpack.c.bf16 %v30149_v49, %v33700_v0  ;;  %v6497_v49 = vpack.c.bf16 %v30155_v43, %v30152_v20  ;;  %v21475_v20 = vld [vmem:[%s28951_s29 + $0x2c2] sm:$0xff]  ;;  %v21476_v43 = vld [vmem:[%s28951_s29 + $0x2d2] sm:$0xff] }
 0x43c   : > { %24798 = vmatprep.subr.bf16.mxu0 %v28380_v21  ;;  %v30373_v33 = vpack.c.bf16 %v21476_v43, %v21475_v20  ;;  %v30512_v20 = vld [vmem:[%s28951_s29 + $0x181] sm:$0xff]  ;;  %v30515_v43 = vld [vmem:[%s28951_s29 + $0x191] sm:$0xff] }
 0x43e   : > { %24767 = vmatmul.mubr.bf16.gmra.mrb[8].mxu0 %v6123_v28  ;;  %v28392_v28 = vld [vmem:[%s33498_s1 + $0x4c0] sm:$0xff]  }
 0x43f   : > { %24770 = vmatprep.mubr.bf16.mxu0 %v6124_v54  ;;  %24799 = vmatpush3.bf16.msra.mxu0 %v28380_v21  ;;  %v28391_v21 = vld [vmem:[%s33498_s1 + $0x4b8] sm:$0xff]   ;;  %v33701_v54 = vld [vmem:[#allocation18_spill] sm:$0xff] }
 0x440   : > { %24800 = vmatprep.subr.bf16.mxu0 %v28381_v50 }
 0x443   : > { %24801 = vmatpush3.bf16.msra.mxu0 %v28381_v50  ;;  %v6498_v50 = vpack.c.bf16 %v30168_v5, %v33701_v54  ;;  %v21477_v5 = vld [vmem:[%s28951_s29 + $0x2e2] sm:$0xff]  ;;  %v30496_v54 = vld [vmem:[%s28951_s29 + $0x390] sm:$0xff] }
 0x444   : > { %24802 = vmatprep.subr.bf16.mxu0 %v28382_v63 }
 0x446   : > { %24771 = vmatmul.mubr.bf16.gmra.mrb[12].mxu0 %v6125_v24  ;;  %v21474_v24 = vld [vmem:[%s28951_s29 + $0x2b2] sm:$0xff] }
 0x447   : > { %24774 = vmatprep.mubr.bf16.mxu0 %v6126_v36  ;;  %24803 = vmatpush3.bf16.msra.mxu0 %v28382_v63  ;;  %v21473_v63 = vld [vmem:[%s28951_s29 + $0x2a2] sm:$0xff]  ;;  %v6499_v36 = vpack.c.bf16 %v21472_v13, %v33702_v42  ;;  %v30500_v13 = vld [vmem:[%s28951_s29 + $0x151] sm:$0xff] }
 0x448   : > { %24804 = vmatprep.subr.bf16.mxu0 %v28383_v46  ;;  %v30506_v42 = vld [vmem:[%s28951_s29 + $0x161] sm:$0xff] }
 0x44b   : > { %24805 = vmatpush3.bf16.msra.mxu0 %v28383_v46  ;;  %v30366_v46 = vpack.c.bf16 %v21474_v24, %v21473_v63 }
 0x44c   : > { %24838 = vmatprep.subr.bf16.mxu0 %v28384_v52 }
 0x44e   : > { %24775 = vmatmul.mubr.bf16.gmra.mrb[16].mxu0 %v6127_v61 }
 0x44f   : > { %24778 = vmatprep.mubr.bf16.mxu0 %v6128_v40  ;;  %v21505_v40 = vld [vmem:[%s28951_s29 + $0x140] sm:$0xff] }
 0x450   : > { %v6859_v48 = vpack.c.bf16 %v30382_v15, %v21505_v40  ;;  %v30525_v40 = vld [vmem:[%s28951_s29 + $0x1a1] sm:$0xff] }
 0x456   : > { %24779 = vmatmul.mubr.bf16.gmra.mrb[20].mxu0 %v6129_v56  ;;  %v30387_v56 = vld [vmem:[%s28951_s29 + $0x160] sm:$0xff] }
 0x457   : > { %24782 = vmatprep.mubr.bf16.mxu0 %v30301_v25  ;;  %v6860_v12 = vpack.c.bf16 %v30390_v29, %v30387_v56 }
 0x45e   : > { %24783 = vmatmul.mubr.bf16.gmra.mrb[24].mxu0 %v30308_v8 }
 0x45f   : > { %24786 = vmatprep.mubr.bf16.mxu0 %v30310_v35 }
 0x466   : > { %24787 = vmatmul.mubr.bf16.gmra.mrb[28].mxu0 %v6133_v9  ;;  %v30406_v9 = vld [vmem:[%s28951_s29 + $0x1a0] sm:$0xff] }
 0x467   : > { %24806 = vmatprep.mubr.bf16.mxu0 %v6488_v47  ;;  %v30409_v47 = vld [vmem:[%s28951_s29 + $0x1b0] sm:$0xff] }
 0x46e   : > { %24807 = vmatmul.mubr.bf16.vlgmr.msra.gmra.mrb[0].mxu0 %v6489_v53  ;;  %v21513_v53 = vld [vmem:[%s28951_s29 + $0x1e0] sm:$0xff] }
 0x46f   : > { %24839 = vmatpush3.bf16.msra.mxu0 %v28384_v52  ;;  %24810 = vmatprep.mubr.bf16.mxu0 %v6490_v55  ;;  %v21478_v52 = vld [vmem:[%s28951_s29 + $0x2f2] sm:$0xff]  ;;  %v6862_v55 = vpack.c.bf16 %v30409_v47, %v30406_v9 }
 0x470   : > { %24840 = vmatprep.subr.bf16.mxu0 %v28385_v6  ;;  %v30375_v61 = vpack.c.bf16 %v21478_v52, %v21477_v5  ;;  %v7231_v52 = vpack.c.bf16 %v30515_v43, %v30512_v20 }
 0x473   : > { %24841 = vmatpush3.bf16.msra.mxu0 %v28385_v6  ;;  %v6863_v6 = vpack.c.bf16 %v30413_v60, %v21513_v53 }
 0x474   : > { %24842 = vmatprep.subr.bf16.mxu0 %v28386_v38 }
 0x476   : > { %24811 = vmatmul.mubr.bf16.gmra.mrb[4].mxu0 %v6491_v16  ;;  %v30431_v16 = vld [vmem:[%s28951_s29 + $0x220] sm:$0xff] }
 0x477   : > { %24814 = vmatprep.mubr.bf16.mxu0 %v6492_v31  ;;  %24843 = vmatpush3.bf16.msra.mxu0 %v28386_v38  ;;  %v30425_v38 = vld [vmem:[%s28951_s29 + $0x200] sm:$0xff] }
 0x478   : > { %24844 = vmatprep.subr.bf16.mxu0 %v28387_v27  ;;  %v6864_v31 = vpack.c.bf16 %v30428_v51, %v30425_v38 }
 0x47b   : > { %24845 = vmatpush3.bf16.msra.mxu0 %v28387_v27  ;;  %v6865_v27 = vpack.c.bf16 %v30434_v41, %v30431_v16 }
 0x47c   : > { %24846 = vmatprep.subr.bf16.mxu0 %v28388_v10 }
 0x47e   : > { %24815 = vmatmul.mubr.bf16.gmra.mrb[8].mxu0 %v6493_v37  ;;  %v21521_v37 = vld [vmem:[%s28951_s29 + $0x280] sm:$0xff] }
 0x47f   : > { %24818 = vmatprep.mubr.bf16.mxu0 %v6494_v44  ;;  %24847 = vmatpush3.bf16.msra.mxu0 %v28388_v10  ;;  %v28397_v10 = vld [vmem:[%s33498_s1 + $0x4e8] sm:$0xff]   ;;  %v6866_v44 = vpack.c.bf16 %v30450_v62, %v30447_v14 }
 0x480   : > { %24848 = vmatprep.subr.bf16.mxu0 %v28389_v23 }
 0x483   : > { %24849 = vmatpush3.bf16.msra.mxu0 %v28389_v23  ;;  %v6867_v23 = vpack.c.bf16 %v30454_v34, %v21521_v37  ;;  %v28405_v37 = vld [vmem:[%s33498_s1 + $0x528] sm:$0xff]  }
 0x484   : > { %24850 = vmatprep.subr.bf16.mxu0 %v28390_v7 }
 0x486   : > { %24819 = vmatmul.mubr.bf16.gmra.mrb[12].mxu0 %v6495_v45  ;;  %v30472_v45 = vld [vmem:[%s28951_s29 + $0x330] sm:$0xff] }
 0x487   : > { %24822 = vmatprep.mubr.bf16.mxu0 %v6496_v1  ;;  %24851 = vmatpush3.bf16.msra.mxu0 %v28390_v7  ;;  %v28400_v7 = vld [vmem:[%s33498_s1 + $0x500] sm:$0xff]   ;;  %v6871_v0 = vpack.c.bf16 %v30472_v45, %v21529_v32 }
 0x488   : > { %24852 = vmatprep.subr.bf16.mxu0 %v28391_v21  ;;  %v30477_v1 = vld [vmem:[%s28951_s29 + $0x340] sm:$0xff] }
 0x48b   : > { %24853 = vmatpush3.bf16.msra.mxu0 %v28391_v21  ;;  %v30480_v21 = vld [vmem:[%s28951_s29 + $0x350] sm:$0xff] }
 0x48c   : > { %24886 = vmatprep.subr.bf16.mxu0 %v28392_v28 }
 0x48e   : > { %24823 = vmatmul.mubr.bf16.gmra.mrb[16].mxu0 %v6497_v49 }
 0x48f   : > { %24826 = vmatprep.mubr.bf16.mxu0 %v6498_v50  ;;  %v21561_v50 = vld [vmem:[%s28951_s29 + $0x141] sm:$0xff] }
 0x490   : > { %v7229_v24 = vpack.c.bf16 %v30500_v13, %v21561_v50  ;;  %v21585_v50 = vld [vmem:[%s28951_s29 + $0x321] sm:$0xff] }
 0x496   : > { %24827 = vmatmul.mubr.bf16.gmra.mrb[20].mxu0 %v6499_v36  ;;  %v30509_v36 = vld [vmem:[%s28951_s29 + $0x171] sm:$0xff] }
 0x497   : > { %24830 = vmatprep.mubr.bf16.mxu0 %v30366_v46  ;;  %v7230_v5 = vpack.c.bf16 %v30509_v36, %v30506_v42 }
 0x49e   : > { %24831 = vmatmul.mubr.bf16.gmra.mrb[24].mxu0 %v30373_v33 }
 0x49f   : > { %24834 = vmatprep.mubr.bf16.mxu0 %v30375_v61 }
 0x4a6   : > { %24835 = vmatmul.mubr.bf16.gmra.mrb[28].mxu0 %v6503_v17  ;;  %v30528_v17 = vld [vmem:[%s28951_s29 + $0x1b1] sm:$0xff] }
 0x4a7   : > { %24854 = vmatprep.mubr.bf16.mxu0 %v6859_v48  ;;  %v21569_v48 = vld [vmem:[%s28951_s29 + $0x1e1] sm:$0xff] }
 0x4ae   : > { %24855 = vmatmul.mubr.bf16.vlgmr.msra.gmra.mrb[0].mxu0 %v6860_v12  ;;  %v30532_v12 = vld [vmem:[%s28951_s29 + $0x1f1] sm:$0xff] }
 0x4af   : > { %24887 = vmatpush3.bf16.msra.mxu0 %v28392_v28  ;;  %24858 = vmatprep.mubr.bf16.mxu0 %v6861_v11  ;;  %v6872_v28 = vpack.c.bf16 %v30480_v21, %v30477_v1  ;;  %v28402_v11 = vld [vmem:[%s33498_s1 + $0x510] sm:$0xff]   ;;  %v7233_v53 = vpack.c.bf16 %v30532_v12, %v21569_v48 }
 0x4b0   : > { %24888 = vmatprep.subr.bf16.mxu0 %v28393_v30 }
 0x4b3   : > { %24889 = vmatpush3.bf16.msra.mxu0 %v28393_v30  ;;  %v7232_v30 = vpack.c.bf16 %v30528_v17, %v30525_v40 }
 0x4b4   : > { %24890 = vmatprep.subr.bf16.mxu0 %v28394_v59 }
 0x4b6   : > { %24859 = vmatmul.mubr.bf16.gmra.mrb[4].mxu0 %v6862_v55  ;;  %v30544_v55 = vld [vmem:[%s28951_s29 + $0x201] sm:$0xff] }
 0x4b7   : > { %24862 = vmatprep.mubr.bf16.mxu0 %v6863_v6  ;;  %24891 = vmatpush3.bf16.msra.mxu0 %v28394_v59  ;;  %v28403_v59 = vld [vmem:[%s33498_s1 + $0x518] sm:$0xff]  }
 0x4b8   : > { %24892 = vmatprep.subr.bf16.mxu0 %v28395_v58  ;;  %v30547_v6 = vld [vmem:[%s28951_s29 + $0x211] sm:$0xff] }
 0x4bb   : > { %24893 = vmatpush3.bf16.msra.mxu0 %v28395_v58  ;;  %v30550_v58 = vld [vmem:[%s28951_s29 + $0x221] sm:$0xff] }
 0x4bc   : > { %24894 = vmatprep.subr.bf16.mxu0 %v28396_v22 }
 0x4be   : > { %24863 = vmatmul.mubr.bf16.gmra.mrb[8].mxu0 %v6864_v31  ;;  %v28404_v31 = vld [vmem:[%s33498_s1 + $0x520] sm:$0xff]  }
 0x4bf   : > { %24866 = vmatprep.mubr.bf16.mxu0 %v6865_v27  ;;  %24895 = vmatpush3.bf16.msra.mxu0 %v28396_v22  ;;  %v30553_v22 = vld [vmem:[%s28951_s29 + $0x231] sm:$0xff]  ;;  %v7234_v27 = vpack.c.bf16 %v30547_v6, %v30544_v55 }
 0x4c0   : > { %24896 = vmatprep.subr.bf16.mxu0 %v28397_v10 }
 0x4c3   : > { %24897 = vmatpush3.bf16.msra.mxu0 %v28397_v10  ;;  %v7235_v10 = vpack.c.bf16 %v30553_v22, %v30550_v58 }
 0x4c4   : > { %24898 = vmatprep.subr.bf16.mxu0 %v28398_v57 }
 0x4c6   : > { %24867 = vmatmul.mubr.bf16.gmra.mrb[12].mxu0 %v6866_v44  ;;  %v30569_v44 = vld [vmem:[%s28951_s29 + $0x251] sm:$0xff] }
 0x4c7   : > { %24870 = vmatprep.mubr.bf16.mxu0 %v6867_v23  ;;  %24899 = vmatpush3.bf16.msra.mxu0 %v28398_v57  ;;  %v30566_v57 = vld [vmem:[%s28951_s29 + $0x241] sm:$0xff] }
 0x4c8   : > { %24900 = vmatprep.subr.bf16.mxu0 %v28399_v2  ;;  %v21577_v23 = vld [vmem:[%s28951_s29 + $0x281] sm:$0xff]  ;;  %v7236_v32 = vpack.c.bf16 %v30569_v44, %v30566_v57 }
 0x4cb   : > { %24901 = vmatpush3.bf16.msra.mxu0 %v28399_v2  ;;  %v30573_v2 = vld [vmem:[%s28951_s29 + $0x291] sm:$0xff] }
 0x4cc   : > { %24934 = vmatprep.subr.bf16.mxu0 %v28400_v7 }
 0x4ce   : > { %24871 = vmatmul.mubr.bf16.gmra.mrb[16].mxu0 %v30236_v18  ;;  %v30483_v18 = vld [vmem:[%s28951_s29 + $0x360] sm:$0xff] }
 0x4cf   : > { %24874 = vmatprep.mubr.bf16.mxu0 %v30243_v3  ;;  %v30486_v3 = vld [vmem:[%s28951_s29 + $0x370] sm:$0xff] }
 0x4d0   : > { %v6873_v49 = vpack.c.bf16 %v30486_v3, %v30483_v18 }
 0x4d6   : > { %24875 = vmatmul.mubr.bf16.gmra.mrb[20].mxu0 %v30245_v19  ;;  %v30493_v19 = vld [vmem:[%s28951_s29 + $0x380] sm:$0xff] }
 0x4d7   : > { %24878 = vmatprep.mubr.bf16.mxu0 %v6871_v0  ;;  %v6874_v63 = vpack.c.bf16 %v30496_v54, %v30493_v19  ;;  %v7237_v0 = vpack.c.bf16 %v30573_v2, %v21577_v23  ;;  %v30634_v23 = vld [vmem:[%s28951_s29 + $0x192] sm:$0xff] }
 0x4d8   : > { %33703 = vst [vmem:[#allocation4_spill] sm:$0xff] %v30634_v23 }
 0x4de   : > { %24879 = vmatmul.mubr.bf16.gmra.mrb[24].mxu0 %v6872_v28  ;;  %v28407_v28 = vld [vmem:[%s33498_s1 + $0x538] sm:$0xff]  }
 0x4df   : > { %24882 = vmatprep.mubr.bf16.mxu0 %v6873_v49  ;;  %v28408_v49 = vld [vmem:[%s33498_s1 + $0x540] sm:$0xff]  }
 0x4e6   : > { %24883 = vmatmul.mubr.bf16.gmra.mrb[28].mxu0 %v6874_v63  ;;  %v30591_v63 = vld [vmem:[%s28951_s29 + $0x331] sm:$0xff] }
 0x4e7   : > { %24902 = vmatprep.mubr.bf16.mxu0 %v7229_v24  ;;  %v7241_v24 = vpack.c.bf16 %v30591_v63, %v21585_v50  ;;  %v30647_v50 = vld [vmem:[%s28951_s29 + $0x1b2] sm:$0xff] }
 0x4e8   : > { %33705 = vst [vmem:[#allocation6_spill] sm:$0xff] %v30647_v50 }
 0x4ee   : > { %24903 = vmatmul.mubr.bf16.vlgmr.msra.gmra.mrb[0].mxu0 %v7230_v5  ;;  %v30596_v5 = vld [vmem:[%s28951_s29 + $0x341] sm:$0xff] }
 0x4ef   : > { %24935 = vmatpush3.bf16.msra.mxu0 %v28400_v7  ;;  %24906 = vmatprep.mubr.bf16.mxu0 %v7231_v52  ;;  %v28406_v7 = vld [vmem:[%s33498_s1 + $0x530] sm:$0xff]  }
 0x4f0   : > { %24936 = vmatprep.subr.bf16.mxu0 %v28401_v39  ;;  %v30599_v52 = vld [vmem:[%s28951_s29 + $0x351] sm:$0xff] }
 0x4f3   : > { %24937 = vmatpush3.bf16.msra.mxu0 %v28401_v39  ;;  %v7242_v39 = vpack.c.bf16 %v30599_v52, %v30596_v5 }
 0x4f4   : > { %24938 = vmatprep.subr.bf16.mxu0 %v28402_v11 }
 0x4f6   : > { %24907 = vmatmul.mubr.bf16.gmra.mrb[4].mxu0 %v7232_v30  ;;  %v21617_v30 = vld [vmem:[%s28951_s29 + $0x142] sm:$0xff] }
 0x4f7   : > { %24910 = vmatprep.mubr.bf16.mxu0 %v7233_v53  ;;  %24939 = vmatpush3.bf16.msra.mxu0 %v28402_v11  ;;  %v30615_v11 = vld [vmem:[%s28951_s29 + $0x391] sm:$0xff] }
 0x4f8   : > { %24940 = vmatprep.subr.bf16.mxu0 %v28403_v59  ;;  %v30619_v53 = vld [vmem:[%s28951_s29 + $0x152] sm:$0xff] }
 0x4fb   : > { %24941 = vmatpush3.bf16.msra.mxu0 %v28403_v59 }
 0x4fc   : > { %24942 = vmatprep.subr.bf16.mxu0 %v28404_v31 }
 0x4fe   : > { %24911 = vmatmul.mubr.bf16.gmra.mrb[8].mxu0 %v7234_v27  ;;  %v30625_v27 = vld [vmem:[%s28951_s29 + $0x162] sm:$0xff] }
 0x4ff   : > { %24914 = vmatprep.mubr.bf16.mxu0 %v7235_v10  ;;  %24943 = vmatpush3.bf16.msra.mxu0 %v28404_v31  ;;  %v7599_v31 = vpack.c.bf16 %v30619_v53, %v21617_v30  ;;  %v30628_v10 = vld [vmem:[%s28951_s29 + $0x172] sm:$0xff] }
 0x500   : > { %24944 = vmatprep.subr.bf16.mxu0 %v28405_v37 }
 0x503   : > { %24945 = vmatpush3.bf16.msra.mxu0 %v28405_v37  ;;  %v30631_v37 = vld [vmem:[%s28951_s29 + $0x182] sm:$0xff] }
 0x504   : > { %24946 = vmatprep.subr.bf16.mxu0 %v28406_v7 }
 0x506   : > { %24915 = vmatmul.mubr.bf16.gmra.mrb[12].mxu0 %v7236_v32  ;;  %v7601_v32 = vpack.c.bf16 %v30634_v23, %v30631_v37  ;;  %v30692_v23 = vld [vmem:[%s28951_s29 + $0x292] sm:$0xff] }
 0x507   : > { %24918 = vmatprep.mubr.bf16.mxu0 %v7237_v0  ;;  %24947 = vmatpush3.bf16.msra.mxu0 %v28406_v7  ;;  %v7600_v7 = vpack.c.bf16 %v30628_v10, %v30625_v27  ;;  %v28409_v0 = vld [vmem:[%s33498_s1 + $0x548] sm:$0xff]   ;;  %33708 = vst [vmem:[#allocation9_spill] sm:$0xff] %v30692_v23 }
 0x508   : > { %24948 = vmatprep.subr.bf16.mxu0 %v28407_v28 }
 0x50b   : > { %24949 = vmatpush3.bf16.msra.mxu0 %v28407_v28  ;;  %v30644_v28 = vld [vmem:[%s28951_s29 + $0x1a2] sm:$0xff] }
 0x50c   : > { %24982 = vmatprep.subr.bf16.mxu0 %v28408_v49  ;;  %33704 = vst [vmem:[#allocation5_spill] sm:$0xff] %v30644_v28  ;;  %v7602_v30 = vpack.c.bf16 %v30647_v50, %v30644_v28  ;;  %v30688_v50 = vld [vmem:[%s28951_s29 + $0x252] sm:$0xff]  ;;  %v21633_v28 = vld [vmem:[%s28951_s29 + $0x282] sm:$0xff] }
 0x50e   : > { %24919 = vmatmul.mubr.bf16.gmra.mrb[16].mxu0 %v30301_v25  ;;  %v30602_v25 = vld [vmem:[%s28951_s29 + $0x361] sm:$0xff] }
 0x50f   : > { %24922 = vmatprep.mubr.bf16.mxu0 %v30308_v8  ;;  %v30605_v8 = vld [vmem:[%s28951_s29 + $0x371] sm:$0xff] }
 0x510   : > { %v7243_v48 = vpack.c.bf16 %v30605_v8, %v30602_v25 }
 0x516   : > { %24923 = vmatmul.mubr.bf16.gmra.mrb[20].mxu0 %v30310_v35  ;;  %v30612_v35 = vld [vmem:[%s28951_s29 + $0x381] sm:$0xff] }
 0x517   : > { %24926 = vmatprep.mubr.bf16.mxu0 %v7241_v24  ;;  %v7244_v59 = vpack.c.bf16 %v30615_v11, %v30612_v35  ;;  %v21625_v24 = vld [vmem:[%s28951_s29 + $0x1e2] sm:$0xff] }
 0x51e   : > { %24927 = vmatmul.mubr.bf16.gmra.mrb[24].mxu0 %v7242_v39  ;;  %v30651_v39 = vld [vmem:[%s28951_s29 + $0x1f2] sm:$0xff] }
 0x51f   : > { %24930 = vmatprep.mubr.bf16.mxu0 %v7243_v48  ;;  %33706 = vst [vmem:[#allocation7_spill] sm:$0xff] %v30651_v39  ;;  %v28410_v48 = vld [vmem:[%s33498_s1 + $0x550] sm:$0xff]  }
 0x526   : > { %24931 = vmatmul.mubr.bf16.gmra.mrb[28].mxu0 %v7244_v59  ;;  %v28411_v59 = vld [vmem:[%s33498_s1 + $0x558] sm:$0xff]  }
 0x527   : > { %24950 = vmatprep.mubr.bf16.mxu0 %v7599_v31  ;;  %v30663_v31 = vld [vmem:[%s28951_s29 + $0x202] sm:$0xff] }
 0x52e   : > { %24951 = vmatmul.mubr.bf16.vlgmr.msra.gmra.mrb[0].mxu0 %v7600_v7  ;;  %v30666_v7 = vld [vmem:[%s28951_s29 + $0x212] sm:$0xff] }
 0x52f   : > { %24983 = vmatpush3.bf16.msra.mxu0 %v28408_v49  ;;  %24954 = vmatprep.mubr.bf16.mxu0 %v7601_v32  ;;  %v7603_v49 = vpack.c.bf16 %v30651_v39, %v21625_v24  ;;  %v30669_v32 = vld [vmem:[%s28951_s29 + $0x222] sm:$0xff] }
 0x530   : > { %24984 = vmatprep.subr.bf16.mxu0 %v28409_v0  ;;  %v28412_v24 = vld [vmem:[%s33498_s1 + $0x560] sm:$0xff]  }
 0x531   : > { %v30685_v39 = vld [vmem:[%s28951_s29 + $0x242] sm:$0xff] }
 0x533   : > { %24985 = vmatpush3.bf16.msra.mxu0 %v28409_v0  ;;  %v30672_v0 = vld [vmem:[%s28951_s29 + $0x232] sm:$0xff] }
 0x534   : > { %24986 = vmatprep.subr.bf16.mxu0 %v28410_v48  ;;  %33707 = vst [vmem:[#allocation8_spill] sm:$0xff] %v30672_v0 }
 0x536   : > { %24955 = vmatmul.mubr.bf16.gmra.mrb[4].mxu0 %v7602_v30  ;;  %v7604_v30 = vpack.c.bf16 %v30666_v7, %v30663_v31 }
 0x537   : > { %24958 = vmatprep.mubr.bf16.mxu0 %v7603_v49  ;;  %24987 = vmatpush3.bf16.msra.mxu0 %v28410_v48  ;;  %v7605_v49 = vpack.c.bf16 %v30672_v0, %v30669_v32  ;;  %v28413_v48 = vld [vmem:[%s33498_s1 + $0x568] sm:$0xff]   ;;  %v7606_v0 = vpack.c.bf16 %v30688_v50, %v30685_v39 }
 0x538   : > { %24988 = vmatprep.subr.bf16.mxu0 %v28411_v59 }
 0x53b   : > { %24989 = vmatpush3.bf16.msra.mxu0 %v28411_v59  ;;  %v28414_v59 = vld [vmem:[%s33498_s1 + $0x570] sm:$0xff]  }
 0x53c   : > { %24990 = vmatprep.subr.bf16.mxu0 %v28412_v24 }
 0x53e   : > { %24959 = vmatmul.mubr.bf16.gmra.mrb[8].mxu0 %v7604_v30  ;;  %v7607_v30 = vpack.c.bf16 %v30692_v23, %v21633_v28  ;;  %v21641_v28 = vld [vmem:[%s28951_s29 + $0x322] sm:$0xff]  ;;  %v30724_v23 = vld [vmem:[%s28951_s29 + $0x372] sm:$0xff] }
 0x53f   : > { %24962 = vmatprep.mubr.bf16.mxu0 %v7605_v49  ;;  %24991 = vmatpush3.bf16.msra.mxu0 %v28412_v24  ;;  %v28415_v24 = vld [vmem:[%s33498_s1 + $0x578] sm:$0xff]   ;;  %v28416_v49 = vld [vmem:[%s33498_s1 + $0x580] sm:$0xff]   ;;  %33711 = vst [vmem:[#allocation12_spill] sm:$0xff] %v30724_v23 }
 0x540   : > { %24992 = vmatprep.subr.bf16.mxu0 %v28413_v48 }
 0x543   : > { %24993 = vmatpush3.bf16.msra.mxu0 %v28413_v48  ;;  %v30710_v48 = vld [vmem:[%s28951_s29 + $0x332] sm:$0xff] }
 0x544   : > { %24994 = vmatprep.subr.bf16.mxu0 %v28414_v59  ;;  %33709 = vst [vmem:[#allocation10_spill] sm:$0xff] %v30710_v48 }
 0x546   : > { %24963 = vmatmul.mubr.bf16.gmra.mrb[12].mxu0 %v7606_v0  ;;  %v7611_v0 = vpack.c.bf16 %v30710_v48, %v21641_v28  ;;  %v30731_v28 = vld [vmem:[%s28951_s29 + $0x382] sm:$0xff]  ;;  %v7970_v48 = vpack.c.bf16 %v30387_v56, %v30382_v15  ;;  %v28418_v15 = vld [vmem:[%s33498_s1 + $0x590] sm:$0xff]  }
 0x547   : > { %24966 = vmatprep.mubr.bf16.mxu0 %v7607_v30  ;;  %24995 = vmatpush3.bf16.msra.mxu0 %v28414_v59  ;;  %v30715_v59 = vld [vmem:[%s28951_s29 + $0x342] sm:$0xff]  ;;  %v30718_v30 = vld [vmem:[%s28951_s29 + $0x352] sm:$0xff] }
 0x548   : > { %24996 = vmatprep.subr.bf16.mxu0 %v28415_v24  ;;  %33710 = vst [vmem:[#allocation11_spill] sm:$0xff] %v30718_v30 }
 0x54b   : > { %24997 = vmatpush3.bf16.msra.mxu0 %v28415_v24  ;;  %v30721_v24 = vld [vmem:[%s28951_s29 + $0x362] sm:$0xff] }
 0x54c   : > { %25030 = vmatprep.subr.bf16.mxu0 %v28416_v49 }
 0x54e   : > { %24967 = vmatmul.mubr.bf16.gmra.mrb[16].mxu0 %v30366_v46  ;;  %v7612_v46 = vpack.c.bf16 %v30718_v30, %v30715_v59  ;;  %v7971_v30 = vpack.c.bf16 %v30393_v26, %v30390_v29  ;;  %v7974_v29 = vpack.c.bf16 %v30425_v38, %v30413_v60  ;;  %v28419_v26 = vld [vmem:[%s33498_s1 + $0x598] sm:$0xff]   ;;  %v28421_v60 = vld [vmem:[%s33498_s1 + $0x5a8] sm:$0xff]   ;;  %v30771_v38 = vld [vmem:[%s28951_s29 + $0x260] sm:$0xff] }
 0x54f   : > { %24970 = vmatprep.mubr.bf16.mxu0 %v30373_v33  ;;  %v7613_v33 = vpack.c.bf16 %v30724_v23, %v30721_v24  ;;  %v7972_v23 = vpack.c.bf16 %v30406_v9, %v30396_v4  ;;  %v28420_v4 = vld [vmem:[%s33498_s1 + $0x5a0] sm:$0xff]   ;;  %v7975_v9 = vpack.c.bf16 %v30431_v16, %v30428_v51  ;;  %v28422_v51 = vld [vmem:[%s33498_s1 + $0x5b0] sm:$0xff]   ;;  %v7977_v16 = vpack.c.bf16 %v30771_v38, %v30450_v62 }
 0x550   : > { %v30796_v62 = vld [vmem:[%s28951_s29 + $0x2e0] sm:$0xff] }
 0x556   : > { %24971 = vmatmul.mubr.bf16.gmra.mrb[20].mxu0 %v30375_v61  ;;  %v30734_v61 = vld [vmem:[%s28951_s29 + $0x392] sm:$0xff] }
 0x557   : > { %24974 = vmatprep.mubr.bf16.mxu0 %v7611_v0  ;;  %v7614_v0 = vpack.c.bf16 %v30734_v61, %v30731_v28 }
 0x55e   : > { %24975 = vmatmul.mubr.bf16.gmra.mrb[24].mxu0 %v7612_v46  ;;  %v28417_v46 = vld [vmem:[%s33498_s1 + $0x588] sm:$0xff]  }
 0x55f   : > { %24978 = vmatprep.mubr.bf16.mxu0 %v7613_v33  ;;  %v30748_v33 = vld [vmem:[%s28951_s29 + $0x1c0] sm:$0xff] }
 0x560   : > { %v7973_v56 = vpack.c.bf16 %v30748_v33, %v30409_v47  ;;  %v7976_v47 = vpack.c.bf16 %v30447_v14, %v30434_v41  ;;  %v28423_v14 = vld [vmem:[%s33498_s1 + $0x5b8] sm:$0xff]  }
 0x566   : > { %24979 = vmatmul.mubr.bf16.gmra.mrb[28].mxu0 %v7614_v0 }
 0x567   : > { %24998 = vmatprep.mubr.bf16.mxu0 %v7970_v48  ;;  %v30790_v48 = vld [vmem:[%s28951_s29 + $0x2c0] sm:$0xff] }
 0x56e   : > { %24999 = vmatmul.mubr.bf16.vlgmr.msra.gmra.mrb[0].mxu0 %v7971_v30  ;;  %v30793_v30 = vld [vmem:[%s28951_s29 + $0x2d0] sm:$0xff] }
 0x56f   : > { %25031 = vmatpush3.bf16.msra.mxu0 %v28416_v49  ;;  %25002 = vmatprep.mubr.bf16.mxu0 %v7972_v23  ;;  %v30774_v23 = vld [vmem:[%s28951_s29 + $0x2a0] sm:$0xff]  ;;  %v30787_v49 = vld [vmem:[%s28951_s29 + $0x2b0] sm:$0xff] }
 0x570   : > { %25032 = vmatprep.subr.bf16.mxu0 %v28417_v46  ;;  %v7978_v41 = vpack.c.bf16 %v30774_v23, %v30454_v34  ;;  %v28424_v34 = vld [vmem:[%s33498_s1 + $0x5c0] sm:$0xff]   ;;  %v7979_v0 = vpack.c.bf16 %v30790_v48, %v30787_v49 }
 0x573   : > { %25033 = vmatpush3.bf16.msra.mxu0 %v28417_v46  ;;  %v7980_v46 = vpack.c.bf16 %v30796_v62, %v30793_v30 }
 0x574   : > { %25034 = vmatprep.subr.bf16.mxu0 %v28418_v15 }
 0x576   : > { %25003 = vmatmul.mubr.bf16.gmra.mrb[4].mxu0 %v7973_v56  ;;  %v30809_v56 = vld [vmem:[%s28951_s29 + $0x300] sm:$0xff] }
 0x577   : > { %25006 = vmatprep.mubr.bf16.mxu0 %v7974_v29  ;;  %25035 = vmatpush3.bf16.msra.mxu0 %v28418_v15  ;;  %v30806_v15 = vld [vmem:[%s28951_s29 + $0x2f0] sm:$0xff] }
 0x578   : > { %25036 = vmatprep.subr.bf16.mxu0 %v28419_v26  ;;  %v7981_v29 = vpack.c.bf16 %v30809_v56, %v30806_v15 }
 0x57b   : > { %25037 = vmatpush3.bf16.msra.mxu0 %v28419_v26  ;;  %v7982_v26 = vpack.c.bf16 %v30477_v1, %v30472_v45  ;;  %v8341_v45 = vpack.c.bf16 %v30512_v20, %v30509_v36  ;;  %v8342_v1 = vpack.c.bf16 %v30525_v40, %v30515_v43  ;;  %v8345_v36 = vpack.c.bf16 %v30550_v58, %v30547_v6  ;;  %v28429_v43 = vld [vmem:[%s33498_s1 + $0x5e8] sm:$0xff]   ;;  %v28431_v58 = vld [vmem:[%s33498_s1 + $0x5f8] sm:$0xff]  }
 0x57c   : > { %25038 = vmatprep.subr.bf16.mxu0 %v28420_v4  ;;  %v8346_v20 = vpack.c.bf16 %v30566_v57, %v30553_v22  ;;  %v30857_v40 = vld [vmem:[%s28951_s29 + $0x261] sm:$0xff]  ;;  %v30873_v22 = vld [vmem:[%s28951_s29 + $0x2b1] sm:$0xff] }
 0x57d   : > { %v30876_v57 = vld [vmem:[%s28951_s29 + $0x2c1] sm:$0xff] }
 0x57e   : > { %25007 = vmatmul.mubr.bf16.gmra.mrb[8].mxu0 %v7975_v9  ;;  %v7984_v9 = vpack.c.bf16 %v30493_v19, %v30486_v3  ;;  %v28426_v3 = vld [vmem:[%s33498_s1 + $0x5d0] sm:$0xff]  }
 0x57f   : > { %25010 = vmatprep.mubr.bf16.mxu0 %v7976_v47  ;;  %25039 = vmatpush3.bf16.msra.mxu0 %v28420_v4  ;;  %v7983_v4 = vpack.c.bf16 %v30483_v18, %v30480_v21  ;;  %v30820_v47 = vld [vmem:[%s28951_s29 + $0x3a0] sm:$0xff]  ;;  %v28425_v21 = vld [vmem:[%s33498_s1 + $0x5c8] sm:$0xff]  }
 0x580   : > { %25040 = vmatprep.subr.bf16.mxu0 %v28421_v60  ;;  %v30834_v18 = vld [vmem:[%s28951_s29 + $0x1c1] sm:$0xff] }
 0x581   : > { %v8343_v19 = vpack.c.bf16 %v30834_v18, %v30528_v17  ;;  %v30860_v17 = vld [vmem:[%s28951_s29 + $0x2a1] sm:$0xff] }
 0x582   : > { %v8348_v6 = vpack.c.bf16 %v30860_v17, %v30573_v2  ;;  %v28432_v2 = vld [vmem:[%s33498_s1 + $0x600] sm:$0xff]  }
 0x583   : > { %25041 = vmatpush3.bf16.msra.mxu0 %v28421_v60  ;;  %v7985_v60 = vpack.c.bf16 %v30820_v47, %v30496_v54  ;;  %v8344_v54 = vpack.c.bf16 %v30544_v55, %v30532_v12  ;;  %v28430_v12 = vld [vmem:[%s33498_s1 + $0x5f0] sm:$0xff]   ;;  %v8347_v55 = vpack.c.bf16 %v30857_v40, %v30569_v44  ;;  %v30882_v44 = vld [vmem:[%s28951_s29 + $0x2e1] sm:$0xff] }
 0x584   : > { %25042 = vmatprep.subr.bf16.mxu0 %v28422_v51 }
 0x586   : > { %25011 = vmatmul.mubr.bf16.gmra.mrb[12].mxu0 %v7977_v16  ;;  %v30879_v16 = vld [vmem:[%s28951_s29 + $0x2d1] sm:$0xff] }
 0x587   : > { %25014 = vmatprep.mubr.bf16.mxu0 %v7978_v41  ;;  %25043 = vmatpush3.bf16.msra.mxu0 %v28422_v51  ;;  %v8340_v51 = vpack.c.bf16 %v30506_v42, %v30500_v13  ;;  %v28427_v13 = vld [vmem:[%s33498_s1 + $0x5d8] sm:$0xff]   ;;  %v28428_v42 = vld [vmem:[%s33498_s1 + $0x5e0] sm:$0xff]   ;;  %v8349_v41 = vpack.c.bf16 %v30876_v57, %v30873_v22 }
 0x588   : > { %25044 = vmatprep.subr.bf16.mxu0 %v28423_v14 }
 0x58b   : > { %25045 = vmatpush3.bf16.msra.mxu0 %v28423_v14  ;;  %v8350_v14 = vpack.c.bf16 %v30882_v44, %v30879_v16 }
 0x58c   : > { %25078 = vmatprep.subr.bf16.mxu0 %v28424_v34 }
 0x58e   : > { %25015 = vmatmul.mubr.bf16.gmra.mrb[16].mxu0 %v7979_v0  ;;  %v30895_v0 = vld [vmem:[%s28951_s29 + $0x301] sm:$0xff] }
 0x58f   : > { %25018 = vmatprep.mubr.bf16.mxu0 %v7980_v46 }
 0x596   : > { %25019 = vmatmul.mubr.bf16.gmra.mrb[20].mxu0 %v7981_v29  ;;  %v8352_v29 = vpack.c.bf16 %v30596_v5, %v30591_v63  ;;  %v8711_v63 = vpack.c.bf16 %v30631_v37, %v30628_v10  ;;  %v33712_v5 = vld [vmem:[#allocation4_spill] sm:$0xff]  ;;  %v33715_v10 = vld [vmem:[#allocation7_spill] sm:$0xff] }
 0x597   : > { %25022 = vmatprep.mubr.bf16.mxu0 %v7982_v26  ;;  %v8353_v26 = vpack.c.bf16 %v30602_v25, %v30599_v52  ;;  %v33713_v52 = vld [vmem:[#allocation5_spill] sm:$0xff]  ;;  %v8714_v37 = vpack.c.bf16 %v30663_v31, %v33715_v10 }
 0x598   : > { %v8712_v25 = vpack.c.bf16 %v33713_v52, %v33712_v5  ;;  %v21841_v5 = vld [vmem:[%s28951_s29 + $0x160] sm:$0xff]  ;;  %v21842_v52 = vld [vmem:[%s28951_s29 + $0x170] sm:$0xff]  ;;  %v28441_v10 = vld [vmem:[%s33498_s1 + $0x648] sm:$0xff]  }
 0x59e   : > { %25023 = vmatmul.mubr.bf16.gmra.mrb[24].mxu0 %v7983_v4  ;;  %v8354_v4 = vpack.c.bf16 %v30612_v35, %v30605_v8  ;;  %v28433_v8 = vld [vmem:[%s33498_s1 + $0x608] sm:$0xff]  }
 0x59f   : > { %25026 = vmatprep.mubr.bf16.mxu0 %v7984_v9  ;;  %v30906_v9 = vld [vmem:[%s28951_s29 + $0x3a1] sm:$0xff] }
 0x5a0   : > { %v30920_v35 = vld [vmem:[%s28951_s29 + $0x1c2] sm:$0xff] }
 0x5a6   : > { %25027 = vmatmul.mubr.bf16.gmra.mrb[28].mxu0 %v7985_v60  ;;  %v8355_v60 = vpack.c.bf16 %v30906_v9, %v30615_v11  ;;  %v28434_v11 = vld [vmem:[%s33498_s1 + $0x610] sm:$0xff]  }
 0x5a7   : > { %25046 = vmatprep.mubr.bf16.mxu0 %v8340_v51  ;;  %v8710_v51 = vpack.c.bf16 %v30625_v27, %v30619_v53  ;;  %v33714_v53 = vld [vmem:[#allocation6_spill] sm:$0xff] }
 0x5a8   : > { %v8713_v27 = vpack.c.bf16 %v30920_v35, %v33714_v53  ;;  %v21846_v53 = vld [vmem:[%s28951_s29 + $0x1b0] sm:$0xff] }
 0x5ae   : > { %25047 = vmatmul.mubr.bf16.vlgmr.msra.gmra.mrb[0].mxu0 %v8341_v45  ;;  %v28435_v45 = vld [vmem:[%s33498_s1 + $0x618] sm:$0xff]  }
 0x5af   : > { %25079 = vmatpush3.bf16.msra.mxu0 %v28424_v34  ;;  %25050 = vmatprep.mubr.bf16.mxu0 %v8342_v1  ;;  %v30892_v34 = vld [vmem:[%s28951_s29 + $0x2f1] sm:$0xff]  ;;  %v28436_v1 = vld [vmem:[%s33498_s1 + $0x620] sm:$0xff]  }
 0x5b0   : > { %25080 = vmatprep.subr.bf16.mxu0 %v28425_v21  ;;  %v8351_v46 = vpack.c.bf16 %v30895_v0, %v30892_v34 }
 0x5b3   : > { %25081 = vmatpush3.bf16.msra.mxu0 %v28425_v21  ;;  %v8715_v21 = vpack.c.bf16 %v30669_v32, %v30666_v7  ;;  %v33717_v32 = vld [vmem:[#allocation9_spill] sm:$0xff] }
 0x5b4   : > { %25082 = vmatprep.subr.bf16.mxu0 %v28426_v3 }
 0x5b6   : > { %25051 = vmatmul.mubr.bf16.gmra.mrb[4].mxu0 %v8343_v19  ;;  %v28437_v19 = vld [vmem:[%s33498_s1 + $0x628] sm:$0xff]  }
 0x5b7   : > { %25054 = vmatprep.mubr.bf16.mxu0 %v8344_v54  ;;  %25083 = vmatpush3.bf16.msra.mxu0 %v28426_v3  ;;  %v33716_v3 = vld [vmem:[#allocation8_spill] sm:$0xff] }
 0x5b8   : > { %25084 = vmatprep.subr.bf16.mxu0 %v28427_v13  ;;  %v8716_v31 = vpack.c.bf16 %v30685_v39, %v33716_v3  ;;  %v30943_v54 = vld [vmem:[%s28951_s29 + $0x262] sm:$0xff]  ;;  %v28438_v39 = vld [vmem:[%s33498_s1 + $0x630] sm:$0xff]  }
 0x5b9   : > { %v8717_v7 = vpack.c.bf16 %v30943_v54, %v30688_v50  ;;  %v30968_v50 = vld [vmem:[%s28951_s29 + $0x2e2] sm:$0xff] }
 0x5bb   : > { %25085 = vmatpush3.bf16.msra.mxu0 %v28427_v13  ;;  %v30946_v13 = vld [vmem:[%s28951_s29 + $0x2a2] sm:$0xff] }
 0x5bc   : > { %25086 = vmatprep.subr.bf16.mxu0 %v28428_v42 }
 0x5be   : > { %25055 = vmatmul.mubr.bf16.gmra.mrb[8].mxu0 %v8345_v36  ;;  %v28439_v36 = vld [vmem:[%s33498_s1 + $0x638] sm:$0xff]  }
 0x5bf   : > { %25058 = vmatprep.mubr.bf16.mxu0 %v8346_v20  ;;  %25087 = vmatpush3.bf16.msra.mxu0 %v28428_v42  ;;  %v8718_v42 = vpack.c.bf16 %v30946_v13, %v33717_v32  ;;  %v30959_v20 = vld [vmem:[%s28951_s29 + $0x2b2] sm:$0xff] }
 0x5c0   : > { %25088 = vmatprep.subr.bf16.mxu0 %v28429_v43  ;;  %v21854_v32 = vld [vmem:[%s28951_s29 + $0x250] sm:$0xff] }
 0x5c3   : > { %25089 = vmatpush3.bf16.msra.mxu0 %v28429_v43  ;;  %v30962_v43 = vld [vmem:[%s28951_s29 + $0x2c2] sm:$0xff] }
 0x5c4   : > { %25090 = vmatprep.subr.bf16.mxu0 %v28430_v12 }
 0x5c6   : > { %25059 = vmatmul.mubr.bf16.gmra.mrb[12].mxu0 %v8347_v55  ;;  %v28440_v55 = vld [vmem:[%s33498_s1 + $0x640] sm:$0xff]  }
 0x5c7   : > { %25062 = vmatprep.mubr.bf16.mxu0 %v8348_v6  ;;  %25091 = vmatpush3.bf16.msra.mxu0 %v28430_v12  ;;  %v30965_v12 = vld [vmem:[%s28951_s29 + $0x2d2] sm:$0xff]  ;;  %v8719_v6 = vpack.c.bf16 %v30962_v43, %v30959_v20 }
 0x5c8   : > { %25092 = vmatprep.subr.bf16.mxu0 %v28431_v58 }
 0x5cb   : > { %25093 = vmatpush3.bf16.msra.mxu0 %v28431_v58  ;;  %v8720_v58 = vpack.c.bf16 %v30968_v50, %v30965_v12 }
 0x5cc   : > { %25126 = vmatprep.subr.bf16.mxu0 %v28432_v2 }
 0x5ce   : > { %25063 = vmatmul.mubr.bf16.gmra.mrb[16].mxu0 %v8349_v41  ;;  %v30981_v41 = vld [vmem:[%s28951_s29 + $0x302] sm:$0xff] }
 0x5cf   : > { %25066 = vmatprep.mubr.bf16.mxu0 %v8350_v14 }
 0x5d6   : > { %25067 = vmatmul.mubr.bf16.gmra.mrb[20].mxu0 %v8351_v46  ;;  %v33718_v46 = vld [vmem:[#allocation10_spill] sm:$0xff] }
 0x5d7   : > { %25070 = vmatprep.mubr.bf16.mxu0 %v8352_v29  ;;  %v8722_v29 = vpack.c.bf16 %v30715_v59, %v33718_v46  ;;  %v9089_v46 = vpack.c.bf16 %v30787_v49, %v30774_v23  ;;  %v9090_v23 = vpack.c.bf16 %v30793_v30, %v30790_v48  ;;  %v9091_v49 = vpack.c.bf16 %v30806_v15, %v30796_v62  ;;  %v21867_v48 = vld [vmem:[%s28951_s29 + $0x360] sm:$0xff]  ;;  %v21868_v30 = vld [vmem:[%s28951_s29 + $0x370] sm:$0xff] }
 0x5d8   : > { %v21870_v62 = vld [vmem:[%s28951_s29 + $0x390] sm:$0xff]  ;;  %v9094_v15 = vpack.c.bf16 %v21868_v30, %v21867_v48  ;;  %v28455_v48 = vld [vmem:[%s33498_s1 + $0x6b8] sm:$0xff]   ;;  %v21921_v30 = vld [vmem:[%s28951_s29 + $0x341] sm:$0xff] }
 0x5de   : > { %25071 = vmatmul.mubr.bf16.gmra.mrb[24].mxu0 %v8353_v26  ;;  %v33719_v26 = vld [vmem:[#allocation11_spill] sm:$0xff] }
 0x5df   : > { %25074 = vmatprep.mubr.bf16.mxu0 %v8354_v4  ;;  %v8723_v4 = vpack.c.bf16 %v30721_v24, %v33719_v26  ;;  %v21844_v24 = vld [vmem:[%s28951_s29 + $0x190] sm:$0xff] }
 0x5e0   : > { %v21864_v26 = vld [vmem:[%s28951_s29 + $0x310] sm:$0xff] }
 0x5e6   : > { %25075 = vmatmul.mubr.bf16.gmra.mrb[28].mxu0 %v8355_v60  ;;  %v33720_v60 = vld [vmem:[#allocation12_spill] sm:$0xff] }
 0x5e7   : > { %25094 = vmatprep.mubr.bf16.mxu0 %v8710_v51  ;;  %v8724_v51 = vpack.c.bf16 %v30731_v28, %v33720_v60  ;;  %v21866_v60 = vld [vmem:[%s28951_s29 + $0x350] sm:$0xff] }
 0x5ee   : > { %25095 = vmatmul.mubr.bf16.vlgmr.msra.gmra.mrb[0].mxu0 %v8711_v63  ;;  %v30992_v63 = vld [vmem:[%s28951_s29 + $0x3a2] sm:$0xff] }
 0x5ef   : > { %25127 = vmatpush3.bf16.msra.mxu0 %v28432_v2  ;;  %25098 = vmatprep.mubr.bf16.mxu0 %v8712_v25  ;;  %v30978_v2 = vld [vmem:[%s28951_s29 + $0x2f2] sm:$0xff]  ;;  %v8725_v59 = vpack.c.bf16 %v30992_v63, %v30734_v61  ;;  %v9081_v25 = vpack.c.bf16 %v21842_v52, %v21841_v5  ;;  %v21869_v52 = vld [vmem:[%s28951_s29 + $0x380] sm:$0xff] }
 0x5f0   : > { %25128 = vmatprep.subr.bf16.mxu0 %v28433_v8  ;;  %v8721_v14 = vpack.c.bf16 %v30981_v41, %v30978_v2  ;;  %v21848_v61 = vld [vmem:[%s28951_s29 + $0x1d0] sm:$0xff] }
 0x5f3   : > { %25129 = vmatpush3.bf16.msra.mxu0 %v28433_v8  ;;  %v21843_v8 = vld [vmem:[%s28951_s29 + $0x180] sm:$0xff] }
 0x5f4   : > { %25130 = vmatprep.subr.bf16.mxu0 %v28434_v11  ;;  %v9082_v28 = vpack.c.bf16 %v21844_v24, %v21843_v8  ;;  %v21897_v8 = vld [vmem:[%s28951_s29 + $0x161] sm:$0xff]  ;;  %v21898_v24 = vld [vmem:[%s28951_s29 + $0x171] sm:$0xff] }
 0x5f6   : > { %25099 = vmatmul.mubr.bf16.gmra.mrb[4].mxu0 %v8713_v27 }
 0x5f7   : > { %25102 = vmatprep.mubr.bf16.mxu0 %v8714_v37  ;;  %25131 = vmatpush3.bf16.msra.mxu0 %v28434_v11  ;;  %v21845_v11 = vld [vmem:[%s28951_s29 + $0x1a0] sm:$0xff] }
 0x5f8   : > { %25132 = vmatprep.subr.bf16.mxu0 %v28435_v45  ;;  %v9083_v27 = vpack.c.bf16 %v21846_v53, %v21845_v11  ;;  %v21849_v37 = vld [vmem:[%s28951_s29 + $0x200] sm:$0xff]  ;;  %v9451_v11 = vpack.c.bf16 %v21898_v24, %v21897_v8  ;;  %v21928_v8 = vld [vmem:[%s28951_s29 + $0x3b1] sm:$0xff] }
 0x5f9   : > { %v28456_v53 = vld [vmem:[%s33500_s3] sm:$0xff]  }
 0x5fa   : > { %25270 = vmatprep.subr.bf16.mxu1 %v28456_v53  ;;  %v21953_v24 = vld [vmem:[%s28951_s29 + $0x162] sm:$0xff] }
 0x5fb   : > { %25133 = vmatpush3.bf16.msra.mxu0 %v28435_v45  ;;  %v21850_v45 = vld [vmem:[%s28951_s29 + $0x210] sm:$0xff]  ;;  %25271 = vmatpush3.bf16.msra.mxu1 %v28456_v53  ;;  %v21955_v53 = vld [vmem:[%s28951_s29 + $0x182] sm:$0xff] }
 0x5fc   : > { %25134 = vmatprep.subr.bf16.mxu0 %v28436_v1  ;;  %v9085_v3 = vpack.c.bf16 %v21850_v45, %v21849_v37  ;;  %v21902_v37 = vld [vmem:[%s28951_s29 + $0x1b1] sm:$0xff] }
 0x5fd   : > { %v28458_v45 = vld [vmem:[%s33500_s3 + $0x10] sm:$0xff]  }
 0x5fe   : > { %25103 = vmatmul.mubr.bf16.gmra.mrb[8].mxu0 %v8715_v21  ;;  %v9084_v21 = vpack.c.bf16 %v21848_v61, %v30748_v33  ;;  %v28444_v33 = vld [vmem:[%s33498_s1 + $0x660] sm:$0xff]  }
 0x5ff   : > { %25106 = vmatprep.mubr.bf16.mxu0 %v8716_v31  ;;  %25135 = vmatpush3.bf16.msra.mxu0 %v28436_v1  ;;  %v28442_v1 = vld [vmem:[%s33498_s1 + $0x650] sm:$0xff]   ;;  %v28443_v31 = vld [vmem:[%s33498_s1 + $0x658] sm:$0xff]   ;;  %v21901_v61 = vld [vmem:[%s28951_s29 + $0x1a1] sm:$0xff] }
 0x600   : > { %25136 = vmatprep.subr.bf16.mxu0 %v28437_v19 }
 0x603   : > { %25137 = vmatpush3.bf16.msra.mxu0 %v28437_v19  ;;  %v21851_v19 = vld [vmem:[%s28951_s29 + $0x220] sm:$0xff] }
 0x604   : > { %25138 = vmatprep.subr.bf16.mxu0 %v28438_v39 }
 0x606   : > { %25107 = vmatmul.mubr.bf16.gmra.mrb[12].mxu0 %v8717_v7  ;;  %v21853_v7 = vld [vmem:[%s28951_s29 + $0x240] sm:$0xff] }
 0x607   : > { %25110 = vmatprep.mubr.bf16.mxu0 %v8718_v42  ;;  %25139 = vmatpush3.bf16.msra.mxu0 %v28438_v39  ;;  %v21852_v39 = vld [vmem:[%s28951_s29 + $0x230] sm:$0xff] }
 0x608   : > { %25140 = vmatprep.subr.bf16.mxu0 %v28439_v36  ;;  %v9086_v42 = vpack.c.bf16 %v21852_v39, %v21851_v19  ;;  %v21905_v19 = vld [vmem:[%s28951_s29 + $0x201] sm:$0xff]  ;;  %v21906_v39 = vld [vmem:[%s28951_s29 + $0x211] sm:$0xff] }
 0x60b   : > { %25141 = vmatpush3.bf16.msra.mxu0 %v28439_v36  ;;  %v9087_v36 = vpack.c.bf16 %v21854_v32, %v21853_v7  ;;  %v28450_v7 = vld [vmem:[%s33498_s1 + $0x690] sm:$0xff]  }
 0x60c   : > { %25174 = vmatprep.subr.bf16.mxu0 %v28440_v55 }
 0x60e   : > { %25111 = vmatmul.mubr.bf16.gmra.mrb[16].mxu0 %v8719_v6  ;;  %v21856_v6 = vld [vmem:[%s28951_s29 + $0x270] sm:$0xff] }
 0x60f   : > { %25114 = vmatprep.mubr.bf16.mxu0 %v8720_v58  ;;  %v28446_v58 = vld [vmem:[%s33498_s1 + $0x670] sm:$0xff]  }
 0x616   : > { %25115 = vmatmul.mubr.bf16.gmra.mrb[20].mxu0 %v8721_v14  ;;  %v9088_v14 = vpack.c.bf16 %v21856_v6, %v30771_v38  ;;  %v28448_v38 = vld [vmem:[%s33498_s1 + $0x680] sm:$0xff]   ;;  %v21908_v6 = vld [vmem:[%s28951_s29 + $0x231] sm:$0xff] }
 0x617   : > { %25118 = vmatprep.mubr.bf16.mxu0 %v8722_v29  ;;  %v28447_v29 = vld [vmem:[%s33498_s1 + $0x678] sm:$0xff]  }
 0x61e   : > { %25119 = vmatmul.mubr.bf16.gmra.mrb[24].mxu0 %v8723_v4  ;;  %v21865_v4 = vld [vmem:[%s28951_s29 + $0x340] sm:$0xff] }
 0x61f   : > { %25122 = vmatprep.mubr.bf16.mxu0 %v8724_v51  ;;  %v9092_v51 = vpack.c.bf16 %v21864_v26, %v30809_v56  ;;  %v9093_v5 = vpack.c.bf16 %v21866_v60, %v21865_v4  ;;  %v28463_v26 = vld [vmem:[%s33500_s3 + $0x38] sm:$0xff]   ;;  %v28454_v60 = vld [vmem:[%s33498_s1 + $0x6b0] sm:$0xff]  }
 0x620   : > { %v21912_v4 = vld [vmem:[%s28951_s29 + $0x271] sm:$0xff] }
 0x626   : > { %25123 = vmatmul.mubr.bf16.gmra.mrb[28].mxu0 %v8725_v59  ;;  %v9095_v59 = vpack.c.bf16 %v21870_v62, %v21869_v52  ;;  %v21922_v52 = vld [vmem:[%s28951_s29 + $0x351] sm:$0xff] }
 0x627   : > { %25142 = vmatprep.mubr.bf16.mxu0 %v9081_v25  ;;  %v21872_v25 = vld [vmem:[%s28951_s29 + $0x3b0] sm:$0xff] }
 0x628   : > { %v9096_v56 = vpack.c.bf16 %v21872_v25, %v30820_v47 }
 0x62e   : > { %25143 = vmatmul.mubr.bf16.vlgmr.msra.gmra.mrb[0].mxu0 %v9082_v28  ;;  %v28457_v28 = vld [vmem:[%s33500_s3 + $0x8] sm:$0xff]  }
 0x62f   : > { %25175 = vmatpush3.bf16.msra.mxu0 %v28440_v55  ;;  %25146 = vmatprep.mubr.bf16.mxu0 %v9083_v27  ;;  %v28445_v55 = vld [vmem:[%s33498_s1 + $0x668] sm:$0xff]  }
 0x630   : > { %25176 = vmatprep.subr.bf16.mxu0 %v28441_v10  ;;  %v21899_v27 = vld [vmem:[%s28951_s29 + $0x181] sm:$0xff]  ;;  %25272 = vmatprep.subr.bf16.mxu1 %v28457_v28 }
 0x631   : > { %25273 = vmatpush3.bf16.msra.mxu1 %v28457_v28  ;;  %v21956_v28 = vld [vmem:[%s28951_s29 + $0x192] sm:$0xff] }
 0x632   : > { %25274 = vmatprep.subr.bf16.mxu1 %v28458_v45 }
 0x633   : > { %25177 = vmatpush3.bf16.msra.mxu0 %v28441_v10  ;;  %v21900_v10 = vld [vmem:[%s28951_s29 + $0x191] sm:$0xff] }
 0x634   : > { %25178 = vmatprep.subr.bf16.mxu0 %v28442_v1  ;;  %v9452_v47 = vpack.c.bf16 %v21900_v10, %v21899_v27  ;;  %v21957_v27 = vld [vmem:[%s28951_s29 + $0x1a2] sm:$0xff]  ;;  %v21958_v10 = vld [vmem:[%s28951_s29 + $0x1b2] sm:$0xff] }
 0x635   : > { %25275 = vmatpush3.bf16.msra.mxu1 %v28458_v45  ;;  %v21961_v45 = vld [vmem:[%s28951_s29 + $0x202] sm:$0xff] }
 0x636   : > { %25147 = vmatmul.mubr.bf16.gmra.mrb[4].mxu0 %v9084_v21  ;;  %v28449_v21 = vld [vmem:[%s33498_s1 + $0x688] sm:$0xff]  }
 0x637   : > { %25150 = vmatprep.mubr.bf16.mxu0 %v9085_v3  ;;  %25179 = vmatpush3.bf16.msra.mxu0 %v28442_v1  ;;  %v9453_v1 = vpack.c.bf16 %v21902_v37, %v21901_v61  ;;  %v28459_v3 = vld [vmem:[%s33500_s3 + $0x18] sm:$0xff]   ;;  %v9822_v61 = vpack.c.bf16 %v21956_v28, %v21955_v53  ;;  %v9823_v37 = vpack.c.bf16 %v21958_v10, %v21957_v27 }
 0x638   : > { %25180 = vmatprep.subr.bf16.mxu0 %v28443_v31  ;;  %25276 = vmatprep.subr.bf16.mxu1 %v28459_v3 }
 0x639   : > { %25277 = vmatpush3.bf16.msra.mxu1 %v28459_v3  ;;  %v21963_v3 = vld [vmem:[%s28951_s29 + $0x222] sm:$0xff] }
 0x63b   : > { %25181 = vmatpush3.bf16.msra.mxu0 %v28443_v31  ;;  %v21904_v31 = vld [vmem:[%s28951_s29 + $0x1d1] sm:$0xff] }
 0x63c   : > { %25182 = vmatprep.subr.bf16.mxu0 %v28444_v33  ;;  %v9454_v32 = vpack.c.bf16 %v21904_v31, %v30834_v18  ;;  %v28461_v18 = vld [vmem:[%s33500_s3 + $0x28] sm:$0xff]   ;;  %v21964_v31 = vld [vmem:[%s28951_s29 + $0x232] sm:$0xff] }
 0x63e   : > { %25151 = vmatmul.mubr.bf16.gmra.mrb[8].mxu0 %v9086_v42  ;;  %v9455_v42 = vpack.c.bf16 %v21906_v39, %v21905_v19  ;;  %v21965_v19 = vld [vmem:[%s28951_s29 + $0x242] sm:$0xff]  ;;  %v21966_v39 = vld [vmem:[%s28951_s29 + $0x252] sm:$0xff] }
 0x63f   : > { %25154 = vmatprep.mubr.bf16.mxu0 %v9087_v36  ;;  %25183 = vmatpush3.bf16.msra.mxu0 %v28444_v33  ;;  %v28460_v33 = vld [vmem:[%s33500_s3 + $0x20] sm:$0xff]   ;;  %v28451_v36 = vld [vmem:[%s33498_s1 + $0x698] sm:$0xff]  }
 0x640   : > { %25184 = vmatprep.subr.bf16.mxu0 %v28445_v55  ;;  %25278 = vmatprep.subr.bf16.mxu1 %v28460_v33 }
 0x641   : > { %25279 = vmatpush3.bf16.msra.mxu1 %v28460_v33  ;;  %v21968_v33 = vld [vmem:[%s28951_s29 + $0x272] sm:$0xff] }
 0x642   : > { %25280 = vmatprep.subr.bf16.mxu1 %v28461_v18 }
 0x643   : > { %25185 = vmatpush3.bf16.msra.mxu0 %v28445_v55  ;;  %v21907_v55 = vld [vmem:[%s28951_s29 + $0x221] sm:$0xff] }
 0x644   : > { %25186 = vmatprep.subr.bf16.mxu0 %v28446_v58 }
 0x645   : > { %25281 = vmatpush3.bf16.msra.mxu1 %v28461_v18  ;;  %v9831_v18 = vpack.c.bf16 %v30978_v2, %v30968_v50  ;;  %v33532_v2 = vmov 0.0  }
 0x646   : > { %25155 = vmatmul.mubr.bf16.gmra.mrb[12].mxu0 %v9088_v14  ;;  %v21910_v14 = vld [vmem:[%s28951_s29 + $0x251] sm:$0xff]  ;;  %10288 = vst [vmem:[#allocation2 + $0xd0] sm:$0xff] %v33532_v2  ;;  %10289 = vst [vmem:[#allocation2 + $0xd8] sm:$0x3] %v33532_v2 }
 0x647   : > { %25158 = vmatprep.mubr.bf16.mxu0 %v9089_v46  ;;  %25187 = vmatpush3.bf16.msra.mxu0 %v28446_v58  ;;  %v21909_v58 = vld [vmem:[%s28951_s29 + $0x241] sm:$0xff]  ;;  %10262 = vst [vmem:[#allocation2] sm:$0xff] %v33532_v2  ;;  %10263 = vst [vmem:[#allocation2 + $0x8] sm:$0x3] %v33532_v2 }
 0x648   : > { %25188 = vmatprep.subr.bf16.mxu0 %v28447_v29  ;;  %v28452_v46 = vld [vmem:[%s33498_s1 + $0x6a0] sm:$0xff]   ;;  %10264 = vst [vmem:[#allocation2 + $0x10] sm:$0xff] %v33532_v2  ;;  %10265 = vst [vmem:[#allocation2 + $0x18] sm:$0x3] %v33532_v2 }
 0x649   : > { %10266 = vst [vmem:[#allocation2 + $0x20] sm:$0xff] %v33532_v2  ;;  %10267 = vst [vmem:[#allocation2 + $0x28] sm:$0x3] %v33532_v2 }
 0x64a   : > { %10268 = vst [vmem:[#allocation2 + $0x30] sm:$0xff] %v33532_v2  ;;  %10269 = vst [vmem:[#allocation2 + $0x38] sm:$0x3] %v33532_v2 }
 0x64b   : > { %25189 = vmatpush3.bf16.msra.mxu0 %v28447_v29  ;;  %v9456_v29 = vpack.c.bf16 %v21908_v6, %v21907_v55  ;;  %v21976_v55 = vld [vmem:[%s28951_s29 + $0x312] sm:$0xff]  ;;  %v21977_v6 = vld [vmem:[%s28951_s29 + $0x342] sm:$0xff]  ;;  %10270 = vst [vmem:[#allocation2 + $0x40] sm:$0xff] %v33532_v2  ;;  %10271 = vst [vmem:[#allocation2 + $0x48] sm:$0x3] %v33532_v2 }
 0x64c   : > { %25222 = vmatprep.subr.bf16.mxu0 %v28448_v38  ;;  %10272 = vst [vmem:[#allocation2 + $0x50] sm:$0xff] %v33532_v2  ;;  %10273 = vst [vmem:[#allocation2 + $0x58] sm:$0x3] %v33532_v2 }
 0x64d   : > { %10274 = vst [vmem:[#allocation2 + $0x60] sm:$0xff] %v33532_v2  ;;  %10275 = vst [vmem:[#allocation2 + $0x68] sm:$0x3] %v33532_v2 }
 0x64e   : > { %25159 = vmatmul.mubr.bf16.gmra.mrb[16].mxu0 %v9090_v23  ;;  %v9457_v23 = vpack.c.bf16 %v21910_v14, %v21909_v58  ;;  %v9832_v58 = vpack.c.bf16 %v21976_v55, %v30981_v41  ;;  %10276 = vst [vmem:[#allocation2 + $0x70] sm:$0xff] %v33532_v2  ;;  %10277 = vst [vmem:[#allocation2 + $0x78] sm:$0x3] %v33532_v2  ;;  %v33528_v41 = vmov 0.0|0.0  }
 0x64f   : > { %25162 = vmatprep.mubr.bf16.mxu0 %v9091_v49  ;;  %v28453_v49 = vld [vmem:[%s33498_s1 + $0x6a8] sm:$0xff]   ;;  %10278 = vst [vmem:[#allocation2 + $0x80] sm:$0xff] %v33532_v2  ;;  %10279 = vst [vmem:[#allocation2 + $0x88] sm:$0x3] %v33532_v2  ;;  %25286 = vmatprep.mubr.bf16.mxu1 %v33528_v41 }
 0x650   : > { %10280 = vst [vmem:[#allocation2 + $0x90] sm:$0xff] %v33532_v2  ;;  %10281 = vst [vmem:[#allocation2 + $0x98] sm:$0x3] %v33532_v2 }
 0x651   : > { %10282 = vst [vmem:[#allocation2 + $0xa0] sm:$0xff] %v33532_v2  ;;  %10283 = vst [vmem:[#allocation2 + $0xa8] sm:$0x3] %v33532_v2 }
 0x652   : > { %10284 = vst [vmem:[#allocation2 + $0xb0] sm:$0xff] %v33532_v2  ;;  %10285 = vst [vmem:[#allocation2 + $0xb8] sm:$0x3] %v33532_v2 }
 0x653   : > { %10286 = vst [vmem:[#allocation2 + $0xc0] sm:$0xff] %v33532_v2  ;;  %10287 = vst [vmem:[#allocation2 + $0xc8] sm:$0x3] %v33532_v2 }
 0x654   : > { %10290 = vst [vmem:[#allocation2 + $0xe0] sm:$0xff] %v33532_v2  ;;  %10291 = vst [vmem:[#allocation2 + $0xe8] sm:$0x3] %v33532_v2 }
 0x655   : > { %10292 = vst [vmem:[#allocation2 + $0xf0] sm:$0xff] %v33532_v2  ;;  %10293 = vst [vmem:[#allocation2 + $0xf8] sm:$0x3] %v33532_v2 }
 0x656   : > { %25163 = vmatmul.mubr.bf16.gmra.mrb[20].mxu0 %v9092_v51  ;;  %v9458_v51 = vpack.c.bf16 %v21912_v4, %v30857_v40  ;;  %v9460_v40 = vpack.c.bf16 %v30879_v16, %v30876_v57  ;;  %v21924_v57 = vld [vmem:[%s28951_s29 + $0x371] sm:$0xff]  ;;  %v21925_v16 = vld [vmem:[%s28951_s29 + $0x381] sm:$0xff]  ;;  %10294 = vst [vmem:[#allocation2 + $0x100] sm:$0xff] %v33532_v2  ;;  %10295 = vst [vmem:[#allocation2 + $0x108] sm:$0x3] %v33532_v2 }
 0x657   : > { %25166 = vmatprep.mubr.bf16.mxu0 %v9093_v5  ;;  %v9459_v5 = vpack.c.bf16 %v30873_v22, %v30860_v17  ;;  %v9461_v17 = vpack.c.bf16 %v30892_v34, %v30882_v44  ;;  %v21920_v22 = vld [vmem:[%s28951_s29 + $0x311] sm:$0xff]  ;;  %10296 = vst [vmem:[#allocation2 + $0x110] sm:$0xff] %v33532_v2  ;;  %10297 = vst [vmem:[#allocation2 + $0x118] sm:$0x3] %v33532_v2  ;;  %v28468_v4 = vld [vmem:[%s33500_s3 + $0x60] sm:$0xff]  }
 0x658   : > { %v9462_v62 = vpack.c.bf16 %v21920_v22, %v30895_v0  ;;  %v21926_v44 = vld [vmem:[%s28951_s29 + $0x391] sm:$0xff]  ;;  %10298 = vst [vmem:[#allocation2 + $0x120] sm:$0xff] %v33532_v2  ;;  %10299 = vst [vmem:[#allocation2 + $0x128] sm:$0x3] %v33532_v2 }
 0x659   : > { %v9465_v25 = vpack.c.bf16 %v21926_v44, %v21925_v16  ;;  %v21954_v0 = vld [vmem:[%s28951_s29 + $0x172] sm:$0xff]  ;;  %10300 = vst [vmem:[#allocation2 + $0x130] sm:$0xff] %v33532_v2  ;;  %10301 = vst [vmem:[#allocation2 + $0x138] sm:$0x3] %v33532_v2 }
 0x65a   : > { %10302 = vst [vmem:[#allocation2 + $0x140] sm:$0xff] %v33532_v2  ;;  %10303 = vst [vmem:[#allocation2 + $0x148] sm:$0x3] %v33532_v2 }
 0x65b   : > { %10304 = vst [vmem:[#allocation2 + $0x150] sm:$0xff] %v33532_v2  ;;  %10305 = vst [vmem:[#allocation2 + $0x158] sm:$0x3] %v33532_v2 }
 0x65c   : > { %10306 = vst [vmem:[#allocation2 + $0x160] sm:$0xff] %v33532_v2  ;;  %10307 = vst [vmem:[#allocation2 + $0x168] sm:$0x3] %v33532_v2 }
 0x65d   : > { %10308 = vst [vmem:[#allocation2 + $0x170] sm:$0xff] %v33532_v2  ;;  %10309 = vst [vmem:[#allocation2 + $0x178] sm:$0x3] %v33532_v2 }
 0x65e   : > { %25167 = vmatmul.mubr.bf16.gmra.mrb[24].mxu0 %v9094_v15  ;;  %v9463_v15 = vpack.c.bf16 %v21922_v52, %v21921_v30  ;;  %10310 = vst [vmem:[#allocation2 + $0x180] sm:$0xff] %v33532_v2  ;;  %10311 = vst [vmem:[#allocation2 + $0x188] sm:$0x3] %v33532_v2 }
 0x65f   : > { %25170 = vmatprep.mubr.bf16.mxu0 %v9095_v59  ;;  %v21923_v59 = vld [vmem:[%s28951_s29 + $0x361] sm:$0xff]  ;;  %10312 = vst [vmem:[#allocation2 + $0x190] sm:$0xff] %v33532_v2  ;;  %10313 = vst [vmem:[#allocation2 + $0x198] sm:$0x3] %v33532_v2 }
 0x660   : > { %v9464_v34 = vpack.c.bf16 %v21924_v57, %v21923_v59  ;;  %10314 = vst [vmem:[#allocation2 + $0x1a0] sm:$0xff] %v33532_v2  ;;  %10315 = vst [vmem:[#allocation2 + $0x1a8] sm:$0x3] %v33532_v2 }
 0x661   : > { %10316 = vst [vmem:[#allocation2 + $0x1b0] sm:$0xff] %v33532_v2  ;;  %10317 = vst [vmem:[#allocation2 + $0x1b8] sm:$0x3] %v33532_v2 }
 0x662   : > { %10318 = vst [vmem:[#allocation2 + $0x1c0] sm:$0xff] %v33532_v2  ;;  %10319 = vst [vmem:[#allocation2 + $0x1c8] sm:$0x3] %v33532_v2 }
 0x663   : > { %10320 = vst [vmem:[#allocation2 + $0x1d0] sm:$0xff] %v33532_v2  ;;  %10321 = vst [vmem:[#allocation2 + $0x1d8] sm:$0x3] %v33532_v2 }
 0x664   : > { %10322 = vst [vmem:[#allocation2 + $0x1e0] sm:$0xff] %v33532_v2  ;;  %10323 = vst [vmem:[#allocation2 + $0x1e8] sm:$0x3] %v33532_v2 }
 0x665   : > { %10324 = vst [vmem:[#allocation2 + $0x1f0] sm:$0xff] %v33532_v2  ;;  %10325 = vst [vmem:[#allocation2 + $0x1f8] sm:$0x3] %v33532_v2 }
 0x666   : > { %25171 = vmatmul.mubr.bf16.gmra.mrb[28].mxu0 %v9096_v56  ;;  %v9466_v56 = vpack.c.bf16 %v21928_v8, %v30906_v9  ;;  %10326 = vst [vmem:[#allocation2 + $0x200] sm:$0xff] %v33532_v2  ;;  %10327 = vst [vmem:[#allocation2 + $0x208] sm:$0x3] %v33532_v2 }
 0x667   : > { %25190 = vmatprep.mubr.bf16.mxu0 %v9451_v11  ;;  %v9821_v11 = vpack.c.bf16 %v21954_v0, %v21953_v24  ;;  %10328 = vst [vmem:[#allocation2 + $0x210] sm:$0xff] %v33532_v2  ;;  %10329 = vst [vmem:[#allocation2 + $0x218] sm:$0x3] %v33532_v2 }
 0x668   : > { %10330 = vst [vmem:[#allocation2 + $0x220] sm:$0xff] %v33532_v2  ;;  %10331 = vst [vmem:[#allocation2 + $0x228] sm:$0x3] %v33532_v2 }
 0x669   : > { %10332 = vst [vmem:[#allocation2 + $0x230] sm:$0xff] %v33532_v2  ;;  %10333 = vst [vmem:[#allocation2 + $0x238] sm:$0x3] %v33532_v2 }
 0x66a   : > { %10334 = vst [vmem:[#allocation2 + $0x240] sm:$0xff] %v33532_v2  ;;  %10335 = vst [vmem:[#allocation2 + $0x248] sm:$0x3] %v33532_v2 }
 0x66b   : > { %10336 = vst [vmem:[#allocation2 + $0x250] sm:$0xff] %v33532_v2  ;;  %10337 = vst [vmem:[#allocation2 + $0x258] sm:$0x3] %v33532_v2 }
 0x66c   : > { %10338 = vst [vmem:[#allocation2 + $0x260] sm:$0xff] %v33532_v2  ;;  %10339 = vst [vmem:[#allocation2 + $0x268] sm:$0x3] %v33532_v2 }
 0x66d   : > { %10340 = vst [vmem:[#allocation2 + $0x270] sm:$0xff] %v33532_v2  ;;  %10341 = vst [vmem:[#allocation2 + $0x278] sm:$0x3] %v33532_v2 }
 0x66e   : > { %25191 = vmatmul.mubr.bf16.vlgmr.msra.gmra.mrb[0].mxu0 %v9452_v47  ;;  %v21960_v47 = vld [vmem:[%s28951_s29 + $0x1d2] sm:$0xff]  ;;  %10342 = vst [vmem:[#allocation2 + $0x280] sm:$0xff] %v33532_v2  ;;  %10343 = vst [vmem:[#allocation2 + $0x288] sm:$0x3] %v33532_v2 }
 0x66f   : > { %25223 = vmatpush3.bf16.msra.mxu0 %v28448_v38  ;;  %25194 = vmatprep.mubr.bf16.mxu0 %v9453_v1  ;;  %v28462_v38 = vld [vmem:[%s33500_s3 + $0x30] sm:$0xff]   ;;  %v9824_v9 = vpack.c.bf16 %v21960_v47, %v30920_v35  ;;  %v9829_v35 = vpack.c.bf16 %v30959_v20, %v30946_v13  ;;  %v21979_v13 = vld [vmem:[%s28951_s29 + $0x362] sm:$0xff]  ;;  %10344 = vst [vmem:[#allocation2 + $0x290] sm:$0xff] %v33532_v2  ;;  %10345 = vst [vmem:[#allocation2 + $0x298] sm:$0x3] %v33532_v2 }
 0x670   : > { %25224 = vmatprep.subr.bf16.mxu0 %v28449_v21  ;;  %25282 = vmatprep.subr.bf16.mxu1 %v28462_v38  ;;  %v21962_v1 = vld [vmem:[%s28951_s29 + $0x212] sm:$0xff]  ;;  %10346 = vst [vmem:[#allocation2 + $0x2a0] sm:$0xff] %v33532_v2  ;;  %10347 = vst [vmem:[#allocation2 + $0x2a8] sm:$0x3] %v33532_v2 }
 0x671   : > { %25283 = vmatpush3.bf16.msra.mxu1 %v28462_v38  ;;  %v21980_v20 = vld [vmem:[%s28951_s29 + $0x372] sm:$0xff]  ;;  %10348 = vst [vmem:[#allocation2 + $0x2b0] sm:$0xff] %v33532_v2  ;;  %10349 = vst [vmem:[#allocation2 + $0x2b8] sm:$0x3] %v33532_v2 }
 0x672   : > { %25284 = vmatprep.subr.bf16.mxu1 %v28463_v26  ;;  %v9834_v38 = vpack.c.bf16 %v21980_v20, %v21979_v13  ;;  %10350 = vst [vmem:[#allocation2 + $0x2c0] sm:$0xff] %v33532_v2  ;;  %10351 = vst [vmem:[#allocation2 + $0x2c8] sm:$0x3] %v33532_v2 }
 0x673   : > { %25225 = vmatpush3.bf16.msra.mxu0 %v28449_v21  ;;  %v9825_v21 = vpack.c.bf16 %v21962_v1, %v21961_v45  ;;  %10352 = vst [vmem:[#allocation2 + $0x2d0] sm:$0xff] %v33532_v2  ;;  %10353 = vst [vmem:[#allocation2 + $0x2d8] sm:$0x3] %v33532_v2 }
 0x674   : > { %25226 = vmatprep.subr.bf16.mxu0 %v28450_v7  ;;  %10354 = vst [vmem:[#allocation2 + $0x2e0] sm:$0xff] %v33532_v2  ;;  %10355 = vst [vmem:[#allocation2 + $0x2e8] sm:$0x3] %v33532_v2 }
 0x675   : > { %25285 = vmatpush3.bf16.msra.mxu1 %v28463_v26  ;;  %10356 = vst [vmem:[#allocation2 + $0x2f0] sm:$0xff] %v33532_v2  ;;  %10357 = vst [vmem:[#allocation2 + $0x2f8] sm:$0x3] %v33532_v2  ;;  %v28467_v26 = vld [vmem:[%s33500_s3 + $0x58] sm:$0xff]  }
 0x676   : > { %25195 = vmatmul.mubr.bf16.gmra.mrb[4].mxu0 %v9454_v32  ;;  %v9827_v32 = vpack.c.bf16 %v21966_v39, %v21965_v19  ;;  %10358 = vst [vmem:[#allocation2 + $0x300] sm:$0xff] %v33532_v2  ;;  %10359 = vst [vmem:[#allocation2 + $0x308] sm:$0x3] %v33532_v2 }
 0x677   : > { %25198 = vmatprep.mubr.bf16.mxu0 %v9455_v42  ;;  %25227 = vmatpush3.bf16.msra.mxu0 %v28450_v7  ;;  %v9826_v7 = vpack.c.bf16 %v21964_v31, %v21963_v3  ;;  %v9828_v42 = vpack.c.bf16 %v21968_v33, %v30943_v54  ;;  %v21978_v54 = vld [vmem:[%s28951_s29 + $0x352] sm:$0xff]  ;;  %10360 = vst [vmem:[#allocation2 + $0x310] sm:$0xff] %v33532_v2  ;;  %10361 = vst [vmem:[#allocation2 + $0x318] sm:$0x3] %v33532_v2 }
 0x678   : > { %25228 = vmatprep.subr.bf16.mxu0 %v28451_v36  ;;  %v9833_v14 = vpack.c.bf16 %v21978_v54, %v21977_v6  ;;  %10362 = vst [vmem:[#allocation2 + $0x320] sm:$0xff] %v33532_v2  ;;  %10363 = vst [vmem:[#allocation2 + $0x328] sm:$0x3] %v33532_v2  ;;  %25287 = vmatmul.mubr.bf16.vlgmr.msra.gmra.mrb[0].mxu1 %v33528_v41 }
 0x679   : > { %10364 = vst [vmem:[#allocation2 + $0x330] sm:$0xff] %v33532_v2  ;;  %10365 = vst [vmem:[#allocation2 + $0x338] sm:$0x3] %v33532_v2  ;;  %25290 = vmatprep.mubr.bf16.mxu1 %v33528_v41 }
 0x67a   : > { %10366 = vst [vmem:[#allocation2 + $0x340] sm:$0xff] %v33532_v2  ;;  %10367 = vst [vmem:[#allocation2 + $0x348] sm:$0x3] %v33532_v2 }
 0x67b   : > { %25229 = vmatpush3.bf16.msra.mxu0 %v28451_v36  ;;  %v9830_v36 = vpack.c.bf16 %v30965_v12, %v30962_v43  ;;  %v21984_v12 = vld [vmem:[%s28951_s29 + $0x3b2] sm:$0xff]  ;;  %10368 = vst [vmem:[#allocation2 + $0x350] sm:$0xff] %v33532_v2  ;;  %10369 = vst [vmem:[#allocation2 + $0x358] sm:$0x3] %v33532_v2 }
 0x67c   : > { %25230 = vmatprep.subr.bf16.mxu0 %v28452_v46  ;;  %v9836_v50 = vpack.c.bf16 %v21984_v12, %v30992_v63  ;;  %10370 = vst [vmem:[#allocation2 + $0x360] sm:$0xff] %v33532_v2  ;;  %10371 = vst [vmem:[#allocation2 + $0x368] sm:$0x3] %v33532_v2  ;;  %v28464_v63 = vld [vmem:[%s33500_s3 + $0x40] sm:$0xff]  }
 0x67d   : > { %10372 = vst [vmem:[#allocation2 + $0x370] sm:$0xff] %v33532_v2  ;;  %10373 = vst [vmem:[#allocation2 + $0x378] sm:$0x3] %v33532_v2  ;;  %25318 = vmatprep.subr.bf16.mxu1 %v28464_v63 }
 0x67e   : > { %25199 = vmatmul.mubr.bf16.gmra.mrb[8].mxu0 %v9456_v29  ;;  %v21982_v29 = vld [vmem:[%s28951_s29 + $0x392] sm:$0xff]  ;;  %10374 = vst [vmem:[#allocation2 + $0x380] sm:$0xff] %v33532_v2  ;;  %10375 = vst [vmem:[#allocation2 + $0x388] sm:$0x3] %v33532_v2  ;;  %25319 = vmatpush3.bf16.msra.mxu1 %v28464_v63 }
 0x67f   : > { %25202 = vmatprep.mubr.bf16.mxu0 %v9457_v23  ;;  %25231 = vmatpush3.bf16.msra.mxu0 %v28452_v46  ;;  %v21981_v46 = vld [vmem:[%s28951_s29 + $0x382] sm:$0xff]  ;;  %10376 = vst [vmem:[#allocation2 + $0x390] sm:$0xff] %v33532_v2  ;;  %10377 = vst [vmem:[#allocation2 + $0x398] sm:$0x3] %v33532_v2 }
 0x680   : > { %25232 = vmatprep.subr.bf16.mxu0 %v28453_v49  ;;  %v9835_v43 = vpack.c.bf16 %v21982_v29, %v21981_v46  ;;  %10378 = vst [vmem:[#allocation2 + $0x3a0] sm:$0xff] %v33532_v2  ;;  %10379 = vst [vmem:[#allocation2 + $0x3a8] sm:$0x3] %v33532_v2  ;;  %25291 = vmatmul.mubr.bf16.gmra.mrb[4].mxu1 %v33528_v41  ;;  %v28465_v23 = vld [vmem:[%s33500_s3 + $0x48] sm:$0xff]  }
 0x681   : > { %10380 = vst [vmem:[#allocation2 + $0x3b0] sm:$0xff] %v33532_v2  ;;  %10381 = vst [vmem:[#allocation2 + $0x3b8] sm:$0x3] %v33532_v2  ;;  %25320 = vmatprep.subr.bf16.mxu1 %v28465_v23 }
 0x682   : > { %25321 = vmatpush3.bf16.msra.mxu1 %v28465_v23 }
 0x683   : > { %25233 = vmatpush3.bf16.msra.mxu0 %v28453_v49  ;;  %v28466_v49 = vld [vmem:[%s33500_s3 + $0x50] sm:$0xff]  }
 0x684   : > { %25234 = vmatprep.subr.bf16.mxu0 %v28454_v60  ;;  %25322 = vmatprep.subr.bf16.mxu1 %v28466_v49 }
 0x686   : > { %25203 = vmatmul.mubr.bf16.gmra.mrb[12].mxu0 %v9458_v51  ;;  %25323 = vmatpush3.bf16.msra.mxu1 %v28466_v49  ;;  %v28470_v51 = vld [vmem:[%s33500_s3 + $0x70] sm:$0xff]  }
 0x687   : > { %25206 = vmatprep.mubr.bf16.mxu0 %v9459_v5  ;;  %25235 = vmatpush3.bf16.msra.mxu0 %v28454_v60  ;;  %v28469_v60 = vld [vmem:[%s33500_s3 + $0x68] sm:$0xff]   ;;  %v28471_v5 = vld [vmem:[%s33500_s3 + $0x78] sm:$0xff]  }
 0x688   : > { %25236 = vmatprep.subr.bf16.mxu0 %v28455_v48  ;;  %25324 = vmatprep.subr.bf16.mxu1 %v28467_v26 }
 0x68a   : > { %25325 = vmatpush3.bf16.msra.mxu1 %v28467_v26 }
 0x68b   : > { %25237 = vmatpush3.bf16.msra.mxu0 %v28455_v48  ;;  %25326 = vmatprep.subr.bf16.mxu1 %v28468_v4  ;;  %v31312_v48 = vld [vmem:[%s33500_s3 + $0x80] sm:$0xff]  }
 0x68e   : > { %25207 = vmatmul.mubr.bf16.gmra.mrb[16].mxu0 %v9460_v40  ;;  %25327 = vmatpush3.bf16.msra.mxu1 %v28468_v4  ;;  %v31318_v40 = vld [vmem:[%s33499_s2] ss:$0 sm:$0xff] }
 0x68f   : > { %25210 = vmatprep.mubr.bf16.mxu0 %v9461_v17  ;;  %25328 = vmatprep.subr.bf16.mxu1 %v28469_v60 }
 0x692   : > { %25329 = vmatpush3.bf16.msra.mxu1 %v28469_v60 }
 0x693   : > { %25330 = vmatprep.subr.bf16.mxu1 %v28470_v51 }
 0x696   : > { %25211 = vmatmul.mubr.bf16.gmra.mrb[20].mxu0 %v9462_v62  ;;  %25331 = vmatpush3.bf16.msra.mxu1 %v28470_v51 }
 0x697   : > { %25214 = vmatprep.mubr.bf16.mxu0 %v9463_v15  ;;  %25332 = vmatprep.subr.bf16.mxu1 %v28471_v5 }
 0x69a   : > { %25333 = vmatpush3.bf16.msra.mxu1 %v28471_v5 }
 0x69b   : > { %25366 = vmatprep.subr.bf16.mxu1 %v31312_v48 }
 0x69e   : > { %25215 = vmatmul.mubr.bf16.gmra.mrb[24].mxu0 %v9464_v34 }
 0x69f   : > { %25218 = vmatprep.mubr.bf16.mxu0 %v9465_v25 }
 0x6a6   : > { %25219 = vmatmul.mubr.bf16.gmra.mrb[28].mxu0 %v9466_v56 }
 0x6a7   : > { %25238 = vmatprep.mubr.bf16.mxu0 %v9821_v11 }
 0x6ae   : > { %25239 = vmatmul.mubr.bf16.vlgmr.msra.gmra.mrb[0].mxu0 %v9822_v61 }
 0x6af   : > { %25242 = vmatprep.mubr.bf16.mxu0 %v9823_v37 }
 0x6b6   : > { %25243 = vmatmul.mubr.bf16.gmra.mrb[4].mxu0 %v9824_v9 }
 0x6b7   : > { %25246 = vmatprep.mubr.bf16.mxu0 %v9825_v21 }
 0x6be   : > { %25247 = vmatmul.mubr.bf16.gmra.mrb[8].mxu0 %v9826_v7 }
 0x6bf   : > { %25250 = vmatprep.mubr.bf16.mxu0 %v9827_v32 }
 0x6c6   : > { %25251 = vmatmul.mubr.bf16.gmra.mrb[12].mxu0 %v9828_v42 }
 0x6c7   : > { %25254 = vmatprep.mubr.bf16.mxu0 %v9829_v35 }
 0x6ce   : > { %25255 = vmatmul.mubr.bf16.gmra.mrb[16].mxu0 %v9830_v36 }
 0x6cf   : > { %25258 = vmatprep.mubr.bf16.mxu0 %v9831_v18 }
 0x6d6   : > { %25259 = vmatmul.mubr.bf16.gmra.mrb[20].mxu0 %v9832_v58 }
 0x6d7   : > { %25262 = vmatprep.mubr.bf16.mxu0 %v9833_v14 }
 0x6de   : > { %25263 = vmatmul.mubr.bf16.gmra.mrb[24].mxu0 %v9834_v38 }
 0x6df   : > { %25266 = vmatprep.mubr.bf16.mxu0 %v9835_v43 }
 0x6e6   : > { %25267 = vmatmul.mubr.bf16.gmra.mrb[28].mxu0 %v9836_v50 }
 0x781   : > { %v25240_v17 = vpop.f32.mrb[0].mxu0 }
 0x782   : > { %v10200_v22 = vadd.f32 %v25240_v17, %v31318_v40  ;;  %v9936_v30 = vpop.f32.mrb[1].mxu0 }
 0x783   : > { %v31322_v52 = vadd.f32 %v31318_v40, %v9936_v30  ;;  %v25241_v62 = vpop.f32.mrb[2].mxu0 }
 0x784   : > { %v10232_v15 = vmax.f32 %v10200_v22, 0.0  ;;  %v10201_v59 = vadd.f32 %v25241_v62, %v31318_v40  ;;  %v9939_v57 = vpop.f32.mrb[3].mxu0 }
 0x785   : > { %v33531_v16 = vmax.f32 %v31322_v52, 0.0  ;;  %v10199_v44 = vadd.f32 %v31318_v40, %v9939_v57 }
 0x786   : > { %10385 = vst [vmem:[#allocation2 + $0xd1] sm:$0xff] %v10232_v15  ;;  %v10233_v34 = vmax.f32 %v10201_v59, 0.0 }
 0x787   : > { %10383 = vst [vmem:[#allocation2 + $0xb1] sm:$0xff] %v33531_v16  ;;  %v10231_v25 = vmax.f32 %v10199_v44, 0.0 }
 0x788   : > { %10386 = vst [vmem:[#allocation2 + $0xe1] sm:$0xff] %v10233_v34 }
 0x789   : > { %10384 = vst [vmem:[#allocation2 + $0xc1] sm:$0xff] %v10231_v25  ;;  %v25244_v8 = vpop.f32.mrb[4].mxu0  ;;  %v31329_v24 = vpack.c.bf16 %v10232_v15, %v10231_v25 }
 0x78a   : > { %v10204_v0 = vadd.f32 %v25244_v8, %v31318_v40  ;;  %v9952_v56 = vpop.f32.mrb[5].mxu0 }
 0x78b   : > { %v10202_v11 = vadd.f32 %v31318_v40, %v9952_v56  ;;  %v25245_v53 = vpop.f32.mrb[6].mxu0 }
 0x78c   : > { %v10236_v28 = vmax.f32 %v10204_v0, 0.0  ;;  %v10205_v27 = vadd.f32 %v25245_v53, %v31318_v40  ;;  %v9955_v10 = vpop.f32.mrb[7].mxu0 }
 0x78d   : > { %v10234_v61 = vmax.f32 %v10202_v11, 0.0  ;;  %v10203_v37 = vadd.f32 %v31318_v40, %v9955_v10  ;;  %v31337_v1 = vld [vmem:[#allocation2 + $0xd0] sm:$0xff] }
 0x78e   : > { %10389 = vst [vmem:[#allocation2 + $0x111] sm:$0xff] %v10236_v28  ;;  %v10237_v47 = vmax.f32 %v10205_v27, 0.0  ;;  %v31335_v45 = vld [vmem:[#allocation2 + $0xb0] sm:$0xff] }
 0x78f   : > { %10387 = vst [vmem:[#allocation2 + $0xf1] sm:$0xff] %v10234_v61  ;;  %v10235_v9 = vmax.f32 %v10203_v37, 0.0  ;;  %v10451_v21 = vpack.c.bf16 %v31335_v45, %v33532_v2  ;;  %v31341_v3 = vld [vmem:[#allocation2 + $0xe0] sm:$0xff]  ;;  %v31343_v31 = vpack.c.bf16 %v10234_v61, %v10233_v34  ;;  %v31345_v19 = vld [vmem:[#allocation2 + $0xd2] sm:$0xff] }
 0x790   : > { %v31347_v39 = vld [vmem:[#allocation2 + $0xe2] sm:$0xff]  ;;  %10390 = vst [vmem:[#allocation2 + $0x121] sm:$0xff] %v10237_v47  ;;  %v31363_v6 = vld [vmem:[#allocation2 + $0xb2] sm:$0xff] }
 0x791   : > { %v31349_v7 = vld [vmem:[#allocation2 + $0xc0] sm:$0xff]  ;;  %10388 = vst [vmem:[#allocation2 + $0x101] sm:$0xff] %v10235_v9  ;;  %v25248_v36 = vpop.f32.mrb[8].mxu0  ;;  %25294 = vmatprep.mubr.bf16.mxu1 %v10451_v21  ;;  %v31361_v55 = vpack.c.bf16 %v10236_v28, %v10235_v9  ;;  %v31368_v13 = vld [vmem:[#allocation2 + $0xd1] sm:$0xff] }
 0x792   : > { %v31351_v32 = vld [vmem:[#allocation2 + $0xc2] sm:$0xff]  ;;  %v10452_v18 = vpack.c.bf16 %v31337_v1, %v31349_v7  ;;  %v10208_v58 = vadd.f32 %v25248_v36, %v31318_v40  ;;  %v9968_v14 = vpop.f32.mrb[9].mxu0  ;;  %33722 = vst [vmem:[#allocation14_spill] sm:$0xff] %v31368_v13  ;;  %v31378_v63 = vld [vmem:[#allocation2 + $0xb1] sm:$0xff] }
 0x793   : > { %v31355_v42 = vld [vmem:[#allocation2 + $0xc1] sm:$0xff]  ;;  %v31373_v46 = vadd.f32 %v31318_v40, %v9968_v14  ;;  %v25249_v29 = vpop.f32.mrb[10].mxu0  ;;  %33723 = vst [vmem:[#allocation15_spill] sm:$0xff] %v31378_v63  ;;  %v31386_v60 = vld [vmem:[#allocation2 + $0xd1] sm:$0xff] }
 0x794   : > { %33721 = vst [vmem:[#allocation13_spill] sm:$0xff] %v31355_v42  ;;  %25295 = vmatmul.mubr.bf16.gmra.mrb[8].mxu1 %v10452_v18  ;;  %v10240_v43 = vmax.f32 %v10208_v58, 0.0  ;;  %v10209_v12 = vadd.f32 %v25249_v29, %v31318_v40  ;;  %v9971_v50 = vpop.f32.mrb[11].mxu0  ;;  %v31380_v23 = vld [vmem:[#allocation2 + $0xc1] sm:$0xff]  ;;  %33726 = vst [vmem:[#allocation18_spill] sm:$0xff] %v31386_v60 }
 0x795   : > { %33724 = vst [vmem:[#allocation16_spill] sm:$0xff] %v31380_v23  ;;  %v31382_v49 = vld [vmem:[#allocation2 + $0xe1] sm:$0xff]  ;;  %v33530_v26 = vmax.f32 %v31373_v46, 0.0  ;;  %v10207_v4 = vadd.f32 %v31318_v40, %v9971_v50  ;;  %v31398_v15 = vld [vmem:[#allocation2 + $0x110] sm:$0xff] }
 0x796   : > { %33725 = vst [vmem:[#allocation17_spill] sm:$0xff] %v31382_v49  ;;  %10393 = vst [vmem:[#allocation2 + $0x171] sm:$0xff] %v10240_v43  ;;  %v10241_v5 = vmax.f32 %v10209_v12, 0.0  ;;  %v31390_v17 = vld [vmem:[#allocation2 + $0xf0] sm:$0xff]  ;;  %v31417_v27 = vld [vmem:[#allocation2 + $0xe1] sm:$0xff] }
 0x797   : > { %10391 = vst [vmem:[#allocation2 + $0x151] sm:$0xff] %v33530_v26  ;;  %v10239_v30 = vmax.f32 %v10207_v4, 0.0  ;;  %v10453_v62 = vpack.c.bf16 %v31390_v17, %v31341_v3  ;;  %33727 = vst [vmem:[#allocation19_spill] sm:$0xff] %v31398_v15  ;;  %v31400_v59 = vld [vmem:[#allocation2 + $0xf1] sm:$0xff] }
 0x798   : > { %33728 = vst [vmem:[#allocation4_spill] sm:$0xff] %v31400_v59  ;;  %10394 = vst [vmem:[#allocation2 + $0x181] sm:$0xff] %v10241_v5  ;;  %v31402_v57 = vld [vmem:[#allocation2 + $0x100] sm:$0xff]  ;;  %v31412_v56 = vld [vmem:[#allocation2 + $0xf2] sm:$0xff] }
 0x799   : > { %v31404_v44 = vld [vmem:[#allocation2 + $0x102] sm:$0xff]  ;;  %10392 = vst [vmem:[#allocation2 + $0x161] sm:$0xff] %v10239_v30  ;;  %v25252_v25 = vpop.f32.mrb[12].mxu0  ;;  %25298 = vmatprep.mubr.bf16.mxu1 %v10453_v62  ;;  %v10454_v8 = vpack.c.bf16 %v31398_v15, %v31402_v57  ;;  %v31410_v0 = vpack.c.bf16 %v10240_v43, %v10239_v30  ;;  %33730 = vst [vmem:[#allocation6_spill] sm:$0xff] %v31417_v27  ;;  %v31419_v10 = vld [vmem:[#allocation2 + $0x111] sm:$0xff] }
 0x79a   : > { %v31406_v34 = vld [vmem:[#allocation2 + $0x101] sm:$0xff]  ;;  %v10212_v53 = vadd.f32 %v25252_v25, %v31318_v40  ;;  %v9984_v28 = vpop.f32.mrb[13].mxu0  ;;  %33731 = vst [vmem:[#allocation7_spill] sm:$0xff] %v31419_v10  ;;  %v31484_v22 = vld [vmem:[#allocation2 + $0xf1] sm:$0xff] }
 0x79b   : > { %33729 = vst [vmem:[#allocation5_spill] sm:$0xff] %v31406_v34  ;;  %v10210_v37 = vadd.f32 %v31318_v40, %v9984_v28  ;;  %v25253_v47 = vpop.f32.mrb[14].mxu0  ;;  %33740 = vst [vmem:[#allocation23_spill] sm:$0xff] %v31484_v22  ;;  %v31578_v10 = vld [vmem:[#allocation2 + $0xf0] sm:$0xff] }
 0x79c   : > { %25299 = vmatmul.mubr.bf16.gmra.mrb[12].mxu1 %v10454_v8  ;;  %v10244_v36 = vmax.f32 %v10212_v53, 0.0  ;;  %v10213_v18 = vadd.f32 %v25253_v47, %v31318_v40  ;;  %v9987_v58 = vpop.f32.mrb[15].mxu0  ;;  %33752 = vst [vmem:[#allocation34_spill] sm:$0xff] %v31578_v10  ;;  %v31625_v10 = vld [vmem:[#allocation2 + $0x41] sm:$0xff] }
 0x79d   : > { %v31429_v14 = vmax.f32 %v10210_v37, 0.0  ;;  %v10211_v29 = vadd.f32 %v31318_v40, %v9987_v58  ;;  %v31434_v50 = vld [vmem:[#allocation2 + $0x170] sm:$0xff]  ;;  %33763 = vst [vmem:[#allocation45_spill] sm:$0xff] %v31625_v10 }
 0x79e   : > { %10397 = vst [vmem:[#allocation2 + $0x1b1] sm:$0xff] %v10244_v36  ;;  %v10245_v43 = vmax.f32 %v10213_v18, 0.0  ;;  %v31432_v12 = vld [vmem:[#allocation2 + $0x150] sm:$0xff]  ;;  %33734 = vst [vmem:[#allocation10_spill] sm:$0xff] %v31434_v50 }
 0x79f   : > { %33732 = vst [vmem:[#allocation8_spill] sm:$0xff] %v31429_v14  ;;  %33733 = vst [vmem:[#allocation9_spill] sm:$0xff] %v31432_v12  ;;  %v31437_v4 = vmax.f32 %v10211_v29, 0.0  ;;  %v10455_v30 = vpack.c.bf16 %v31432_v12, %v33532_v2  ;;  %v31441_v62 = vld [vmem:[#allocation2 + $0x180] sm:$0xff]  ;;  %v31444_v25 = vpack.c.bf16 %v31429_v14, %v10241_v5  ;;  %v31446_v8 = vld [vmem:[#allocation2 + $0x172] sm:$0xff] }
 0x7a0   : > { %10395 = vst [vmem:[#allocation2 + $0x191] sm:$0xff] %v31429_v14  ;;  %33736 = vst [vmem:[#allocation12_spill] sm:$0xff] %v31441_v62  ;;  %v31448_v53 = vld [vmem:[#allocation2 + $0x182] sm:$0xff] }
 0x7a1   : > { %33735 = vst [vmem:[#allocation11_spill] sm:$0xff] %v31437_v4  ;;  %10398 = vst [vmem:[#allocation2 + $0x1c1] sm:$0xff] %v10245_v43  ;;  %v31450_v28 = vld [vmem:[#allocation2 + $0x160] sm:$0xff]  ;;  %v25256_v58 = vpop.f32.mrb[16].mxu0  ;;  %25302 = vmatprep.mubr.bf16.mxu1 %v10455_v30  ;;  %v31462_v29 = vpack.c.bf16 %v10244_v36, %v31437_v4  ;;  %v31464_v43 = vld [vmem:[#allocation2 + $0x152] sm:$0xff] }
 0x7a2   : > { %33737 = vst [vmem:[#allocation20_spill] sm:$0xff] %v31450_v28  ;;  %v31452_v37 = vld [vmem:[#allocation2 + $0x162] sm:$0xff]  ;;  %10396 = vst [vmem:[#allocation2 + $0x1a1] sm:$0xff] %v31437_v4  ;;  %v10456_v5 = vpack.c.bf16 %v31434_v50, %v31450_v28  ;;  %v10216_v51 = vadd.f32 %v25256_v58, %v31318_v40  ;;  %v10000_v21 = vpop.f32.mrb[17].mxu0  ;;  %v31486_v30 = vld [vmem:[#allocation2 + $0x171] sm:$0xff] }
 0x7a3   : > { %v10214_v38 = vadd.f32 %v31318_v40, %v10000_v21  ;;  %v25257_v18 = vpop.f32.mrb[18].mxu0  ;;  %v31474_v36 = vld [vmem:[#allocation2 + $0x101] sm:$0xff]  ;;  %33741 = vst [vmem:[#allocation24_spill] sm:$0xff] %v31486_v30 }
 0x7a4   : > { %25303 = vmatmul.mubr.bf16.gmra.mrb[16].mxu1 %v10456_v5  ;;  %33738 = vst [vmem:[#allocation21_spill] sm:$0xff] %v31474_v36  ;;  %v31476_v61 = vmax.f32 %v10216_v51, 0.0  ;;  %v10217_v35 = vadd.f32 %v25257_v18, %v31318_v40  ;;  %v10003_v20 = vpop.f32.mrb[19].mxu0  ;;  %v31479_v47 = vld [vmem:[#allocation2 + $0x181] sm:$0xff] }
 0x7a5   : > { %33739 = vst [vmem:[#allocation22_spill] sm:$0xff] %v31479_v47  ;;  %v31481_v58 = vmax.f32 %v10214_v38, 0.0  ;;  %v10215_v9 = vadd.f32 %v31318_v40, %v10003_v20  ;;  %v31580_v14 = vld [vmem:[#allocation2 + $0x100] sm:$0xff] }
 0x7a6   : > { %10401 = vst [vmem:[#allocation2 + $0x211] sm:$0xff] %v31476_v61  ;;  %v31489_v21 = vmax.f32 %v10217_v35, 0.0  ;;  %v31505_v35 = vld [vmem:[#allocation2 + $0x1b0] sm:$0xff]  ;;  %33753 = vst [vmem:[#allocation35_spill] sm:$0xff] %v31580_v14 }
 0x7a7   : > { %v31491_v5 = vld [vmem:[#allocation2 + $0x190] sm:$0xff]  ;;  %10399 = vst [vmem:[#allocation2 + $0x1f1] sm:$0xff] %v31481_v58  ;;  %v31498_v38 = vmax.f32 %v10215_v9, 0.0  ;;  %33744 = vst [vmem:[#allocation27_spill] sm:$0xff] %v31505_v35 }
 0x7a8   : > { %33742 = vst [vmem:[#allocation25_spill] sm:$0xff] %v31491_v5  ;;  %v10457_v20 = vpack.c.bf16 %v31491_v5, %v31441_v62  ;;  %10402 = vst [vmem:[#allocation2 + $0x221] sm:$0xff] %v31489_v21  ;;  %v31516_v41 = vld [vmem:[#allocation2 + $0x192] sm:$0xff] }
 0x7a9   : > { %v31503_v11 = vld [vmem:[#allocation2 + $0x1a0] sm:$0xff]  ;;  %10400 = vst [vmem:[#allocation2 + $0x201] sm:$0xff] %v31498_v38  ;;  %v25260_v18 = vpop.f32.mrb[20].mxu0 }
 0x7aa   : > { %33743 = vst [vmem:[#allocation26_spill] sm:$0xff] %v31503_v11  ;;  %v31507_v33 = vld [vmem:[#allocation2 + $0x1a2] sm:$0xff]  ;;  %25306 = vmatprep.mubr.bf16.mxu1 %v10457_v20  ;;  %v10458_v9 = vpack.c.bf16 %v31505_v35, %v31503_v11  ;;  %v10220_v16 = vadd.f32 %v25260_v18, %v31318_v40  ;;  %v10016_v2 = vpop.f32.mrb[21].mxu0 }
 0x7ab   : > { %v10218_v30 = vadd.f32 %v31318_v40, %v10016_v2  ;;  %v25261_v47 = vpop.f32.mrb[22].mxu0 }
 0x7ac   : > { %25307 = vmatmul.mubr.bf16.gmra.mrb[20].mxu1 %v10458_v9  ;;  %v31526_v22 = vmax.f32 %v10220_v16, 0.0  ;;  %v10221_v54 = vadd.f32 %v25261_v47, %v31318_v40  ;;  %v10019_v36 = vpop.f32.mrb[23].mxu0  ;;  %v33747_v16 = vmov 0.0  }
 0x7ad   : > { %v31529_v60 = vmax.f32 %v10218_v30, 0.0  ;;  %v10219_v18 = vadd.f32 %v31318_v40, %v10019_v36  ;;  %v31535_v49 = vld [vmem:[#allocation2 + $0x210] sm:$0xff] }
 0x7ae   : > { %10405 = vst [vmem:[#allocation2 + $0x251] sm:$0xff] %v31526_v22  ;;  %v10253_v26 = vmax.f32 %v10221_v54, 0.0  ;;  %v31533_v51 = vld [vmem:[#allocation2 + $0x1f0] sm:$0xff]  ;;  %33746 = vst [vmem:[#allocation29_spill] sm:$0xff] %v31535_v49 }
 0x7af   : > { %33745 = vst [vmem:[#allocation28_spill] sm:$0xff] %v31533_v51  ;;  %10403 = vst [vmem:[#allocation2 + $0x231] sm:$0xff] %v31529_v60  ;;  %v31538_v2 = vmax.f32 %v10219_v18, 0.0  ;;  %v10459_v9 = vpack.c.bf16 %v31533_v51, %v33747_v16  ;;  %v31542_v47 = vld [vmem:[#allocation2 + $0x220] sm:$0xff]  ;;  %v31546_v36 = vld [vmem:[#allocation2 + $0x212] sm:$0xff] }
 0x7b0   : > { %33748 = vst [vmem:[#allocation30_spill] sm:$0xff] %v31542_v47  ;;  %v31548_v20 = vld [vmem:[#allocation2 + $0x222] sm:$0xff]  ;;  %10406 = vst [vmem:[#allocation2 + $0x261] sm:$0xff] %v10253_v26  ;;  %v31557_v23 = vpack.c.bf16 %v10253_v26, %v31526_v22  ;;  %v31566_v27 = vld [vmem:[#allocation2 + $0x1f2] sm:$0xff] }
 0x7b1   : > { %v31550_v54 = vld [vmem:[#allocation2 + $0x200] sm:$0xff]  ;;  %10404 = vst [vmem:[#allocation2 + $0x241] sm:$0xff] %v31538_v2  ;;  %v25264_v30 = vpop.f32.mrb[24].mxu0  ;;  %25310 = vmatprep.mubr.bf16.mxu1 %v10459_v9  ;;  %v31583_v51 = vld [vmem:[#allocation2 + $0x11] sm:$0xff] }
 0x7b2   : > { %33749 = vst [vmem:[#allocation31_spill] sm:$0xff] %v31550_v54  ;;  %v31552_v63 = vld [vmem:[#allocation2 + $0x202] sm:$0xff]  ;;  %33750 = vst [vmem:[#allocation32_spill] sm:$0xff] %v31557_v23  ;;  %v10460_v34 = vpack.c.bf16 %v31535_v49, %v31550_v54  ;;  %v10224_v26 = vadd.f32 %v25264_v30, %v31318_v40  ;;  %v10032_v59 = vpop.f32.mrb[25].mxu0  ;;  %v31586_v54 = vld [vmem:[#allocation2 + $0xd0] sm:$0xff] }
 0x7b3   : > { %v10222_v42 = vadd.f32 %v31318_v40, %v10032_v59  ;;  %v25265_v13 = vpop.f32.mrb[26].mxu0  ;;  %v31576_v23 = vld [vmem:[#allocation2 + $0xc0] sm:$0xff]  ;;  %33754 = vst [vmem:[#allocation36_spill] sm:$0xff] %v31583_v51  ;;  %33755 = vst [vmem:[#allocation37_spill] sm:$0xff] %v31586_v54 }
 0x7b4   : > { %25311 = vmatmul.mubr.bf16.gmra.mrb[24].mxu1 %v10460_v34  ;;  %33751 = vst [vmem:[#allocation33_spill] sm:$0xff] %v31576_v23  ;;  %v10256_v18 = vmax.f32 %v10224_v26, 0.0  ;;  %v10225_v30 = vadd.f32 %v25265_v13, %v31318_v40  ;;  %v10035_v4 = vpop.f32.mrb[27].mxu0  ;;  %v10720_v49 = vld [vmem:[#allocation2 + $0x1] sm:$0xff]  ;;  %v31590_v34 = vld [vmem:[#allocation2 + $0x110] sm:$0xff] }
 0x7b5   : > { %v10254_v16 = vmax.f32 %v10222_v42, 0.0  ;;  %v10223_v9 = vadd.f32 %v31318_v40, %v10035_v4  ;;  %v31588_v59 = vld [vmem:[#allocation2 + $0xe0] sm:$0xff]  ;;  %33757 = vst [vmem:[#allocation39_spill] sm:$0xff] %v31590_v34  ;;  %v31602_v50 = vld [vmem:[#allocation2 + $0x250] sm:$0xff] }
 0x7b6   : > { %33756 = vst [vmem:[#allocation38_spill] sm:$0xff] %v31588_v59  ;;  %10409 = vst [vmem:[#allocation2 + $0x2b1] sm:$0xff] %v10256_v18  ;;  %v10257_v35 = vmax.f32 %v10225_v30, 0.0  ;;  %v31592_v5 = vld [vmem:[#allocation2 + $0x230] sm:$0xff]  ;;  %v10752_v30 = vpack.c.bf16 %v31583_v51, %v10720_v49  ;;  %v31618_v49 = vld [vmem:[#allocation2 + $0x21] sm:$0xff] }
 0x7b7   : > { %33758 = vst [vmem:[#allocation40_spill] sm:$0xff] %v31592_v5  ;;  %10407 = vst [vmem:[#allocation2 + $0x291] sm:$0xff] %v10254_v16  ;;  %v10255_v4 = vmax.f32 %v10223_v9, 0.0  ;;  %v10461_v11 = vpack.c.bf16 %v31592_v5, %v31542_v47  ;;  %v31607_v62 = vld [vmem:[#allocation2 + $0x232] sm:$0xff]  ;;  %v31620_v34 = vld [vmem:[#allocation2 + $0x160] sm:$0xff] }
 0x7b8   : > { %33759 = vst [vmem:[#allocation41_spill] sm:$0xff] %v31602_v50  ;;  %10410 = vst [vmem:[#allocation2 + $0x2c1] sm:$0xff] %v10257_v35  ;;  %v31604_v18 = vld [vmem:[#allocation2 + $0x240] sm:$0xff]  ;;  %v31627_v23 = vld [vmem:[#allocation2 + $0x51] sm:$0xff] }
 0x7b9   : > { %33760 = vst [vmem:[#allocation42_spill] sm:$0xff] %v31604_v18  ;;  %v31609_v13 = vld [vmem:[#allocation2 + $0x242] sm:$0xff]  ;;  %10408 = vst [vmem:[#allocation2 + $0x2a1] sm:$0xff] %v10255_v4  ;;  %v25268_v26 = vpop.f32.mrb[28].mxu0  ;;  %25314 = vmatprep.mubr.bf16.mxu1 %v10461_v11  ;;  %v10462_v16 = vpack.c.bf16 %v31602_v50, %v31604_v18  ;;  %v31623_v11 = vld [vmem:[#allocation2 + $0x31] sm:$0xff] }
 0x7ba   : > { %v10228_v42 = vadd.f32 %v25268_v26, %v31318_v40  ;;  %v10048_v14 = vpop.f32.mrb[29].mxu0  ;;  %33761 = vst [vmem:[#allocation43_spill] sm:$0xff] %v31620_v34  ;;  %33762 = vst [vmem:[#allocation44_spill] sm:$0xff] %v31623_v11  ;;  %v31630_v26 = vld [vmem:[#allocation2 + $0x170] sm:$0xff]  ;;  %v31634_v51 = vld [vmem:[#allocation2 + $0x1a0] sm:$0xff]  ;;  %v10753_v15 = vpack.c.bf16 %v31623_v11, %v31618_v49 }
 0x7bb   : > { %v10226_v4 = vadd.f32 %v31318_v40, %v10048_v14  ;;  %v25269_v59 = vpop.f32.mrb[30].mxu0  ;;  %33764 = vst [vmem:[#allocation46_spill] sm:$0xff] %v31627_v23  ;;  %33765 = vst [vmem:[#allocation47_spill] sm:$0xff] %v31630_v26  ;;  %v31632_v50 = vld [vmem:[#allocation2 + $0x190] sm:$0xff]  ;;  %v31639_v18 = vld [vmem:[#allocation2 + $0x180] sm:$0xff] }
 0x7bc   : > { %25315 = vmatmul.mubr.bf16.gmra.mrb[28].mxu1 %v10462_v16  ;;  %v10260_v9 = vmax.f32 %v10228_v42, 0.0  ;;  %v10229_v35 = vadd.f32 %v25269_v59, %v31318_v40  ;;  %v10051_v54 = vpop.f32.mrb[31].mxu0  ;;  %33766 = vst [vmem:[#allocation48_spill] sm:$0xff] %v31632_v50  ;;  %33767 = vst [vmem:[#allocation49_spill] sm:$0xff] %v31634_v51  ;;  %v31641_v47 = vld [vmem:[#allocation2 + $0x1b0] sm:$0xff]  ;;  %v31684_v26 = vld [vmem:[#allocation2 + $0x200] sm:$0xff] }
 0x7bd   : > { %25334 = vmatprep.mubr.bf16.mxu1 %v10752_v30  ;;  %v10258_v14 = vmax.f32 %v10226_v4, 0.0  ;;  %v10227_v16 = vadd.f32 %v31318_v40, %v10051_v54  ;;  %v31637_v5 = vld [vmem:[#allocation2 + $0x2b0] sm:$0xff]  ;;  %33769 = vst [vmem:[#allocation51_spill] sm:$0xff] %v31639_v18  ;;  %33770 = vst [vmem:[#allocation52_spill] sm:$0xff] %v31641_v47  ;;  %v10754_v40 = vpack.c.bf16 %v31627_v23, %v31625_v10  ;;  %v31692_v51 = vld [vmem:[#allocation2 + $0x240] sm:$0xff] }
 0x7be   : > { %33768 = vst [vmem:[#allocation50_spill] sm:$0xff] %v31637_v5  ;;  %10413 = vst [vmem:[#allocation2 + $0x2f1] sm:$0xff] %v10260_v9  ;;  %v10261_v42 = vmax.f32 %v10229_v35, 0.0  ;;  %v31645_v30 = vld [vmem:[#allocation2 + $0x290] sm:$0xff]  ;;  %v28473_v9 = vld [vmem:[%s33500_s3 + $0x88] sm:$0xff]  }
 0x7bf   : > { %v31647_v12 = vld [vmem:[#allocation2 + $0x2b1] sm:$0xff]  ;;  %10411 = vst [vmem:[#allocation2 + $0x2d1] sm:$0xff] %v10258_v14  ;;  %v10259_v4 = vmax.f32 %v10227_v16, 0.0  ;;  %v31660_v35 = vld [vmem:[#allocation2 + $0x2c0] sm:$0xff]  ;;  %33780 = vst [vmem:[#allocation62_spill] sm:$0xff] %v31684_v26 }
 0x7c0   : > { %33771 = vst [vmem:[#allocation53_spill] sm:$0xff] %v31647_v12  ;;  %v31649_v28 = vld [vmem:[#allocation2 + $0x2b2] sm:$0xff]  ;;  %33773 = vst [vmem:[#allocation55_spill] sm:$0xff] %v31660_v35  ;;  %v31662_v59 = vld [vmem:[#allocation2 + $0x2c1] sm:$0xff] }
 0x7c1   : > { %33772 = vst [vmem:[#allocation54_spill] sm:$0xff] %v31649_v28  ;;  %33774 = vst [vmem:[#allocation56_spill] sm:$0xff] %v31662_v59  ;;  %v31664_v34 = vld [vmem:[#allocation2 + $0x2c2] sm:$0xff]  ;;  %v31682_v50 = vld [vmem:[#allocation2 + $0x292] sm:$0xff] }
 0x7c2   : > { %33775 = vst [vmem:[#allocation57_spill] sm:$0xff] %v31664_v34  ;;  %10414 = vst [vmem:[#allocation2 + $0x301] sm:$0xff] %v10261_v42  ;;  %v31668_v54 = vld [vmem:[#allocation2 + $0x2a0] sm:$0xff]  ;;  %v31680_v42 = vld [vmem:[#allocation2 + $0x291] sm:$0xff] }
 0x7c3   : > { %v31670_v14 = vld [vmem:[#allocation2 + $0x2a1] sm:$0xff]  ;;  %10412 = vst [vmem:[#allocation2 + $0x2e1] sm:$0xff] %v10259_v4  ;;  %33778 = vst [vmem:[#allocation60_spill] sm:$0xff] %v31680_v42  ;;  %v31688_v10 = vld [vmem:[#allocation2 + $0x210] sm:$0xff] }
 0x7c4   : > { %33776 = vst [vmem:[#allocation58_spill] sm:$0xff] %v31670_v14  ;;  %v31672_v16 = vld [vmem:[#allocation2 + $0x2a2] sm:$0xff]  ;;  %33779 = vst [vmem:[#allocation61_spill] sm:$0xff] %v31682_v50  ;;  %v31690_v11 = vld [vmem:[#allocation2 + $0x230] sm:$0xff]  ;;  %25335 = vmatmul.mubr.bf16.vlgmr.msra.gmra.mrb[0].mxu1 %v10753_v15 }
 0x7c5   : > { %33777 = vst [vmem:[#allocation59_spill] sm:$0xff] %v31672_v16  ;;  %33781 = vst [vmem:[#allocation63_spill] sm:$0xff] %v31688_v10  ;;  %v31698_v18 = vld [vmem:[#allocation2 + $0x220] sm:$0xff]  ;;  %v31700_v28 = vld [vmem:[#allocation2 + $0x250] sm:$0xff]  ;;  %25367 = vmatpush3.bf16.msra.mxu1 %v31312_v48  ;;  %25338 = vmatprep.mubr.bf16.mxu1 %v10754_v40  ;;  %v33790_v16 = vmax.f32 %v31322_v52, 0.0 }
 0x7c6   : > { %33782 = vst [vmem:[#allocation64_spill] sm:$0xff] %v31690_v11  ;;  %33783 = vst [vmem:[#allocation65_spill] sm:$0xff] %v31692_v51  ;;  %v31705_v34 = vld [vmem:[#allocation2 + $0x61] sm:$0xff]  ;;  %v31707_v12 = vld [vmem:[#allocation2 + $0x71] sm:$0xff]  ;;  %25368 = vmatprep.subr.bf16.mxu1 %v28473_v9 }
 0x7c7   : > { %33784 = vst [vmem:[#allocation66_spill] sm:$0xff] %v31698_v18  ;;  %33785 = vst [vmem:[#allocation67_spill] sm:$0xff] %v31700_v28  ;;  %v28474_v4 = vld [vmem:[%s33500_s3 + $0x90] sm:$0xff]   ;;  %v10728_v50 = vld [vmem:[#allocation2 + $0xa1] sm:$0xff]  ;;  %v10755_v48 = vpack.c.bf16 %v31707_v12, %v31705_v34 }
 0x7c8   : > { %v28475_v40 = vld [vmem:[%s33500_s3 + $0x98] sm:$0xff]   ;;  %v31721_v23 = vld [vmem:[#allocation2 + $0x2d0] sm:$0xff]  ;;  %v31735_v11 = vld [vmem:[#allocation2 + $0x201] sm:$0xff]  ;;  %v10756_v59 = vpack.c.bf16 %v33790_v16, %v10728_v50 }
 0x7c9   : > { %33786 = vst [vmem:[#allocation68_spill] sm:$0xff] %v31721_v23  ;;  %v31723_v26 = vld [vmem:[#allocation2 + $0x2d1] sm:$0xff]  ;;  %25369 = vmatpush3.bf16.msra.mxu1 %v28473_v9  ;;  %33789 = vst [vmem:[#allocation71_spill] sm:$0xff] %v31735_v11  ;;  %v31741_v9 = vld [vmem:[#allocation2 + $0x221] sm:$0xff] }
 0x7ca   : > { %v31725_v47 = vld [vmem:[#allocation2 + $0x2e0] sm:$0xff]  ;;  %25370 = vmatprep.subr.bf16.mxu1 %v28474_v4  ;;  %v31731_v28 = vld [vmem:[#allocation2 + $0x2d2] sm:$0xff]  ;;  %33791 = vst [vmem:[#allocation72_spill] sm:$0xff] %v31741_v9 }
 0x7cb   : > { %v31727_v15 = vld [vmem:[#allocation2 + $0x2e1] sm:$0xff]  ;;  %33788 = vst [vmem:[#allocation70_spill] sm:$0xff] %v31731_v28  ;;  %v31737_v10 = vld [vmem:[#allocation2 + $0x211] sm:$0xff] }
 0x7cc   : > { %v31729_v51 = vld [vmem:[#allocation2 + $0x2e2] sm:$0xff]  ;;  %v31743_v42 = vld [vmem:[#allocation2 + $0x231] sm:$0xff]  ;;  %25339 = vmatmul.mubr.bf16.gmra.mrb[4].mxu1 %v10755_v48 }
 0x7cd   : > { %33787 = vst [vmem:[#allocation69_spill] sm:$0xff] %v31729_v51  ;;  %33792 = vst [vmem:[#allocation73_spill] sm:$0xff] %v31743_v42  ;;  %v31745_v14 = vld [vmem:[#allocation2 + $0x241] sm:$0xff]  ;;  %v31754_v23 = vld [vmem:[#allocation2 + $0x251] sm:$0xff]  ;;  %25342 = vmatprep.mubr.bf16.mxu1 %v10756_v59  ;;  %25371 = vmatpush3.bf16.msra.mxu1 %v28474_v4 }
 0x7ce   : > { %33793 = vst [vmem:[#allocation74_spill] sm:$0xff] %v31745_v14  ;;  %v28476_v18 = vld [vmem:[%s33500_s3 + $0xa0] sm:$0xff]   ;;  %33794 = vst [vmem:[#allocation75_spill] sm:$0xff] %v31754_v23  ;;  %v31762_v5 = vld [vmem:[#allocation2 + $0xd2] sm:$0xff]  ;;  %25372 = vmatprep.subr.bf16.mxu1 %v28475_v40 }
 0x7cf   : > { %v31760_v16 = vld [vmem:[#allocation2 + $0xc2] sm:$0xff]  ;;  %v31768_v28 = vld [vmem:[#allocation2 + $0xf2] sm:$0xff] }
 0x7d0   : > { %33795 = vst [vmem:[#allocation76_spill] sm:$0xff] %v31760_v16  ;;  %v31764_v35 = vld [vmem:[#allocation2 + $0xe2] sm:$0xff]  ;;  %v31772_v52 = vld [vmem:[#allocation2 + $0x112] sm:$0xff] }
 0x7d1   : > { %33796 = vst [vmem:[#allocation77_spill] sm:$0xff] %v31764_v35  ;;  %v31770_v51 = vld [vmem:[#allocation2 + $0x102] sm:$0xff]  ;;  %33798 = vst [vmem:[#allocation79_spill] sm:$0xff] %v31772_v52  ;;  %v31778_v50 = vld [vmem:[#allocation2 + $0x172] sm:$0xff]  ;;  %25373 = vmatpush3.bf16.msra.mxu1 %v28475_v40 }
 0x7d2   : > { %33797 = vst [vmem:[#allocation78_spill] sm:$0xff] %v31770_v51  ;;  %v31776_v4 = vld [vmem:[#allocation2 + $0x162] sm:$0xff]  ;;  %33800 = vst [vmem:[#allocation81_spill] sm:$0xff] %v31778_v50  ;;  %v31786_v23 = vld [vmem:[#allocation2 + $0x192] sm:$0xff]  ;;  %25374 = vmatprep.subr.bf16.mxu1 %v28476_v18 }
 0x7d3   : > { %33799 = vst [vmem:[#allocation80_spill] sm:$0xff] %v31776_v4  ;;  %v31784_v14 = vld [vmem:[#allocation2 + $0x182] sm:$0xff]  ;;  %v31795_v16 = vld [vmem:[#allocation2 + $0x1b2] sm:$0xff] }
 0x7d4   : > { %33801 = vst [vmem:[#allocation82_spill] sm:$0xff] %v31784_v14  ;;  %v31788_v42 = vld [vmem:[#allocation2 + $0x1a2] sm:$0xff]  ;;  %33803 = vst [vmem:[#allocation84_spill] sm:$0xff] %v31795_v16  ;;  %v31801_v51 = vld [vmem:[#allocation2 + $0x212] sm:$0xff]  ;;  %25343 = vmatmul.mubr.bf16.gmra.mrb[8].mxu1 %v31329_v24  ;;  %v33810_v24 = vmax.f32 %v31373_v46, 0.0 }
 0x7d5   : > { %33802 = vst [vmem:[#allocation83_spill] sm:$0xff] %v31788_v42  ;;  %v28477_v59 = vld [vmem:[%s33500_s3 + $0xa8] sm:$0xff]   ;;  %33805 = vst [vmem:[#allocation86_spill] sm:$0xff] %v31801_v51  ;;  %v31805_v35 = vld [vmem:[#allocation2 + $0x232] sm:$0xff]  ;;  %25346 = vmatprep.mubr.bf16.mxu1 %v31343_v31  ;;  %25375 = vmatpush3.bf16.msra.mxu1 %v28476_v18 }
 0x7d6   : > { %v31797_v9 = vld [vmem:[#allocation2 + $0x202] sm:$0xff]  ;;  %33807 = vst [vmem:[#allocation88_spill] sm:$0xff] %v31805_v35  ;;  %v31811_v4 = vld [vmem:[#allocation2 + $0x252] sm:$0xff]  ;;  %25376 = vmatprep.subr.bf16.mxu1 %v28477_v59 }
 0x7d7   : > { %33804 = vst [vmem:[#allocation85_spill] sm:$0xff] %v31797_v9  ;;  %v31803_v52 = vld [vmem:[#allocation2 + $0x222] sm:$0xff]  ;;  %33809 = vst [vmem:[#allocation90_spill] sm:$0xff] %v31811_v4  ;;  %v28478_v40 = vld [vmem:[%s33500_s3 + $0xb0] sm:$0xff]  }
 0x7d8   : > { %33806 = vst [vmem:[#allocation87_spill] sm:$0xff] %v31803_v52  ;;  %v31809_v11 = vld [vmem:[#allocation2 + $0x242] sm:$0xff]  ;;  %v28479_v48 = vld [vmem:[%s33500_s3 + $0xb8] sm:$0xff]   ;;  %v31835_v18 = vld [vmem:[#allocation2 + $0x150] sm:$0xff] }
 0x7d9   : > { %33808 = vst [vmem:[#allocation89_spill] sm:$0xff] %v31809_v11  ;;  %v10736_v42 = vld [vmem:[#allocation2 + $0x141] sm:$0xff]  ;;  %25377 = vmatpush3.bf16.msra.mxu1 %v28477_v59  ;;  %33811 = vst [vmem:[#allocation91_spill] sm:$0xff] %v31835_v18  ;;  %v31839_v14 = vld [vmem:[#allocation2 + $0x170] sm:$0xff] }
 0x7da   : > { %25378 = vmatprep.subr.bf16.mxu1 %v28478_v40  ;;  %v10760_v50 = vpack.c.bf16 %v33810_v24, %v10736_v42  ;;  %v31833_v31 = vld [vmem:[%s33500_s3 + $0xc0] sm:$0xff]   ;;  %33813 = vst [vmem:[#allocation93_spill] sm:$0xff] %v31839_v14  ;;  %v31843_v46 = vld [vmem:[#allocation2 + $0x190] sm:$0xff]  ;;  %v33891_v16 = vld [vmem:[#allocation41_spill] sm:$0xff] }
 0x7db   : > { %v31837_v59 = vld [vmem:[#allocation2 + $0x160] sm:$0xff]  ;;  %33815 = vst [vmem:[#allocation95_spill] sm:$0xff] %v31843_v46  ;;  %v31855_v4 = vld [vmem:[#allocation2 + $0x210] sm:$0xff] }
 0x7dc   : > { %25347 = vmatmul.mubr.bf16.gmra.mrb[12].mxu1 %v31361_v55  ;;  %33812 = vst [vmem:[#allocation92_spill] sm:$0xff] %v31837_v59  ;;  %v31841_v11 = vld [vmem:[#allocation2 + $0x180] sm:$0xff]  ;;  %33819 = vst [vmem:[#allocation99_spill] sm:$0xff] %v31855_v4  ;;  %v31862_v9 = vld [vmem:[#allocation2 + $0x230] sm:$0xff] }
 0x7dd   : > { %25350 = vmatprep.mubr.bf16.mxu1 %v10760_v50  ;;  %25379 = vmatpush3.bf16.msra.mxu1 %v28478_v40  ;;  %33814 = vst [vmem:[#allocation94_spill] sm:$0xff] %v31841_v11  ;;  %v31845_v42 = vld [vmem:[#allocation2 + $0x1a0] sm:$0xff]  ;;  %v31851_v40 = vld [vmem:[#allocation2 + $0x1f0] sm:$0xff]  ;;  %33821 = vst [vmem:[#allocation101_spill] sm:$0xff] %v31862_v9 }
 0x7de   : > { %25380 = vmatprep.subr.bf16.mxu1 %v28479_v48  ;;  %33816 = vst [vmem:[#allocation96_spill] sm:$0xff] %v31845_v42  ;;  %33817 = vst [vmem:[#allocation97_spill] sm:$0xff] %v31851_v40  ;;  %v31853_v24 = vld [vmem:[#allocation2 + $0x200] sm:$0xff]  ;;  %v31873_v52 = vld [vmem:[#allocation2 + $0x151] sm:$0xff] }
 0x7df   : > { %33818 = vst [vmem:[#allocation98_spill] sm:$0xff] %v31853_v24  ;;  %v31860_v35 = vld [vmem:[#allocation2 + $0x220] sm:$0xff]  ;;  %33823 = vst [vmem:[#allocation103_spill] sm:$0xff] %v31873_v52  ;;  %v31877_v42 = vld [vmem:[#allocation2 + $0x191] sm:$0xff] }
 0x7e0   : > { %33820 = vst [vmem:[#allocation100_spill] sm:$0xff] %v31860_v35  ;;  %v31864_v55 = vld [vmem:[#allocation2 + $0x240] sm:$0xff]  ;;  %33825 = vst [vmem:[#allocation105_spill] sm:$0xff] %v31877_v42  ;;  %v31882_v18 = vld [vmem:[#allocation2 + $0x1f1] sm:$0xff] }
 0x7e1   : > { %25381 = vmatpush3.bf16.msra.mxu1 %v28479_v48  ;;  %33822 = vst [vmem:[#allocation102_spill] sm:$0xff] %v31864_v55  ;;  %v31875_v46 = vld [vmem:[#allocation2 + $0x161] sm:$0xff]  ;;  %33827 = vst [vmem:[#allocation107_spill] sm:$0xff] %v31882_v18  ;;  %v31888_v14 = vld [vmem:[#allocation2 + $0x211] sm:$0xff] }
 0x7e2   : > { %25414 = vmatprep.subr.bf16.mxu1 %v31833_v31  ;;  %33824 = vst [vmem:[#allocation104_spill] sm:$0xff] %v31875_v46  ;;  %v31880_v11 = vld [vmem:[#allocation2 + $0x1a1] sm:$0xff]  ;;  %33829 = vst [vmem:[#allocation109_spill] sm:$0xff] %v31888_v14  ;;  %v31896_v4 = vld [vmem:[#allocation2 + $0x231] sm:$0xff] }
 0x7e3   : > { %33826 = vst [vmem:[#allocation106_spill] sm:$0xff] %v31880_v11  ;;  %v31884_v48 = vld [vmem:[#allocation2 + $0x201] sm:$0xff]  ;;  %33831 = vst [vmem:[#allocation111_spill] sm:$0xff] %v31896_v4  ;;  %v31902_v24 = vld [vmem:[#allocation2 + $0x152] sm:$0xff] }
 0x7e4   : > { %25351 = vmatmul.mubr.bf16.gmra.mrb[16].mxu1 %v31410_v0  ;;  %33828 = vst [vmem:[#allocation108_spill] sm:$0xff] %v31884_v48  ;;  %v31890_v0 = vld [vmem:[#allocation2 + $0x221] sm:$0xff]  ;;  %33833 = vst [vmem:[#allocation113_spill] sm:$0xff] %v31902_v24  ;;  %v31906_v52 = vld [vmem:[#allocation2 + $0x172] sm:$0xff] }
 0x7e5   : > { %25354 = vmatprep.mubr.bf16.mxu1 %v31444_v25  ;;  %33830 = vst [vmem:[#allocation110_spill] sm:$0xff] %v31890_v0  ;;  %v10744_v25 = vld [vmem:[#allocation2 + $0x1e1] sm:$0xff]  ;;  %33835 = vst [vmem:[#allocation115_spill] sm:$0xff] %v31906_v52  ;;  %v31912_v55 = vld [vmem:[#allocation2 + $0x192] sm:$0xff] }
 0x7e6   : > { %v31898_v35 = vld [vmem:[#allocation2 + $0x241] sm:$0xff]  ;;  %33837 = vst [vmem:[#allocation117_spill] sm:$0xff] %v31912_v55  ;;  %v31918_v11 = vld [vmem:[#allocation2 + $0x1f2] sm:$0xff]  ;;  %v10764_v9 = vpack.c.bf16 %v31481_v58, %v10744_v25 }
 0x7e7   : > { %33832 = vst [vmem:[#allocation112_spill] sm:$0xff] %v31898_v35  ;;  %v31904_v50 = vld [vmem:[#allocation2 + $0x162] sm:$0xff]  ;;  %33839 = vst [vmem:[#allocation119_spill] sm:$0xff] %v31918_v11  ;;  %v31927_v4 = vld [vmem:[#allocation2 + $0x212] sm:$0xff] }
 0x7e8   : > { %33834 = vst [vmem:[#allocation114_spill] sm:$0xff] %v31904_v50  ;;  %v31910_v42 = vld [vmem:[#allocation2 + $0x182] sm:$0xff]  ;;  %33841 = vst [vmem:[#allocation121_spill] sm:$0xff] %v31927_v4  ;;  %v31934_v48 = vld [vmem:[#allocation2 + $0x232] sm:$0xff] }
 0x7e9   : > { %33836 = vst [vmem:[#allocation116_spill] sm:$0xff] %v31910_v42  ;;  %v31914_v18 = vld [vmem:[#allocation2 + $0x1a2] sm:$0xff]  ;;  %33843 = vst [vmem:[#allocation123_spill] sm:$0xff] %v31934_v48  ;;  %v31944_v55 = vld [vmem:[#allocation2 + $0x2b0] sm:$0xff]  ;;  %v33866_v42 = vmov 0.0|0.0  }
 0x7ea   : > { %33838 = vst [vmem:[#allocation118_spill] sm:$0xff] %v31914_v18  ;;  %v31920_v40 = vld [vmem:[#allocation2 + $0x202] sm:$0xff]  ;;  %33846 = vst [vmem:[#allocation126_spill] sm:$0xff] %v31944_v55  ;;  %v31948_v46 = vld [vmem:[#allocation2 + $0x2d0] sm:$0xff] }
 0x7eb   : > { %33840 = vst [vmem:[#allocation120_spill] sm:$0xff] %v31920_v40  ;;  %v31929_v35 = vld [vmem:[#allocation2 + $0x222] sm:$0xff]  ;;  %33848 = vst [vmem:[#allocation128_spill] sm:$0xff] %v31948_v46  ;;  %v31952_v11 = vld [vmem:[#allocation2 + $0x2f0] sm:$0xff] }
 0x7ec   : > { %33842 = vst [vmem:[#allocation122_spill] sm:$0xff] %v31929_v35  ;;  %25355 = vmatmul.mubr.bf16.gmra.mrb[20].mxu1 %v31462_v29  ;;  %v31936_v24 = vld [vmem:[#allocation2 + $0x242] sm:$0xff]  ;;  %33850 = vst [vmem:[#allocation130_spill] sm:$0xff] %v31952_v11  ;;  %v31962_v48 = vld [vmem:[#allocation2 + $0x2b1] sm:$0xff] }
 0x7ed   : > { %33844 = vst [vmem:[#allocation124_spill] sm:$0xff] %v31936_v24  ;;  %25358 = vmatprep.mubr.bf16.mxu1 %v10764_v9  ;;  %v31942_v0 = vld [vmem:[#allocation2 + $0x2a0] sm:$0xff]  ;;  %33852 = vst [vmem:[#allocation132_spill] sm:$0xff] %v31962_v48  ;;  %v31966_v4 = vld [vmem:[#allocation2 + $0x2d1] sm:$0xff]  ;;  %v33857_v9 = vpack.c.bf16 %v31476_v61, %v31498_v38 }
 0x7ee   : > { %33845 = vst [vmem:[#allocation125_spill] sm:$0xff] %v31942_v0  ;;  %v31946_v18 = vld [vmem:[#allocation2 + $0x2c0] sm:$0xff]  ;;  %33854 = vst [vmem:[#allocation134_spill] sm:$0xff] %v31966_v4  ;;  %v31970_v52 = vld [vmem:[#allocation2 + $0x2f1] sm:$0xff] }
 0x7ef   : > { %33847 = vst [vmem:[#allocation127_spill] sm:$0xff] %v31946_v18  ;;  %v31950_v29 = vld [vmem:[#allocation2 + $0x2e0] sm:$0xff]  ;;  %33856 = vst [vmem:[#allocation136_spill] sm:$0xff] %v31970_v52  ;;  %v33858_v18 = vpack.c.bf16 %v31529_v60, %v31489_v21  ;;  %v31984_v46 = vld [vmem:[#allocation2 + $0x12] sm:$0xff] }
 0x7f0   : > { %33849 = vst [vmem:[#allocation129_spill] sm:$0xff] %v31950_v29  ;;  %v31960_v14 = vld [vmem:[#allocation2 + $0x2a1] sm:$0xff]  ;;  %v31988_v40 = vld [vmem:[#allocation2 + $0x2b2] sm:$0xff] }
 0x7f1   : > { %33851 = vst [vmem:[#allocation131_spill] sm:$0xff] %v31960_v14  ;;  %v31964_v24 = vld [vmem:[#allocation2 + $0x2c1] sm:$0xff]  ;;  %33860 = vst [vmem:[#allocation138_spill] sm:$0xff] %v31988_v40  ;;  %v31998_v11 = vld [vmem:[#allocation2 + $0x2f2] sm:$0xff] }
 0x7f2   : > { %33853 = vst [vmem:[#allocation133_spill] sm:$0xff] %v31964_v24  ;;  %v31968_v35 = vld [vmem:[#allocation2 + $0x2e1] sm:$0xff]  ;;  %33864 = vst [vmem:[#allocation142_spill] sm:$0xff] %v31998_v11  ;;  %v33865_v24 = vpack.c.bf16 %v31526_v22, %v31538_v2  ;;  %v32010_v55 = vld [vmem:[#allocation2 + $0x32] sm:$0xff] }
 0x7f3   : > { %33855 = vst [vmem:[#allocation135_spill] sm:$0xff] %v31968_v35  ;;  %v11090_v25 = vld [vmem:[#allocation2 + $0x2] sm:$0xff] }
 0x7f4   : > { %25359 = vmatmul.mubr.bf16.gmra.mrb[24].mxu1 %v33857_v9  ;;  %v31986_v0 = vld [vmem:[#allocation2 + $0x2a2] sm:$0xff]  ;;  %v31992_v9 = vld [vmem:[#allocation2 + $0x2d2] sm:$0xff]  ;;  %v11122_v52 = vpack.c.bf16 %v31984_v46, %v11090_v25 }
 0x7f5   : > { %25362 = vmatprep.mubr.bf16.mxu1 %v33858_v18  ;;  %33859 = vst [vmem:[#allocation137_spill] sm:$0xff] %v31986_v0  ;;  %v31990_v14 = vld [vmem:[#allocation2 + $0x2c2] sm:$0xff]  ;;  %33862 = vst [vmem:[#allocation140_spill] sm:$0xff] %v31992_v9  ;;  %v32014_v0 = vld [vmem:[#allocation2 + $0x52] sm:$0xff] }
 0x7f6   : > { %33861 = vst [vmem:[#allocation139_spill] sm:$0xff] %v31990_v14  ;;  %v31994_v48 = vld [vmem:[#allocation2 + $0x2e2] sm:$0xff]  ;;  %v28482_v25 = vld [vmem:[%s33500_s3 + $0xd0] sm:$0xff]   ;;  %v11127_v14 = vpack.c.bf16 %v31345_v19, %v31351_v32  ;;  %v28487_v9 = vld [vmem:[%s33500_s3 + $0xf8] sm:$0xff]  }
 0x7f7   : > { %33863 = vst [vmem:[#allocation141_spill] sm:$0xff] %v31994_v48  ;;  %v32008_v4 = vld [vmem:[#allocation2 + $0x22] sm:$0xff] }
 0x7f8   : > { %v32012_v29 = vld [vmem:[#allocation2 + $0x42] sm:$0xff]  ;;  %v11123_v18 = vpack.c.bf16 %v32010_v55, %v32008_v4 }
 0x7f9   : > { %v11124_v35 = vpack.c.bf16 %v32014_v0, %v32012_v29  ;;  %v28481_v22 = vld [vmem:[%s33500_s3 + $0xc8] sm:$0xff]  }
 0x7fa   : > { %v11098_v11 = vld [vmem:[#allocation2 + $0xa2] sm:$0xff] }
 0x7fb   : > { %v11114_v40 = vld [vmem:[#allocation2 + $0x1e2] sm:$0xff] }
 0x7fc   : > { %25363 = vmatmul.mubr.bf16.gmra.mrb[28].mxu1 %v33865_v24  ;;  %v32026_v24 = vld [vmem:[#allocation2 + $0x72] sm:$0xff]  ;;  %v33885_v59 = vld [vmem:[#allocation29_spill] sm:$0xff] }
 0x7fd   : > { %25382 = vmatprep.mubr.bf16.mxu1 %v11122_v52  ;;  %v32024_v52 = vld [vmem:[#allocation2 + $0x62] sm:$0xff] }
 0x7fe   : > { %v11125_v48 = vpack.c.bf16 %v32026_v24, %v32024_v52 }
 0x804   : > { %25383 = vmatmul.mubr.bf16.vlgmr.msra.gmra.mrb[0].mxu1 %v11123_v18  ;;  %v28484_v18 = vld [vmem:[%s33500_s3 + $0xe0] sm:$0xff]  }
 0x805   : > { %25415 = vmatpush3.bf16.msra.mxu1 %v31833_v31  ;;  %25386 = vmatprep.mubr.bf16.mxu1 %v11124_v35  ;;  %v28483_v31 = vld [vmem:[%s33500_s3 + $0xd8] sm:$0xff]   ;;  %v11126_v35 = vpack.c.bf16 %v31363_v6, %v11098_v11  ;;  %v11128_v11 = vpack.c.bf16 %v31412_v56, %v31347_v39 }
 0x806   : > { %25416 = vmatprep.subr.bf16.mxu1 %v28481_v22 }
 0x809   : > { %25417 = vmatpush3.bf16.msra.mxu1 %v28481_v22  ;;  %v28485_v22 = vld [vmem:[%s33500_s3 + $0xe8] sm:$0xff]  }
 0x80a   : > { %25418 = vmatprep.subr.bf16.mxu1 %v28482_v25 }
 0x80c   : > { %25387 = vmatmul.mubr.bf16.gmra.mrb[4].mxu1 %v11125_v48  ;;  %v28486_v48 = vld [vmem:[%s33500_s3 + $0xf0] sm:$0xff]  }
 0x80d   : > { %25390 = vmatprep.mubr.bf16.mxu1 %v11126_v35  ;;  %25419 = vmatpush3.bf16.msra.mxu1 %v28482_v25  ;;  %v11106_v25 = vld [vmem:[#allocation2 + $0x142] sm:$0xff] }
 0x80e   : > { %25420 = vmatprep.subr.bf16.mxu1 %v28483_v31 }
 0x811   : > { %25421 = vmatpush3.bf16.msra.mxu1 %v28483_v31  ;;  %v32050_v31 = vld [vmem:[#allocation2 + $0x112] sm:$0xff] }
 0x812   : > { %25422 = vmatprep.subr.bf16.mxu1 %v28484_v18  ;;  %v11129_v35 = vpack.c.bf16 %v32050_v31, %v31404_v44 }
 0x814   : > { %25391 = vmatmul.mubr.bf16.gmra.mrb[8].mxu1 %v11127_v14  ;;  %v11130_v14 = vpack.c.bf16 %v31464_v43, %v11106_v25  ;;  %v32065_v25 = vld [vmem:[#allocation2 + $0x1b2] sm:$0xff] }
 0x815   : > { %25394 = vmatprep.mubr.bf16.mxu1 %v11128_v11  ;;  %25423 = vmatpush3.bf16.msra.mxu1 %v28484_v18  ;;  %v28488_v18 = vld [vmem:[%s33500_s3 + $0x100] sm:$0xff]   ;;  %v11132_v11 = vpack.c.bf16 %v31516_v41, %v31448_v53 }
 0x816   : > { %25424 = vmatprep.subr.bf16.mxu1 %v28485_v22 }
 0x819   : > { %25425 = vmatpush3.bf16.msra.mxu1 %v28485_v22  ;;  %v11131_v22 = vpack.c.bf16 %v31446_v8, %v31452_v37 }
 0x81a   : > { %25426 = vmatprep.subr.bf16.mxu1 %v28486_v48 }
 0x81c   : > { %25395 = vmatmul.mubr.bf16.gmra.mrb[12].mxu1 %v11129_v35  ;;  %v11134_v35 = vpack.c.bf16 %v31566_v27, %v11114_v40  ;;  %v28489_v40 = vld [vmem:[%s33500_s3 + $0x108] sm:$0xff]  }
 0x81d   : > { %25398 = vmatprep.mubr.bf16.mxu1 %v11130_v14  ;;  %25427 = vmatpush3.bf16.msra.mxu1 %v28486_v48  ;;  %v11133_v48 = vpack.c.bf16 %v32065_v25, %v31507_v33  ;;  %v11136_v14 = vpack.c.bf16 %v31607_v62, %v31548_v20 }
 0x81e   : > { %25428 = vmatprep.subr.bf16.mxu1 %v28487_v9 }
 0x821   : > { %25429 = vmatpush3.bf16.msra.mxu1 %v28487_v9  ;;  %v11135_v9 = vpack.c.bf16 %v31546_v36, %v31552_v63 }
 0x822   : > { %25462 = vmatprep.subr.bf16.mxu1 %v28488_v18 }
 0x824   : > { %25399 = vmatmul.mubr.bf16.gmra.mrb[16].mxu1 %v11131_v22  ;;  %v32074_v22 = vld [vmem:[#allocation2 + $0x252] sm:$0xff] }
 0x825   : > { %25402 = vmatprep.mubr.bf16.mxu1 %v11132_v11  ;;  %v11137_v11 = vpack.c.bf16 %v32074_v22, %v31609_v13 }
 0x82c   : > { %25403 = vmatmul.mubr.bf16.gmra.mrb[20].mxu1 %v11133_v48  ;;  %v28490_v48 = vld [vmem:[%s33500_s3 + $0x110] sm:$0xff]  }
 0x82d   : > { %25406 = vmatprep.mubr.bf16.mxu1 %v11134_v35  ;;  %v28491_v35 = vld [vmem:[%s33500_s3 + $0x118] sm:$0xff]  }
 0x834   : > { %25407 = vmatmul.mubr.bf16.gmra.mrb[24].mxu1 %v11135_v9  ;;  %v33867_v9 = vpack.c.bf16 %v31349_v7, %v31335_v45  ;;  %v33869_v45 = vpack.c.bf16 %v31402_v57, %v31390_v17  ;;  %v28494_v7 = vld [vmem:[%s33500_s3 + $0x130] sm:$0xff]   ;;  %v33872_v17 = vld [vmem:[#allocation9_spill] sm:$0xff] }
 0x835   : > { %25410 = vmatprep.mubr.bf16.mxu1 %v11136_v14  ;;  %v28493_v14 = vld [vmem:[%s33500_s3 + $0x128] sm:$0xff]  }
 0x83c   : > { %25411 = vmatmul.mubr.bf16.gmra.mrb[28].mxu1 %v11137_v11  ;;  %v33868_v11 = vpack.c.bf16 %v31341_v3, %v31337_v1  ;;  %v28495_v1 = vld [vmem:[%s33500_s3 + $0x138] sm:$0xff]   ;;  %v33871_v3 = vld [vmem:[#allocation20_spill] sm:$0xff] }
 0x83d   : > { %25430 = vmatprep.mubr.bf16.mxu1 %v33866_v42  ;;  %v33873_v57 = vpack.c.bf16 %v33871_v3, %v33872_v17  ;;  %v33880_v3 = vld [vmem:[#allocation27_spill] sm:$0xff] }
 0x83e   : > { %v33881_v17 = vld [vmem:[#allocation31_spill] sm:$0xff] }
 0x844   : > { %25431 = vmatmul.mubr.bf16.vlgmr.msra.gmra.mrb[0].mxu1 %v33866_v42 }
 0x845   : > { %25463 = vmatpush3.bf16.msra.mxu1 %v28488_v18  ;;  %25434 = vmatprep.mubr.bf16.mxu1 %v33866_v42  ;;  %v28492_v18 = vld [vmem:[%s33500_s3 + $0x120] sm:$0xff]  }
 0x846   : > { %25464 = vmatprep.subr.bf16.mxu1 %v28489_v40 }
 0x849   : > { %25465 = vmatpush3.bf16.msra.mxu1 %v28489_v40  ;;  %v33870_v40 = vld [vmem:[#allocation19_spill] sm:$0xff] }
 0x84a   : > { %25466 = vmatprep.subr.bf16.mxu1 %v28490_v48 }
 0x84c   : > { %25435 = vmatmul.mubr.bf16.gmra.mrb[4].mxu1 %v33866_v42  ;;  %v32109_v42 = vld [vmem:[#allocation2 + $0x120] sm:$0xff] }
 0x84d   : > { %25438 = vmatprep.mubr.bf16.mxu1 %v33867_v9  ;;  %25467 = vmatpush3.bf16.msra.mxu1 %v28490_v48  ;;  %v11500_v48 = vpack.c.bf16 %v32109_v42, %v33870_v40  ;;  %v33874_v9 = vld [vmem:[#allocation12_spill] sm:$0xff] }
 0x84e   : > { %25468 = vmatprep.subr.bf16.mxu1 %v28491_v35 }
 0x851   : > { %25469 = vmatpush3.bf16.msra.mxu1 %v28491_v35  ;;  %v28496_v35 = vld [vmem:[%s33500_s3 + $0x140] sm:$0xff]  }
 0x852   : > { %25470 = vmatprep.subr.bf16.mxu1 %v28492_v18 }
 0x854   : > { %25439 = vmatmul.mubr.bf16.gmra.mrb[8].mxu1 %v33868_v11  ;;  %v33877_v11 = vld [vmem:[#allocation26_spill] sm:$0xff] }
 0x855   : > { %25442 = vmatprep.mubr.bf16.mxu1 %v33869_v45  ;;  %25471 = vmatpush3.bf16.msra.mxu1 %v28492_v18  ;;  %v33875_v18 = vld [vmem:[#allocation10_spill] sm:$0xff]  ;;  %v33878_v45 = vld [vmem:[#allocation25_spill] sm:$0xff] }
 0x856   : > { %25472 = vmatprep.subr.bf16.mxu1 %v28493_v14  ;;  %v33879_v40 = vpack.c.bf16 %v33877_v11, %v33878_v45  ;;  %v32141_v11 = vld [vmem:[#allocation2 + $0x260] sm:$0xff] }
 0x857   : > { %v33890_v45 = vld [vmem:[#allocation36_spill] sm:$0xff] }
 0x859   : > { %25473 = vmatpush3.bf16.msra.mxu1 %v28493_v14  ;;  %v33876_v14 = vpack.c.bf16 %v33874_v9, %v33875_v18  ;;  %v33887_v9 = vld [vmem:[#allocation42_spill] sm:$0xff]  ;;  %v33888_v18 = vld [vmem:[#allocation40_spill] sm:$0xff] }
 0x85a   : > { %25474 = vmatprep.subr.bf16.mxu1 %v28494_v7 }
 0x85c   : > { %25443 = vmatmul.mubr.bf16.gmra.mrb[12].mxu1 %v11500_v48  ;;  %v32128_v48 = vld [vmem:[#allocation2 + $0x1c0] sm:$0xff] }
 0x85d   : > { %25446 = vmatprep.mubr.bf16.mxu1 %v33873_v57  ;;  %25475 = vmatpush3.bf16.msra.mxu1 %v28494_v7  ;;  %v11504_v7 = vpack.c.bf16 %v32128_v48, %v33880_v3  ;;  %v33882_v57 = vld [vmem:[#allocation28_spill] sm:$0xff]  ;;  %v11508_v3 = vpack.c.bf16 %v32141_v11, %v33891_v16 }
 0x85e   : > { %25476 = vmatprep.subr.bf16.mxu1 %v28495_v1  ;;  %v33883_v50 = vpack.c.bf16 %v33881_v17, %v33882_v57  ;;  %v33894_v57 = vld [vmem:[#allocation46_spill] sm:$0xff] }
 0x861   : > { %25477 = vmatpush3.bf16.msra.mxu1 %v28495_v1  ;;  %v33884_v1 = vld [vmem:[#allocation30_spill] sm:$0xff] }
 0x862   : > { %25510 = vmatprep.subr.bf16.mxu1 %v28496_v35  ;;  %v33886_v51 = vpack.c.bf16 %v33884_v1, %v33885_v59  ;;  %v28497_v59 = vld [vmem:[%s33500_s3 + $0x148] sm:$0xff]  }
 0x863   : > { %v32154_v1 = vld [vmem:[#allocation2 + $0x81] sm:$0xff] }
 0x864   : > { %25447 = vmatmul.mubr.bf16.gmra.mrb[16].mxu1 %v33876_v14  ;;  %v33889_v14 = vpack.c.bf16 %v33887_v9, %v33888_v18  ;;  %v11866_v16 = vpack.c.bf16 %v32154_v1, %v31707_v12  ;;  %v11839_v9 = vld [vmem:[#allocation2 + $0xb1] sm:$0xff]  ;;  %v28757_v18 = vld [vmem:[#allocation2 + $0xc1] sm:$0xff] }
 0x865   : > { %25450 = vmatprep.mubr.bf16.mxu1 %v33879_v40  ;;  %v11863_v40 = vpack.c.bf16 %v31618_v49, %v33890_v45  ;;  %v28498_v49 = vld [vmem:[%s33500_s3 + $0x150] sm:$0xff]   ;;  %v28759_v12 = vld [vmem:[#allocation2 + $0xe1] sm:$0xff] }
 0x866   : > { %v28758_v45 = vld [vmem:[#allocation2 + $0xd1] sm:$0xff] }
 0x86c   : > { %25451 = vmatmul.mubr.bf16.gmra.mrb[20].mxu1 %v11504_v7  ;;  %v33892_v7 = vld [vmem:[#allocation44_spill] sm:$0xff] }
 0x86d   : > { %25454 = vmatprep.mubr.bf16.mxu1 %v33883_v50  ;;  %v33893_v50 = vld [vmem:[#allocation45_spill] sm:$0xff] }
 0x86e   : > { %v11864_v17 = vpack.c.bf16 %v33893_v50, %v33892_v7  ;;  %v28760_v7 = vld [vmem:[#allocation2 + $0xf1] sm:$0xff]  ;;  %v28761_v50 = vld [vmem:[#allocation2 + $0x101] sm:$0xff] }
 0x874   : > { %25455 = vmatmul.mubr.bf16.gmra.mrb[24].mxu1 %v33886_v51  ;;  %v11865_v51 = vpack.c.bf16 %v31705_v34, %v33894_v57  ;;  %v28499_v34 = vld [vmem:[%s33500_s3 + $0x158] sm:$0xff]   ;;  %v28502_v57 = vld [vmem:[%s33500_s3 + $0x170] sm:$0xff]  }
 0x875   : > { %25458 = vmatprep.mubr.bf16.mxu1 %v33889_v14  ;;  %v28500_v14 = vld [vmem:[%s33500_s3 + $0x160] sm:$0xff]  }
 0x87c   : > { %25459 = vmatmul.mubr.bf16.gmra.mrb[28].mxu1 %v11508_v3  ;;  %v28501_v3 = vld [vmem:[%s33500_s3 + $0x168] sm:$0xff]  }
 0x87d   : > { %25478 = vmatprep.mubr.bf16.mxu1 %v11863_v40  ;;  %v11868_v40 = vpack.c.bf16 %v28759_v12, %v28758_v45  ;;  %v32184_v45 = vld [vmem:[#allocation2 + $0x171] sm:$0xff] }
 0x884   : > { %25479 = vmatmul.mubr.bf16.vlgmr.msra.gmra.mrb[0].mxu1 %v11864_v17  ;;  %v11869_v17 = vpack.c.bf16 %v28761_v50, %v28760_v7  ;;  %v32191_v50 = vld [vmem:[#allocation2 + $0x1b1] sm:$0xff] }
 0x885   : > { %25511 = vmatpush3.bf16.msra.mxu1 %v28496_v35  ;;  %25482 = vmatprep.mubr.bf16.mxu1 %v11865_v51  ;;  %v11867_v35 = vpack.c.bf16 %v28757_v18, %v11839_v9  ;;  %v32173_v51 = vld [vmem:[#allocation2 + $0x121] sm:$0xff]  ;;  %v28503_v9 = vld [vmem:[%s33500_s3 + $0x178] sm:$0xff]  }
 0x886   : > { %25512 = vmatprep.subr.bf16.mxu1 %v28497_v59 }
 0x889   : > { %25513 = vmatpush3.bf16.msra.mxu1 %v28497_v59  ;;  %v11847_v59 = vld [vmem:[#allocation2 + $0x151] sm:$0xff] }
 0x88a   : > { %25514 = vmatprep.subr.bf16.mxu1 %v28498_v49 }
 0x88c   : > { %25483 = vmatmul.mubr.bf16.gmra.mrb[4].mxu1 %v11866_v16 }
 0x88d   : > { %25486 = vmatprep.mubr.bf16.mxu1 %v11867_v35  ;;  %25515 = vmatpush3.bf16.msra.mxu1 %v28498_v49  ;;  %v28762_v49 = vld [vmem:[#allocation2 + $0x111] sm:$0xff]  ;;  %v28504_v35 = vld [vmem:[%s33500_s3 + $0x180] sm:$0xff]  }
 0x88e   : > { %25516 = vmatprep.subr.bf16.mxu1 %v28499_v34  ;;  %v11870_v16 = vpack.c.bf16 %v32173_v51, %v28762_v49  ;;  %v33899_v49 = vpack.c.bf16 %v31489_v21, %v31476_v61  ;;  %v28505_v61 = vld [vmem:[%s33500_s3 + $0x188] sm:$0xff]   ;;  %v28506_v21 = vld [vmem:[%s33500_s3 + $0x190] sm:$0xff]  }
 0x891   : > { %25517 = vmatpush3.bf16.msra.mxu1 %v28499_v34  ;;  %v28763_v34 = vld [vmem:[#allocation2 + $0x161] sm:$0xff] }
 0x892   : > { %25518 = vmatprep.subr.bf16.mxu1 %v28500_v14  ;;  %v11871_v18 = vpack.c.bf16 %v28763_v34, %v11847_v59  ;;  %v33898_v59 = vpack.c.bf16 %v31498_v38, %v31481_v58  ;;  %v33901_v34 = vld [vmem:[#allocation32_spill] sm:$0xff]  ;;  %v12235_v58 = vpack.c.bf16 %v32024_v52, %v32014_v0  ;;  %v33903_v0 = vpack.c.bf16 %v31347_v39, %v31345_v19  ;;  %v28511_v19 = vld [vmem:[%s33500_s3 + $0x1b8] sm:$0xff]  }
 0x893   : > { %v33905_v39 = vpack.c.bf16 %v31452_v37, %v31464_v43  ;;  %v33908_v43 = vpack.c.bf16 %v31552_v63, %v31566_v27  ;;  %v28513_v63 = vld [vmem:[%s33500_s3 + $0x1c8] sm:$0xff]   ;;  %v28514_v27 = vld [vmem:[%s33500_s3 + $0x1d0] sm:$0xff]  }
 0x894   : > { %25487 = vmatmul.mubr.bf16.gmra.mrb[8].mxu1 %v11868_v40  ;;  %v33895_v40 = vld [vmem:[#allocation11_spill] sm:$0xff] }
 0x895   : > { %25490 = vmatprep.mubr.bf16.mxu1 %v11869_v17  ;;  %25519 = vmatpush3.bf16.msra.mxu1 %v28500_v14  ;;  %v32182_v14 = vld [vmem:[#allocation2 + $0x181] sm:$0xff] }
 0x896   : > { %25520 = vmatprep.subr.bf16.mxu1 %v28501_v3  ;;  %v11872_v12 = vpack.c.bf16 %v32182_v14, %v32184_v45  ;;  %v28764_v17 = vld [vmem:[#allocation2 + $0x1c1] sm:$0xff] }
 0x899   : > { %25521 = vmatpush3.bf16.msra.mxu1 %v28501_v3  ;;  %v33896_v3 = vld [vmem:[#allocation8_spill] sm:$0xff] }
 0x89a   : > { %25522 = vmatprep.subr.bf16.mxu1 %v28502_v57  ;;  %v33897_v7 = vpack.c.bf16 %v33895_v40, %v33896_v3  ;;  %v12584_v40 = vld [vmem:[#allocation2 + $0x100] sm:$0xff] }
 0x89b   : > { %v12582_v3 = vld [vmem:[#allocation2 + $0xe0] sm:$0xff] }
 0x89c   : > { %25491 = vmatmul.mubr.bf16.gmra.mrb[12].mxu1 %v11870_v16  ;;  %v33900_v16 = vpack.c.bf16 %v31538_v2, %v31529_v60  ;;  %v32213_v60 = vld [vmem:[#allocation2 + $0x82] sm:$0xff]  ;;  %v28507_v2 = vld [vmem:[%s33500_s3 + $0x198] sm:$0xff]  }
 0x89d   : > { %25494 = vmatprep.mubr.bf16.mxu1 %v11871_v18  ;;  %25523 = vmatpush3.bf16.msra.mxu1 %v28502_v57  ;;  %v11874_v57 = vpack.c.bf16 %v28764_v17, %v32191_v50  ;;  %v12234_v18 = vpack.c.bf16 %v32012_v29, %v32010_v55  ;;  %v12236_v38 = vpack.c.bf16 %v32213_v60, %v32026_v24  ;;  %v28509_v55 = vld [vmem:[%s33500_s3 + $0x1a8] sm:$0xff]   ;;  %v12585_v17 = vld [vmem:[#allocation2 + $0x110] sm:$0xff] }
 0x89e   : > { %25524 = vmatprep.subr.bf16.mxu1 %v28503_v9  ;;  %v32241_v29 = vld [vmem:[#allocation2 + $0x122] sm:$0xff]  ;;  %v33907_v24 = vpack.c.bf16 %v31507_v33, %v31516_v41 }
 0x89f   : > { %v12240_v52 = vpack.c.bf16 %v32241_v29, %v32050_v31  ;;  %v32260_v31 = vld [vmem:[#allocation2 + $0x1c2] sm:$0xff] }
 0x8a0   : > { %v12244_v37 = vpack.c.bf16 %v32260_v31, %v32065_v25  ;;  %v32273_v41 = vld [vmem:[#allocation2 + $0x262] sm:$0xff] }
 0x8a1   : > { %25525 = vmatpush3.bf16.msra.mxu1 %v28503_v9  ;;  %v12233_v9 = vpack.c.bf16 %v32008_v4, %v31984_v46  ;;  %v33902_v4 = vpack.c.bf16 %v31351_v32, %v31363_v6  ;;  %v28508_v46 = vld [vmem:[%s33500_s3 + $0x1a0] sm:$0xff]   ;;  %v33904_v32 = vpack.c.bf16 %v31404_v44, %v31412_v56  ;;  %v28510_v6 = vld [vmem:[%s33500_s3 + $0x1b0] sm:$0xff]   ;;  %v33906_v56 = vpack.c.bf16 %v31448_v53, %v31446_v8 }
 0x8a2   : > { %25558 = vmatprep.subr.bf16.mxu1 %v28504_v35  ;;  %v28512_v44 = vld [vmem:[%s33500_s3 + $0x1c0] sm:$0xff]   ;;  %v33910_v8 = vpack.c.bf16 %v31609_v13, %v31607_v62  ;;  %v12248_v25 = vpack.c.bf16 %v32273_v41, %v32074_v22 }
 0x8a3   : > { %v32275_v33 = vld [vmem:[#allocation2] sm:$0xff] }
 0x8a4   : > { %25495 = vmatmul.mubr.bf16.gmra.mrb[16].mxu1 %v11872_v12  ;;  %v12604_v53 = vpack.c.bf16 %v32275_v33, %v32275_v33  ;;  %v12580_v62 = vld [vmem:[#allocation2 + $0xc0] sm:$0xff]  ;;  %v12583_v12 = vld [vmem:[#allocation2 + $0xf0] sm:$0xff] }
 0x8a5   : > { %25498 = vmatprep.mubr.bf16.mxu1 %v33897_v7  ;;  %v28516_v22 = vld [vmem:[%s33500_s3 + $0x1e0] sm:$0xff]   ;;  %v32296_v7 = vpack.c.bf16 %v12583_v12, %v12582_v3  ;;  %v28523_v12 = vld [vmem:[%s33500_s3 + $0x218] sm:$0xff]   ;;  %v33912_v3 = vld [vmem:[#allocation13_spill] sm:$0xff] }
 0x8ac   : > { %25499 = vmatmul.mubr.bf16.gmra.mrb[20].mxu1 %v11874_v57  ;;  %v28517_v57 = vld [vmem:[%s33500_s3 + $0x1e8] sm:$0xff]  }
 0x8ad   : > { %25502 = vmatprep.mubr.bf16.mxu1 %v33898_v59  ;;  %v32301_v59 = vpack.c.bf16 %v12585_v17, %v12584_v40  ;;  %v33911_v40 = vld [vmem:[#allocation14_spill] sm:$0xff] }
 0x8ae   : > { %v33913_v17 = vpack.c.bf16 %v33911_v40, %v33912_v3  ;;  %v13315_v40 = vld [vmem:[#allocation2 + $0x52] sm:$0xff]  ;;  %v13316_v3 = vld [vmem:[#allocation2 + $0x62] sm:$0xff] }
 0x8b4   : > { %25503 = vmatmul.mubr.bf16.gmra.mrb[24].mxu1 %v33899_v49  ;;  %v28518_v49 = vld [vmem:[%s33500_s3 + $0x1f0] sm:$0xff]  }
 0x8b5   : > { %25506 = vmatprep.mubr.bf16.mxu1 %v33900_v16  ;;  %v12588_v16 = vld [vmem:[#allocation2 + $0x160] sm:$0xff] }
 0x8bc   : > { %25507 = vmatmul.mubr.bf16.gmra.mrb[28].mxu1 %v33901_v34  ;;  %v12589_v34 = vld [vmem:[#allocation2 + $0x170] sm:$0xff] }
 0x8bd   : > { %25526 = vmatprep.mubr.bf16.mxu1 %v12233_v9  ;;  %v12611_v9 = vpack.c.bf16 %v32275_v33, %v32109_v42  ;;  %v12590_v42 = vld [vmem:[#allocation2 + $0x180] sm:$0xff] }
 0x8c4   : > { %25527 = vmatmul.mubr.bf16.vlgmr.msra.gmra.mrb[0].mxu1 %v12234_v18  ;;  %v28519_v18 = vld [vmem:[%s33500_s3 + $0x1f8] sm:$0xff]  }
 0x8c5   : > { %25559 = vmatpush3.bf16.msra.mxu1 %v28504_v35  ;;  %25530 = vmatprep.mubr.bf16.mxu1 %v12235_v58  ;;  %v33909_v35 = vpack.c.bf16 %v31548_v20, %v31546_v36  ;;  %v12581_v20 = vld [vmem:[#allocation2 + $0xd0] sm:$0xff]  ;;  %v28515_v36 = vld [vmem:[%s33500_s3 + $0x1d8] sm:$0xff]   ;;  %v32313_v58 = vpack.c.bf16 %v12589_v34, %v12588_v16 }
 0x8c6   : > { %25560 = vmatprep.subr.bf16.mxu1 %v28505_v61  ;;  %v32290_v13 = vpack.c.bf16 %v12581_v20, %v12580_v62  ;;  %v28521_v20 = vld [vmem:[%s33500_s3 + $0x208] sm:$0xff]   ;;  %v33915_v16 = vld [vmem:[#allocation6_spill] sm:$0xff]  ;;  %v33917_v34 = vld [vmem:[#allocation7_spill] sm:$0xff] }
 0x8c9   : > { %25561 = vmatpush3.bf16.msra.mxu1 %v28505_v61  ;;  %v28520_v61 = vld [vmem:[%s33500_s3 + $0x200] sm:$0xff]  }
 0x8ca   : > { %25562 = vmatprep.subr.bf16.mxu1 %v28506_v21 }
 0x8cc   : > { %25531 = vmatmul.mubr.bf16.gmra.mrb[4].mxu1 %v12236_v38  ;;  %v12592_v38 = vld [vmem:[#allocation2 + $0x1a0] sm:$0xff] }
 0x8cd   : > { %25534 = vmatprep.mubr.bf16.mxu1 %v33902_v4  ;;  %25563 = vmatpush3.bf16.msra.mxu1 %v28506_v21  ;;  %v12591_v21 = vld [vmem:[#allocation2 + $0x190] sm:$0xff] }
 0x8ce   : > { %25564 = vmatprep.subr.bf16.mxu1 %v28507_v2  ;;  %v12593_v4 = vld [vmem:[#allocation2 + $0x1b0] sm:$0xff] }
 0x8d1   : > { %25565 = vmatpush3.bf16.msra.mxu1 %v28507_v2  ;;  %v32319_v2 = vpack.c.bf16 %v12591_v21, %v12590_v42  ;;  %v28526_v21 = vld [vmem:[%s33500_s3 + $0x230] sm:$0xff]   ;;  %v32366_v42 = vld [vmem:[#allocation2 + $0x161] sm:$0xff] }
 0x8d2   : > { %25566 = vmatprep.subr.bf16.mxu1 %v28508_v46 }
 0x8d4   : > { %25535 = vmatmul.mubr.bf16.gmra.mrb[8].mxu1 %v33903_v0  ;;  %v12615_v0 = vpack.c.bf16 %v32275_v33, %v32128_v48  ;;  %v12943_v48 = vld [vmem:[#allocation2 + $0x31] sm:$0xff] }
 0x8d5   : > { %25538 = vmatprep.mubr.bf16.mxu1 %v33904_v32  ;;  %25567 = vmatpush3.bf16.msra.mxu1 %v28508_v46  ;;  %v32321_v46 = vpack.c.bf16 %v12593_v4, %v12592_v38  ;;  %v12597_v32 = vld [vmem:[#allocation2 + $0x210] sm:$0xff] }
 0x8d6   : > { %25568 = vmatprep.subr.bf16.mxu1 %v28509_v55  ;;  %v12957_v38 = vld [vmem:[#allocation2 + $0x131] sm:$0xff] }
 0x8d7   : > { %v12981_v4 = vpack.c.bf16 %v12957_v38, %v32173_v51 }
 0x8d9   : > { %25569 = vmatpush3.bf16.msra.mxu1 %v28509_v55  ;;  %v12596_v55 = vld [vmem:[#allocation2 + $0x200] sm:$0xff] }
 0x8da   : > { %25570 = vmatprep.subr.bf16.mxu1 %v28510_v6 }
 0x8dc   : > { %25539 = vmatmul.mubr.bf16.gmra.mrb[12].mxu1 %v12240_v52  ;;  %v12599_v52 = vld [vmem:[#allocation2 + $0x230] sm:$0xff] }
 0x8dd   : > { %25542 = vmatprep.mubr.bf16.mxu1 %v33905_v39  ;;  %25571 = vmatpush3.bf16.msra.mxu1 %v28510_v6  ;;  %v32327_v6 = vpack.c.bf16 %v12597_v32, %v12596_v55  ;;  %v12598_v39 = vld [vmem:[#allocation2 + $0x220] sm:$0xff]  ;;  %v28527_v55 = vld [vmem:[%s33500_s3 + $0x238] sm:$0xff]  }
 0x8de   : > { %25572 = vmatprep.subr.bf16.mxu1 %v28511_v19  ;;  %v28528_v32 = vld [vmem:[%s33500_s3 + $0x240] sm:$0xff]  }
 0x8e1   : > { %25573 = vmatpush3.bf16.msra.mxu1 %v28511_v19  ;;  %v12600_v19 = vld [vmem:[#allocation2 + $0x240] sm:$0xff] }
 0x8e2   : > { %25606 = vmatprep.subr.bf16.mxu1 %v28512_v44 }
 0x8e4   : > { %25543 = vmatmul.mubr.bf16.gmra.mrb[16].mxu1 %v33906_v56  ;;  %v12601_v56 = vld [vmem:[#allocation2 + $0x250] sm:$0xff] }
 0x8e5   : > { %25546 = vmatprep.mubr.bf16.mxu1 %v33907_v24  ;;  %v32332_v24 = vpack.c.bf16 %v12601_v56, %v12600_v19  ;;  %v32379_v19 = vld [vmem:[#allocation2 + $0x1a1] sm:$0xff]  ;;  %v12965_v56 = vld [vmem:[#allocation2 + $0x1d1] sm:$0xff] }
 0x8ec   : > { %25547 = vmatmul.mubr.bf16.gmra.mrb[20].mxu1 %v12244_v37  ;;  %v12942_v37 = vld [vmem:[#allocation2 + $0x21] sm:$0xff] }
 0x8ed   : > { %25550 = vmatprep.mubr.bf16.mxu1 %v33908_v43  ;;  %v12974_v43 = vpack.c.bf16 %v12943_v48, %v12942_v37  ;;  %v12966_v37 = vld [vmem:[#allocation2 + $0x201] sm:$0xff] }
 0x8f4   : > { %25551 = vmatmul.mubr.bf16.gmra.mrb[24].mxu1 %v33909_v35  ;;  %v12619_v35 = vpack.c.bf16 %v32275_v33, %v32141_v11  ;;  %v28522_v11 = vld [vmem:[%s33500_s3 + $0x210] sm:$0xff]  }
 0x8f5   : > { %25554 = vmatprep.mubr.bf16.mxu1 %v33910_v8  ;;  %v12944_v8 = vld [vmem:[#allocation2 + $0x41] sm:$0xff] }
 0x8fc   : > { %25555 = vmatmul.mubr.bf16.gmra.mrb[28].mxu1 %v12248_v25  ;;  %v12946_v25 = vld [vmem:[#allocation2 + $0x61] sm:$0xff] }
 0x8fd   : > { %25574 = vmatprep.mubr.bf16.mxu1 %v12604_v53 }
 0x904   : > { %25575 = vmatmul.mubr.bf16.vlgmr.msra.gmra.mrb[0].mxu1 %v12604_v53 }
 0x905   : > { %25607 = vmatpush3.bf16.msra.mxu1 %v28512_v44  ;;  %25578 = vmatprep.mubr.bf16.mxu1 %v12604_v53  ;;  %v32330_v44 = vpack.c.bf16 %v12599_v52, %v12598_v39  ;;  %v32377_v52 = vld [vmem:[#allocation2 + $0x191] sm:$0xff]  ;;  %v12964_v39 = vld [vmem:[#allocation2 + $0x1c1] sm:$0xff] }
 0x906   : > { %25608 = vmatprep.subr.bf16.mxu1 %v28513_v63  ;;  %v12983_v51 = vpack.c.bf16 %v32377_v52, %v32182_v14  ;;  %v12985_v48 = vpack.c.bf16 %v12965_v56, %v12964_v39  ;;  %v28534_v56 = vld [vmem:[%s33500_s3 + $0x270] sm:$0xff]  }
 0x909   : > { %25609 = vmatpush3.bf16.msra.mxu1 %v28513_v63  ;;  %v12947_v63 = vld [vmem:[#allocation2 + $0x71] sm:$0xff] }
 0x90a   : > { %25610 = vmatprep.subr.bf16.mxu1 %v28514_v27  ;;  %v12976_v62 = vpack.c.bf16 %v12947_v63, %v12946_v25  ;;  %v12968_v25 = vld [vmem:[#allocation2 + $0x221] sm:$0xff]  ;;  %v12971_v63 = vld [vmem:[#allocation2 + $0x251] sm:$0xff] }
 0x90c   : > { %25579 = vmatmul.mubr.bf16.gmra.mrb[4].mxu1 %v12604_v53  ;;  %v12945_v53 = vld [vmem:[#allocation2 + $0x51] sm:$0xff] }
 0x90d   : > { %25582 = vmatprep.mubr.bf16.mxu1 %v32290_v13  ;;  %25611 = vmatpush3.bf16.msra.mxu1 %v28514_v27  ;;  %v12975_v27 = vpack.c.bf16 %v12945_v53, %v12944_v8  ;;  %v12969_v8 = vld [vmem:[#allocation2 + $0x231] sm:$0xff]  ;;  %v12970_v53 = vld [vmem:[#allocation2 + $0x241] sm:$0xff] }
 0x90e   : > { %25612 = vmatprep.subr.bf16.mxu1 %v28515_v36  ;;  %v32388_v14 = vpack.c.bf16 %v12969_v8, %v12968_v25  ;;  %v13329_v8 = vld [vmem:[#allocation2 + $0x172] sm:$0xff] }
 0x911   : > { %25613 = vmatpush3.bf16.msra.mxu1 %v28515_v36  ;;  %v12949_v36 = vld [vmem:[#allocation2 + $0x91] sm:$0xff] }
 0x912   : > { %25614 = vmatprep.subr.bf16.mxu1 %v28516_v22 }
 0x914   : > { %25583 = vmatmul.mubr.bf16.gmra.mrb[8].mxu1 %v32296_v7 }
 0x915   : > { %25586 = vmatprep.mubr.bf16.mxu1 %v32301_v59  ;;  %25615 = vmatpush3.bf16.msra.mxu1 %v28516_v22  ;;  %v12977_v22 = vpack.c.bf16 %v12949_v36, %v32154_v1  ;;  %v28525_v1 = vld [vmem:[%s33500_s3 + $0x228] sm:$0xff]   ;;  %v12973_v36 = vld [vmem:[#allocation2 + $0x271] sm:$0xff] }
 0x916   : > { %25616 = vmatprep.subr.bf16.mxu1 %v28517_v57 }
 0x919   : > { %25617 = vmatpush3.bf16.msra.mxu1 %v28517_v57  ;;  %v28524_v57 = vld [vmem:[%s33500_s3 + $0x220] sm:$0xff]  }
 0x91a   : > { %25618 = vmatprep.subr.bf16.mxu1 %v28518_v49 }
 0x91c   : > { %25587 = vmatmul.mubr.bf16.gmra.mrb[12].mxu1 %v12611_v9 }
 0x91d   : > { %25590 = vmatprep.mubr.bf16.mxu1 %v32313_v58  ;;  %25619 = vmatpush3.bf16.msra.mxu1 %v28518_v49  ;;  %v33914_v49 = vld [vmem:[#allocation4_spill] sm:$0xff] }
 0x91e   : > { %25620 = vmatprep.subr.bf16.mxu1 %v28519_v18  ;;  %v33916_v9 = vpack.c.bf16 %v33914_v49, %v33915_v16  ;;  %v28529_v49 = vld [vmem:[%s33500_s3 + $0x248] sm:$0xff]   ;;  %v13319_v16 = vld [vmem:[#allocation2 + $0x92] sm:$0xff] }
 0x921   : > { %25621 = vmatpush3.bf16.msra.mxu1 %v28519_v18  ;;  %v33918_v18 = vld [vmem:[#allocation5_spill] sm:$0xff] }
 0x922   : > { %25654 = vmatprep.subr.bf16.mxu1 %v28520_v61 }
 0x924   : > { %25591 = vmatmul.mubr.bf16.gmra.mrb[16].mxu1 %v32319_v2 }
 0x925   : > { %25594 = vmatprep.mubr.bf16.mxu1 %v32321_v46 }
 0x92c   : > { %25595 = vmatmul.mubr.bf16.gmra.mrb[20].mxu1 %v12615_v0  ;;  %v12982_v0 = vpack.c.bf16 %v32184_v45, %v32366_v42  ;;  %v12984_v45 = vpack.c.bf16 %v32191_v50, %v32379_v19  ;;  %v13312_v50 = vld [vmem:[#allocation2 + $0x22] sm:$0xff] }
 0x92d   : > { %25598 = vmatprep.mubr.bf16.mxu1 %v32327_v6 }
 0x934   : > { %25599 = vmatmul.mubr.bf16.gmra.mrb[24].mxu1 %v32330_v44 }
 0x935   : > { %25602 = vmatprep.mubr.bf16.mxu1 %v32332_v24 }
 0x93c   : > { %25603 = vmatmul.mubr.bf16.gmra.mrb[28].mxu1 %v12619_v35 }
 0x93d   : > { %25622 = vmatprep.mubr.bf16.mxu1 %v12974_v43  ;;  %v12967_v43 = vld [vmem:[#allocation2 + $0x211] sm:$0xff] }
 0x93e   : > { %v32385_v35 = vpack.c.bf16 %v12967_v43, %v12966_v37  ;;  %v13327_v37 = vld [vmem:[#allocation2 + $0x132] sm:$0xff] }
 0x93f   : > { %v13351_v43 = vpack.c.bf16 %v13327_v37, %v32241_v29  ;;  %v13330_v29 = vld [vmem:[#allocation2 + $0x182] sm:$0xff] }
 0x944   : > { %25623 = vmatmul.mubr.bf16.vlgmr.msra.gmra.mrb[0].mxu1 %v12975_v27  ;;  %v32390_v27 = vpack.c.bf16 %v12971_v63, %v12970_v53  ;;  %v28535_v53 = vld [vmem:[%s33500_s3 + $0x278] sm:$0xff]   ;;  %v28536_v63 = vld [vmem:[%s33500_s3 + $0x280] sm:$0xff]  }
 0x945   : > { %25655 = vmatpush3.bf16.msra.mxu1 %v28520_v61  ;;  %25626 = vmatprep.mubr.bf16.mxu1 %v12976_v62  ;;  %v33919_v61 = vpack.c.bf16 %v33917_v34, %v33918_v18  ;;  %v13313_v62 = vld [vmem:[#allocation2 + $0x32] sm:$0xff]  ;;  %v13347_v34 = vpack.c.bf16 %v13319_v16, %v32213_v60  ;;  %v13320_v18 = vld [vmem:[#allocation2 + $0xc2] sm:$0xff] }
 0x946   : > { %25656 = vmatprep.subr.bf16.mxu1 %v28521_v20  ;;  %v13323_v60 = vld [vmem:[#allocation2 + $0xf2] sm:$0xff] }
 0x949   : > { %25657 = vmatpush3.bf16.msra.mxu1 %v28521_v20  ;;  %v12972_v20 = vld [vmem:[#allocation2 + $0x261] sm:$0xff] }
 0x94a   : > { %25658 = vmatprep.subr.bf16.mxu1 %v28522_v11 }
 0x94c   : > { %25627 = vmatmul.mubr.bf16.gmra.mrb[4].mxu1 %v12977_v22  ;;  %v12989_v22 = vpack.c.bf16 %v12973_v36, %v12972_v20  ;;  %v13333_v36 = vld [vmem:[#allocation2 + $0x1b2] sm:$0xff] }
 0x94d   : > { %25630 = vmatprep.mubr.bf16.mxu1 %v33913_v17  ;;  %25659 = vmatpush3.bf16.msra.mxu1 %v28522_v11  ;;  %v13344_v11 = vpack.c.bf16 %v13313_v62, %v13312_v50  ;;  %v13317_v17 = vld [vmem:[#allocation2 + $0x72] sm:$0xff]  ;;  %v13332_v62 = vld [vmem:[#allocation2 + $0x1a2] sm:$0xff] }
 0x94e   : > { %25660 = vmatprep.subr.bf16.mxu1 %v28523_v12  ;;  %v13331_v50 = vld [vmem:[#allocation2 + $0x192] sm:$0xff] }
 0x94f   : > { %v32432_v20 = vpack.c.bf16 %v13331_v50, %v13330_v29  ;;  %v14053_v50 = vld [vmem:[#allocation2 + $0xa1] sm:$0xff]  ;;  %v28772_v29 = vld [vmem:[#allocation2 + $0xb1] sm:$0xff] }
 0x951   : > { %25661 = vmatpush3.bf16.msra.mxu1 %v28523_v12  ;;  %v13314_v12 = vld [vmem:[#allocation2 + $0x42] sm:$0xff] }
 0x952   : > { %25662 = vmatprep.subr.bf16.mxu1 %v28524_v57 }
 0x954   : > { %25631 = vmatmul.mubr.bf16.gmra.mrb[8].mxu1 %v33916_v9  ;;  %v28530_v9 = vld [vmem:[%s33500_s3 + $0x250] sm:$0xff]  }
 0x955   : > { %25634 = vmatprep.mubr.bf16.mxu1 %v33919_v61  ;;  %25663 = vmatpush3.bf16.msra.mxu1 %v28524_v57  ;;  %v13345_v57 = vpack.c.bf16 %v13315_v40, %v13314_v12  ;;  %v13321_v61 = vld [vmem:[#allocation2 + $0xd2] sm:$0xff]  ;;  %v13336_v12 = vld [vmem:[#allocation2 + $0x202] sm:$0xff] }
 0x956   : > { %25664 = vmatprep.subr.bf16.mxu1 %v28525_v1  ;;  %v32404_v38 = vpack.c.bf16 %v13321_v61, %v13320_v18  ;;  %v13343_v18 = vld [vmem:[#allocation2 + $0x272] sm:$0xff] }
 0x957   : > { %v13359_v61 = vpack.c.bf16 %v13343_v18, %v32273_v41  ;;  %v32461_v41 = vld [vmem:[#allocation2 + $0x150] sm:$0xff] }
 0x958   : > { %v32506_v18 = vld [vmem:[#allocation2 + $0x111] sm:$0xff] }
 0x959   : > { %25665 = vmatpush3.bf16.msra.mxu1 %v28525_v1  ;;  %v13346_v1 = vpack.c.bf16 %v13317_v17, %v13316_v3  ;;  %v13337_v3 = vld [vmem:[#allocation2 + $0x212] sm:$0xff] }
 0x95a   : > { %25666 = vmatprep.subr.bf16.mxu1 %v28526_v21  ;;  %v32439_v17 = vpack.c.bf16 %v13337_v3, %v13336_v12  ;;  %v28545_v12 = vld [vmem:[%s33500_s3 + $0x2c8] sm:$0xff]   ;;  %v28776_v3 = vld [vmem:[#allocation2 + $0xf1] sm:$0xff] }
 0x95c   : > { %25635 = vmatmul.mubr.bf16.gmra.mrb[12].mxu1 %v12981_v4  ;;  %v28532_v4 = vld [vmem:[%s33500_s3 + $0x260] sm:$0xff]  }
 0x95d   : > { %25638 = vmatprep.mubr.bf16.mxu1 %v12982_v0  ;;  %25667 = vmatpush3.bf16.msra.mxu1 %v28526_v21  ;;  %v28531_v21 = vld [vmem:[%s33500_s3 + $0x258] sm:$0xff]   ;;  %v13322_v0 = vld [vmem:[#allocation2 + $0xe2] sm:$0xff] }
 0x95e   : > { %25668 = vmatprep.subr.bf16.mxu1 %v28527_v55 }
 0x961   : > { %25669 = vmatpush3.bf16.msra.mxu1 %v28527_v55  ;;  %v13324_v55 = vld [vmem:[#allocation2 + $0x102] sm:$0xff] }
 0x962   : > { %25702 = vmatprep.subr.bf16.mxu1 %v28528_v32 }
 0x964   : > { %25639 = vmatmul.mubr.bf16.gmra.mrb[16].mxu1 %v12983_v51  ;;  %v13325_v51 = vld [vmem:[#allocation2 + $0x112] sm:$0xff] }
 0x965   : > { %25642 = vmatprep.mubr.bf16.mxu1 %v12984_v45  ;;  %v28533_v45 = vld [vmem:[%s33500_s3 + $0x268] sm:$0xff]   ;;  %v32415_v39 = vpack.c.bf16 %v13325_v51, %v13324_v55  ;;  %v28539_v55 = vld [vmem:[%s33500_s3 + $0x298] sm:$0xff]   ;;  %v32480_v51 = vld [vmem:[#allocation2 + $0x1f0] sm:$0xff] }
 0x96c   : > { %25643 = vmatmul.mubr.bf16.gmra.mrb[20].mxu1 %v12985_v48  ;;  %v13328_v48 = vld [vmem:[#allocation2 + $0x162] sm:$0xff] }
 0x96d   : > { %25646 = vmatprep.mubr.bf16.mxu1 %v32385_v35  ;;  %v32426_v25 = vpack.c.bf16 %v13329_v8, %v13328_v48  ;;  %v28768_v48 = vld [vmem:[#allocation2 + $0x2a0] sm:$0xff] }
 0x96e   : > { %v28769_v8 = vld [vmem:[#allocation2 + $0x2c0] sm:$0xff] }
 0x974   : > { %25647 = vmatmul.mubr.bf16.gmra.mrb[24].mxu1 %v32388_v14 }
 0x975   : > { %25650 = vmatprep.mubr.bf16.mxu1 %v32390_v27 }
 0x97c   : > { %25651 = vmatmul.mubr.bf16.gmra.mrb[28].mxu1 %v12989_v22  ;;  %v13335_v22 = vld [vmem:[#allocation2 + $0x1d2] sm:$0xff] }
 0x97d   : > { %25670 = vmatprep.mubr.bf16.mxu1 %v13344_v11  ;;  %v32434_v11 = vpack.c.bf16 %v13333_v36, %v13332_v62  ;;  %v13355_v40 = vpack.c.bf16 %v13335_v22, %v32260_v31  ;;  %v32448_v31 = vld [vmem:[#allocation2 + $0xb0] sm:$0xff]  ;;  %v14085_v36 = vpack.c.bf16 %v28772_v29, %v14053_v50 }
 0x97e   : > { %v32495_v62 = vld [vmem:[#allocation2 + $0x2f0] sm:$0xff] }
 0x984   : > { %25671 = vmatmul.mubr.bf16.vlgmr.msra.gmra.mrb[0].mxu1 %v13345_v57  ;;  %v13339_v57 = vld [vmem:[#allocation2 + $0x232] sm:$0xff] }
 0x985   : > { %25703 = vmatpush3.bf16.msra.mxu1 %v28528_v32  ;;  %25674 = vmatprep.mubr.bf16.mxu1 %v13346_v1  ;;  %v32410_v32 = vpack.c.bf16 %v13323_v60, %v13322_v0  ;;  %v13340_v1 = vld [vmem:[#allocation2 + $0x242] sm:$0xff]  ;;  %v28538_v60 = vld [vmem:[%s33500_s3 + $0x290] sm:$0xff]   ;;  %v13719_v0 = vpack.c.bf16 %v32461_v41, %v32275_v33 }
 0x986   : > { %25704 = vmatprep.subr.bf16.mxu1 %v28529_v49 }
 0x989   : > { %25705 = vmatpush3.bf16.msra.mxu1 %v28529_v49  ;;  %v13338_v49 = vld [vmem:[#allocation2 + $0x222] sm:$0xff] }
 0x98a   : > { %25706 = vmatprep.subr.bf16.mxu1 %v28530_v9  ;;  %v32442_v16 = vpack.c.bf16 %v13339_v57, %v13338_v49  ;;  %v14061_v49 = vld [vmem:[#allocation2 + $0x141] sm:$0xff] }
 0x98c   : > { %25675 = vmatmul.mubr.bf16.gmra.mrb[4].mxu1 %v13347_v34 }
 0x98d   : > { %25678 = vmatprep.mubr.bf16.mxu1 %v32404_v38  ;;  %25707 = vmatpush3.bf16.msra.mxu1 %v28530_v9  ;;  %v13341_v9 = vld [vmem:[#allocation2 + $0x252] sm:$0xff] }
 0x98e   : > { %25708 = vmatprep.subr.bf16.mxu1 %v28531_v21  ;;  %v32444_v34 = vpack.c.bf16 %v13341_v9, %v13340_v1  ;;  %v28546_v1 = vld [vmem:[%s33500_s3 + $0x2d0] sm:$0xff]  }
 0x98f   : > { %v32504_v9 = vld [vmem:[#allocation2 + $0x151] sm:$0xff] }
 0x991   : > { %25709 = vmatpush3.bf16.msra.mxu1 %v28531_v21  ;;  %v13715_v21 = vpack.c.bf16 %v32448_v31, %v32275_v33 }
 0x992   : > { %25710 = vmatprep.subr.bf16.mxu1 %v28532_v4 }
 0x994   : > { %25679 = vmatmul.mubr.bf16.gmra.mrb[8].mxu1 %v32410_v32 }
 0x995   : > { %25682 = vmatprep.mubr.bf16.mxu1 %v32415_v39  ;;  %25711 = vmatpush3.bf16.msra.mxu1 %v28532_v4  ;;  %v28537_v4 = vld [vmem:[%s33500_s3 + $0x288] sm:$0xff]  }
 0x996   : > { %25712 = vmatprep.subr.bf16.mxu1 %v28533_v45 }
 0x999   : > { %25713 = vmatpush3.bf16.msra.mxu1 %v28533_v45  ;;  %v28543_v45 = vld [vmem:[%s33500_s3 + $0x2b8] sm:$0xff]  }
 0x99a   : > { %25714 = vmatprep.subr.bf16.mxu1 %v28534_v56 }
 0x99c   : > { %25683 = vmatmul.mubr.bf16.gmra.mrb[12].mxu1 %v13351_v43 }
 0x99d   : > { %25686 = vmatprep.mubr.bf16.mxu1 %v32426_v25  ;;  %25715 = vmatpush3.bf16.msra.mxu1 %v28534_v56  ;;  %v13723_v56 = vpack.c.bf16 %v32480_v51, %v32275_v33 }
 0x99e   : > { %25716 = vmatprep.subr.bf16.mxu1 %v28535_v53 }
 0x9a1   : > { %25717 = vmatpush3.bf16.msra.mxu1 %v28535_v53  ;;  %v28770_v53 = vld [vmem:[#allocation2 + $0x2d0] sm:$0xff] }
 0x9a2   : > { %25750 = vmatprep.subr.bf16.mxu1 %v28536_v63 }
 0x9a4   : > { %25687 = vmatmul.mubr.bf16.gmra.mrb[16].mxu1 %v32432_v20 }
 0x9a5   : > { %25690 = vmatprep.mubr.bf16.mxu1 %v32434_v11 }
 0x9ac   : > { %25691 = vmatmul.mubr.bf16.gmra.mrb[20].mxu1 %v13355_v40  ;;  %v28775_v40 = vld [vmem:[#allocation2 + $0xe1] sm:$0xff] }
 0x9ad   : > { %25694 = vmatprep.mubr.bf16.mxu1 %v32439_v17  ;;  %v14087_v57 = vpack.c.bf16 %v28776_v3, %v28775_v40  ;;  %v14431_v40 = vld [vmem:[#allocation2 + $0x142] sm:$0xff]  ;;  %v32554_v3 = vld [vmem:[#allocation2 + $0x152] sm:$0xff] }
 0x9b4   : > { %25695 = vmatmul.mubr.bf16.gmra.mrb[24].mxu1 %v32442_v16 }
 0x9b5   : > { %25698 = vmatprep.mubr.bf16.mxu1 %v32444_v34 }
 0x9bc   : > { %25699 = vmatmul.mubr.bf16.gmra.mrb[28].mxu1 %v13359_v61  ;;  %v28777_v61 = vld [vmem:[#allocation2 + $0x101] sm:$0xff] }
 0x9bd   : > { %25718 = vmatprep.mubr.bf16.mxu1 %v13715_v21  ;;  %v14088_v21 = vpack.c.bf16 %v32506_v18, %v28777_v61  ;;  %v32572_v61 = vld [vmem:[#allocation2 + $0x1f2] sm:$0xff] }
 0x9c4   : > { %25719 = vmatmul.mubr.bf16.vlgmr.msra.gmra.mrb[0].mxu1 %v32290_v13  ;;  %v28540_v13 = vld [vmem:[%s33500_s3 + $0x2a0] sm:$0xff]  }
 0x9c5   : > { %25722 = vmatprep.mubr.bf16.mxu1 %v32296_v7  ;;  %25751 = vmatpush3.bf16.msra.mxu1 %v28536_v63  ;;  %v28541_v7 = vld [vmem:[%s33500_s3 + $0x2a8] sm:$0xff]   ;;  %v13729_v63 = vpack.c.bf16 %v28770_v53, %v28769_v8  ;;  %v28781_v53 = vld [vmem:[#allocation2 + $0x2b1] sm:$0xff] }
 0x9c6   : > { %25752 = vmatprep.subr.bf16.mxu1 %v28537_v4 }
 0x9c9   : > { %25753 = vmatpush3.bf16.msra.mxu1 %v28537_v4  ;;  %v28547_v4 = vld [vmem:[%s33500_s3 + $0x2d8] sm:$0xff]  }
 0x9ca   : > { %25754 = vmatprep.subr.bf16.mxu1 %v28538_v60 }
 0x9cc   : > { %25723 = vmatmul.mubr.bf16.gmra.mrb[4].mxu1 %v32301_v59  ;;  %v28542_v59 = vld [vmem:[%s33500_s3 + $0x2b0] sm:$0xff]  }
 0x9cd   : > { %25726 = vmatprep.mubr.bf16.mxu1 %v13719_v0  ;;  %25755 = vmatpush3.bf16.msra.mxu1 %v28538_v60  ;;  %v14089_v60 = vpack.c.bf16 %v32504_v9, %v14061_v49  ;;  %v28778_v0 = vld [vmem:[#allocation2 + $0x171] sm:$0xff]  ;;  %v14439_v49 = vld [vmem:[#allocation2 + $0x1e2] sm:$0xff] }
 0x9ce   : > { %25756 = vmatprep.subr.bf16.mxu1 %v28539_v55 }
 0x9d1   : > { %25757 = vmatpush3.bf16.msra.mxu1 %v28539_v55  ;;  %v28548_v55 = vld [vmem:[%s33500_s3 + $0x2e0] sm:$0xff]  }
 0x9d2   : > { %25758 = vmatprep.subr.bf16.mxu1 %v28540_v13 }
 0x9d4   : > { %25727 = vmatmul.mubr.bf16.gmra.mrb[8].mxu1 %v32313_v58  ;;  %v28544_v58 = vld [vmem:[%s33500_s3 + $0x2c0] sm:$0xff]  }
 0x9d5   : > { %25730 = vmatprep.mubr.bf16.mxu1 %v32319_v2  ;;  %25759 = vmatpush3.bf16.msra.mxu1 %v28540_v13  ;;  %v28766_v2 = vld [vmem:[#allocation2 + $0x290] sm:$0xff]  ;;  %v14090_v13 = vpack.c.bf16 %v28778_v0, %v32366_v42  ;;  %v28788_v0 = vld [vmem:[#allocation2 + $0x2a2] sm:$0xff] }
 0x9d6   : > { %25760 = vmatprep.subr.bf16.mxu1 %v28541_v7  ;;  %v13727_v37 = vpack.c.bf16 %v28766_v2, %v32275_v33  ;;  %v28773_v33 = vld [vmem:[#allocation2 + $0xc1] sm:$0xff]  ;;  %v32524_v2 = vld [vmem:[#allocation2 + $0x1f1] sm:$0xff] }
 0x9d7   : > { %v32526_v42 = vld [vmem:[#allocation2 + $0x1b1] sm:$0xff] }
 0x9d9   : > { %25761 = vmatpush3.bf16.msra.mxu1 %v28541_v7  ;;  %v28549_v7 = vld [vmem:[%s33500_s3 + $0x2e8] sm:$0xff]  }
 0x9da   : > { %25762 = vmatprep.subr.bf16.mxu1 %v28542_v59 }
 0x9dc   : > { %25731 = vmatmul.mubr.bf16.gmra.mrb[12].mxu1 %v32321_v46  ;;  %v28767_v46 = vld [vmem:[#allocation2 + $0x2b0] sm:$0xff] }
 0x9dd   : > { %25734 = vmatprep.mubr.bf16.mxu1 %v13723_v56  ;;  %25763 = vmatpush3.bf16.msra.mxu1 %v28542_v59  ;;  %v13728_v43 = vpack.c.bf16 %v28767_v46, %v28768_v48  ;;  %v28779_v59 = vld [vmem:[#allocation2 + $0x181] sm:$0xff]  ;;  %v28550_v56 = vld [vmem:[%s33500_s3 + $0x2f0] sm:$0xff]  }
 0x9de   : > { %25764 = vmatprep.subr.bf16.mxu1 %v28543_v45  ;;  %v28552_v48 = vld [vmem:[%s33500_s3 + $0x300] sm:$0xff]  }
 0x9e1   : > { %25765 = vmatpush3.bf16.msra.mxu1 %v28543_v45  ;;  %v14091_v45 = vpack.c.bf16 %v32377_v52, %v28779_v59  ;;  %v28551_v52 = vld [vmem:[%s33500_s3 + $0x2f8] sm:$0xff]  }
 0x9e2   : > { %25798 = vmatprep.subr.bf16.mxu1 %v28544_v58  ;;  %v28790_v59 = vld [vmem:[#allocation2 + $0x2d2] sm:$0xff] }
 0x9e4   : > { %25735 = vmatmul.mubr.bf16.gmra.mrb[16].mxu1 %v32327_v6  ;;  %v28771_v6 = vld [vmem:[#allocation2 + $0x2e0] sm:$0xff] }
 0x9e5   : > { %25738 = vmatprep.mubr.bf16.mxu1 %v32330_v44  ;;  %v13730_v44 = vpack.c.bf16 %v32495_v62, %v28771_v6  ;;  %v28783_v6 = vld [vmem:[#allocation2 + $0x2c1] sm:$0xff] }
 0x9ec   : > { %25739 = vmatmul.mubr.bf16.gmra.mrb[20].mxu1 %v32332_v24  ;;  %v28774_v24 = vld [vmem:[#allocation2 + $0xd1] sm:$0xff] }
 0x9ed   : > { %25742 = vmatprep.mubr.bf16.mxu1 %v13727_v37  ;;  %v14086_v22 = vpack.c.bf16 %v28774_v24, %v28773_v33  ;;  %v14092_v37 = vpack.c.bf16 %v32526_v42, %v32379_v19  ;;  %v14077_v19 = vld [vmem:[#allocation2 + $0x281] sm:$0xff]  ;;  %v32540_v33 = vld [vmem:[#allocation2 + $0xb2] sm:$0xff] }
 0x9f4   : > { %25743 = vmatmul.mubr.bf16.gmra.mrb[24].mxu1 %v13728_v43  ;;  %v28780_v43 = vld [vmem:[#allocation2 + $0x291] sm:$0xff] }
 0x9f5   : > { %25746 = vmatprep.mubr.bf16.mxu1 %v13729_v63  ;;  %v14097_v8 = vpack.c.bf16 %v28780_v43, %v14077_v19  ;;  %v28782_v63 = vld [vmem:[#allocation2 + $0x2a1] sm:$0xff]  ;;  %v28795_v19 = vld [vmem:[#allocation2 + $0xf0] sm:$0xff] }
 0x9f6   : > { %v14098_v50 = vpack.c.bf16 %v28781_v53, %v28782_v63  ;;  %v28796_v43 = vld [vmem:[#allocation2 + $0x100] sm:$0xff]  ;;  %v28797_v63 = vld [vmem:[#allocation2 + $0x110] sm:$0xff] }
 0x9f7   : > { %v32595_v53 = vld [vmem:[#allocation2 + $0x120] sm:$0xff] }
 0x9fc   : > { %25747 = vmatmul.mubr.bf16.gmra.mrb[28].mxu1 %v13730_v44  ;;  %v28784_v44 = vld [vmem:[#allocation2 + $0x2d1] sm:$0xff] }
 0x9fd   : > { %25766 = vmatprep.mubr.bf16.mxu1 %v14085_v36  ;;  %v14099_v29 = vpack.c.bf16 %v28784_v44, %v28783_v6  ;;  %v14423_v36 = vld [vmem:[#allocation2 + $0xa2] sm:$0xff]  ;;  %v28563_v6 = vld [vmem:[%s33500_s3 + $0x358] sm:$0xff]  }
 0x9fe   : > { %v28798_v44 = vld [vmem:[#allocation2 + $0x160] sm:$0xff] }
 0xa04   : > { %25767 = vmatmul.mubr.bf16.vlgmr.msra.gmra.mrb[0].mxu1 %v14086_v22  ;;  %v14455_v22 = vpack.c.bf16 %v32540_v33, %v14423_v36  ;;  %v28564_v36 = vld [vmem:[%s33500_s3 + $0x360] sm:$0xff]  }
 0xa05   : > { %25770 = vmatprep.mubr.bf16.mxu1 %v14087_v57  ;;  %25799 = vmatpush3.bf16.msra.mxu1 %v28544_v58  ;;  %v14069_v58 = vld [vmem:[#allocation2 + $0x1e1] sm:$0xff]  ;;  %v28555_v57 = vld [vmem:[%s33500_s3 + $0x318] sm:$0xff]  }
 0xa06   : > { %25800 = vmatprep.subr.bf16.mxu1 %v28545_v12  ;;  %v14093_v46 = vpack.c.bf16 %v32524_v2, %v14069_v58  ;;  %v28791_v58 = vld [vmem:[#allocation2 + $0x2e2] sm:$0xff] }
 0xa09   : > { %25801 = vmatpush3.bf16.msra.mxu1 %v28545_v12  ;;  %v28554_v12 = vld [vmem:[%s33500_s3 + $0x310] sm:$0xff]  }
 0xa0a   : > { %25802 = vmatprep.subr.bf16.mxu1 %v28546_v1 }
 0xa0c   : > { %25771 = vmatmul.mubr.bf16.gmra.mrb[4].mxu1 %v14088_v21  ;;  %v28559_v21 = vld [vmem:[%s33500_s3 + $0x338] sm:$0xff]  }
 0xa0d   : > { %25774 = vmatprep.mubr.bf16.mxu1 %v14089_v60  ;;  %25803 = vmatpush3.bf16.msra.mxu1 %v28546_v1  ;;  %v14459_v1 = vpack.c.bf16 %v32554_v3, %v14431_v40  ;;  %v28786_v60 = vld [vmem:[#allocation2 + $0x292] sm:$0xff]  ;;  %v28802_v40 = vld [vmem:[#allocation2 + $0x1a0] sm:$0xff] }
 0xa0e   : > { %25804 = vmatprep.subr.bf16.mxu1 %v28547_v4 }
 0xa11   : > { %25805 = vmatpush3.bf16.msra.mxu1 %v28547_v4  ;;  %v14463_v4 = vpack.c.bf16 %v32572_v61, %v14439_v49  ;;  %v28804_v49 = vld [vmem:[#allocation2 + $0x200] sm:$0xff] }
 0xa12   : > { %25806 = vmatprep.subr.bf16.mxu1 %v28548_v55 }
 0xa14   : > { %25775 = vmatmul.mubr.bf16.gmra.mrb[8].mxu1 %v14090_v13 }
 0xa15   : > { %25778 = vmatprep.mubr.bf16.mxu1 %v14091_v45  ;;  %25807 = vmatpush3.bf16.msra.mxu1 %v28548_v55 }
 0xa16   : > { %25808 = vmatprep.subr.bf16.mxu1 %v28549_v7 }
 0xa19   : > { %25809 = vmatpush3.bf16.msra.mxu1 %v28549_v7  ;;  %v28789_v7 = vld [vmem:[#allocation2 + $0x2c2] sm:$0xff] }
 0xa1a   : > { %25810 = vmatprep.subr.bf16.mxu1 %v28550_v56  ;;  %v14469_v45 = vpack.c.bf16 %v28790_v59, %v28789_v7  ;;  %v33920_v59 = vpack.c.bf16 %v31668_v54, %v31645_v30  ;;  %v28569_v30 = vld [vmem:[%s33500_s3 + $0x388] sm:$0xff]  }
 0xa1b   : > { %v33929_v54 = vld [vmem:[#allocation17_spill] sm:$0xff] }
 0xa1c   : > { %25779 = vmatmul.mubr.bf16.gmra.mrb[12].mxu1 %v14092_v37 }
 0xa1d   : > { %25782 = vmatprep.mubr.bf16.mxu1 %v14093_v46  ;;  %25811 = vmatpush3.bf16.msra.mxu1 %v28550_v56  ;;  %v32585_v56 = vld [vmem:[#allocation2 + $0x2f2] sm:$0xff] }
 0xa1e   : > { %25812 = vmatprep.subr.bf16.mxu1 %v28551_v52 }
 0xa21   : > { %25813 = vmatpush3.bf16.msra.mxu1 %v28551_v52  ;;  %v28794_v52 = vld [vmem:[#allocation2 + $0xe0] sm:$0xff] }
 0xa22   : > { %25846 = vmatprep.subr.bf16.mxu1 %v28552_v48 }
 0xa24   : > { %25783 = vmatmul.mubr.bf16.gmra.mrb[16].mxu1 %v32385_v35  ;;  %v32542_v35 = vld [vmem:[#allocation2 + $0x2f1] sm:$0xff] }
 0xa25   : > { %25786 = vmatprep.mubr.bf16.mxu1 %v32388_v14  ;;  %v28785_v14 = vld [vmem:[#allocation2 + $0x2e1] sm:$0xff] }
 0xa26   : > { %v14100_v24 = vpack.c.bf16 %v32542_v35, %v28785_v14  ;;  %v28799_v14 = vld [vmem:[#allocation2 + $0x170] sm:$0xff] }
 0xa2c   : > { %25787 = vmatmul.mubr.bf16.gmra.mrb[20].mxu1 %v32390_v27  ;;  %v28553_v27 = vld [vmem:[%s33500_s3 + $0x308] sm:$0xff]  }
 0xa2d   : > { %25790 = vmatprep.mubr.bf16.mxu1 %v14097_v8  ;;  %v14827_v8 = vpack.c.bf16 %v28796_v43, %v28795_v19  ;;  %v33930_v43 = vld [vmem:[#allocation18_spill] sm:$0xff] }
 0xa34   : > { %25791 = vmatmul.mubr.bf16.gmra.mrb[24].mxu1 %v14098_v50  ;;  %v14828_v50 = vpack.c.bf16 %v32595_v53, %v28797_v63 }
 0xa35   : > { %25794 = vmatprep.mubr.bf16.mxu1 %v14099_v29  ;;  %v14829_v29 = vpack.c.bf16 %v28798_v44, %v32461_v41 }
 0xa3c   : > { %25795 = vmatmul.mubr.bf16.gmra.mrb[28].mxu1 %v14100_v24  ;;  %v28800_v24 = vld [vmem:[#allocation2 + $0x180] sm:$0xff] }
 0xa3d   : > { %25814 = vmatprep.mubr.bf16.mxu1 %v14455_v22  ;;  %v14830_v22 = vpack.c.bf16 %v28800_v24, %v28799_v14  ;;  %v28572_v14 = vld [vmem:[%s33500_s3 + $0x3a0] sm:$0xff]  }
 0xa3e   : > { %v32666_v24 = vld [vmem:[#allocation2 + $0x1a1] sm:$0xff] }
 0xa44   : > { %25815 = vmatmul.mubr.bf16.vlgmr.msra.gmra.mrb[0].mxu1 %v32404_v38  ;;  %v28556_v38 = vld [vmem:[%s33500_s3 + $0x320] sm:$0xff]  }
 0xa45   : > { %25818 = vmatprep.mubr.bf16.mxu1 %v32410_v32  ;;  %25847 = vmatpush3.bf16.msra.mxu1 %v28552_v48  ;;  %v28557_v32 = vld [vmem:[%s33500_s3 + $0x328] sm:$0xff]  }
 0xa46   : > { %25848 = vmatprep.subr.bf16.mxu1 %v28553_v27  ;;  %v28561_v48 = vld [vmem:[%s33500_s3 + $0x348] sm:$0xff]  }
 0xa49   : > { %25849 = vmatpush3.bf16.msra.mxu1 %v28553_v27  ;;  %v28565_v27 = vld [vmem:[%s33500_s3 + $0x368] sm:$0xff]  }
 0xa4a   : > { %25850 = vmatprep.subr.bf16.mxu1 %v28554_v12 }
 0xa4c   : > { %25819 = vmatmul.mubr.bf16.gmra.mrb[4].mxu1 %v32415_v39  ;;  %v28558_v39 = vld [vmem:[%s33500_s3 + $0x330] sm:$0xff]  }
 0xa4d   : > { %25822 = vmatprep.mubr.bf16.mxu1 %v14459_v1  ;;  %25851 = vmatpush3.bf16.msra.mxu1 %v28554_v12  ;;  %v28801_v12 = vld [vmem:[#allocation2 + $0x190] sm:$0xff]  ;;  %v32611_v1 = vld [vmem:[#allocation2 + $0x1c0] sm:$0xff] }
 0xa4e   : > { %25852 = vmatprep.subr.bf16.mxu1 %v28555_v57  ;;  %v14831_v41 = vpack.c.bf16 %v28802_v40, %v28801_v12  ;;  %v33936_v12 = vld [vmem:[#allocation24_spill] sm:$0xff] }
 0xa51   : > { %25853 = vmatpush3.bf16.msra.mxu1 %v28555_v57  ;;  %v28566_v57 = vld [vmem:[%s33500_s3 + $0x370] sm:$0xff]  }
 0xa52   : > { %25854 = vmatprep.subr.bf16.mxu1 %v28556_v38 }
 0xa54   : > { %25823 = vmatmul.mubr.bf16.gmra.mrb[8].mxu1 %v32426_v25  ;;  %v28560_v25 = vld [vmem:[%s33500_s3 + $0x340] sm:$0xff]  }
 0xa55   : > { %25826 = vmatprep.mubr.bf16.mxu1 %v32432_v20  ;;  %25855 = vmatpush3.bf16.msra.mxu1 %v28556_v38  ;;  %v14447_v20 = vld [vmem:[#allocation2 + $0x282] sm:$0xff]  ;;  %v28803_v38 = vld [vmem:[#allocation2 + $0x1b0] sm:$0xff] }
 0xa56   : > { %25856 = vmatprep.subr.bf16.mxu1 %v28557_v32  ;;  %v14467_v55 = vpack.c.bf16 %v28786_v60, %v14447_v20  ;;  %v28806_v20 = vld [vmem:[#allocation2 + $0x220] sm:$0xff] }
 0xa59   : > { %25857 = vmatpush3.bf16.msra.mxu1 %v28557_v32  ;;  %v14832_v32 = vpack.c.bf16 %v32611_v1, %v28803_v38 }
 0xa5a   : > { %25858 = vmatprep.subr.bf16.mxu1 %v28558_v39 }
 0xa5c   : > { %25827 = vmatmul.mubr.bf16.gmra.mrb[12].mxu1 %v32434_v11  ;;  %v28787_v11 = vld [vmem:[#allocation2 + $0x2b2] sm:$0xff] }
 0xa5d   : > { %25830 = vmatprep.mubr.bf16.mxu1 %v14463_v4  ;;  %25859 = vmatpush3.bf16.msra.mxu1 %v28558_v39  ;;  %v14468_v13 = vpack.c.bf16 %v28787_v11, %v28788_v0  ;;  %v28567_v39 = vld [vmem:[%s33500_s3 + $0x378] sm:$0xff]   ;;  %v28568_v4 = vld [vmem:[%s33500_s3 + $0x380] sm:$0xff]  }
 0xa5e   : > { %25860 = vmatprep.subr.bf16.mxu1 %v28559_v21  ;;  %v28808_v11 = vld [vmem:[#allocation2 + $0x240] sm:$0xff] }
 0xa61   : > { %25861 = vmatpush3.bf16.msra.mxu1 %v28559_v21  ;;  %v14833_v21 = vpack.c.bf16 %v28804_v49, %v32480_v51  ;;  %v28809_v51 = vld [vmem:[#allocation2 + $0x250] sm:$0xff] }
 0xa62   : > { %25894 = vmatprep.subr.bf16.mxu1 %v28560_v25 }
 0xa64   : > { %25831 = vmatmul.mubr.bf16.gmra.mrb[16].mxu1 %v32439_v17  ;;  %v14470_v17 = vpack.c.bf16 %v32585_v56, %v28791_v58  ;;  %v33922_v58 = vld [vmem:[#allocation50_spill] sm:$0xff] }
 0xa65   : > { %25834 = vmatprep.mubr.bf16.mxu1 %v32442_v16  ;;  %v28792_v16 = vld [vmem:[#allocation2 + $0xc0] sm:$0xff] }
 0xa66   : > { %v14825_v37 = vpack.c.bf16 %v28792_v16, %v32448_v31  ;;  %v28562_v31 = vld [vmem:[%s33500_s3 + $0x350] sm:$0xff]   ;;  %v33924_v16 = vld [vmem:[#allocation68_spill] sm:$0xff] }
 0xa6c   : > { %25835 = vmatmul.mubr.bf16.gmra.mrb[20].mxu1 %v32444_v34  ;;  %v28793_v34 = vld [vmem:[#allocation2 + $0xd0] sm:$0xff] }
 0xa6d   : > { %25838 = vmatprep.mubr.bf16.mxu1 %v14467_v55  ;;  %v14826_v46 = vpack.c.bf16 %v28794_v52, %v28793_v34  ;;  %v28807_v55 = vld [vmem:[#allocation2 + $0x230] sm:$0xff]  ;;  %v32633_v34 = vld [vmem:[#allocation2 + $0x300] sm:$0xff] }
 0xa6e   : > { %v14835_v0 = vpack.c.bf16 %v28808_v11, %v28807_v55  ;;  %v14840_v52 = vpack.c.bf16 %v32633_v34, %v32495_v62  ;;  %v28570_v62 = vld [vmem:[%s33500_s3 + $0x390] sm:$0xff]   ;;  %v32692_v11 = vld [vmem:[#allocation2 + $0x261] sm:$0xff] }
 0xa74   : > { %25839 = vmatmul.mubr.bf16.gmra.mrb[24].mxu1 %v14468_v13  ;;  %v32621_v13 = vld [vmem:[#allocation2 + $0x260] sm:$0xff] }
 0xa75   : > { %25842 = vmatprep.mubr.bf16.mxu1 %v14469_v45  ;;  %v14836_v7 = vpack.c.bf16 %v32621_v13, %v28809_v51  ;;  %v33921_v45 = vld [vmem:[#allocation55_spill] sm:$0xff]  ;;  %v33938_v51 = vld [vmem:[#allocation58_spill] sm:$0xff] }
 0xa7c   : > { %25843 = vmatmul.mubr.bf16.gmra.mrb[28].mxu1 %v14470_v17  ;;  %v33923_v17 = vpack.c.bf16 %v33921_v45, %v33922_v58  ;;  %v33941_v45 = vld [vmem:[#allocation56_spill] sm:$0xff]  ;;  %v33942_v58 = vld [vmem:[#allocation53_spill] sm:$0xff] }
 0xa7d   : > { %25862 = vmatprep.mubr.bf16.mxu1 %v14825_v37  ;;  %v33925_v37 = vpack.c.bf16 %v31725_v47, %v33924_v16  ;;  %v33932_v47 = vld [vmem:[#allocation21_spill] sm:$0xff]  ;;  %v33944_v16 = vpack.c.bf16 %v31727_v15, %v31723_v26 }
 0xa7e   : > { %v28820_v26 = vld [vmem:[#allocation2 + $0x102] sm:$0xff] }
 0xa84   : > { %25863 = vmatmul.mubr.bf16.vlgmr.msra.gmra.mrb[0].mxu1 %v14826_v46  ;;  %v33926_v46 = vld [vmem:[#allocation16_spill] sm:$0xff] }
 0xa85   : > { %25866 = vmatprep.mubr.bf16.mxu1 %v14827_v8  ;;  %25895 = vmatpush3.bf16.msra.mxu1 %v28560_v25  ;;  %v28805_v25 = vld [vmem:[#allocation2 + $0x210] sm:$0xff]  ;;  %v33931_v8 = vpack.c.bf16 %v33929_v54, %v33930_v43  ;;  %v28577_v43 = vld [vmem:[%s33500_s3 + $0x3c8] sm:$0xff]  }
 0xa86   : > { %25896 = vmatprep.subr.bf16.mxu1 %v28561_v48  ;;  %v14834_v60 = vpack.c.bf16 %v28806_v20, %v28805_v25  ;;  %v28812_v25 = vld [vmem:[#allocation2 + $0x221] sm:$0xff]  ;;  %v28813_v20 = vld [vmem:[#allocation2 + $0x231] sm:$0xff] }
 0xa89   : > { %25897 = vmatpush3.bf16.msra.mxu1 %v28561_v48  ;;  %v33927_v48 = vld [vmem:[#allocation15_spill] sm:$0xff] }
 0xa8a   : > { %25898 = vmatprep.subr.bf16.mxu1 %v28562_v31  ;;  %v33928_v19 = vpack.c.bf16 %v33926_v46, %v33927_v48  ;;  %v28816_v46 = vld [vmem:[#allocation2 + $0xc2] sm:$0xff] }
 0xa8b   : > { %v15565_v48 = vpack.c.bf16 %v28816_v46, %v32540_v33  ;;  %v28578_v33 = vld [vmem:[%s33500_s3 + $0x3d0] sm:$0xff]  }
 0xa8c   : > { %25867 = vmatmul.mubr.bf16.gmra.mrb[4].mxu1 %v14828_v50  ;;  %v32652_v50 = vld [vmem:[#allocation2 + $0x121] sm:$0xff]  ;;  %v33952_v46 = vld [vmem:[#allocation70_spill] sm:$0xff] }
 0xa8d   : > { %25870 = vmatprep.mubr.bf16.mxu1 %v14829_v29  ;;  %25899 = vmatpush3.bf16.msra.mxu1 %v28562_v31  ;;  %v33933_v31 = vld [vmem:[#allocation23_spill] sm:$0xff]  ;;  %v15198_v44 = vpack.c.bf16 %v32652_v50, %v32506_v18 }
 0xa8e   : > { %25900 = vmatprep.subr.bf16.mxu1 %v28563_v6  ;;  %v33934_v63 = vpack.c.bf16 %v33932_v47, %v33933_v31  ;;  %v28571_v29 = vld [vmem:[%s33500_s3 + $0x398] sm:$0xff]  }
 0xa8f   : > { %v32668_v18 = vld [vmem:[#allocation2 + $0x191] sm:$0xff] }
 0xa90   : > { %v28821_v47 = vld [vmem:[#allocation2 + $0x112] sm:$0xff] }
 0xa91   : > { %25901 = vmatpush3.bf16.msra.mxu1 %v28563_v6  ;;  %v32654_v6 = vld [vmem:[#allocation2 + $0x161] sm:$0xff] }
 0xa92   : > { %25902 = vmatprep.subr.bf16.mxu1 %v28564_v36 }
 0xa94   : > { %25871 = vmatmul.mubr.bf16.gmra.mrb[8].mxu1 %v14830_v22  ;;  %v28573_v22 = vld [vmem:[%s33500_s3 + $0x3a8] sm:$0xff]  }
 0xa95   : > { %25874 = vmatprep.mubr.bf16.mxu1 %v14831_v41  ;;  %25903 = vmatpush3.bf16.msra.mxu1 %v28564_v36  ;;  %v15199_v36 = vpack.c.bf16 %v32654_v6, %v32504_v9  ;;  %v15201_v9 = vpack.c.bf16 %v32666_v24, %v32668_v18  ;;  %v28574_v41 = vld [vmem:[%s33500_s3 + $0x3b0] sm:$0xff]  }
 0xa96   : > { %25904 = vmatprep.subr.bf16.mxu1 %v28565_v27 }
 0xa99   : > { %25905 = vmatpush3.bf16.msra.mxu1 %v28565_v27  ;;  %v33935_v27 = vld [vmem:[#allocation22_spill] sm:$0xff] }
 0xa9a   : > { %25906 = vmatprep.subr.bf16.mxu1 %v28566_v57  ;;  %v33937_v40 = vpack.c.bf16 %v33935_v27, %v33936_v12  ;;  %v28825_v27 = vld [vmem:[#allocation2 + $0x192] sm:$0xff]  ;;  %v28826_v12 = vld [vmem:[#allocation2 + $0x1a2] sm:$0xff] }
 0xa9c   : > { %25875 = vmatmul.mubr.bf16.gmra.mrb[12].mxu1 %v14832_v32  ;;  %v28575_v32 = vld [vmem:[%s33500_s3 + $0x3b8] sm:$0xff]  }
 0xa9d   : > { %25878 = vmatprep.mubr.bf16.mxu1 %v14833_v21  ;;  %25907 = vmatpush3.bf16.msra.mxu1 %v28566_v57  ;;  %v32681_v57 = vld [vmem:[#allocation2 + $0x1c1] sm:$0xff] }
 0xa9e   : > { %25908 = vmatprep.subr.bf16.mxu1 %v28567_v39  ;;  %v15202_v38 = vpack.c.bf16 %v32681_v57, %v32526_v42  ;;  %v28576_v21 = vld [vmem:[%s33500_s3 + $0x3c0] sm:$0xff]  }
 0xaa1   : > { %25909 = vmatpush3.bf16.msra.mxu1 %v28567_v39  ;;  %v28810_v39 = vld [vmem:[#allocation2 + $0x201] sm:$0xff] }
 0xaa2   : > { %25942 = vmatprep.subr.bf16.mxu1 %v28568_v4  ;;  %v15203_v49 = vpack.c.bf16 %v28810_v39, %v32524_v2  ;;  %v28815_v2 = vld [vmem:[#allocation2 + $0x251] sm:$0xff] }
 0xaa3   : > { %v28583_v39 = vld [vmem:[%s33500_s3 + $0x3f8] sm:$0xff]  }
 0xaa4   : > { %25879 = vmatmul.mubr.bf16.gmra.mrb[16].mxu1 %v14834_v60  ;;  %v28814_v60 = vld [vmem:[#allocation2 + $0x241] sm:$0xff] }
 0xaa5   : > { %25882 = vmatprep.mubr.bf16.mxu1 %v14835_v0  ;;  %v15205_v55 = vpack.c.bf16 %v28814_v60, %v28813_v20  ;;  %v15206_v0 = vpack.c.bf16 %v32692_v11, %v28815_v2  ;;  %v28831_v60 = vld [vmem:[#allocation2 + $0x232] sm:$0xff] }
 0xaac   : > { %25883 = vmatmul.mubr.bf16.gmra.mrb[20].mxu1 %v14836_v7  ;;  %v33939_v7 = vld [vmem:[#allocation60_spill] sm:$0xff] }
 0xaad   : > { %25886 = vmatprep.mubr.bf16.mxu1 %v33920_v59  ;;  %v33940_v59 = vpack.c.bf16 %v33938_v51, %v33939_v7  ;;  %v33945_v7 = vld [vmem:[#allocation59_spill] sm:$0xff] }
 0xab4   : > { %25887 = vmatmul.mubr.bf16.gmra.mrb[24].mxu1 %v33923_v17  ;;  %v33943_v17 = vpack.c.bf16 %v33941_v45, %v33942_v58  ;;  %v33948_v58 = vld [vmem:[#allocation57_spill] sm:$0xff] }
 0xab5   : > { %25890 = vmatprep.mubr.bf16.mxu1 %v33925_v37  ;;  %v32704_v37 = vld [vmem:[#allocation2 + $0x301] sm:$0xff] }
 0xabc   : > { %25891 = vmatmul.mubr.bf16.gmra.mrb[28].mxu1 %v14840_v52  ;;  %v15210_v52 = vpack.c.bf16 %v32704_v37, %v32542_v35  ;;  %v32715_v35 = vld [vmem:[#allocation2 + $0x122] sm:$0xff] }
 0xabd   : > { %25910 = vmatprep.mubr.bf16.mxu1 %v33928_v19  ;;  %v28817_v19 = vld [vmem:[#allocation2 + $0xd2] sm:$0xff]  ;;  %v15568_v31 = vpack.c.bf16 %v32715_v35, %v28821_v47 }
 0xac4   : > { %25911 = vmatmul.mubr.bf16.vlgmr.msra.gmra.mrb[0].mxu1 %v33931_v8  ;;  %v28819_v8 = vld [vmem:[#allocation2 + $0xf2] sm:$0xff] }
 0xac5   : > { %25914 = vmatprep.mubr.bf16.mxu1 %v33934_v63  ;;  %25943 = vmatpush3.bf16.msra.mxu1 %v28568_v4  ;;  %v28811_v4 = vld [vmem:[#allocation2 + $0x211] sm:$0xff]  ;;  %v15567_v15 = vpack.c.bf16 %v28820_v26, %v28819_v8  ;;  %v28585_v26 = vld [vmem:[%s33500_s3 + $0x408] sm:$0xff]  }
 0xac6   : > { %25944 = vmatprep.subr.bf16.mxu1 %v28569_v30  ;;  %v15204_v42 = vpack.c.bf16 %v28812_v25, %v28811_v4  ;;  %v28579_v63 = vld [vmem:[%s33500_s3 + $0x3d8] sm:$0xff]   ;;  %v28584_v4 = vld [vmem:[%s33500_s3 + $0x400] sm:$0xff]  }
 0xac7   : > { %v28829_v25 = vld [vmem:[#allocation2 + $0x212] sm:$0xff] }
 0xac9   : > { %25945 = vmatpush3.bf16.msra.mxu1 %v28569_v30  ;;  %v28818_v30 = vld [vmem:[#allocation2 + $0xe2] sm:$0xff] }
 0xaca   : > { %25946 = vmatprep.subr.bf16.mxu1 %v28570_v62  ;;  %v15566_v54 = vpack.c.bf16 %v28818_v30, %v28817_v19  ;;  %v32753_v19 = vld [vmem:[#allocation2 + $0x302] sm:$0xff] }
 0xacb   : > { %v15580_v30 = vpack.c.bf16 %v32753_v19, %v32585_v56  ;;  %v28586_v56 = vld [vmem:[%s33500_s3 + $0x410] sm:$0xff]  }
 0xacc   : > { %25915 = vmatmul.mubr.bf16.gmra.mrb[4].mxu1 %v15198_v44 }
 0xacd   : > { %25918 = vmatprep.mubr.bf16.mxu1 %v15199_v36  ;;  %25947 = vmatpush3.bf16.msra.mxu1 %v28570_v62  ;;  %v28822_v62 = vld [vmem:[#allocation2 + $0x162] sm:$0xff]  ;;  %v28823_v36 = vld [vmem:[#allocation2 + $0x172] sm:$0xff] }
 0xace   : > { %25948 = vmatprep.subr.bf16.mxu1 %v28571_v29  ;;  %v15569_v44 = vpack.c.bf16 %v28822_v62, %v32554_v3  ;;  %v15571_v3 = vpack.c.bf16 %v28826_v12, %v28825_v27  ;;  %v28588_v27 = vld [vmem:[%s33500_s3 + $0x420] sm:$0xff]  }
 0xacf   : > { %v33966_v12 = vld [vmem:[#allocation48_spill] sm:$0xff] }
 0xad1   : > { %25949 = vmatpush3.bf16.msra.mxu1 %v28571_v29  ;;  %v28580_v29 = vld [vmem:[%s33500_s3 + $0x3e0] sm:$0xff]  }
 0xad2   : > { %25950 = vmatprep.subr.bf16.mxu1 %v28572_v14 }
 0xad4   : > { %25919 = vmatmul.mubr.bf16.gmra.mrb[8].mxu1 %v33937_v40  ;;  %v28582_v40 = vld [vmem:[%s33500_s3 + $0x3f0] sm:$0xff]  }
 0xad5   : > { %25922 = vmatprep.mubr.bf16.mxu1 %v15201_v9  ;;  %25951 = vmatpush3.bf16.msra.mxu1 %v28572_v14  ;;  %v28824_v14 = vld [vmem:[#allocation2 + $0x182] sm:$0xff] }
 0xad6   : > { %25952 = vmatprep.subr.bf16.mxu1 %v28573_v22  ;;  %v28581_v9 = vld [vmem:[%s33500_s3 + $0x3e8] sm:$0xff]  }
 0xad9   : > { %25953 = vmatpush3.bf16.msra.mxu1 %v28573_v22  ;;  %v15570_v22 = vpack.c.bf16 %v28824_v14, %v28823_v36  ;;  %v28587_v36 = vld [vmem:[%s33500_s3 + $0x418] sm:$0xff]  }
 0xada   : > { %25954 = vmatprep.subr.bf16.mxu1 %v28574_v41  ;;  %v33963_v14 = vld [vmem:[#allocation47_spill] sm:$0xff] }
 0xadc   : > { %25923 = vmatmul.mubr.bf16.gmra.mrb[12].mxu1 %v15202_v38  ;;  %v28827_v38 = vld [vmem:[#allocation2 + $0x1b2] sm:$0xff] }
 0xadd   : > { %25926 = vmatprep.mubr.bf16.mxu1 %v15203_v49  ;;  %25955 = vmatpush3.bf16.msra.mxu1 %v28574_v41  ;;  %v32731_v41 = vld [vmem:[#allocation2 + $0x1c2] sm:$0xff] }
 0xade   : > { %25956 = vmatprep.subr.bf16.mxu1 %v28575_v32  ;;  %v28828_v49 = vld [vmem:[#allocation2 + $0x202] sm:$0xff] }
 0xae1   : > { %25957 = vmatpush3.bf16.msra.mxu1 %v28575_v32  ;;  %v15572_v32 = vpack.c.bf16 %v32731_v41, %v28827_v38  ;;  %v33969_v38 = vld [vmem:[#allocation52_spill] sm:$0xff] }
 0xae2   : > { %25990 = vmatprep.subr.bf16.mxu1 %v28576_v21 }
 0xae4   : > { %25927 = vmatmul.mubr.bf16.gmra.mrb[16].mxu1 %v15204_v42  ;;  %v28830_v42 = vld [vmem:[#allocation2 + $0x222] sm:$0xff] }
 0xae5   : > { %25930 = vmatprep.mubr.bf16.mxu1 %v15205_v55  ;;  %v15574_v20 = vpack.c.bf16 %v28830_v42, %v28829_v25  ;;  %v28832_v55 = vld [vmem:[#allocation2 + $0x242] sm:$0xff]  ;;  %v33972_v25 = vld [vmem:[#allocation63_spill] sm:$0xff]  ;;  %v33973_v42 = vld [vmem:[#allocation62_spill] sm:$0xff] }
 0xae6   : > { %v15575_v2 = vpack.c.bf16 %v28832_v55, %v28831_v60  ;;  %v28592_v60 = vld [vmem:[%s33500_s3 + $0x440] sm:$0xff]  }
 0xae7   : > { %v33975_v55 = vld [vmem:[#allocation64_spill] sm:$0xff] }
 0xaec   : > { %25931 = vmatmul.mubr.bf16.gmra.mrb[20].mxu1 %v15206_v0  ;;  %v32741_v0 = vld [vmem:[#allocation2 + $0x262] sm:$0xff] }
 0xaed   : > { %25934 = vmatprep.mubr.bf16.mxu1 %v33940_v59  ;;  %v33946_v59 = vld [vmem:[#allocation61_spill] sm:$0xff] }
 0xaee   : > { %v33947_v45 = vpack.c.bf16 %v33945_v7, %v33946_v59  ;;  %v15928_v59 = vld [vmem:[#allocation2 + $0x2a0] sm:$0xff] }
 0xaf4   : > { %25935 = vmatmul.mubr.bf16.gmra.mrb[24].mxu1 %v33943_v17  ;;  %v33949_v17 = vld [vmem:[#allocation54_spill] sm:$0xff] }
 0xaf5   : > { %25938 = vmatprep.mubr.bf16.mxu1 %v33944_v16  ;;  %v33950_v16 = vpack.c.bf16 %v33948_v58, %v33949_v17  ;;  %v15929_v58 = vld [vmem:[#allocation2 + $0x2b0] sm:$0xff] }
 0xaf6   : > { %v32816_v17 = vpack.c.bf16 %v15929_v58, %v15928_v59 }
 0xafc   : > { %25939 = vmatmul.mubr.bf16.gmra.mrb[28].mxu1 %v15210_v52  ;;  %v33951_v52 = vld [vmem:[#allocation69_spill] sm:$0xff] }
 0xafd   : > { %25958 = vmatprep.mubr.bf16.mxu1 %v15565_v48  ;;  %v33953_v48 = vpack.c.bf16 %v33951_v52, %v33952_v46  ;;  %v15932_v52 = vld [vmem:[#allocation2 + $0x2e0] sm:$0xff] }
 0xafe   : > { %v15930_v46 = vld [vmem:[#allocation2 + $0x2c0] sm:$0xff] }
 0xb04   : > { %25959 = vmatmul.mubr.bf16.vlgmr.msra.gmra.mrb[0].mxu1 %v15566_v54  ;;  %v33954_v54 = vld [vmem:[#allocation37_spill] sm:$0xff] }
 0xb05   : > { %25962 = vmatprep.mubr.bf16.mxu1 %v15567_v15  ;;  %25991 = vmatpush3.bf16.msra.mxu1 %v28576_v21  ;;  %v15573_v21 = vpack.c.bf16 %v28828_v49, %v32572_v61  ;;  %v28833_v61 = vld [vmem:[#allocation2 + $0x252] sm:$0xff] }
 0xb06   : > { %25992 = vmatprep.subr.bf16.mxu1 %v28577_v43  ;;  %v15576_v51 = vpack.c.bf16 %v32741_v0, %v28833_v61  ;;  %v33957_v15 = vld [vmem:[#allocation34_spill] sm:$0xff]  ;;  %v33978_v61 = vld [vmem:[#allocation67_spill] sm:$0xff] }
 0xb07   : > { %v28590_v49 = vld [vmem:[%s33500_s3 + $0x430] sm:$0xff]  }
 0xb09   : > { %25993 = vmatpush3.bf16.msra.mxu1 %v28577_v43  ;;  %v33955_v43 = vld [vmem:[#allocation33_spill] sm:$0xff] }
 0xb0a   : > { %25994 = vmatprep.subr.bf16.mxu1 %v28578_v33  ;;  %v33956_v8 = vpack.c.bf16 %v33954_v54, %v33955_v43  ;;  %v16274_v43 = vld [vmem:[#allocation2 + $0xc1] sm:$0xff] }
 0xb0c   : > { %25963 = vmatmul.mubr.bf16.gmra.mrb[4].mxu1 %v15568_v31  ;;  %v33960_v31 = vld [vmem:[#allocation39_spill] sm:$0xff] }
 0xb0d   : > { %25966 = vmatprep.mubr.bf16.mxu1 %v15569_v44  ;;  %25995 = vmatpush3.bf16.msra.mxu1 %v28578_v33  ;;  %v33958_v33 = vld [vmem:[#allocation38_spill] sm:$0xff]  ;;  %v32772_v44 = vld [vmem:[#allocation2] sm:$0xff] }
 0xb0e   : > { %25996 = vmatprep.subr.bf16.mxu1 %v28579_v63  ;;  %v33959_v47 = vpack.c.bf16 %v33957_v15, %v33958_v33  ;;  %v16277_v15 = vld [vmem:[#allocation2 + $0xf1] sm:$0xff]  ;;  %v16278_v33 = vld [vmem:[#allocation2 + $0x101] sm:$0xff] }
 0xb11   : > { %25997 = vmatpush3.bf16.msra.mxu1 %v28579_v63  ;;  %v33961_v63 = vld [vmem:[#allocation35_spill] sm:$0xff] }
 0xb12   : > { %25998 = vmatprep.subr.bf16.mxu1 %v28580_v29  ;;  %v33962_v62 = vpack.c.bf16 %v33960_v31, %v33961_v63  ;;  %v16279_v63 = vld [vmem:[#allocation2 + $0x111] sm:$0xff] }
 0xb14   : > { %25967 = vmatmul.mubr.bf16.gmra.mrb[8].mxu1 %v15570_v22  ;;  %v33964_v22 = vld [vmem:[#allocation43_spill] sm:$0xff] }
 0xb15   : > { %25970 = vmatprep.mubr.bf16.mxu1 %v15571_v3  ;;  %25999 = vmatpush3.bf16.msra.mxu1 %v28580_v29  ;;  %v15939_v29 = vpack.c.bf16 %v32772_v44, %v32595_v53  ;;  %v28589_v53 = vld [vmem:[%s33500_s3 + $0x428] sm:$0xff]   ;;  %v33967_v3 = vld [vmem:[#allocation51_spill] sm:$0xff] }
 0xb16   : > { %26000 = vmatprep.subr.bf16.mxu1 %v28581_v9 }
 0xb19   : > { %26001 = vmatpush3.bf16.msra.mxu1 %v28581_v9  ;;  %v33965_v9 = vpack.c.bf16 %v33963_v14, %v33964_v22  ;;  %v32834_v14 = vld [vmem:[#allocation2 + $0x171] sm:$0xff] }
 0xb1a   : > { %26002 = vmatprep.subr.bf16.mxu1 %v28582_v40  ;;  %v28595_v22 = vld [vmem:[%s33500_s3 + $0x458] sm:$0xff]  }
 0xb1c   : > { %25971 = vmatmul.mubr.bf16.gmra.mrb[12].mxu1 %v15572_v32  ;;  %v33970_v32 = vld [vmem:[#allocation49_spill] sm:$0xff] }
 0xb1d   : > { %25974 = vmatprep.mubr.bf16.mxu1 %v15573_v21  ;;  %26003 = vmatpush3.bf16.msra.mxu1 %v28582_v40  ;;  %v33968_v40 = vpack.c.bf16 %v33966_v12, %v33967_v3  ;;  %v15943_v21 = vpack.c.bf16 %v32772_v44, %v32611_v1  ;;  %v33976_v1 = vld [vmem:[#allocation66_spill] sm:$0xff] }
 0xb1e   : > { %26004 = vmatprep.subr.bf16.mxu1 %v28583_v39  ;;  %v32848_v12 = vld [vmem:[#allocation2 + $0x1b1] sm:$0xff] }
 0xb1f   : > { %v16312_v3 = vpack.c.bf16 %v32848_v12, %v32666_v24  ;;  %v33981_v24 = vld [vmem:[#allocation71_spill] sm:$0xff] }
 0xb21   : > { %26005 = vmatpush3.bf16.msra.mxu1 %v28583_v39  ;;  %v33971_v39 = vpack.c.bf16 %v33969_v38, %v33970_v32  ;;  %v16289_v38 = vld [vmem:[#allocation2 + $0x1d1] sm:$0xff] }
 0xb22   : > { %26038 = vmatprep.subr.bf16.mxu1 %v28584_v4  ;;  %v28599_v32 = vld [vmem:[%s33500_s3 + $0x478] sm:$0xff]  }
 0xb24   : > { %25975 = vmatmul.mubr.bf16.gmra.mrb[16].mxu1 %v15574_v20  ;;  %v33974_v20 = vpack.c.bf16 %v33972_v25, %v33973_v42  ;;  %v33986_v25 = vld [vmem:[#allocation75_spill] sm:$0xff]  ;;  %v33987_v42 = vld [vmem:[#allocation74_spill] sm:$0xff] }
 0xb25   : > { %25978 = vmatprep.mubr.bf16.mxu1 %v15575_v2  ;;  %v33977_v2 = vpack.c.bf16 %v33975_v55, %v33976_v1  ;;  %v16298_v55 = vld [vmem:[#allocation2 + $0x2a1] sm:$0xff]  ;;  %v16299_v1 = vld [vmem:[#allocation2 + $0x2b1] sm:$0xff] }
 0xb2c   : > { %25979 = vmatmul.mubr.bf16.gmra.mrb[20].mxu1 %v15576_v51  ;;  %v33979_v51 = vld [vmem:[#allocation65_spill] sm:$0xff] }
 0xb2d   : > { %25982 = vmatprep.mubr.bf16.mxu1 %v33947_v45  ;;  %v33980_v7 = vpack.c.bf16 %v33978_v61, %v33979_v51  ;;  %v15947_v45 = vpack.c.bf16 %v32772_v44, %v32621_v13  ;;  %v15951_v13 = vpack.c.bf16 %v32772_v44, %v32633_v34  ;;  %v28594_v34 = vld [vmem:[%s33500_s3 + $0x450] sm:$0xff]   ;;  %v16302_v51 = vld [vmem:[#allocation2 + $0x2e1] sm:$0xff] }
 0xb2e   : > { %v16301_v61 = vld [vmem:[#allocation2 + $0x2d1] sm:$0xff] }
 0xb34   : > { %25983 = vmatmul.mubr.bf16.gmra.mrb[24].mxu1 %v33950_v16  ;;  %v15931_v16 = vld [vmem:[#allocation2 + $0x2d0] sm:$0xff] }
 0xb35   : > { %25986 = vmatprep.mubr.bf16.mxu1 %v33953_v48  ;;  %v32819_v48 = vpack.c.bf16 %v15931_v16, %v15930_v46  ;;  %v16305_v16 = vld [vmem:[#allocation2 + $0x311] sm:$0xff] }
 0xb3c   : > { %25987 = vmatmul.mubr.bf16.gmra.mrb[28].mxu1 %v15580_v30  ;;  %v15933_v30 = vld [vmem:[#allocation2 + $0x2f0] sm:$0xff] }
 0xb3d   : > { %26006 = vmatprep.mubr.bf16.mxu1 %v33956_v8  ;;  %v32821_v54 = vpack.c.bf16 %v15933_v30, %v15932_v52  ;;  %v16275_v8 = vld [vmem:[#allocation2 + $0xd1] sm:$0xff]  ;;  %v33989_v52 = vld [vmem:[#allocation76_spill] sm:$0xff]  ;;  %v28601_v30 = vld [vmem:[%s33500_s3 + $0x488] sm:$0xff]  }
 0xb3e   : > { %v33990_v46 = vpack.c.bf16 %v31762_v5, %v33989_v52  ;;  %v16651_v5 = vld [vmem:[#allocation2 + $0x132] sm:$0xff] }
 0xb44   : > { %26007 = vmatmul.mubr.bf16.vlgmr.msra.gmra.mrb[0].mxu1 %v33959_v47  ;;  %v16276_v47 = vld [vmem:[#allocation2 + $0xe1] sm:$0xff] }
 0xb45   : > { %26010 = vmatprep.mubr.bf16.mxu1 %v33962_v62  ;;  %26039 = vmatpush3.bf16.msra.mxu1 %v28584_v4  ;;  %v28591_v4 = vld [vmem:[%s33500_s3 + $0x438] sm:$0xff]   ;;  %v16307_v31 = vpack.c.bf16 %v16277_v15, %v16276_v47  ;;  %v28593_v62 = vld [vmem:[%s33500_s3 + $0x448] sm:$0xff]  }
 0xb46   : > { %26040 = vmatprep.subr.bf16.mxu1 %v28585_v26  ;;  %v33996_v47 = vld [vmem:[#allocation81_spill] sm:$0xff] }
 0xb49   : > { %26041 = vmatpush3.bf16.msra.mxu1 %v28585_v26  ;;  %v16306_v26 = vpack.c.bf16 %v16275_v8, %v16274_v43  ;;  %v33991_v43 = vld [vmem:[#allocation77_spill] sm:$0xff]  ;;  %v33993_v8 = vld [vmem:[#allocation79_spill] sm:$0xff] }
 0xb4a   : > { %26042 = vmatprep.subr.bf16.mxu1 %v28586_v56 }
 0xb4c   : > { %26011 = vmatmul.mubr.bf16.gmra.mrb[4].mxu1 %v15939_v29  ;;  %v16281_v29 = vld [vmem:[#allocation2 + $0x131] sm:$0xff] }
 0xb4d   : > { %26014 = vmatprep.mubr.bf16.mxu1 %v33965_v9  ;;  %26043 = vmatpush3.bf16.msra.mxu1 %v28586_v56  ;;  %v16308_v56 = vpack.c.bf16 %v16279_v63, %v16278_v33  ;;  %v16310_v9 = vpack.c.bf16 %v32834_v14, %v32654_v6  ;;  %v28597_v6 = vld [vmem:[%s33500_s3 + $0x468] sm:$0xff]   ;;  %v16679_v33 = vpack.c.bf16 %v16651_v5, %v32715_v35  ;;  %v28841_v5 = vld [vmem:[#allocation2 + $0x1f0] sm:$0xff] }
 0xb4e   : > { %26044 = vmatprep.subr.bf16.mxu1 %v28587_v36  ;;  %v28605_v35 = vld [vmem:[%s33500_s3 + $0x4a8] sm:$0xff]  }
 0xb51   : > { %26045 = vmatpush3.bf16.msra.mxu1 %v28587_v36  ;;  %v16309_v36 = vpack.c.bf16 %v16281_v29, %v32652_v50  ;;  %v34001_v29 = vld [vmem:[#allocation84_spill] sm:$0xff] }
 0xb52   : > { %26046 = vmatprep.subr.bf16.mxu1 %v28588_v27 }
 0xb54   : > { %26015 = vmatmul.mubr.bf16.gmra.mrb[8].mxu1 %v33968_v40  ;;  %v28598_v40 = vld [vmem:[%s33500_s3 + $0x470] sm:$0xff]  }
 0xb55   : > { %26018 = vmatprep.mubr.bf16.mxu1 %v33971_v39  ;;  %26047 = vmatpush3.bf16.msra.mxu1 %v28588_v27  ;;  %v28596_v27 = vld [vmem:[%s33500_s3 + $0x460] sm:$0xff]   ;;  %v33982_v39 = vpack.c.bf16 %v31737_v10, %v33981_v24  ;;  %v34010_v24 = vld [vmem:[#allocation90_spill] sm:$0xff] }
 0xb56   : > { %26048 = vmatprep.subr.bf16.mxu1 %v28589_v53 }
 0xb59   : > { %26049 = vmatpush3.bf16.msra.mxu1 %v28589_v53  ;;  %v32844_v53 = vld [vmem:[#allocation2 + $0x181] sm:$0xff] }
 0xb5a   : > { %26050 = vmatprep.subr.bf16.mxu1 %v28590_v49  ;;  %v16311_v50 = vpack.c.bf16 %v32668_v18, %v32844_v53  ;;  %v16313_v18 = vpack.c.bf16 %v16289_v38, %v32681_v57  ;;  %v33984_v57 = vld [vmem:[#allocation72_spill] sm:$0xff] }
 0xb5b   : > { %v28608_v38 = vld [vmem:[%s33500_s3 + $0x4c0] sm:$0xff]  }
 0xb5c   : > { %26019 = vmatmul.mubr.bf16.gmra.mrb[12].mxu1 %v15943_v21  ;;  %v33983_v21 = vld [vmem:[#allocation73_spill] sm:$0xff] }
 0xb5d   : > { %26022 = vmatprep.mubr.bf16.mxu1 %v33974_v20  ;;  %26051 = vmatpush3.bf16.msra.mxu1 %v28590_v49  ;;  %v28600_v49 = vld [vmem:[%s33500_s3 + $0x480] sm:$0xff]   ;;  %v33988_v20 = vpack.c.bf16 %v33986_v25, %v33987_v42  ;;  %v16669_v25 = vld [vmem:[#allocation2 + $0x2b2] sm:$0xff] }
 0xb5e   : > { %26052 = vmatprep.subr.bf16.mxu1 %v28591_v4 }
 0xb61   : > { %26053 = vmatpush3.bf16.msra.mxu1 %v28591_v4  ;;  %v33985_v4 = vpack.c.bf16 %v33983_v21, %v33984_v57  ;;  %v16667_v21 = vld [vmem:[#allocation2 + $0x272] sm:$0xff]  ;;  %v16668_v57 = vld [vmem:[#allocation2 + $0x2a2] sm:$0xff] }
 0xb62   : > { %26086 = vmatprep.subr.bf16.mxu1 %v28592_v60  ;;  %v32939_v42 = vpack.c.bf16 %v16669_v25, %v16668_v57  ;;  %v28620_v57 = vld [vmem:[%s33500_s3 + $0x520] sm:$0xff]   ;;  %v28853_v25 = vld [vmem:[#allocation2 + $0x211] sm:$0xff] }
 0xb64   : > { %26023 = vmatmul.mubr.bf16.gmra.mrb[16].mxu1 %v33977_v2  ;;  %v32875_v2 = vpack.c.bf16 %v16299_v1, %v16298_v55  ;;  %v16670_v55 = vld [vmem:[#allocation2 + $0x2c2] sm:$0xff]  ;;  %v16673_v1 = vld [vmem:[#allocation2 + $0x2f2] sm:$0xff] }
 0xb65   : > { %26026 = vmatprep.mubr.bf16.mxu1 %v33980_v7  ;;  %v16300_v7 = vld [vmem:[#allocation2 + $0x2c1] sm:$0xff] }
 0xb66   : > { %v32878_v59 = vpack.c.bf16 %v16301_v61, %v16300_v7  ;;  %v28835_v7 = vld [vmem:[#allocation2 + $0x150] sm:$0xff] }
 0xb6c   : > { %26027 = vmatmul.mubr.bf16.gmra.mrb[20].mxu1 %v15947_v45  ;;  %v16303_v45 = vld [vmem:[#allocation2 + $0x2f1] sm:$0xff] }
 0xb6d   : > { %26030 = vmatprep.mubr.bf16.mxu1 %v32816_v17  ;;  %v32880_v58 = vpack.c.bf16 %v16303_v45, %v16302_v51  ;;  %v16675_v51 = vld [vmem:[#allocation2 + $0x312] sm:$0xff]  ;;  %v17047_v45 = vpack.c.bf16 %v28835_v7, %v32772_v44 }
 0xb6e   : > { %v33017_v7 = vld [vmem:[#allocation2 + $0x291] sm:$0xff] }
 0xb74   : > { %26031 = vmatmul.mubr.bf16.gmra.mrb[24].mxu1 %v32819_v48 }
 0xb75   : > { %26034 = vmatprep.mubr.bf16.mxu1 %v32821_v54 }
 0xb7c   : > { %26035 = vmatmul.mubr.bf16.gmra.mrb[28].mxu1 %v15951_v13  ;;  %v33992_v13 = vpack.c.bf16 %v31768_v28, %v33991_v43  ;;  %v28603_v28 = vld [vmem:[%s33500_s3 + $0x498] sm:$0xff]   ;;  %v28839_v43 = vld [vmem:[#allocation2 + $0x190] sm:$0xff] }
 0xb7d   : > { %26054 = vmatprep.mubr.bf16.mxu1 %v16306_v26  ;;  %v33994_v26 = vld [vmem:[#allocation78_spill] sm:$0xff] }
 0xb7e   : > { %v33995_v15 = vpack.c.bf16 %v33993_v8, %v33994_v26  ;;  %v32956_v8 = vld [vmem:[#allocation2 + $0x1b0] sm:$0xff]  ;;  %v28840_v26 = vld [vmem:[#allocation2 + $0x1a0] sm:$0xff] }
 0xb84   : > { %26055 = vmatmul.mubr.bf16.vlgmr.msra.gmra.mrb[0].mxu1 %v16307_v31  ;;  %v33997_v31 = vld [vmem:[#allocation80_spill] sm:$0xff] }
 0xb85   : > { %26058 = vmatprep.mubr.bf16.mxu1 %v16308_v56  ;;  %26087 = vmatpush3.bf16.msra.mxu1 %v28592_v60  ;;  %v16297_v60 = vld [vmem:[#allocation2 + $0x271] sm:$0xff]  ;;  %v33998_v63 = vpack.c.bf16 %v33996_v47, %v33997_v31  ;;  %v28842_v47 = vld [vmem:[#allocation2 + $0x200] sm:$0xff] }
 0xb86   : > { %26088 = vmatprep.subr.bf16.mxu1 %v28593_v62  ;;  %v16317_v10 = vpack.c.bf16 %v16297_v60, %v32692_v11  ;;  %v16321_v11 = vpack.c.bf16 %v16305_v16, %v32704_v37  ;;  %v28602_v37 = vld [vmem:[%s33500_s3 + $0x490] sm:$0xff]   ;;  %v16672_v60 = vld [vmem:[#allocation2 + $0x2e2] sm:$0xff] }
 0xb87   : > { %v33999_v56 = vld [vmem:[#allocation82_spill] sm:$0xff]  ;;  %v32944_v61 = vpack.c.bf16 %v16673_v1, %v16672_v60  ;;  %v28836_v16 = vld [vmem:[#allocation2 + $0x160] sm:$0xff] }
 0xb88   : > { %v28843_v31 = vld [vmem:[#allocation2 + $0x210] sm:$0xff]  ;;  %v28854_v60 = vld [vmem:[#allocation2 + $0x221] sm:$0xff] }
 0xb89   : > { %26089 = vmatpush3.bf16.msra.mxu1 %v28593_v62  ;;  %v28604_v62 = vld [vmem:[%s33500_s3 + $0x4a0] sm:$0xff]  }
 0xb8a   : > { %26090 = vmatprep.subr.bf16.mxu1 %v28594_v34 }
 0xb8c   : > { %26059 = vmatmul.mubr.bf16.gmra.mrb[4].mxu1 %v16309_v36  ;;  %v34002_v36 = vld [vmem:[#allocation83_spill] sm:$0xff] }
 0xb8d   : > { %26062 = vmatprep.mubr.bf16.mxu1 %v16310_v9  ;;  %26091 = vmatpush3.bf16.msra.mxu1 %v28594_v34  ;;  %v34000_v34 = vpack.c.bf16 %v31786_v23, %v33999_v56  ;;  %v28606_v9 = vld [vmem:[%s33500_s3 + $0x4b0] sm:$0xff]   ;;  %v28607_v23 = vld [vmem:[%s33500_s3 + $0x4b8] sm:$0xff]  }
 0xb8e   : > { %26092 = vmatprep.subr.bf16.mxu1 %v28595_v22  ;;  %v28845_v56 = vld [vmem:[#allocation2 + $0x230] sm:$0xff] }
 0xb91   : > { %26093 = vmatpush3.bf16.msra.mxu1 %v28595_v22  ;;  %v34003_v22 = vpack.c.bf16 %v34001_v29, %v34002_v36  ;;  %v28614_v29 = vld [vmem:[%s33500_s3 + $0x4f0] sm:$0xff]  }
 0xb92   : > { %26094 = vmatprep.subr.bf16.mxu1 %v28596_v27  ;;  %v32972_v36 = vld [vmem:[#allocation2 + $0x290] sm:$0xff] }
 0xb94   : > { %26063 = vmatmul.mubr.bf16.gmra.mrb[8].mxu1 %v16311_v50 }
 0xb95   : > { %26066 = vmatprep.mubr.bf16.mxu1 %v16312_v3  ;;  %26095 = vmatpush3.bf16.msra.mxu1 %v28596_v27  ;;  %v16659_v27 = vld [vmem:[#allocation2 + $0x1d2] sm:$0xff]  ;;  %v34005_v3 = vld [vmem:[#allocation85_spill] sm:$0xff] }
 0xb96   : > { %26096 = vmatprep.subr.bf16.mxu1 %v28597_v6  ;;  %v16683_v50 = vpack.c.bf16 %v16659_v27, %v32731_v41  ;;  %v34008_v41 = vld [vmem:[#allocation87_spill] sm:$0xff] }
 0xb99   : > { %26097 = vmatpush3.bf16.msra.mxu1 %v28597_v6  ;;  %v34004_v6 = vld [vmem:[#allocation86_spill] sm:$0xff] }
 0xb9a   : > { %26098 = vmatprep.subr.bf16.mxu1 %v28598_v40 }
 0xb9c   : > { %26067 = vmatmul.mubr.bf16.gmra.mrb[12].mxu1 %v16313_v18  ;;  %v34007_v18 = vld [vmem:[#allocation88_spill] sm:$0xff] }
 0xb9d   : > { %26070 = vmatprep.mubr.bf16.mxu1 %v33982_v39  ;;  %26099 = vmatpush3.bf16.msra.mxu1 %v28598_v40  ;;  %v34006_v40 = vpack.c.bf16 %v34004_v6, %v34005_v3  ;;  %v34011_v39 = vld [vmem:[#allocation89_spill] sm:$0xff]  ;;  %v28616_v6 = vld [vmem:[%s33500_s3 + $0x500] sm:$0xff]   ;;  %v32989_v3 = vpack.c.bf16 %v32772_v44, %v32772_v44 }
 0xb9e   : > { %26100 = vmatprep.subr.bf16.mxu1 %v28599_v32 }
 0xba1   : > { %26101 = vmatpush3.bf16.msra.mxu1 %v28599_v32  ;;  %v34009_v32 = vpack.c.bf16 %v34007_v18, %v34008_v41 }
 0xba2   : > { %26134 = vmatprep.subr.bf16.mxu1 %v28600_v49 }
 0xba4   : > { %26071 = vmatmul.mubr.bf16.gmra.mrb[16].mxu1 %v33985_v4  ;;  %v16687_v4 = vpack.c.bf16 %v16667_v21, %v32741_v0  ;;  %v16691_v0 = vpack.c.bf16 %v16675_v51, %v32753_v19  ;;  %v28610_v19 = vld [vmem:[%s33500_s3 + $0x4d0] sm:$0xff]  }
 0xba5   : > { %26074 = vmatprep.mubr.bf16.mxu1 %v33988_v20  ;;  %v16671_v20 = vld [vmem:[#allocation2 + $0x2d2] sm:$0xff] }
 0xba6   : > { %v28851_v21 = vld [vmem:[#allocation2 + $0x1f1] sm:$0xff] }
 0xba7   : > { %v28622_v51 = vld [vmem:[%s33500_s3 + $0x530] sm:$0xff]  }
 0xbac   : > { %26075 = vmatmul.mubr.bf16.gmra.mrb[20].mxu1 %v16317_v10  ;;  %v32942_v10 = vpack.c.bf16 %v16671_v20, %v16670_v55  ;;  %v28855_v55 = vld [vmem:[#allocation2 + $0x231] sm:$0xff] }
 0xbad   : > { %26078 = vmatprep.mubr.bf16.mxu1 %v32875_v2  ;;  %v17423_v1 = vpack.c.bf16 %v28855_v55, %v28854_v60  ;;  %v28632_v55 = vld [vmem:[%s33500_s3 + $0x580] sm:$0xff]  }
 0xbb4   : > { %26079 = vmatmul.mubr.bf16.gmra.mrb[24].mxu1 %v32878_v59 }
 0xbb5   : > { %26082 = vmatprep.mubr.bf16.mxu1 %v32880_v58 }
 0xbbc   : > { %26083 = vmatmul.mubr.bf16.gmra.mrb[28].mxu1 %v16321_v11  ;;  %v28837_v11 = vld [vmem:[#allocation2 + $0x170] sm:$0xff] }
 0xbbd   : > { %26102 = vmatprep.mubr.bf16.mxu1 %v33990_v46  ;;  %v17048_v52 = vpack.c.bf16 %v28837_v11, %v28836_v16  ;;  %v28609_v46 = vld [vmem:[%s33500_s3 + $0x4c8] sm:$0xff]  }
 0xbbe   : > { %v28856_v16 = vld [vmem:[#allocation2 + $0x241] sm:$0xff] }
 0xbc4   : > { %26103 = vmatmul.mubr.bf16.vlgmr.msra.gmra.mrb[0].mxu1 %v33992_v13 }
 0xbc5   : > { %26106 = vmatprep.mubr.bf16.mxu1 %v33995_v15  ;;  %26135 = vmatpush3.bf16.msra.mxu1 %v28600_v49  ;;  %v34012_v49 = vpack.c.bf16 %v34010_v24, %v34011_v39  ;;  %v17050_v15 = vpack.c.bf16 %v32956_v8, %v28840_v26  ;;  %v17393_v24 = vld [vmem:[#allocation2 + $0x1e1] sm:$0xff] }
 0xbc6   : > { %26136 = vmatprep.subr.bf16.mxu1 %v28601_v30  ;;  %v28850_v39 = vld [vmem:[#allocation2 + $0x1a1] sm:$0xff] }
 0xbc7   : > { %v33035_v26 = vld [vmem:[#allocation2 + $0x341] sm:$0xff] }
 0xbc9   : > { %26137 = vmatpush3.bf16.msra.mxu1 %v28601_v30  ;;  %v28838_v30 = vld [vmem:[#allocation2 + $0x180] sm:$0xff] }
 0xbca   : > { %26138 = vmatprep.subr.bf16.mxu1 %v28602_v37  ;;  %v17049_v13 = vpack.c.bf16 %v28839_v43, %v28838_v30  ;;  %v28624_v30 = vld [vmem:[%s33500_s3 + $0x540] sm:$0xff]  }
 0xbcb   : > { %v17409_v43 = vld [vmem:[#allocation2 + $0x321] sm:$0xff] }
 0xbcc   : > { %26107 = vmatmul.mubr.bf16.gmra.mrb[4].mxu1 %v16679_v33  ;;  %v17051_v33 = vpack.c.bf16 %v28841_v5, %v32772_v44  ;;  %v33041_v5 = vld [vmem:[#allocation2 + $0x371] sm:$0xff] }
 0xbcd   : > { %26110 = vmatprep.mubr.bf16.mxu1 %v33998_v63  ;;  %26139 = vmatpush3.bf16.msra.mxu1 %v28602_v37  ;;  %v28611_v37 = vld [vmem:[%s33500_s3 + $0x4d8] sm:$0xff]   ;;  %v17052_v63 = vpack.c.bf16 %v28843_v31, %v28842_v47  ;;  %v17755_v47 = vld [vmem:[#allocation2 + $0x142] sm:$0xff] }
 0xbce   : > { %26140 = vmatprep.subr.bf16.mxu1 %v28603_v28  ;;  %v28857_v31 = vld [vmem:[#allocation2 + $0x152] sm:$0xff] }
 0xbd1   : > { %26141 = vmatpush3.bf16.msra.mxu1 %v28603_v28  ;;  %v28612_v28 = vld [vmem:[%s33500_s3 + $0x4e0] sm:$0xff]  }
 0xbd2   : > { %26142 = vmatprep.subr.bf16.mxu1 %v28604_v62 }
 0xbd4   : > { %26111 = vmatmul.mubr.bf16.gmra.mrb[8].mxu1 %v34000_v34 }
 0xbd5   : > { %26114 = vmatprep.mubr.bf16.mxu1 %v34003_v22  ;;  %26143 = vmatpush3.bf16.msra.mxu1 %v28604_v62  ;;  %v28613_v62 = vld [vmem:[%s33500_s3 + $0x4e8] sm:$0xff]   ;;  %v32974_v22 = vld [vmem:[#allocation2 + $0x250] sm:$0xff] }
 0xbd6   : > { %26144 = vmatprep.subr.bf16.mxu1 %v28605_v35 }
 0xbd9   : > { %26145 = vmatpush3.bf16.msra.mxu1 %v28605_v35  ;;  %v28844_v35 = vld [vmem:[#allocation2 + $0x220] sm:$0xff] }
 0xbda   : > { %26146 = vmatprep.subr.bf16.mxu1 %v28606_v9  ;;  %v17053_v34 = vpack.c.bf16 %v28845_v56, %v28844_v35  ;;  %v28859_v35 = vld [vmem:[#allocation2 + $0x172] sm:$0xff] }
 0xbdc   : > { %26115 = vmatmul.mubr.bf16.gmra.mrb[12].mxu1 %v16683_v50  ;;  %v28615_v50 = vld [vmem:[%s33500_s3 + $0x4f8] sm:$0xff]  }
 0xbdd   : > { %26118 = vmatprep.mubr.bf16.mxu1 %v34006_v40  ;;  %26147 = vmatpush3.bf16.msra.mxu1 %v28606_v9  ;;  %v28846_v9 = vld [vmem:[#allocation2 + $0x240] sm:$0xff] }
 0xbde   : > { %26148 = vmatprep.subr.bf16.mxu1 %v28607_v23  ;;  %v17054_v27 = vpack.c.bf16 %v32974_v22, %v28846_v9  ;;  %v17385_v40 = vld [vmem:[#allocation2 + $0x141] sm:$0xff]  ;;  %v28861_v9 = vld [vmem:[#allocation2 + $0x192] sm:$0xff] }
 0xbe1   : > { %26149 = vmatpush3.bf16.msra.mxu1 %v28607_v23  ;;  %v17055_v23 = vpack.c.bf16 %v32972_v36, %v32772_v44  ;;  %v28617_v44 = vld [vmem:[%s33500_s3 + $0x508] sm:$0xff]  }
 0xbe2   : > { %26182 = vmatprep.subr.bf16.mxu1 %v28608_v38 }
 0xbe4   : > { %26119 = vmatmul.mubr.bf16.gmra.mrb[16].mxu1 %v34009_v32  ;;  %v28618_v32 = vld [vmem:[%s33500_s3 + $0x510] sm:$0xff]  }
 0xbe5   : > { %26122 = vmatprep.mubr.bf16.mxu1 %v34012_v49  ;;  %v28619_v49 = vld [vmem:[%s33500_s3 + $0x518] sm:$0xff]  }
 0xbec   : > { %26123 = vmatmul.mubr.bf16.gmra.mrb[20].mxu1 %v16687_v4  ;;  %v28852_v4 = vld [vmem:[#allocation2 + $0x201] sm:$0xff] }
 0xbed   : > { %26126 = vmatprep.mubr.bf16.mxu1 %v32939_v42  ;;  %v17422_v20 = vpack.c.bf16 %v28853_v25, %v28852_v4  ;;  %v33076_v4 = vld [vmem:[#allocation2 + $0x252] sm:$0xff]  ;;  %v28868_v25 = vld [vmem:[#allocation2 + $0x242] sm:$0xff] }
 0xbf4   : > { %26127 = vmatmul.mubr.bf16.gmra.mrb[24].mxu1 %v32942_v10 }
 0xbf5   : > { %26130 = vmatprep.mubr.bf16.mxu1 %v32944_v61 }
 0xbfc   : > { %26131 = vmatmul.mubr.bf16.gmra.mrb[28].mxu1 %v16691_v0  ;;  %v17401_v0 = vld [vmem:[#allocation2 + $0x281] sm:$0xff] }
 0xbfd   : > { %26150 = vmatprep.mubr.bf16.mxu1 %v17047_v45  ;;  %v33019_v45 = vld [vmem:[#allocation2 + $0x251] sm:$0xff] }
 0xbfe   : > { %v17424_v11 = vpack.c.bf16 %v33019_v45, %v28856_v16  ;;  %v33092_v16 = vld [vmem:[#allocation2 + $0x342] sm:$0xff] }
 0xc04   : > { %26151 = vmatmul.mubr.bf16.vlgmr.msra.gmra.mrb[0].mxu1 %v17048_v52  ;;  %v28623_v52 = vld [vmem:[%s33500_s3 + $0x538] sm:$0xff]  }
 0xc05   : > { %26154 = vmatprep.mubr.bf16.mxu1 %v17049_v13  ;;  %26183 = vmatpush3.bf16.msra.mxu1 %v28608_v38  ;;  %v28847_v38 = vld [vmem:[#allocation2 + $0x151] sm:$0xff] }
 0xc06   : > { %26184 = vmatprep.subr.bf16.mxu1 %v28609_v46  ;;  %v17417_v18 = vpack.c.bf16 %v28847_v38, %v17385_v40  ;;  %v33031_v13 = vld [vmem:[#allocation2 + $0x331] sm:$0xff]  ;;  %v28862_v40 = vld [vmem:[#allocation2 + $0x1a2] sm:$0xff] }
 0xc09   : > { %26185 = vmatpush3.bf16.msra.mxu1 %v28609_v46  ;;  %v17425_v46 = vpack.c.bf16 %v33017_v7, %v17401_v0 }
 0xc0a   : > { %26186 = vmatprep.subr.bf16.mxu1 %v28610_v19 }
 0xc0c   : > { %26155 = vmatmul.mubr.bf16.gmra.mrb[4].mxu1 %v17050_v15  ;;  %v33037_v15 = vld [vmem:[#allocation2 + $0x351] sm:$0xff] }
 0xc0d   : > { %26158 = vmatprep.mubr.bf16.mxu1 %v17051_v33  ;;  %26187 = vmatpush3.bf16.msra.mxu1 %v28610_v19  ;;  %v17429_v19 = vpack.c.bf16 %v33031_v13, %v17409_v43  ;;  %v33047_v33 = vld [vmem:[#allocation2 + $0x381] sm:$0xff] }
 0xc0e   : > { %26188 = vmatprep.subr.bf16.mxu1 %v28611_v37 }
 0xc11   : > { %26189 = vmatpush3.bf16.msra.mxu1 %v28611_v37  ;;  %v33039_v37 = vld [vmem:[#allocation2 + $0x361] sm:$0xff] }
 0xc12   : > { %26190 = vmatprep.subr.bf16.mxu1 %v28612_v28 }
 0xc14   : > { %26159 = vmatmul.mubr.bf16.gmra.mrb[8].mxu1 %v17052_v63  ;;  %v17787_v63 = vpack.c.bf16 %v28857_v31, %v17755_v47  ;;  %v34016_v47 = vld [vmem:[#allocation94_spill] sm:$0xff]  ;;  %v34017_v31 = vld [vmem:[#allocation93_spill] sm:$0xff] }
 0xc15   : > { %26162 = vmatprep.mubr.bf16.mxu1 %v17053_v34  ;;  %26191 = vmatpush3.bf16.msra.mxu1 %v28612_v28  ;;  %v28625_v34 = vld [vmem:[%s33500_s3 + $0x548] sm:$0xff]  }
 0xc16   : > { %26192 = vmatprep.subr.bf16.mxu1 %v28613_v62 }
 0xc19   : > { %26193 = vmatpush3.bf16.msra.mxu1 %v28613_v62  ;;  %v28858_v62 = vld [vmem:[#allocation2 + $0x162] sm:$0xff] }
 0xc1a   : > { %26194 = vmatprep.subr.bf16.mxu1 %v28614_v29  ;;  %v17788_v56 = vpack.c.bf16 %v28859_v35, %v28858_v62  ;;  %v34019_v62 = vld [vmem:[#allocation96_spill] sm:$0xff]  ;;  %v34020_v35 = vld [vmem:[#allocation95_spill] sm:$0xff] }
 0xc1c   : > { %26163 = vmatmul.mubr.bf16.gmra.mrb[12].mxu1 %v17054_v27 }
 0xc1d   : > { %26166 = vmatprep.mubr.bf16.mxu1 %v17055_v23  ;;  %26195 = vmatpush3.bf16.msra.mxu1 %v28614_v29  ;;  %v28860_v29 = vld [vmem:[#allocation2 + $0x182] sm:$0xff] }
 0xc1e   : > { %26196 = vmatprep.subr.bf16.mxu1 %v28615_v50  ;;  %v17789_v27 = vpack.c.bf16 %v28861_v9, %v28860_v29  ;;  %v17763_v23 = vld [vmem:[#allocation2 + $0x1e2] sm:$0xff] }
 0xc1f   : > { %v33125_v29 = vld [vmem:[#allocation2 + $0x1c0] sm:$0xff] }
 0xc20   : > { %v18161_v9 = vpack.c.bf16 %v33125_v29, %v32956_v8  ;;  %v28637_v8 = vld [vmem:[%s33500_s3 + $0x5a8] sm:$0xff]  }
 0xc21   : > { %26197 = vmatpush3.bf16.msra.mxu1 %v28615_v50  ;;  %v28626_v50 = vld [vmem:[%s33500_s3 + $0x550] sm:$0xff]  }
 0xc22   : > { %26230 = vmatprep.subr.bf16.mxu1 %v28616_v6 }
 0xc24   : > { %26167 = vmatmul.mubr.bf16.gmra.mrb[16].mxu1 %v32816_v17  ;;  %v28848_v17 = vld [vmem:[#allocation2 + $0x161] sm:$0xff] }
 0xc25   : > { %26170 = vmatprep.mubr.bf16.mxu1 %v32819_v48  ;;  %v17418_v48 = vpack.c.bf16 %v32834_v14, %v28848_v17  ;;  %v17420_v14 = vpack.c.bf16 %v32848_v12, %v28850_v39  ;;  %v28621_v12 = vld [vmem:[%s33500_s3 + $0x528] sm:$0xff]   ;;  %v28863_v17 = vld [vmem:[#allocation2 + $0x1f2] sm:$0xff] }
 0xc26   : > { %v28866_v39 = vld [vmem:[#allocation2 + $0x222] sm:$0xff] }
 0xc2c   : > { %26171 = vmatmul.mubr.bf16.gmra.mrb[20].mxu1 %v32821_v54  ;;  %v28849_v54 = vld [vmem:[#allocation2 + $0x191] sm:$0xff] }
 0xc2d   : > { %26174 = vmatprep.mubr.bf16.mxu1 %v32989_v3  ;;  %v17419_v41 = vpack.c.bf16 %v28849_v54, %v32844_v53  ;;  %v17421_v53 = vpack.c.bf16 %v28851_v21, %v17393_v24  ;;  %v28864_v54 = vld [vmem:[#allocation2 + $0x202] sm:$0xff]  ;;  %v28630_v21 = vld [vmem:[%s33500_s3 + $0x570] sm:$0xff]  }
 0xc2e   : > { %v28629_v24 = vld [vmem:[%s33500_s3 + $0x568] sm:$0xff]  }
 0xc34   : > { %26175 = vmatmul.mubr.bf16.gmra.mrb[24].mxu1 %v32989_v3 }
 0xc35   : > { %26178 = vmatprep.mubr.bf16.mxu1 %v32989_v3 }
 0xc3c   : > { %26179 = vmatmul.mubr.bf16.gmra.mrb[28].mxu1 %v32989_v3 }
 0xc3d   : > { %26198 = vmatprep.mubr.bf16.mxu1 %v17417_v18  ;;  %v28627_v18 = vld [vmem:[%s33500_s3 + $0x558] sm:$0xff]  }
 0xc44   : > { %26199 = vmatmul.mubr.bf16.vlgmr.msra.gmra.mrb[0].mxu1 %v17418_v48  ;;  %v17791_v48 = vpack.c.bf16 %v28863_v17, %v17763_v23  ;;  %v34023_v23 = vld [vmem:[#allocation97_spill] sm:$0xff]  ;;  %v34026_v17 = vld [vmem:[#allocation99_spill] sm:$0xff] }
 0xc45   : > { %26202 = vmatprep.mubr.bf16.mxu1 %v17419_v41  ;;  %26231 = vmatpush3.bf16.msra.mxu1 %v28616_v6  ;;  %v33059_v6 = vld [vmem:[#allocation2 + $0x1b2] sm:$0xff] }
 0xc46   : > { %26232 = vmatprep.subr.bf16.mxu1 %v28617_v44  ;;  %v17790_v38 = vpack.c.bf16 %v33059_v6, %v28862_v40  ;;  %v28865_v41 = vld [vmem:[#allocation2 + $0x212] sm:$0xff] }
 0xc49   : > { %26233 = vmatpush3.bf16.msra.mxu1 %v28617_v44  ;;  %v28628_v44 = vld [vmem:[%s33500_s3 + $0x560] sm:$0xff]  }
 0xc4a   : > { %26234 = vmatprep.subr.bf16.mxu1 %v28618_v32 }
 0xc4c   : > { %26203 = vmatmul.mubr.bf16.gmra.mrb[4].mxu1 %v17420_v14  ;;  %v28867_v14 = vld [vmem:[#allocation2 + $0x232] sm:$0xff] }
 0xc4d   : > { %26206 = vmatprep.mubr.bf16.mxu1 %v17421_v53  ;;  %26235 = vmatpush3.bf16.msra.mxu1 %v28618_v32  ;;  %v17792_v32 = vpack.c.bf16 %v28865_v41, %v28864_v54  ;;  %v17771_v53 = vld [vmem:[#allocation2 + $0x282] sm:$0xff] }
 0xc4e   : > { %26236 = vmatprep.subr.bf16.mxu1 %v28619_v49  ;;  %v34029_v54 = vld [vmem:[#allocation101_spill] sm:$0xff] }
 0xc51   : > { %26237 = vmatpush3.bf16.msra.mxu1 %v28619_v49  ;;  %v17793_v49 = vpack.c.bf16 %v28867_v14, %v28866_v39  ;;  %v28639_v14 = vld [vmem:[%s33500_s3 + $0x5b8] sm:$0xff]  }
 0xc52   : > { %26238 = vmatprep.subr.bf16.mxu1 %v28620_v57 }
 0xc54   : > { %26207 = vmatmul.mubr.bf16.gmra.mrb[8].mxu1 %v17422_v20  ;;  %v17794_v20 = vpack.c.bf16 %v33076_v4, %v28868_v25  ;;  %v28870_v25 = vld [vmem:[#allocation2 + $0x2b0] sm:$0xff] }
 0xc55   : > { %26210 = vmatprep.mubr.bf16.mxu1 %v17423_v1  ;;  %26239 = vmatpush3.bf16.msra.mxu1 %v28620_v57  ;;  %v33074_v57 = vld [vmem:[#allocation2 + $0x292] sm:$0xff]  ;;  %v17779_v1 = vld [vmem:[#allocation2 + $0x322] sm:$0xff] }
 0xc56   : > { %26240 = vmatprep.subr.bf16.mxu1 %v28621_v12  ;;  %v17795_v60 = vpack.c.bf16 %v33074_v57, %v17771_v53  ;;  %v28640_v53 = vld [vmem:[%s33500_s3 + $0x5c0] sm:$0xff]  }
 0xc59   : > { %26241 = vmatpush3.bf16.msra.mxu1 %v28621_v12  ;;  %v28631_v12 = vld [vmem:[%s33500_s3 + $0x578] sm:$0xff]  }
 0xc5a   : > { %26242 = vmatprep.subr.bf16.mxu1 %v28622_v51 }
 0xc5c   : > { %26211 = vmatmul.mubr.bf16.gmra.mrb[12].mxu1 %v17424_v11  ;;  %v33094_v11 = vld [vmem:[#allocation2 + $0x352] sm:$0xff] }
 0xc5d   : > { %26214 = vmatprep.mubr.bf16.mxu1 %v17425_v46  ;;  %26243 = vmatpush3.bf16.msra.mxu1 %v28622_v51  ;;  %v33088_v51 = vld [vmem:[#allocation2 + $0x332] sm:$0xff] }
 0xc5e   : > { %26244 = vmatprep.subr.bf16.mxu1 %v28623_v52  ;;  %v17799_v0 = vpack.c.bf16 %v33088_v51, %v17779_v1  ;;  %v33098_v46 = vld [vmem:[#allocation2 + $0x372] sm:$0xff]  ;;  %v33161_v1 = vld [vmem:[#allocation2 + $0x300] sm:$0xff] }
 0xc61   : > { %26245 = vmatpush3.bf16.msra.mxu1 %v28623_v52  ;;  %v33096_v52 = vld [vmem:[#allocation2 + $0x362] sm:$0xff] }
 0xc62   : > { %26278 = vmatprep.subr.bf16.mxu1 %v28624_v30 }
 0xc64   : > { %26215 = vmatmul.mubr.bf16.gmra.mrb[16].mxu1 %v32875_v2  ;;  %v17430_v2 = vpack.c.bf16 %v33037_v15, %v33035_v26 }
 0xc65   : > { %26218 = vmatprep.mubr.bf16.mxu1 %v32878_v59  ;;  %v17431_v59 = vpack.c.bf16 %v33041_v5, %v33039_v37 }
 0xc6c   : > { %26219 = vmatmul.mubr.bf16.gmra.mrb[20].mxu1 %v32880_v58  ;;  %v33049_v58 = vld [vmem:[#allocation2 + $0x391] sm:$0xff] }
 0xc6d   : > { %26222 = vmatprep.mubr.bf16.mxu1 %v17429_v19  ;;  %v17432_v28 = vpack.c.bf16 %v33049_v58, %v33047_v33  ;;  %v34013_v19 = vld [vmem:[#allocation92_spill] sm:$0xff] }
 0xc74   : > { %26223 = vmatmul.mubr.bf16.gmra.mrb[24].mxu1 %v17430_v2  ;;  %v34014_v2 = vld [vmem:[#allocation91_spill] sm:$0xff] }
 0xc75   : > { %26226 = vmatprep.mubr.bf16.mxu1 %v17431_v59  ;;  %v34015_v59 = vpack.c.bf16 %v34013_v19, %v34014_v2  ;;  %v33171_v19 = vld [vmem:[#allocation2 + $0x181] sm:$0xff]  ;;  %v33173_v2 = vld [vmem:[#allocation2 + $0x171] sm:$0xff] }
 0xc7c   : > { %26227 = vmatmul.mubr.bf16.gmra.mrb[28].mxu1 %v17432_v28  ;;  %v28633_v28 = vld [vmem:[%s33500_s3 + $0x588] sm:$0xff]  }
 0xc7d   : > { %26246 = vmatprep.mubr.bf16.mxu1 %v17787_v63  ;;  %v34018_v63 = vpack.c.bf16 %v34016_v47, %v34017_v31  ;;  %v34034_v47 = vld [vmem:[#allocation106_spill] sm:$0xff]  ;;  %v34035_v31 = vld [vmem:[#allocation105_spill] sm:$0xff] }
 0xc84   : > { %26247 = vmatmul.mubr.bf16.vlgmr.msra.gmra.mrb[0].mxu1 %v17788_v56  ;;  %v34021_v56 = vpack.c.bf16 %v34019_v62, %v34020_v35  ;;  %v33186_v62 = vld [vmem:[#allocation2 + $0x1c1] sm:$0xff]  ;;  %v33188_v35 = vld [vmem:[#allocation2 + $0x1b1] sm:$0xff] }
 0xc85   : > { %26250 = vmatprep.mubr.bf16.mxu1 %v17789_v27  ;;  %26279 = vmatpush3.bf16.msra.mxu1 %v28624_v30  ;;  %v33104_v30 = vld [vmem:[#allocation2 + $0x382] sm:$0xff]  ;;  %v28635_v27 = vld [vmem:[%s33500_s3 + $0x598] sm:$0xff]  }
 0xc86   : > { %26280 = vmatprep.subr.bf16.mxu1 %v28625_v34 }
 0xc89   : > { %26281 = vmatpush3.bf16.msra.mxu1 %v28625_v34  ;;  %v28634_v34 = vld [vmem:[%s33500_s3 + $0x590] sm:$0xff]  }
 0xc8a   : > { %26282 = vmatprep.subr.bf16.mxu1 %v28626_v50 }
 0xc8c   : > { %26251 = vmatmul.mubr.bf16.gmra.mrb[4].mxu1 %v17790_v38  ;;  %v28636_v38 = vld [vmem:[%s33500_s3 + $0x5a0] sm:$0xff]  }
 0xc8d   : > { %26254 = vmatprep.mubr.bf16.mxu1 %v17791_v48  ;;  %26283 = vmatpush3.bf16.msra.mxu1 %v28626_v50  ;;  %v34022_v50 = vld [vmem:[#allocation98_spill] sm:$0xff] }
 0xc8e   : > { %26284 = vmatprep.subr.bf16.mxu1 %v28627_v18  ;;  %v34024_v40 = vpack.c.bf16 %v34022_v50, %v34023_v23  ;;  %v28644_v23 = vld [vmem:[%s33500_s3 + $0x5e0] sm:$0xff]  }
 0xc91   : > { %26285 = vmatpush3.bf16.msra.mxu1 %v28627_v18  ;;  %v34025_v18 = vld [vmem:[#allocation100_spill] sm:$0xff] }
 0xc92   : > { %26286 = vmatprep.subr.bf16.mxu1 %v28628_v44  ;;  %v34027_v48 = vpack.c.bf16 %v34025_v18, %v34026_v17  ;;  %v34043_v17 = vld [vmem:[#allocation112_spill] sm:$0xff] }
 0xc94   : > { %26255 = vmatmul.mubr.bf16.gmra.mrb[8].mxu1 %v17792_v32  ;;  %v28638_v32 = vld [vmem:[%s33500_s3 + $0x5b0] sm:$0xff]  }
 0xc95   : > { %26258 = vmatprep.mubr.bf16.mxu1 %v17793_v49  ;;  %26287 = vmatpush3.bf16.msra.mxu1 %v28628_v44  ;;  %v34028_v44 = vld [vmem:[#allocation102_spill] sm:$0xff]  ;;  %v28869_v49 = vld [vmem:[#allocation2 + $0x2a0] sm:$0xff] }
 0xc96   : > { %26288 = vmatprep.subr.bf16.mxu1 %v28629_v24  ;;  %v34030_v41 = vpack.c.bf16 %v34028_v44, %v34029_v54  ;;  %v28646_v54 = vld [vmem:[%s33500_s3 + $0x5f0] sm:$0xff]  }
 0xc99   : > { %26289 = vmatpush3.bf16.msra.mxu1 %v28629_v24  ;;  %v33150_v24 = vld [vmem:[#allocation2 + $0x260] sm:$0xff] }
 0xc9a   : > { %26290 = vmatprep.subr.bf16.mxu1 %v28630_v21  ;;  %v18165_v39 = vpack.c.bf16 %v33150_v24, %v32974_v22 }
 0xc9c   : > { %26259 = vmatmul.mubr.bf16.gmra.mrb[12].mxu1 %v17794_v20  ;;  %v28871_v20 = vld [vmem:[#allocation2 + $0x2c0] sm:$0xff] }
 0xc9d   : > { %26262 = vmatprep.mubr.bf16.mxu1 %v17795_v60  ;;  %26291 = vmatpush3.bf16.msra.mxu1 %v28630_v21  ;;  %v18166_v21 = vpack.c.bf16 %v28869_v49, %v32972_v36  ;;  %v18167_v22 = vpack.c.bf16 %v28871_v20, %v28870_v25  ;;  %v28873_v60 = vld [vmem:[#allocation2 + $0x2e0] sm:$0xff]  ;;  %v28874_v36 = vld [vmem:[#allocation2 + $0x2f0] sm:$0xff] }
 0xc9e   : > { %26292 = vmatprep.subr.bf16.mxu1 %v28631_v12  ;;  %v28877_v25 = vld [vmem:[#allocation2 + $0x2c1] sm:$0xff]  ;;  %v28878_v20 = vld [vmem:[#allocation2 + $0x2d1] sm:$0xff] }
 0xca1   : > { %26293 = vmatpush3.bf16.msra.mxu1 %v28631_v12  ;;  %v28872_v12 = vld [vmem:[#allocation2 + $0x2d0] sm:$0xff] }
 0xca2   : > { %26326 = vmatprep.subr.bf16.mxu1 %v28632_v55 }
 0xca4   : > { %26263 = vmatmul.mubr.bf16.gmra.mrb[16].mxu1 %v32939_v42  ;;  %v17800_v42 = vpack.c.bf16 %v33094_v11, %v33092_v16 }
 0xca5   : > { %26266 = vmatprep.mubr.bf16.mxu1 %v32942_v10  ;;  %v17801_v10 = vpack.c.bf16 %v33098_v46, %v33096_v52 }
 0xcac   : > { %26267 = vmatmul.mubr.bf16.gmra.mrb[20].mxu1 %v32944_v61  ;;  %v33106_v61 = vld [vmem:[#allocation2 + $0x392] sm:$0xff] }
 0xcad   : > { %26270 = vmatprep.mubr.bf16.mxu1 %v17799_v0  ;;  %v17802_v43 = vpack.c.bf16 %v33106_v61, %v33104_v30  ;;  %v18169_v0 = vpack.c.bf16 %v33161_v1, %v28874_v36 }
 0xcb4   : > { %26271 = vmatmul.mubr.bf16.gmra.mrb[24].mxu1 %v17800_v42  ;;  %v34031_v42 = vld [vmem:[#allocation104_spill] sm:$0xff] }
 0xcb5   : > { %26274 = vmatprep.mubr.bf16.mxu1 %v17801_v10  ;;  %v34032_v10 = vld [vmem:[#allocation103_spill] sm:$0xff] }
 0xcbc   : > { %26275 = vmatmul.mubr.bf16.gmra.mrb[28].mxu1 %v17802_v43  ;;  %v34033_v43 = vpack.c.bf16 %v34031_v42, %v34032_v10  ;;  %v18542_v42 = vpack.c.bf16 %v33047_v33, %v33041_v5  ;;  %v33233_v10 = vld [vmem:[#allocation2 + $0x3a1] sm:$0xff]  ;;  %v34052_v5 = vld [vmem:[#allocation118_spill] sm:$0xff] }
 0xcbd   : > { %26294 = vmatprep.mubr.bf16.mxu1 %v34015_v59  ;;  %v18529_v59 = vpack.c.bf16 %v33171_v19, %v33173_v2  ;;  %v34053_v33 = vld [vmem:[#allocation117_spill] sm:$0xff] }
 0xcc4   : > { %26295 = vmatmul.mubr.bf16.vlgmr.msra.gmra.mrb[0].mxu1 %v34018_v63  ;;  %v34036_v63 = vpack.c.bf16 %v34034_v47, %v34035_v31  ;;  %v34054_v31 = vpack.c.bf16 %v34052_v5, %v34053_v33  ;;  %v28659_v5 = vld [vmem:[%s33500_s3 + $0x658] sm:$0xff]  }
 0xcc5   : > { %26298 = vmatprep.mubr.bf16.mxu1 %v34021_v56  ;;  %26327 = vmatpush3.bf16.msra.mxu1 %v28632_v55  ;;  %v18168_v55 = vpack.c.bf16 %v28873_v60, %v28872_v12  ;;  %v18531_v56 = vpack.c.bf16 %v33186_v62, %v33188_v35  ;;  %v33224_v60 = vld [vmem:[#allocation2 + $0x301] sm:$0xff] }
 0xcc6   : > { %26328 = vmatprep.subr.bf16.mxu1 %v28633_v28 }
 0xcc9   : > { %26329 = vmatpush3.bf16.msra.mxu1 %v28633_v28  ;;  %v28641_v28 = vld [vmem:[%s33500_s3 + $0x5c8] sm:$0xff]  }
 0xcca   : > { %26330 = vmatprep.subr.bf16.mxu1 %v28634_v34 }
 0xccc   : > { %26299 = vmatmul.mubr.bf16.gmra.mrb[4].mxu1 %v18161_v9  ;;  %v34037_v9 = vld [vmem:[#allocation108_spill] sm:$0xff] }
 0xccd   : > { %26302 = vmatprep.mubr.bf16.mxu1 %v34024_v40  ;;  %26331 = vmatpush3.bf16.msra.mxu1 %v28634_v34  ;;  %v28643_v34 = vld [vmem:[%s33500_s3 + $0x5d8] sm:$0xff]   ;;  %v28645_v40 = vld [vmem:[%s33500_s3 + $0x5e8] sm:$0xff]  }
 0xcce   : > { %26332 = vmatprep.subr.bf16.mxu1 %v28635_v27 }
 0xcd1   : > { %26333 = vmatpush3.bf16.msra.mxu1 %v28635_v27  ;;  %v34038_v27 = vld [vmem:[#allocation107_spill] sm:$0xff] }
 0xcd2   : > { %26334 = vmatprep.subr.bf16.mxu1 %v28636_v38  ;;  %v34039_v50 = vpack.c.bf16 %v34037_v9, %v34038_v27  ;;  %v34056_v9 = vld [vmem:[#allocation119_spill] sm:$0xff] }
 0xcd4   : > { %26303 = vmatmul.mubr.bf16.gmra.mrb[8].mxu1 %v34027_v48  ;;  %v34044_v48 = vld [vmem:[#allocation111_spill] sm:$0xff] }
 0xcd5   : > { %26306 = vmatprep.mubr.bf16.mxu1 %v34030_v41  ;;  %26335 = vmatpush3.bf16.msra.mxu1 %v28636_v38  ;;  %v34040_v38 = vld [vmem:[#allocation110_spill] sm:$0xff]  ;;  %v34045_v44 = vpack.c.bf16 %v34043_v17, %v34044_v48  ;;  %v33213_v41 = vld [vmem:[#allocation2 + $0x261] sm:$0xff] }
 0xcd6   : > { %26336 = vmatprep.subr.bf16.mxu1 %v28637_v8  ;;  %v28654_v48 = vld [vmem:[%s33500_s3 + $0x630] sm:$0xff]  }
 0xcd9   : > { %26337 = vmatpush3.bf16.msra.mxu1 %v28637_v8  ;;  %v34041_v8 = vld [vmem:[#allocation109_spill] sm:$0xff] }
 0xcda   : > { %26338 = vmatprep.subr.bf16.mxu1 %v28638_v32  ;;  %v34042_v18 = vpack.c.bf16 %v34040_v38, %v34041_v8  ;;  %v34061_v8 = vld [vmem:[#allocation124_spill] sm:$0xff] }
 0xcdc   : > { %26307 = vmatmul.mubr.bf16.gmra.mrb[12].mxu1 %v18165_v39  ;;  %v28647_v39 = vld [vmem:[%s33500_s3 + $0x5f8] sm:$0xff]  }
 0xcdd   : > { %26310 = vmatprep.mubr.bf16.mxu1 %v18166_v21  ;;  %26339 = vmatpush3.bf16.msra.mxu1 %v28638_v32  ;;  %v18535_v32 = vpack.c.bf16 %v33213_v41, %v33019_v45  ;;  %v28648_v21 = vld [vmem:[%s33500_s3 + $0x600] sm:$0xff]  }
 0xcde   : > { %26340 = vmatprep.subr.bf16.mxu1 %v28639_v14 }
 0xce1   : > { %26341 = vmatpush3.bf16.msra.mxu1 %v28639_v14  ;;  %v28875_v14 = vld [vmem:[#allocation2 + $0x2a1] sm:$0xff] }
 0xce2   : > { %26374 = vmatprep.subr.bf16.mxu1 %v28640_v53  ;;  %v18536_v49 = vpack.c.bf16 %v28875_v14, %v33017_v7  ;;  %v18540_v7 = vpack.c.bf16 %v33035_v26, %v33031_v13  ;;  %v34046_v13 = vld [vmem:[#allocation114_spill] sm:$0xff]  ;;  %v34047_v26 = vld [vmem:[#allocation113_spill] sm:$0xff] }
 0xce4   : > { %26311 = vmatmul.mubr.bf16.gmra.mrb[16].mxu1 %v18167_v22  ;;  %v28879_v22 = vld [vmem:[#allocation2 + $0x2e1] sm:$0xff] }
 0xce5   : > { %26314 = vmatprep.mubr.bf16.mxu1 %v18168_v55  ;;  %v18538_v12 = vpack.c.bf16 %v28879_v22, %v28878_v20  ;;  %v28880_v55 = vld [vmem:[#allocation2 + $0x2f1] sm:$0xff]  ;;  %v33288_v22 = vld [vmem:[#allocation2 + $0x302] sm:$0xff] }
 0xce6   : > { %v18539_v36 = vpack.c.bf16 %v33224_v60, %v28880_v55  ;;  %v18911_v55 = vpack.c.bf16 %v33096_v52, %v33094_v11  ;;  %v19242_v11 = vld [vmem:[#allocation2 + $0x1b0] sm:$0xff]  ;;  %v28657_v52 = vld [vmem:[%s33500_s3 + $0x648] sm:$0xff]  }
 0xcec   : > { %26315 = vmatmul.mubr.bf16.gmra.mrb[20].mxu1 %v18169_v0  ;;  %v18541_v0 = vpack.c.bf16 %v33039_v37, %v33037_v15  ;;  %v34049_v15 = vld [vmem:[#allocation116_spill] sm:$0xff]  ;;  %v34050_v37 = vld [vmem:[#allocation115_spill] sm:$0xff] }
 0xced   : > { %26318 = vmatprep.mubr.bf16.mxu1 %v32989_v3  ;;  %v34051_v47 = vpack.c.bf16 %v34049_v15, %v34050_v37  ;;  %v28887_v15 = vld [vmem:[#allocation2] sm:$0xff] }
 0xcee   : > { %v19272_v37 = vpack.c.bf16 %v28887_v15, %v33125_v29 }
 0xcf4   : > { %26319 = vmatmul.mubr.bf16.gmra.mrb[24].mxu1 %v32989_v3 }
 0xcf5   : > { %26322 = vmatprep.mubr.bf16.mxu1 %v32989_v3 }
 0xcfc   : > { %26323 = vmatmul.mubr.bf16.gmra.mrb[28].mxu1 %v32989_v3  ;;  %v28642_v3 = vld [vmem:[%s33500_s3 + $0x5d0] sm:$0xff]  }
 0xcfd   : > { %26342 = vmatprep.mubr.bf16.mxu1 %v34033_v43  ;;  %v18543_v43 = vpack.c.bf16 %v33233_v10, %v33049_v58  ;;  %v28650_v58 = vld [vmem:[%s33500_s3 + $0x610] sm:$0xff]  }
 0xd04   : > { %26343 = vmatmul.mubr.bf16.vlgmr.msra.gmra.mrb[0].mxu1 %v18529_v59  ;;  %v34048_v59 = vpack.c.bf16 %v34046_v13, %v34047_v26  ;;  %v19240_v13 = vld [vmem:[#allocation2 + $0x190] sm:$0xff]  ;;  %v19241_v26 = vld [vmem:[#allocation2 + $0x1a0] sm:$0xff] }
 0xd05   : > { %26346 = vmatprep.mubr.bf16.mxu1 %v34036_v63  ;;  %26375 = vmatpush3.bf16.msra.mxu1 %v28640_v53  ;;  %v28876_v53 = vld [vmem:[#allocation2 + $0x2b1] sm:$0xff]  ;;  %v33252_v63 = vld [vmem:[#allocation2 + $0x1c2] sm:$0xff] }
 0xd06   : > { %26376 = vmatprep.subr.bf16.mxu1 %v28641_v28  ;;  %v18537_v45 = vpack.c.bf16 %v28877_v25, %v28876_v53  ;;  %v28883_v53 = vld [vmem:[#allocation2 + $0x2c2] sm:$0xff]  ;;  %v28884_v25 = vld [vmem:[#allocation2 + $0x2d2] sm:$0xff] }
 0xd09   : > { %26377 = vmatpush3.bf16.msra.mxu1 %v28641_v28  ;;  %v28649_v28 = vld [vmem:[%s33500_s3 + $0x608] sm:$0xff]  }
 0xd0a   : > { %26378 = vmatprep.subr.bf16.mxu1 %v28642_v3 }
 0xd0c   : > { %26347 = vmatmul.mubr.bf16.gmra.mrb[4].mxu1 %v18531_v56  ;;  %v28651_v56 = vld [vmem:[%s33500_s3 + $0x618] sm:$0xff]  }
 0xd0d   : > { %26350 = vmatprep.mubr.bf16.mxu1 %v34039_v50  ;;  %26379 = vmatpush3.bf16.msra.mxu1 %v28642_v3  ;;  %v18901_v3 = vpack.c.bf16 %v33252_v63, %v33059_v6  ;;  %v28652_v50 = vld [vmem:[%s33500_s3 + $0x620] sm:$0xff]   ;;  %v28653_v6 = vld [vmem:[%s33500_s3 + $0x628] sm:$0xff]  }
 0xd0e   : > { %26380 = vmatprep.subr.bf16.mxu1 %v28643_v34 }
 0xd11   : > { %26381 = vmatpush3.bf16.msra.mxu1 %v28643_v34  ;;  %v34055_v34 = vld [vmem:[#allocation120_spill] sm:$0xff] }
 0xd12   : > { %26382 = vmatprep.subr.bf16.mxu1 %v28644_v23  ;;  %v34057_v27 = vpack.c.bf16 %v34055_v34, %v34056_v9  ;;  %v19250_v34 = vld [vmem:[#allocation2 + $0x250] sm:$0xff]  ;;  %v28661_v9 = vld [vmem:[%s33500_s3 + $0x668] sm:$0xff]  }
 0xd14   : > { %26351 = vmatmul.mubr.bf16.gmra.mrb[8].mxu1 %v34042_v18  ;;  %v34062_v18 = vld [vmem:[#allocation123_spill] sm:$0xff] }
 0xd15   : > { %26354 = vmatprep.mubr.bf16.mxu1 %v34045_v44  ;;  %26383 = vmatpush3.bf16.msra.mxu1 %v28644_v23  ;;  %v34058_v23 = vld [vmem:[#allocation122_spill] sm:$0xff]  ;;  %v34063_v17 = vpack.c.bf16 %v34061_v8, %v34062_v18  ;;  %v33277_v44 = vld [vmem:[#allocation2 + $0x262] sm:$0xff] }
 0xd16   : > { %26384 = vmatprep.subr.bf16.mxu1 %v28645_v40  ;;  %v28664_v18 = vld [vmem:[%s33500_s3 + $0x680] sm:$0xff]  }
 0xd19   : > { %26385 = vmatpush3.bf16.msra.mxu1 %v28645_v40  ;;  %v34059_v40 = vld [vmem:[#allocation121_spill] sm:$0xff] }
 0xd1a   : > { %26386 = vmatprep.subr.bf16.mxu1 %v28646_v54  ;;  %v34060_v38 = vpack.c.bf16 %v34058_v23, %v34059_v40  ;;  %v28663_v23 = vld [vmem:[%s33500_s3 + $0x678] sm:$0xff]   ;;  %v34064_v40 = vld [vmem:[#allocation126_spill] sm:$0xff] }
 0xd1c   : > { %26355 = vmatmul.mubr.bf16.gmra.mrb[12].mxu1 %v18535_v32  ;;  %v28655_v32 = vld [vmem:[%s33500_s3 + $0x638] sm:$0xff]  }
 0xd1d   : > { %26358 = vmatprep.mubr.bf16.mxu1 %v18536_v49  ;;  %26387 = vmatpush3.bf16.msra.mxu1 %v28646_v54  ;;  %v18905_v54 = vpack.c.bf16 %v33277_v44, %v33076_v4  ;;  %v28656_v49 = vld [vmem:[%s33500_s3 + $0x640] sm:$0xff]  }
 0xd1e   : > { %26388 = vmatprep.subr.bf16.mxu1 %v28647_v39 }
 0xd21   : > { %26389 = vmatpush3.bf16.msra.mxu1 %v28647_v39  ;;  %v28881_v39 = vld [vmem:[#allocation2 + $0x2a2] sm:$0xff] }
 0xd22   : > { %26422 = vmatprep.subr.bf16.mxu1 %v28648_v21  ;;  %v18906_v14 = vpack.c.bf16 %v28881_v39, %v33074_v57  ;;  %v18910_v57 = vpack.c.bf16 %v33092_v16, %v33088_v51  ;;  %v19238_v51 = vld [vmem:[#allocation2 + $0x170] sm:$0xff] }
 0xd24   : > { %26359 = vmatmul.mubr.bf16.gmra.mrb[16].mxu1 %v18537_v45  ;;  %v28885_v45 = vld [vmem:[#allocation2 + $0x2e2] sm:$0xff] }
 0xd25   : > { %26362 = vmatprep.mubr.bf16.mxu1 %v18538_v12  ;;  %v18908_v20 = vpack.c.bf16 %v28885_v45, %v28884_v25  ;;  %v28886_v12 = vld [vmem:[#allocation2 + $0x2f2] sm:$0xff]  ;;  %v19611_v25 = vld [vmem:[#allocation2 + $0x1a1] sm:$0xff] }
 0xd2c   : > { %26363 = vmatmul.mubr.bf16.gmra.mrb[20].mxu1 %v18539_v36  ;;  %v18912_v36 = vpack.c.bf16 %v33104_v30, %v33098_v46  ;;  %v19271_v46 = vpack.c.bf16 %v19242_v11, %v19241_v26  ;;  %v28658_v30 = vld [vmem:[%s33500_s3 + $0x650] sm:$0xff]  }
 0xd2d   : > { %26366 = vmatprep.mubr.bf16.mxu1 %v18540_v7  ;;  %v18909_v7 = vpack.c.bf16 %v33288_v22, %v28886_v12  ;;  %v19615_v12 = vld [vmem:[#allocation2 + $0x201] sm:$0xff] }
 0xd34   : > { %26367 = vmatmul.mubr.bf16.gmra.mrb[24].mxu1 %v18541_v0  ;;  %v33297_v0 = vld [vmem:[#allocation2 + $0x3a2] sm:$0xff] }
 0xd35   : > { %26370 = vmatprep.mubr.bf16.mxu1 %v18542_v42  ;;  %v18913_v42 = vpack.c.bf16 %v33297_v0, %v33106_v61  ;;  %v19245_v61 = vld [vmem:[#allocation2 + $0x200] sm:$0xff] }
 0xd3c   : > { %26371 = vmatmul.mubr.bf16.gmra.mrb[28].mxu1 %v18543_v43  ;;  %v19237_v43 = vld [vmem:[#allocation2 + $0x160] sm:$0xff] }
 0xd3d   : > { %26390 = vmatprep.mubr.bf16.mxu1 %v34048_v59  ;;  %v19269_v16 = vpack.c.bf16 %v19238_v51, %v19237_v43  ;;  %v19239_v59 = vld [vmem:[#allocation2 + $0x180] sm:$0xff] }
 0xd3e   : > { %v19619_v43 = vld [vmem:[#allocation2 + $0x241] sm:$0xff] }
 0xd3f   : > { %v19617_v51 = vld [vmem:[#allocation2 + $0x221] sm:$0xff] }
 0xd44   : > { %26391 = vmatmul.mubr.bf16.vlgmr.msra.gmra.mrb[0].mxu1 %v34051_v47  ;;  %v19246_v47 = vld [vmem:[#allocation2 + $0x210] sm:$0xff] }
 0xd45   : > { %26394 = vmatprep.mubr.bf16.mxu1 %v34054_v31  ;;  %26423 = vmatpush3.bf16.msra.mxu1 %v28648_v21  ;;  %v28882_v21 = vld [vmem:[#allocation2 + $0x2b2] sm:$0xff]  ;;  %v19273_v33 = vpack.c.bf16 %v19246_v47, %v19245_v61  ;;  %v28660_v31 = vld [vmem:[%s33500_s3 + $0x660] sm:$0xff]  }
 0xd46   : > { %26424 = vmatprep.subr.bf16.mxu1 %v28649_v28  ;;  %v18907_v4 = vpack.c.bf16 %v28883_v53, %v28882_v21  ;;  %v19607_v21 = vld [vmem:[#allocation2 + $0x161] sm:$0xff] }
 0xd47   : > { %v19639_v53 = vpack.c.bf16 %v33173_v2, %v19607_v21  ;;  %v19614_v2 = vld [vmem:[#allocation2 + $0x1d1] sm:$0xff] }
 0xd49   : > { %26425 = vmatpush3.bf16.msra.mxu1 %v28649_v28  ;;  %v19270_v28 = vpack.c.bf16 %v19240_v13, %v19239_v59  ;;  %v28669_v13 = vld [vmem:[%s33500_s3 + $0x6a8] sm:$0xff]   ;;  %v28670_v59 = vld [vmem:[%s33500_s3 + $0x6b0] sm:$0xff]  }
 0xd4a   : > { %26426 = vmatprep.subr.bf16.mxu1 %v28650_v58 }
 0xd4c   : > { %26395 = vmatmul.mubr.bf16.gmra.mrb[4].mxu1 %v18901_v3  ;;  %v19249_v3 = vld [vmem:[#allocation2 + $0x240] sm:$0xff] }
 0xd4d   : > { %26398 = vmatprep.mubr.bf16.mxu1 %v34057_v27  ;;  %26427 = vmatpush3.bf16.msra.mxu1 %v28650_v58  ;;  %v19248_v58 = vld [vmem:[#allocation2 + $0x230] sm:$0xff]  ;;  %v19275_v27 = vpack.c.bf16 %v19250_v34, %v19249_v3  ;;  %v19633_v34 = vld [vmem:[#allocation2 + $0x361] sm:$0xff] }
 0xd4e   : > { %26428 = vmatprep.subr.bf16.mxu1 %v28651_v56  ;;  %v19630_v3 = vld [vmem:[#allocation2 + $0x311] sm:$0xff] }
 0xd51   : > { %26429 = vmatpush3.bf16.msra.mxu1 %v28651_v56  ;;  %v19247_v56 = vld [vmem:[#allocation2 + $0x220] sm:$0xff] }
 0xd52   : > { %26430 = vmatprep.subr.bf16.mxu1 %v28652_v50  ;;  %v19274_v29 = vpack.c.bf16 %v19248_v58, %v19247_v56  ;;  %v19632_v58 = vld [vmem:[#allocation2 + $0x351] sm:$0xff] }
 0xd54   : > { %26399 = vmatmul.mubr.bf16.gmra.mrb[8].mxu1 %v34060_v38  ;;  %v34065_v38 = vld [vmem:[#allocation125_spill] sm:$0xff] }
 0xd55   : > { %26402 = vmatprep.mubr.bf16.mxu1 %v34063_v17  ;;  %26431 = vmatpush3.bf16.msra.mxu1 %v28652_v50  ;;  %v28662_v50 = vld [vmem:[%s33500_s3 + $0x670] sm:$0xff]   ;;  %v34066_v8 = vpack.c.bf16 %v34064_v40, %v34065_v38  ;;  %v34067_v17 = vld [vmem:[#allocation128_spill] sm:$0xff] }
 0xd56   : > { %26432 = vmatprep.subr.bf16.mxu1 %v28653_v6  ;;  %v19638_v40 = vld [vmem:[#allocation2 + $0x3b1] sm:$0xff] }
 0xd57   : > { %v19654_v38 = vpack.c.bf16 %v19638_v40, %v33233_v10  ;;  %v19988_v10 = vld [vmem:[#allocation2 + $0x232] sm:$0xff] }
 0xd59   : > { %26433 = vmatpush3.bf16.msra.mxu1 %v28653_v6  ;;  %v19276_v6 = vpack.c.bf16 %v28887_v15, %v33150_v24  ;;  %v34068_v24 = vld [vmem:[#allocation127_spill] sm:$0xff] }
 0xd5a   : > { %26434 = vmatprep.subr.bf16.mxu1 %v28654_v48 }
 0xd5c   : > { %26403 = vmatmul.mubr.bf16.gmra.mrb[12].mxu1 %v18905_v54  ;;  %v34070_v54 = vld [vmem:[#allocation130_spill] sm:$0xff] }
 0xd5d   : > { %26406 = vmatprep.mubr.bf16.mxu1 %v18906_v14  ;;  %26435 = vmatpush3.bf16.msra.mxu1 %v28654_v48  ;;  %v34069_v48 = vpack.c.bf16 %v34067_v17, %v34068_v24  ;;  %v19281_v14 = vpack.c.bf16 %v28887_v15, %v28887_v15  ;;  %v19980_v24 = vld [vmem:[#allocation2 + $0x192] sm:$0xff] }
 0xd5e   : > { %26436 = vmatprep.subr.bf16.mxu1 %v28655_v32 }
 0xd61   : > { %26437 = vmatpush3.bf16.msra.mxu1 %v28655_v32  ;;  %v34071_v32 = vld [vmem:[#allocation129_spill] sm:$0xff] }
 0xd62   : > { %26470 = vmatprep.subr.bf16.mxu1 %v28656_v49  ;;  %v34072_v39 = vpack.c.bf16 %v34070_v54, %v34071_v32  ;;  %v19982_v32 = vld [vmem:[#allocation2 + $0x1b2] sm:$0xff] }
 0xd64   : > { %26407 = vmatmul.mubr.bf16.gmra.mrb[16].mxu1 %v18907_v4  ;;  %v19610_v4 = vld [vmem:[#allocation2 + $0x191] sm:$0xff] }
 0xd65   : > { %26410 = vmatprep.mubr.bf16.mxu1 %v18908_v20  ;;  %v19640_v45 = vpack.c.bf16 %v19610_v4, %v33171_v19  ;;  %v28665_v20 = vld [vmem:[%s33500_s3 + $0x688] sm:$0xff]   ;;  %v19616_v19 = vld [vmem:[#allocation2 + $0x211] sm:$0xff] }
 0xd6c   : > { %26411 = vmatmul.mubr.bf16.gmra.mrb[20].mxu1 %v18909_v7  ;;  %v19642_v7 = vpack.c.bf16 %v19614_v2, %v33186_v62  ;;  %v19992_v2 = vld [vmem:[#allocation2 + $0x272] sm:$0xff] }
 0xd6d   : > { %26414 = vmatprep.mubr.bf16.mxu1 %v18910_v57  ;;  %v19641_v57 = vpack.c.bf16 %v33188_v35, %v19611_v25  ;;  %v19643_v35 = vpack.c.bf16 %v19616_v19, %v19615_v12  ;;  %v19989_v25 = vld [vmem:[#allocation2 + $0x242] sm:$0xff]  ;;  %v20016_v12 = vpack.c.bf16 %v19992_v2, %v33277_v44 }
 0xd6e   : > { %v34083_v19 = vld [vmem:[#allocation137_spill] sm:$0xff] }
 0xd6f   : > { %v20003_v44 = vld [vmem:[#allocation2 + $0x362] sm:$0xff] }
 0xd74   : > { %26415 = vmatmul.mubr.bf16.gmra.mrb[24].mxu1 %v18911_v55  ;;  %v28667_v55 = vld [vmem:[%s33500_s3 + $0x698] sm:$0xff]  }
 0xd75   : > { %26418 = vmatprep.mubr.bf16.mxu1 %v18912_v36  ;;  %v28668_v36 = vld [vmem:[%s33500_s3 + $0x6a0] sm:$0xff]  }
 0xd7c   : > { %26419 = vmatmul.mubr.bf16.gmra.mrb[28].mxu1 %v18913_v42  ;;  %v19618_v42 = vld [vmem:[#allocation2 + $0x231] sm:$0xff] }
 0xd7d   : > { %26438 = vmatprep.mubr.bf16.mxu1 %v19269_v16  ;;  %v19644_v62 = vpack.c.bf16 %v19618_v42, %v19617_v51  ;;  %v19620_v16 = vld [vmem:[#allocation2 + $0x251] sm:$0xff] }
 0xd7e   : > { %v19645_v26 = vpack.c.bf16 %v19620_v16, %v19619_v43  ;;  %v34088_v42 = vld [vmem:[#allocation142_spill] sm:$0xff]  ;;  %v34089_v43 = vld [vmem:[#allocation141_spill] sm:$0xff] }
 0xd7f   : > { %v34090_v51 = vpack.c.bf16 %v34088_v42, %v34089_v43  ;;  %v20002_v16 = vld [vmem:[#allocation2 + $0x352] sm:$0xff]  ;;  %v22653_v42 = vld [vmem:[%s28951_s29 + $0x181] sm:$0xff] }
 0xd84   : > { %26439 = vmatmul.mubr.bf16.vlgmr.msra.gmra.mrb[0].mxu1 %v19270_v28  ;;  %v19622_v28 = vld [vmem:[#allocation2 + $0x271] sm:$0xff] }
 0xd85   : > { %26442 = vmatprep.mubr.bf16.mxu1 %v19271_v46  ;;  %26471 = vmatpush3.bf16.msra.mxu1 %v28656_v49  ;;  %v19280_v49 = vpack.c.bf16 %v28887_v15, %v33161_v1  ;;  %v28666_v1 = vld [vmem:[%s33500_s3 + $0x690] sm:$0xff]   ;;  %v19646_v11 = vpack.c.bf16 %v19622_v28, %v33213_v41  ;;  %v34073_v46 = vld [vmem:[#allocation132_spill] sm:$0xff] }
 0xd86   : > { %26472 = vmatprep.subr.bf16.mxu1 %v28657_v52  ;;  %v34076_v15 = vld [vmem:[#allocation134_spill] sm:$0xff] }
 0xd87   : > { %v20004_v28 = vld [vmem:[#allocation2 + $0x372] sm:$0xff] }
 0xd89   : > { %26473 = vmatpush3.bf16.msra.mxu1 %v28657_v52  ;;  %v28671_v52 = vld [vmem:[%s33500_s3 + $0x6b8] sm:$0xff]  }
 0xd8a   : > { %26474 = vmatprep.subr.bf16.mxu1 %v28658_v30 }
 0xd8c   : > { %26443 = vmatmul.mubr.bf16.gmra.mrb[4].mxu1 %v19272_v37  ;;  %v34077_v37 = vld [vmem:[#allocation133_spill] sm:$0xff] }
 0xd8d   : > { %26446 = vmatprep.mubr.bf16.mxu1 %v19273_v33  ;;  %26475 = vmatpush3.bf16.msra.mxu1 %v28658_v30  ;;  %v34074_v30 = vld [vmem:[#allocation131_spill] sm:$0xff]  ;;  %v34078_v47 = vpack.c.bf16 %v34076_v15, %v34077_v37 }
 0xd8e   : > { %26476 = vmatprep.subr.bf16.mxu1 %v28659_v5  ;;  %v34075_v61 = vpack.c.bf16 %v34073_v46, %v34074_v30  ;;  %v34080_v33 = vld [vmem:[#allocation135_spill] sm:$0xff]  ;;  %v20022_v46 = vpack.c.bf16 %v20004_v28, %v20003_v44 }
 0xd91   : > { %26477 = vmatpush3.bf16.msra.mxu1 %v28659_v5  ;;  %v34079_v5 = vld [vmem:[#allocation136_spill] sm:$0xff] }
 0xd92   : > { %26478 = vmatprep.subr.bf16.mxu1 %v28660_v31  ;;  %v34081_v41 = vpack.c.bf16 %v34079_v5, %v34080_v33 }
 0xd94   : > { %26447 = vmatmul.mubr.bf16.gmra.mrb[8].mxu1 %v19274_v29  ;;  %v19650_v29 = vpack.c.bf16 %v19630_v3, %v33224_v60  ;;  %v19981_v60 = vld [vmem:[#allocation2 + $0x1a2] sm:$0xff] }
 0xd95   : > { %26450 = vmatprep.mubr.bf16.mxu1 %v19275_v27  ;;  %26479 = vmatpush3.bf16.msra.mxu1 %v28660_v31  ;;  %v19631_v31 = vld [vmem:[#allocation2 + $0x341] sm:$0xff] }
 0xd96   : > { %26480 = vmatprep.subr.bf16.mxu1 %v28661_v9  ;;  %v19651_v56 = vpack.c.bf16 %v19632_v58, %v19631_v31  ;;  %v19635_v27 = vld [vmem:[#allocation2 + $0x381] sm:$0xff] }
 0xd97   : > { %v22645_v3 = vld [vmem:[%s28951_s29 + $0xe1] sm:$0xff] }
 0xd99   : > { %26481 = vmatpush3.bf16.msra.mxu1 %v28661_v9  ;;  %v19634_v9 = vld [vmem:[#allocation2 + $0x371] sm:$0xff] }
 0xd9a   : > { %26482 = vmatprep.subr.bf16.mxu1 %v28662_v50 }
 0xd9c   : > { %26451 = vmatmul.mubr.bf16.gmra.mrb[12].mxu1 %v19276_v6  ;;  %v19652_v6 = vpack.c.bf16 %v19634_v9, %v19633_v34  ;;  %v22643_v34 = vld [vmem:[%s28951_s29 + $0xc1] sm:$0xff] }
 0xd9d   : > { %26454 = vmatprep.mubr.bf16.mxu1 %v34066_v8  ;;  %26483 = vmatpush3.bf16.msra.mxu1 %v28662_v50  ;;  %v19636_v50 = vld [vmem:[#allocation2 + $0x391] sm:$0xff]  ;;  %v19977_v8 = vld [vmem:[#allocation2 + $0x162] sm:$0xff] }
 0xd9e   : > { %26484 = vmatprep.subr.bf16.mxu1 %v28663_v23 }
 0xda1   : > { %26485 = vmatpush3.bf16.msra.mxu1 %v28663_v23  ;;  %v19653_v23 = vpack.c.bf16 %v19636_v50, %v19635_v27 }
 0xda2   : > { %26518 = vmatprep.subr.bf16.mxu1 %v28664_v18 }
 0xda4   : > { %26455 = vmatmul.mubr.bf16.gmra.mrb[16].mxu1 %v34069_v48  ;;  %v19979_v48 = vld [vmem:[#allocation2 + $0x182] sm:$0xff] }
 0xda5   : > { %26458 = vmatprep.mubr.bf16.mxu1 %v34072_v39  ;;  %v20010_v54 = vpack.c.bf16 %v19980_v24, %v19979_v48  ;;  %v20011_v39 = vpack.c.bf16 %v19982_v32, %v19981_v60  ;;  %v22646_v48 = vld [vmem:[%s28951_s29 + $0xf1] sm:$0xff] }
 0xdac   : > { %26459 = vmatmul.mubr.bf16.gmra.mrb[20].mxu1 %v19280_v49  ;;  %v19985_v49 = vld [vmem:[#allocation2 + $0x202] sm:$0xff] }
 0xdad   : > { %26462 = vmatprep.mubr.bf16.mxu1 %v19281_v14 }
 0xdb4   : > { %26463 = vmatmul.mubr.bf16.gmra.mrb[24].mxu1 %v19281_v14 }
 0xdb5   : > { %26466 = vmatprep.mubr.bf16.mxu1 %v19281_v14 }
 0xdbc   : > { %26467 = vmatmul.mubr.bf16.gmra.mrb[28].mxu1 %v19281_v14  ;;  %v19984_v14 = vld [vmem:[#allocation2 + $0x1d2] sm:$0xff] }
 0xdbd   : > { %26486 = vmatprep.mubr.bf16.mxu1 %v19639_v53  ;;  %v20012_v21 = vpack.c.bf16 %v19984_v14, %v33252_v63  ;;  %v19986_v53 = vld [vmem:[#allocation2 + $0x212] sm:$0xff]  ;;  %v34085_v63 = vld [vmem:[#allocation140_spill] sm:$0xff] }
 0xdbe   : > { %v20013_v4 = vpack.c.bf16 %v19986_v53, %v19985_v49  ;;  %v22647_v53 = vld [vmem:[%s28951_s29 + $0x101] sm:$0xff] }
 0xdc4   : > { %26487 = vmatmul.mubr.bf16.vlgmr.msra.gmra.mrb[0].mxu1 %v19640_v45  ;;  %v19987_v45 = vld [vmem:[#allocation2 + $0x222] sm:$0xff] }
 0xdc5   : > { %26490 = vmatprep.mubr.bf16.mxu1 %v19641_v57  ;;  %26519 = vmatpush3.bf16.msra.mxu1 %v28664_v18  ;;  %v19978_v18 = vld [vmem:[#allocation2 + $0x172] sm:$0xff] }
 0xdc6   : > { %26520 = vmatprep.subr.bf16.mxu1 %v28665_v20  ;;  %v20009_v17 = vpack.c.bf16 %v19978_v18, %v19977_v8  ;;  %v19990_v57 = vld [vmem:[#allocation2 + $0x252] sm:$0xff] }
 0xdc9   : > { %26521 = vmatpush3.bf16.msra.mxu1 %v28665_v20  ;;  %v20014_v20 = vpack.c.bf16 %v19988_v10, %v19987_v45 }
 0xdca   : > { %26522 = vmatprep.subr.bf16.mxu1 %v28666_v1 }
 0xdcc   : > { %26491 = vmatmul.mubr.bf16.gmra.mrb[4].mxu1 %v19642_v7  ;;  %v34082_v7 = vld [vmem:[#allocation138_spill] sm:$0xff] }
 0xdcd   : > { %26494 = vmatprep.mubr.bf16.mxu1 %v19643_v35  ;;  %26523 = vmatpush3.bf16.msra.mxu1 %v28666_v1  ;;  %v20015_v1 = vpack.c.bf16 %v19990_v57, %v19989_v25  ;;  %v34086_v35 = vld [vmem:[#allocation139_spill] sm:$0xff] }
 0xdce   : > { %26524 = vmatprep.subr.bf16.mxu1 %v28667_v55 }
 0xdd1   : > { %26525 = vmatpush3.bf16.msra.mxu1 %v28667_v55  ;;  %v34084_v55 = vpack.c.bf16 %v34082_v7, %v34083_v19  ;;  %v22652_v7 = vld [vmem:[%s28951_s29 + $0x171] sm:$0xff] }
 0xdd2   : > { %26526 = vmatprep.subr.bf16.mxu1 %v28668_v36 }
 0xdd4   : > { %26495 = vmatmul.mubr.bf16.gmra.mrb[8].mxu1 %v19644_v62  ;;  %v20001_v62 = vld [vmem:[#allocation2 + $0x342] sm:$0xff] }
 0xdd5   : > { %26498 = vmatprep.mubr.bf16.mxu1 %v19645_v26  ;;  %26527 = vmatpush3.bf16.msra.mxu1 %v28668_v36  ;;  %v34087_v36 = vpack.c.bf16 %v34085_v63, %v34086_v35  ;;  %v20021_v26 = vpack.c.bf16 %v20002_v16, %v20001_v62  ;;  %v22650_v63 = vld [vmem:[%s28951_s29 + $0x151] sm:$0xff]  ;;  %v22651_v16 = vld [vmem:[%s28951_s29 + $0x161] sm:$0xff] }
 0xdd6   : > { %26528 = vmatprep.subr.bf16.mxu1 %v28669_v13 }
 0xdd9   : > { %26529 = vmatpush3.bf16.msra.mxu1 %v28669_v13  ;;  %v20000_v13 = vld [vmem:[#allocation2 + $0x312] sm:$0xff] }
 0xdda   : > { %26530 = vmatprep.subr.bf16.mxu1 %v28670_v59 }
 0xddc   : > { %26499 = vmatmul.mubr.bf16.gmra.mrb[12].mxu1 %v19646_v11  ;;  %v20005_v11 = vld [vmem:[#allocation2 + $0x382] sm:$0xff] }
 0xddd   : > { %26502 = vmatprep.mubr.bf16.mxu1 %v34075_v61  ;;  %26531 = vmatpush3.bf16.msra.mxu1 %v28670_v59  ;;  %v20020_v59 = vpack.c.bf16 %v20000_v13, %v33288_v22  ;;  %v20008_v61 = vld [vmem:[#allocation2 + $0x3b2] sm:$0xff]  ;;  %v33390_v22 = vld [vmem:[%s33501_s4] ss:$0 sm:$0xff] }
 0xdde   : > { %26532 = vmatprep.subr.bf16.mxu1 %v28671_v52  ;;  %v20024_v15 = vpack.c.bf16 %v20008_v61, %v33297_v0  ;;  %v22656_v61 = vld [vmem:[%s28951_s29 + $0x1b1] sm:$0xff] }
 0xde1   : > { %26533 = vmatpush3.bf16.msra.mxu1 %v28671_v52  ;;  %v20006_v52 = vld [vmem:[#allocation2 + $0x392] sm:$0xff] }
 0xde2   : > { %v20023_v30 = vpack.c.bf16 %v20006_v52, %v20005_v11 }
 0xde4   : > { %26503 = vmatmul.mubr.bf16.gmra.mrb[16].mxu1 %v34078_v47  ;;  %v22644_v47 = vld [vmem:[%s28951_s29 + $0xd1] sm:$0xff] }
 0xde5   : > { %26506 = vmatprep.mubr.bf16.mxu1 %v34081_v41  ;;  %v22642_v41 = vld [vmem:[%s28951_s29 + $0xb1] sm:$0xff] }
 0xdec   : > { %26507 = vmatmul.mubr.bf16.gmra.mrb[20].mxu1 %v19650_v29 }
 0xded   : > { %26510 = vmatprep.mubr.bf16.mxu1 %v19651_v56 }
 0xdf4   : > { %26511 = vmatmul.mubr.bf16.gmra.mrb[24].mxu1 %v19652_v6 }
 0xdf5   : > { %26514 = vmatprep.mubr.bf16.mxu1 %v19653_v23 }
 0xdfc   : > { %26515 = vmatmul.mubr.bf16.gmra.mrb[28].mxu1 %v19654_v38 }
 0xdfd   : > { %26534 = vmatprep.mubr.bf16.mxu1 %v20009_v17  ;;  %v22648_v17 = vld [vmem:[%s28951_s29 + $0x111] sm:$0xff] }
 0xe04   : > { %26535 = vmatmul.mubr.bf16.vlgmr.msra.gmra.mrb[0].mxu1 %v20010_v54 }
 0xe05   : > { %26538 = vmatprep.mubr.bf16.mxu1 %v20011_v39  ;;  %v22649_v39 = vld [vmem:[%s28951_s29 + $0x121] sm:$0xff] }
 0xe0c   : > { %26539 = vmatmul.mubr.bf16.gmra.mrb[4].mxu1 %v20012_v21 }
 0xe0d   : > { %26542 = vmatprep.mubr.bf16.mxu1 %v20013_v4 }
 0xe14   : > { %26543 = vmatmul.mubr.bf16.gmra.mrb[8].mxu1 %v20014_v20 }
 0xe15   : > { %26546 = vmatprep.mubr.bf16.mxu1 %v20015_v1 }
 0xe1c   : > { %26547 = vmatmul.mubr.bf16.gmra.mrb[12].mxu1 %v20016_v12 }
 0xe1d   : > { %26550 = vmatprep.mubr.bf16.mxu1 %v34084_v55 }
 0xe24   : > { %26551 = vmatmul.mubr.bf16.gmra.mrb[16].mxu1 %v34087_v36 }
 0xe25   : > { %26554 = vmatprep.mubr.bf16.mxu1 %v34090_v51 }
 0xe2c   : > { %26555 = vmatmul.mubr.bf16.gmra.mrb[20].mxu1 %v20020_v59 }
 0xe2d   : > { %26558 = vmatprep.mubr.bf16.mxu1 %v20021_v26 }
 0xe34   : > { %26559 = vmatmul.mubr.bf16.gmra.mrb[24].mxu1 %v20022_v46 }
 0xe35   : > { %26562 = vmatprep.mubr.bf16.mxu1 %v20023_v30 }
 0xe3c   : > { %26563 = vmatmul.mubr.bf16.gmra.mrb[28].mxu1 %v20024_v15 }
 0xed7   : > { %v26536_v37 = vpop.f32.mrb[0].mxu1 }
 0xed8   : > { %v20420_v5 = vadd.f32 %v26536_v37, %v33390_v22  ;;  %v20124_v33 = vpop.f32.mrb[1].mxu1 }
 0xed9   : > { %v20418_v31 = vadd.f32 %v33390_v22, %v20124_v33  ;;  %v26537_v58 = vpop.f32.mrb[2].mxu1 }
 0xeda   : > { %v20452_v56 = vadd.f32 %v22644_v47, %v20420_v5  ;;  %v20421_v0 = vadd.f32 %v26537_v58, %v33390_v22  ;;  %v20127_v29 = vpop.f32.mrb[3].mxu1  ;;  %v22654_v47 = vld [vmem:[%s28951_s29 + $0x191] sm:$0xff] }
 0xedb   : > { %v20450_v9 = vadd.f32 %v22642_v41, %v20418_v31  ;;  %v20419_v27 = vadd.f32 %v33390_v22, %v20127_v29  ;;  %v22657_v41 = vld [vmem:[%s28951_s29 + $0x1c1] sm:$0xff] }
 0xedc   : > { %v20484_v50 = vmax.f32 %v20452_v56, 0.0  ;;  %v20453_v6 = vadd.f32 %v22645_v3, %v20421_v0  ;;  %v22655_v56 = vld [vmem:[%s28951_s29 + $0x1a1] sm:$0xff] }
 0xedd   : > { %v20482_v23 = vmax.f32 %v20450_v9, 0.0  ;;  %v20451_v40 = vadd.f32 %v22643_v34, %v20419_v27 }
 0xede   : > { %20516 = vst [vmem:[%s33403_s12 + $0x10] sm:$0xff] %v20484_v50  ;;  %v20485_v38 = vmax.f32 %v20453_v6, 0.0 }
 0xedf   : > { %20514 = vst [vmem:[%s33403_s12] sm:$0xff] %v20482_v23  ;;  %v20483_v8 = vmax.f32 %v20451_v40, 0.0  ;;  %v26540_v18 = vpop.f32.mrb[4].mxu1 }
 0xee0   : > { %20517 = vst [vmem:[%s33403_s12 + $0x18] sm:$0xff] %v20485_v38  ;;  %v20424_v24 = vadd.f32 %v26540_v18, %v33390_v22  ;;  %v20140_v60 = vpop.f32.mrb[5].mxu1  ;;  %v22660_v38 = vld [vmem:[%s28951_s29 + $0x211] sm:$0xff] }
 0xee1   : > { %20515 = vst [vmem:[%s33403_s12 + $0x8] sm:$0xff] %v20483_v8  ;;  %v20422_v54 = vadd.f32 %v33390_v22, %v20140_v60  ;;  %v26541_v32 = vpop.f32.mrb[6].mxu1 }
 0xee2   : > { %v20456_v14 = vadd.f32 %v22648_v17, %v20424_v24  ;;  %v20425_v49 = vadd.f32 %v26541_v32, %v33390_v22  ;;  %v20143_v21 = vpop.f32.mrb[7].mxu1  ;;  %v22658_v17 = vld [vmem:[%s28951_s29 + $0x1f1] sm:$0xff] }
 0xee3   : > { %v20454_v4 = vadd.f32 %v22646_v48, %v20422_v54  ;;  %v20423_v10 = vadd.f32 %v33390_v22, %v20143_v21  ;;  %v22661_v48 = vld [vmem:[%s28951_s29 + $0x221] sm:$0xff] }
 0xee4   : > { %v20488_v25 = vmax.f32 %v20456_v14, 0.0  ;;  %v20457_v45 = vadd.f32 %v22649_v39, %v20425_v49  ;;  %v22659_v14 = vld [vmem:[%s28951_s29 + $0x201] sm:$0xff] }
 0xee5   : > { %v20486_v20 = vmax.f32 %v20454_v4, 0.0  ;;  %v20455_v57 = vadd.f32 %v22647_v53, %v20423_v10 }
 0xee6   : > { %20520 = vst [vmem:[%s33403_s12 + $0x30] sm:$0xff] %v20488_v25  ;;  %v20489_v1 = vmax.f32 %v20457_v45, 0.0 }
 0xee7   : > { %20518 = vst [vmem:[%s33403_s12 + $0x20] sm:$0xff] %v20486_v20  ;;  %v20487_v2 = vmax.f32 %v20455_v57, 0.0  ;;  %v26544_v12 = vpop.f32.mrb[8].mxu1 }
 0xee8   : > { %20521 = vst [vmem:[%s33403_s12 + $0x38] sm:$0xff] %v20489_v1  ;;  %v20428_v19 = vadd.f32 %v26544_v12, %v33390_v22  ;;  %v20156_v55 = vpop.f32.mrb[9].mxu1  ;;  %v22664_v1 = vld [vmem:[%s28951_s29 + $0x251] sm:$0xff] }
 0xee9   : > { %20519 = vst [vmem:[%s33403_s12 + $0x28] sm:$0xff] %v20487_v2  ;;  %v20426_v35 = vadd.f32 %v33390_v22, %v20156_v55  ;;  %v26545_v36 = vpop.f32.mrb[10].mxu1 }
 0xeea   : > { %v20460_v43 = vadd.f32 %v22652_v7, %v20428_v19  ;;  %v20429_v51 = vadd.f32 %v26545_v36, %v33390_v22  ;;  %v20159_v62 = vpop.f32.mrb[11].mxu1  ;;  %v22662_v7 = vld [vmem:[%s28951_s29 + $0x231] sm:$0xff] }
 0xeeb   : > { %v20458_v13 = vadd.f32 %v22650_v63, %v20426_v35  ;;  %v20427_v26 = vadd.f32 %v33390_v22, %v20159_v62  ;;  %v22665_v63 = vld [vmem:[%s28951_s29 + $0x261] sm:$0xff] }
 0xeec   : > { %v20492_v59 = vmax.f32 %v20460_v43, 0.0  ;;  %v20461_v44 = vadd.f32 %v22653_v42, %v20429_v51  ;;  %v22663_v43 = vld [vmem:[%s28951_s29 + $0x241] sm:$0xff] }
 0xeed   : > { %v20490_v28 = vmax.f32 %v20458_v13, 0.0  ;;  %v20459_v11 = vadd.f32 %v22651_v16, %v20427_v26 }
 0xeee   : > { %20524 = vst [vmem:[%s33403_s12 + $0x50] sm:$0xff] %v20492_v59  ;;  %v20493_v52 = vmax.f32 %v20461_v44, 0.0 }
 0xeef   : > { %20522 = vst [vmem:[%s33403_s12 + $0x40] sm:$0xff] %v20490_v28  ;;  %v20491_v46 = vmax.f32 %v20459_v11, 0.0  ;;  %v26548_v30 = vpop.f32.mrb[12].mxu1 }
 0xef0   : > { %20525 = vst [vmem:[%s33403_s12 + $0x58] sm:$0xff] %v20493_v52  ;;  %v20432_v15 = vadd.f32 %v26548_v30, %v33390_v22  ;;  %v20172_v37 = vpop.f32.mrb[13].mxu1  ;;  %v22668_v52 = vld [vmem:[%s28951_s29 + $0x2b1] sm:$0xff] }
 0xef1   : > { %20523 = vst [vmem:[%s33403_s12 + $0x48] sm:$0xff] %v20491_v46  ;;  %v20430_v5 = vadd.f32 %v33390_v22, %v20172_v37  ;;  %v26549_v33 = vpop.f32.mrb[14].mxu1 }
 0xef2   : > { %v20464_v31 = vadd.f32 %v22656_v61, %v20432_v15  ;;  %v20433_v58 = vadd.f32 %v26549_v33, %v33390_v22  ;;  %v20175_v3 = vpop.f32.mrb[15].mxu1  ;;  %v22666_v61 = vld [vmem:[%s28951_s29 + $0x291] sm:$0xff] }
 0xef3   : > { %v20462_v0 = vadd.f32 %v22654_v47, %v20430_v5  ;;  %v20431_v29 = vadd.f32 %v33390_v22, %v20175_v3  ;;  %v22669_v47 = vld [vmem:[%s28951_s29 + $0x2c1] sm:$0xff] }
 0xef4   : > { %v20496_v34 = vmax.f32 %v20464_v31, 0.0  ;;  %v20465_v9 = vadd.f32 %v22657_v41, %v20433_v58  ;;  %v22667_v31 = vld [vmem:[%s28951_s29 + $0x2a1] sm:$0xff] }
 0xef5   : > { %v20494_v27 = vmax.f32 %v20462_v0, 0.0  ;;  %v20463_v50 = vadd.f32 %v22655_v56, %v20431_v29 }
 0xef6   : > { %20528 = vst [vmem:[%s33403_s12 + $0x70] sm:$0xff] %v20496_v34  ;;  %v20497_v6 = vmax.f32 %v20465_v9, 0.0 }
 0xef7   : > { %20526 = vst [vmem:[%s33403_s12 + $0x60] sm:$0xff] %v20494_v27  ;;  %v20495_v23 = vmax.f32 %v20463_v50, 0.0  ;;  %v26552_v40 = vpop.f32.mrb[16].mxu1 }
 0xef8   : > { %20529 = vst [vmem:[%s33403_s12 + $0x78] sm:$0xff] %v20497_v6  ;;  %v20436_v8 = vadd.f32 %v26552_v40, %v33390_v22  ;;  %v20188_v18 = vpop.f32.mrb[17].mxu1  ;;  %v22672_v6 = vld [vmem:[%s28951_s29 + $0x2f1] sm:$0xff] }
 0xef9   : > { %20527 = vst [vmem:[%s33403_s12 + $0x68] sm:$0xff] %v20495_v23  ;;  %v20434_v24 = vadd.f32 %v33390_v22, %v20188_v18  ;;  %v26553_v60 = vpop.f32.mrb[18].mxu1 }
 0xefa   : > { %v20468_v54 = vadd.f32 %v22660_v38, %v20436_v8  ;;  %v20437_v32 = vadd.f32 %v26553_v60, %v33390_v22  ;;  %v20191_v39 = vpop.f32.mrb[19].mxu1  ;;  %v22670_v38 = vld [vmem:[%s28951_s29 + $0x2d1] sm:$0xff] }
 0xefb   : > { %v20466_v49 = vadd.f32 %v22658_v17, %v20434_v24  ;;  %v20435_v21 = vadd.f32 %v33390_v22, %v20191_v39  ;;  %v22673_v17 = vld [vmem:[%s28951_s29 + $0x301] sm:$0xff] }
 0xefc   : > { %v20500_v53 = vmax.f32 %v20468_v54, 0.0  ;;  %v20469_v4 = vadd.f32 %v22661_v48, %v20437_v32  ;;  %v22671_v54 = vld [vmem:[%s28951_s29 + $0x2e1] sm:$0xff] }
 0xefd   : > { %v20498_v10 = vmax.f32 %v20466_v49, 0.0  ;;  %v20467_v25 = vadd.f32 %v22659_v14, %v20435_v21 }
 0xefe   : > { %20532 = vst [vmem:[%s33403_s12 + $0x90] sm:$0xff] %v20500_v53  ;;  %v20501_v45 = vmax.f32 %v20469_v4, 0.0 }
 0xeff   : > { %20530 = vst [vmem:[%s33403_s12 + $0x80] sm:$0xff] %v20498_v10  ;;  %v20499_v20 = vmax.f32 %v20467_v25, 0.0  ;;  %v26556_v57 = vpop.f32.mrb[20].mxu1 }
 0xf00   : > { %20533 = vst [vmem:[%s33403_s12 + $0x98] sm:$0xff] %v20501_v45  ;;  %v20440_v2 = vadd.f32 %v26556_v57, %v33390_v22  ;;  %v20204_v12 = vpop.f32.mrb[21].mxu1 }
 0xf01   : > { %20531 = vst [vmem:[%s33403_s12 + $0x88] sm:$0xff] %v20499_v20  ;;  %v20438_v19 = vadd.f32 %v33390_v22, %v20204_v12  ;;  %v26557_v55 = vpop.f32.mrb[22].mxu1 }
 0xf02   : > { %v20472_v35 = vadd.f32 %v22664_v1, %v20440_v2  ;;  %v20441_v36 = vadd.f32 %v26557_v55, %v33390_v22  ;;  %v20207_v42 = vpop.f32.mrb[23].mxu1 }
 0xf03   : > { %v20470_v51 = vadd.f32 %v22662_v7, %v20438_v19  ;;  %v20439_v62 = vadd.f32 %v33390_v22, %v20207_v42 }
 0xf04   : > { %v20504_v16 = vmax.f32 %v20472_v35, 0.0  ;;  %v20473_v13 = vadd.f32 %v22665_v63, %v20441_v36 }
 0xf05   : > { %v20502_v26 = vmax.f32 %v20470_v51, 0.0  ;;  %v20471_v59 = vadd.f32 %v22663_v43, %v20439_v62 }
 0xf06   : > { %20536 = vst [vmem:[%s33403_s12 + $0xb0] sm:$0xff] %v20504_v16  ;;  %v20505_v44 = vmax.f32 %v20473_v13, 0.0 }
 0xf07   : > { %20534 = vst [vmem:[%s33403_s12 + $0xa0] sm:$0xff] %v20502_v26  ;;  %v20503_v28 = vmax.f32 %v20471_v59, 0.0  ;;  %v26560_v11 = vpop.f32.mrb[24].mxu1 }
 0xf08   : > { %20537 = vst [vmem:[%s33403_s12 + $0xb8] sm:$0xff] %v20505_v44  ;;  %v20444_v46 = vadd.f32 %v26560_v11, %v33390_v22  ;;  %v20220_v30 = vpop.f32.mrb[25].mxu1 }
 0xf09   : > { %20535 = vst [vmem:[%s33403_s12 + $0xa8] sm:$0xff] %v20503_v28  ;;  %v20442_v15 = vadd.f32 %v33390_v22, %v20220_v30  ;;  %v26561_v37 = vpop.f32.mrb[26].mxu1 }
 0xf0a   : > { %v20476_v5 = vadd.f32 %v22668_v52, %v20444_v46  ;;  %v20445_v33 = vadd.f32 %v26561_v37, %v33390_v22  ;;  %v20223_v41 = vpop.f32.mrb[27].mxu1 }
 0xf0b   : > { %v20474_v58 = vadd.f32 %v22666_v61, %v20442_v15  ;;  %v20443_v3 = vadd.f32 %v33390_v22, %v20223_v41 }
 0xf0c   : > { %v20508_v56 = vmax.f32 %v20476_v5, 0.0  ;;  %v20477_v0 = vadd.f32 %v22669_v47, %v20445_v33 }
 0xf0d   : > { %v20506_v29 = vmax.f32 %v20474_v58, 0.0  ;;  %v20475_v34 = vadd.f32 %v22667_v31, %v20443_v3 }
 0xf0e   : > { %20540 = vst [vmem:[%s33403_s12 + $0xd0] sm:$0xff] %v20508_v56  ;;  %v20509_v9 = vmax.f32 %v20477_v0, 0.0 }
 0xf0f   : > { %20538 = vst [vmem:[%s33403_s12 + $0xc0] sm:$0xff] %v20506_v29  ;;  %v20507_v27 = vmax.f32 %v20475_v34, 0.0  ;;  %v26564_v50 = vpop.f32.mrb[28].mxu1 }
 0xf10   : > { %20541 = vst [vmem:[%s33403_s12 + $0xd8] sm:$0xff] %v20509_v9  ;;  %v20448_v23 = vadd.f32 %v26564_v50, %v33390_v22  ;;  %v20236_v40 = vpop.f32.mrb[29].mxu1 }
 0xf11   : > { %20539 = vst [vmem:[%s33403_s12 + $0xc8] sm:$0xff] %v20507_v27  ;;  %v20446_v8 = vadd.f32 %v33390_v22, %v20236_v40  ;;  %v26565_v18 = vpop.f32.mrb[30].mxu1 }
 0xf12   : > { %v20480_v24 = vadd.f32 %v22672_v6, %v20448_v23  ;;  %v20449_v60 = vadd.f32 %v26565_v18, %v33390_v22  ;;  %v20239_v48 = vpop.f32.mrb[31].mxu1 }
 0xf13   : > { %v20478_v32 = vadd.f32 %v22670_v38, %v20446_v8  ;;  %v20447_v39 = vadd.f32 %v33390_v22, %v20239_v48 }
 0xf14   : > { %v20512_v14 = vmax.f32 %v20480_v24, 0.0  ;;  %v20481_v49 = vadd.f32 %v22673_v17, %v20449_v60 }
 0xf15   : > { %v20510_v21 = vmax.f32 %v20478_v32, 0.0  ;;  %v20479_v53 = vadd.f32 %v22671_v54, %v20447_v39 }
 0xf16   : > { %20544 = vst [vmem:[%s33403_s12 + $0xf0] sm:$0xff] %v20512_v14  ;;  %v20513_v4 = vmax.f32 %v20481_v49, 0.0 }
 0xf17   : > { %20542 = vst [vmem:[%s33403_s12 + $0xe0] sm:$0xff] %v20510_v21  ;;  %v20511_v10 = vmax.f32 %v20479_v53, 0.0 }
 0xf18   : > { %20545 = vst [vmem:[%s33403_s12 + $0xf8] sm:$0xff] %v20513_v4 }
 0xf19   : > { %20543 = vst [vmem:[%s33403_s12 + $0xe8] sm:$0xff] %v20511_v10 }
 0xf1a PF: > { %s15_s18 = sadd.s32 1, %s28894_s18  }
 0xf1b   : > { %p12_p4 = scmp.ge.s32.totalorder %s15_s18, 4  }
 0xf1d   :  { %14 = sbr.rel (!%p12_p4) target bundleno = 1 (0x1), region = 138 }

</bundles_post_ra>
